<compile_context>
chip_gen: v6e
topology: v6e:2x2x1
jax: 0.10.0
libtpu: 0.0.40
codegen_flags: <defaults>
</compile_context>

<pallas_src>
import jax
import jax.numpy as jnp
from jax.experimental import pallas as pl


ENC_KEYS = ("wq", "bq", "wk", "bk", "wv", "bv", "wo", "bo",
            "g1", "be1", "w1", "b1", "w2", "b2", "g2", "be2")


# ----------------------------- kernel helpers -------------------------------

def _layer_norm(x, gamma, beta, eps=1e-12):
    mu = jnp.mean(x, axis=-1, keepdims=True)
    var = jnp.mean(jnp.square(x - mu), axis=-1, keepdims=True)
    return (x - mu) * jax.lax.rsqrt(var + eps) * gamma + beta


def _encoder_block(x, mask, w):
    """Single-head transformer encoder block (stand-in for BertLayer(m=True)),
    applied to the whole batch at once.

    x: [B, L, H] f32; mask: [B, L] f32 (1 = keep); w: dict where matmul weights
    are bf16 (wq/bq pre-scaled by 1/sqrt(H)); returns [B*L, H] f32."""
    B, L, H = x.shape
    x2 = x.reshape(B * L, H)
    xb = x2.astype(jnp.bfloat16)
    q = jnp.dot(xb, w["wq"], preferred_element_type=jnp.float32) + w["bq"]
    k = jnp.dot(xb, w["wk"], preferred_element_type=jnp.float32) + w["bk"]
    v = jnp.dot(xb, w["wv"], preferred_element_type=jnp.float32) + w["bv"]
    q3 = q.reshape(B, L, H).astype(jnp.bfloat16)
    k3 = k.reshape(B, L, H).astype(jnp.bfloat16)
    v3 = v.reshape(B, L, H).astype(jnp.bfloat16)
    s = jnp.einsum("bqd,bkd->bqk", q3, k3, preferred_element_type=jnp.float32)
    keep = mask.reshape(B, 1, L) > 0.5           # treats -1 mask rows as "drop"
    s = jnp.where(keep, s, jnp.float32(-1e9))
    p = jax.nn.softmax(s, axis=-1).astype(jnp.bfloat16)
    ctx = jnp.einsum("bqk,bkd->bqd", p, v3, preferred_element_type=jnp.float32)
    attn = jnp.dot(ctx.reshape(B * L, H).astype(jnp.bfloat16), w["wo"],
                   preferred_element_type=jnp.float32) + w["bo"]
    h = _layer_norm(x2 + attn, w["g1"], w["be1"])
    ffn_h = jax.nn.gelu(jnp.dot(h.astype(jnp.bfloat16), w["w1"],
                                preferred_element_type=jnp.float32) + w["b1"],
                        approximate=True)
    ffn = jnp.dot(ffn_h.astype(jnp.bfloat16), w["w2"],
                  preferred_element_type=jnp.float32) + w["b2"]
    return _layer_norm(h + ffn, w["g2"], w["be2"])


# ------------------------------ Pallas kernels -------------------------------

def encoder_kernel(x_ref, mask_ref, *rest):
    """Whole-batch encoder layer -> [B, L, H] (stand-in PLM encoder)."""
    w = {kname: r[...] for kname, r in zip(ENC_KEYS, rest[:16])}
    o_ref = rest[16]
    x = x_ref[...]
    B, L, H = x.shape
    o_ref[...] = _encoder_block(x, mask_ref[...], w).reshape(B, L, H)


def encode_pool_kernel(x_ref, enc_mask_ref, pool_mask_ref, ctx_ref, *rest):
    """Fused encoder layer + tanh-score attention pooling over the sequence
    (BertLayer + AttentionOriContext / ContextAttention)."""
    w = {kname: r[...] for kname, r in zip(ENC_KEYS, rest[:16])}
    wp = rest[16][...]                 # [H, H] bf16
    bp = rest[17][...]                 # [1, H] f32
    pooled_ref, score_ref = rest[18], rest[19]

    x = x_ref[...]
    B, L, H = x.shape
    h2 = _encoder_block(x, enc_mask_ref[...], w)                     # [B*L, H] f32
    u = jnp.tanh(jnp.dot(h2.astype(jnp.bfloat16), wp,
                         preferred_element_type=jnp.float32) + bp)   # [B*L, H]
    u3 = u.reshape(B, L, H).astype(jnp.bfloat16)
    c3 = ctx_ref[...].astype(jnp.bfloat16).reshape(B, 1, H)
    att = jnp.einsum("bqd,bkd->bqk", c3, u3,
                     preferred_element_type=jnp.float32).reshape(B, L)
    att = jnp.where(pool_mask_ref[...] > 0.5, att, jnp.float32(-1e9))
    p = jax.nn.softmax(att, axis=-1)                                 # [B, L] f32
    h3 = h2.reshape(B, L, H).astype(jnp.bfloat16)
    pooled = jnp.einsum("bqk,bkd->bqd",
                        p.astype(jnp.bfloat16).reshape(B, 1, L), h3,
                        preferred_element_type=jnp.float32).reshape(B, H)
    pooled_ref[...] = pooled
    score_ref[...] = p


def graph_distill_pool_kernel(f_ref, adj_ref, w_ref, b_ref, gmask_ref, out_ref):
    """Fused GraphDistillOperator x n_distill + distill_pooling.

    f: [N, D] f32; adj: [N, N] bf16; w: [n_distill, 2D, D] bf16;
    b: [n_distill, 1, D] f32; gmask: [N, G] one-hot f32; out: [G, 2D] f32."""
    f = f_ref[...]
    adj = adj_ref[...]
    n_layers = w_ref.shape[0]
    for i in range(n_layers):                                  # static unroll
        agg = jnp.dot(adj, f.astype(jnp.bfloat16),
                      preferred_element_type=jnp.float32)       # [N, D]
        cat = jnp.concatenate([f, f - agg], axis=-1).astype(jnp.bfloat16)   # [N, 2D]
        f = jax.nn.relu(jnp.dot(cat, w_ref[i],
                                preferred_element_type=jnp.float32) + b_ref[i])
    gm = gmask_ref[...]                                         # [N, G]
    g_num = out_ref.shape[0]
    big = jnp.float32(3.0e38)
    rows = []
    for g in range(g_num):                                      # static unroll (small G)
        sel = gm[:, g:g + 1] > 0.5                              # [N, 1]
        mx = jnp.max(jnp.where(sel, f, -big), axis=0, keepdims=True)   # [1, D]
        mn = jnp.min(jnp.where(sel, f, big), axis=0, keepdims=True)    # [1, D]
        rows.append(jnp.concatenate([mx, mn], axis=-1))         # [1, 2D]
    # NOTE: an empty group keeps the +/-3e38 sentinels (torch would error there).
    out_ref[...] = jnp.concatenate(rows, axis=0)                # single lane-dense store


def group_context_kernel(fb_ref, ctxlist_ref, wh_ref, bh_ref, wg_ref, bg_ref,
                         wc_ref, bc_ref, scores_ref, ctx_sent_ref):
    """group_chosen(group_chosen_hidden(.)) -> softmax -> @context_list ->
    context_s_prior."""
    fb = fb_ref[...].astype(jnp.bfloat16)                       # [B, H]
    h = jnp.dot(fb, wh_ref[...], preferred_element_type=jnp.float32) + bh_ref[...]
    scores = jnp.dot(h.astype(jnp.bfloat16), wg_ref[...],
                     preferred_element_type=jnp.float32) + bg_ref[...]
    pred = jax.nn.softmax(scores, axis=-1).astype(jnp.bfloat16)  # [B, G]
    rec = jnp.dot(pred, ctxlist_ref[...], preferred_element_type=jnp.float32)  # [B, 2H]
    ctx_s = jnp.dot(rec.astype(jnp.bfloat16), wc_ref[...],
                    preferred_element_type=jnp.float32) + bc_ref[...]
    scores_ref[...] = scores
    ctx_sent_ref[...] = ctx_s


# -------------------------------- wrappers -----------------------------------

def _enc_weights(p):
    """Cast matmul weights to bf16 and fold the 1/sqrt(H) attention scale into
    wq/bq; layer-norm params and biases stay f32. Order matches ENC_KEYS."""
    H = p["wq"].shape[0]
    inv = jnp.float32(1.0) / jnp.sqrt(jnp.float32(H))
    return ((p["wq"] * inv).astype(jnp.bfloat16), (p["bq"] * inv).astype(jnp.float32),
            p["wk"].astype(jnp.bfloat16), p["bk"],
            p["wv"].astype(jnp.bfloat16), p["bv"],
            p["wo"].astype(jnp.bfloat16), p["bo"],
            p["g1"], p["be1"],
            p["w1"].astype(jnp.bfloat16), p["b1"],
            p["w2"].astype(jnp.bfloat16), p["b2"],
            p["g2"], p["be2"])


def encoder_layer(x, mask, p):
    B, L, H = x.shape
    args = (x.astype(jnp.float32),
            mask.astype(jnp.float32).reshape(B, L)) + _enc_weights(p)
    return pl.pallas_call(
        encoder_kernel,
        out_shape=jax.ShapeDtypeStruct((B, L, H), jnp.float32),
    )(*args)


def encode_and_pool(x, enc_mask, pool_mask, ctx, p_enc, attn_w, attn_b):
    B, L, H = x.shape
    args = (x.astype(jnp.float32),
            enc_mask.astype(jnp.float32).reshape(B, L),
            pool_mask.astype(jnp.float32).reshape(B, L),
            ctx.astype(jnp.float32).reshape(B, H)) + _enc_weights(p_enc) + (
            attn_w.astype(jnp.bfloat16), attn_b)
    pooled, scores = pl.pallas_call(
        encode_pool_kernel,
        out_shape=[jax.ShapeDtypeStruct((B, H), jnp.float32),
                   jax.ShapeDtypeStruct((B, L), jnp.float32)],
    )(*args)
    return pooled, scores


def graph_distill_pool(features, adj, gd_w, gd_b, group_index, group_num):
    N, D = features.shape
    gmask = jax.nn.one_hot(group_index, group_num, dtype=jnp.float32)   # [N, G]
    return pl.pallas_call(
        graph_distill_pool_kernel,
        out_shape=jax.ShapeDtypeStruct((group_num, 2 * D), jnp.float32),
    )(features.astype(jnp.float32), adj.astype(jnp.bfloat16),
      gd_w.astype(jnp.bfloat16), gd_b.astype(jnp.float32), gmask)


def group_context(fact_base, context_list, params):
    B, H = fact_base.shape
    G = params["wg"].shape[-1]
    scores, ctx_s = pl.pallas_call(
        group_context_kernel,
        out_shape=[jax.ShapeDtypeStruct((B, G), jnp.float32),
                   jax.ShapeDtypeStruct((B, H), jnp.float32)],
    )(fact_base.astype(jnp.float32), context_list.astype(jnp.bfloat16),
      params["wh"].astype(jnp.bfloat16), params["bh"],
      params["wg"].astype(jnp.bfloat16), params["bg"],
      params["wc"].astype(jnp.bfloat16), params["bc"])
    return scores, ctx_s


# --------------------------- model glue (plain JAX) ---------------------------

def get_real_mask(mask):
    """Zero the first token and the last real token of each row (matches torch)."""
    new = mask.at[:, 0].set(0)
    summ = jnp.sum(mask, axis=-1).astype(jnp.int32)
    oh = jax.nn.one_hot(summ - 1, mask.shape[-1], dtype=mask.dtype)
    return new - oh


def plm_forward(ids, mask, type_ids, params):
    # Stand-in for the pretrained BertModel: embeddings + one Pallas encoder block.
    x = (params["tok_emb"][ids] + params["type_emb"][type_ids]
         + params["pos_emb"][None, :, :]).astype(jnp.float32)
    return encoder_layer(x, mask, params["plm_enc"])


def ladan_forward(params, fact_ids, fact_type, fact_mask, sentence_mask,
                  law_ids, law_type, law_mask, adj_law, group_index, group_num):
    real_mask_law = get_real_mask(law_mask)
    real_mask_fact = get_real_mask(fact_mask)

    # ---- law branch ----
    word_emb_law = plm_forward(law_ids, law_mask, law_type, params)      # [Nl,L,H]
    Nlaw = law_ids.shape[0]
    u_law = jnp.tile(params["attn_u"], (Nlaw, 1))
    law_base, _ = encode_and_pool(word_emb_law, law_mask, real_mask_law, u_law,
                                  params["sent_enc"],
                                  params["attn_w"], params["attn_b"])    # [Nl,H]
    context_list_prior = graph_distill_pool(law_base, adj_law,
                                            params["gd_w"], params["gd_b"],
                                            group_index, group_num)      # [G,2H]

    # ---- fact branch ----
    word_emb_fact = plm_forward(fact_ids, fact_mask, fact_type, params)  # [B,L,H]
    B = fact_ids.shape[0]
    u_fact = jnp.tile(params["attn_u"], (B, 1))
    fact_base, score_s_base = encode_and_pool(word_emb_fact, sentence_mask,
                                              real_mask_fact, u_fact,
                                              params["sent_enc"],
                                              params["attn_w"], params["attn_b"])

    # ---- re_encoding_fact (prior) ----
    group_pred_scores, context_sentence = group_context(fact_base,
                                                        context_list_prior, params)
    fact_prior, score_s_prior = encode_and_pool(word_emb_fact, sentence_mask,
                                                real_mask_fact, context_sentence,
                                                params["sent_enc_prior"],
                                                params["attn_prior_w"],
                                                params["attn_prior_b"])

    fact_rep = jnp.concatenate([fact_base, fact_prior], axis=-1)         # [B,2H]
    law_rep = law_base
    return [fact_rep, law_rep, group_pred_scores, score_s_base, score_s_prior]


# -------------------------------- parameters ----------------------------------

def init_params(key, vocab, L, H, F, G, n_distill):
    keys = iter(jax.random.split(key, 64))

    def nrm(shape, s=0.02):
        return jax.random.normal(next(keys), shape, jnp.float32) * s

    def enc():
        return dict(wq=nrm((H, H)), bq=jnp.zeros((1, H), jnp.float32),
                    wk=nrm((H, H)), bk=jnp.zeros((1, H), jnp.float32),
                    wv=nrm((H, H)), bv=jnp.zeros((1, H), jnp.float32),
                    wo=nrm((H, H)), bo=jnp.zeros((1, H), jnp.float32),
                    g1=jnp.ones((1, H), jnp.float32), be1=jnp.zeros((1, H), jnp.float32),
                    w1=nrm((H, F)), b1=jnp.zeros((1, F), jnp.float32),
                    w2=nrm((F, H)), b2=jnp.zeros((1, H), jnp.float32),
                    g2=jnp.ones((1, H), jnp.float32), be2=jnp.zeros((1, H), jnp.float32))

    return dict(
        tok_emb=nrm((vocab, H)), type_emb=nrm((2, H)), pos_emb=nrm((L, H)),
        plm_enc=enc(),            # stand-in PLM encoder
        sent_enc=enc(),           # self.sentence_encoder
        sent_enc_prior=enc(),     # self.sentence_encoder_prior
        attn_w=nrm((H, H)), attn_b=jnp.zeros((1, H), jnp.float32), attn_u=nrm((1, H)),
        attn_prior_w=nrm((H, H)), attn_prior_b=jnp.zeros((1, H), jnp.float32),
        gd_w=nrm((n_distill, 2 * H, H)),                         # GraphDistillOperator
        gd_b=jnp.zeros((n_distill, 1, H), jnp.float32),
        wh=nrm((H, H)), bh=jnp.zeros((1, H), jnp.float32),       # group_chosen_hidden
        wg=nrm((H, G)), bg=jnp.zeros((1, G), jnp.float32),       # group_chosen
        wc=nrm((2 * H, H)), bc=jnp.zeros((1, H), jnp.float32),   # context_s_prior
    )


# ----------------------------------- main --------------------------------------

if __name__ == "__main__":
    B, L, H, F, G, Nlaw, vocab = 2, 16, 32, 64, 4, 8, 100
    n_distill = 2

    key = jax.random.PRNGKey(0)
    kp, kd = jax.random.split(key)
    params = init_params(kp, vocab, L, H, F, G, n_distill)

    ks = jax.random.split(kd, 4)
    fact_ids = jax.random.randint(ks[0], (B, L), 0, vocab)
    fact_type = jnp.zeros((B, L), jnp.int32)
    fact_lens = jnp.array([12, 16], jnp.int32)
    fact_mask = (jnp.arange(L)[None, :] < fact_lens[:, None]).astype(jnp.float32)
    sentence_mask = fact_mask

    law_ids = jax.random.randint(ks[1], (Nlaw, L), 0, vocab)
    law_type = jnp.zeros((Nlaw, L), jnp.int32)
    law_lens = jnp.array([16, 14, 12, 16, 10, 16, 13, 16], jnp.int32)
    law_mask = (jnp.arange(L)[None, :] < law_lens[:, None]).astype(jnp.float32)

    adj_law = (jax.random.uniform(ks[2], (Nlaw, Nlaw)) > 0.5).astype(jnp.float32)
    adj_law = adj_law + jnp.eye(Nlaw, dtype=jnp.float32)
    adj_law = adj_law / (jnp.sum(adj_law, axis=-1, keepdims=True) + 1e-9)
    group_index = jnp.array([0, 0, 1, 1, 2, 2, 3, 3], jnp.int32)

    forward = jax.jit(ladan_forward, static_argnums=(10,))
    outs = forward(params, fact_ids, fact_type, fact_mask, sentence_mask,
                   law_ids, law_type, law_mask, adj_law, group_index, G)
    outs = jax.block_until_ready(outs)

    fact_rep, law_rep, group_pred_prior, score_s_base, score_s_prior = outs
    assert fact_rep.shape == (B, 2 * H)
    assert law_rep.shape == (Nlaw, H)
    assert group_pred_prior.shape == (B, G)
    assert score_s_base.shape == (B, L)
    assert score_s_prior.shape == (B, L)
    assert all(bool(jnp.all(jnp.isfinite(o))) for o in outs)
    print("KERNEL_OK")
</pallas_src>

<mosaic_0001>
module attributes {stable_mosaic.version = 11 : i64} {
  func.func @encoder_kernel(%arg0: memref<2x16x32xf32, #tpu.memory_space<vmem>>, %arg1: memref<2x16xf32, #tpu.memory_space<vmem>>, %arg2: memref<32x32xbf16, #tpu.memory_space<vmem>>, %arg3: memref<1x32xf32, #tpu.memory_space<vmem>>, %arg4: memref<32x32xbf16, #tpu.memory_space<vmem>>, %arg5: memref<1x32xf32, #tpu.memory_space<vmem>>, %arg6: memref<32x32xbf16, #tpu.memory_space<vmem>>, %arg7: memref<1x32xf32, #tpu.memory_space<vmem>>, %arg8: memref<32x32xbf16, #tpu.memory_space<vmem>>, %arg9: memref<1x32xf32, #tpu.memory_space<vmem>>, %arg10: memref<1x32xf32, #tpu.memory_space<vmem>>, %arg11: memref<1x32xf32, #tpu.memory_space<vmem>>, %arg12: memref<32x64xbf16, #tpu.memory_space<vmem>>, %arg13: memref<1x64xf32, #tpu.memory_space<vmem>>, %arg14: memref<64x32xbf16, #tpu.memory_space<vmem>>, %arg15: memref<1x32xf32, #tpu.memory_space<vmem>>, %arg16: memref<1x32xf32, #tpu.memory_space<vmem>>, %arg17: memref<1x32xf32, #tpu.memory_space<vmem>>, %arg18: memref<2x16x32xf32, #tpu.memory_space<vmem>>) attributes {dimension_semantics = [], scalar_prefetch = 0 : i64, scratch_operands = 0 : i64, tpu.core_type = #tpu.core_type<tc>} {
    %c0 = arith.constant 0 : index
    %c0_0 = arith.constant 0 : index
    %0 = vector.load %arg2[%c0, %c0_0] : memref<32x32xbf16, #tpu.memory_space<vmem>>, vector<32x32xbf16>
    %c0_1 = arith.constant 0 : index
    %c0_2 = arith.constant 0 : index
    %1 = vector.load %arg3[%c0_1, %c0_2] : memref<1x32xf32, #tpu.memory_space<vmem>>, vector<1x32xf32>
    %c0_3 = arith.constant 0 : index
    %c0_4 = arith.constant 0 : index
    %2 = vector.load %arg4[%c0_3, %c0_4] : memref<32x32xbf16, #tpu.memory_space<vmem>>, vector<32x32xbf16>
    %c0_5 = arith.constant 0 : index
    %c0_6 = arith.constant 0 : index
    %3 = vector.load %arg5[%c0_5, %c0_6] : memref<1x32xf32, #tpu.memory_space<vmem>>, vector<1x32xf32>
    %c0_7 = arith.constant 0 : index
    %c0_8 = arith.constant 0 : index
    %4 = vector.load %arg6[%c0_7, %c0_8] : memref<32x32xbf16, #tpu.memory_space<vmem>>, vector<32x32xbf16>
    %c0_9 = arith.constant 0 : index
    %c0_10 = arith.constant 0 : index
    %5 = vector.load %arg7[%c0_9, %c0_10] : memref<1x32xf32, #tpu.memory_space<vmem>>, vector<1x32xf32>
    %c0_11 = arith.constant 0 : index
    %c0_12 = arith.constant 0 : index
    %6 = vector.load %arg8[%c0_11, %c0_12] : memref<32x32xbf16, #tpu.memory_space<vmem>>, vector<32x32xbf16>
    %c0_13 = arith.constant 0 : index
    %c0_14 = arith.constant 0 : index
    %7 = vector.load %arg9[%c0_13, %c0_14] : memref<1x32xf32, #tpu.memory_space<vmem>>, vector<1x32xf32>
    %c0_15 = arith.constant 0 : index
    %c0_16 = arith.constant 0 : index
    %8 = vector.load %arg10[%c0_15, %c0_16] : memref<1x32xf32, #tpu.memory_space<vmem>>, vector<1x32xf32>
    %c0_17 = arith.constant 0 : index
    %c0_18 = arith.constant 0 : index
    %9 = vector.load %arg11[%c0_17, %c0_18] : memref<1x32xf32, #tpu.memory_space<vmem>>, vector<1x32xf32>
    %c0_19 = arith.constant 0 : index
    %c0_20 = arith.constant 0 : index
    %10 = vector.load %arg12[%c0_19, %c0_20] : memref<32x64xbf16, #tpu.memory_space<vmem>>, vector<32x64xbf16>
    %c0_21 = arith.constant 0 : index
    %c0_22 = arith.constant 0 : index
    %11 = vector.load %arg13[%c0_21, %c0_22] : memref<1x64xf32, #tpu.memory_space<vmem>>, vector<1x64xf32>
    %c0_23 = arith.constant 0 : index
    %c0_24 = arith.constant 0 : index
    %12 = vector.load %arg14[%c0_23, %c0_24] : memref<64x32xbf16, #tpu.memory_space<vmem>>, vector<64x32xbf16>
    %c0_25 = arith.constant 0 : index
    %c0_26 = arith.constant 0 : index
    %13 = vector.load %arg15[%c0_25, %c0_26] : memref<1x32xf32, #tpu.memory_space<vmem>>, vector<1x32xf32>
    %c0_27 = arith.constant 0 : index
    %c0_28 = arith.constant 0 : index
    %14 = vector.load %arg16[%c0_27, %c0_28] : memref<1x32xf32, #tpu.memory_space<vmem>>, vector<1x32xf32>
    %c0_29 = arith.constant 0 : index
    %c0_30 = arith.constant 0 : index
    %15 = vector.load %arg17[%c0_29, %c0_30] : memref<1x32xf32, #tpu.memory_space<vmem>>, vector<1x32xf32>
    %c0_31 = arith.constant 0 : index
    %c0_32 = arith.constant 0 : index
    %c0_33 = arith.constant 0 : index
    %16 = vector.load %arg0[%c0_31, %c0_32, %c0_33] : memref<2x16x32xf32, #tpu.memory_space<vmem>>, vector<2x16x32xf32>
    %c0_34 = arith.constant 0 : index
    %c0_35 = arith.constant 0 : index
    %17 = vector.load %arg1[%c0_34, %c0_35] : memref<2x16xf32, #tpu.memory_space<vmem>>, vector<2x16xf32>
    %18 = vector.shape_cast %16 : vector<2x16x32xf32> to vector<32x32xf32>
    %19 = arith.truncf %18 : vector<32x32xf32> to vector<32x32xbf16>
    %cst = arith.constant dense<0.000000e+00> : vector<32x32xf32>
    %20 = tpu.matmul %19, %0, %cst {dimension_numbers = #tpu.dot_dimension_numbers<[1], [0], [0], [1], [0, 0, 1, 1], [], []>} : vector<32x32xbf16>, vector<32x32xbf16>, vector<32x32xf32> -> vector<32x32xf32>
    %21 = vector.broadcast %1 : vector<1x32xf32> to vector<32x32xf32>
    %22 = arith.addf %20, %21 : vector<32x32xf32>
    %cst_36 = arith.constant dense<0.000000e+00> : vector<32x32xf32>
    %23 = tpu.matmul %19, %2, %cst_36 {dimension_numbers = #tpu.dot_dimension_numbers<[1], [0], [0], [1], [0, 0, 1, 1], [], []>} : vector<32x32xbf16>, vector<32x32xbf16>, vector<32x32xf32> -> vector<32x32xf32>
    %24 = vector.broadcast %3 : vector<1x32xf32> to vector<32x32xf32>
    %25 = arith.addf %23, %24 : vector<32x32xf32>
    %cst_37 = arith.constant dense<0.000000e+00> : vector<32x32xf32>
    %26 = tpu.matmul %19, %4, %cst_37 {dimension_numbers = #tpu.dot_dimension_numbers<[1], [0], [0], [1], [0, 0, 1, 1], [], []>} : vector<32x32xbf16>, vector<32x32xbf16>, vector<32x32xf32> -> vector<32x32xf32>
    %27 = vector.broadcast %5 : vector<1x32xf32> to vector<32x32xf32>
    %28 = arith.addf %26, %27 : vector<32x32xf32>
    %29 = vector.shape_cast %22 : vector<32x32xf32> to vector<2x16x32xf32>
    %30 = arith.truncf %29 : vector<2x16x32xf32> to vector<2x16x32xbf16>
    %31 = vector.shape_cast %25 : vector<32x32xf32> to vector<2x16x32xf32>
    %32 = arith.truncf %31 : vector<2x16x32xf32> to vector<2x16x32xbf16>
    %33 = vector.shape_cast %28 : vector<32x32xf32> to vector<2x16x32xf32>
    %34 = arith.truncf %33 : vector<2x16x32xf32> to vector<2x16x32xbf16>
    "tpu.trace_start"() <{level = 10 : i32, message = "bqd,bkd->bqk"}> : () -> ()
    %cst_38 = arith.constant dense<0.000000e+00> : vector<2x16x16xf32>
    %35 = tpu.matmul %30, %32, %cst_38 {dimension_numbers = #tpu.dot_dimension_numbers<[2], [2], [1], [1], [0, 0, 0, 1, 1, 1], [0], [0]>} : vector<2x16x32xbf16>, vector<2x16x32xbf16>, vector<2x16x16xf32> -> vector<2x16x16xf32>
    "tpu.trace_stop"() : () -> ()
    %36 = vector.shape_cast %17 : vector<2x16xf32> to vector<2x1x16xf32>
    %cst_39 = arith.constant 5.000000e-01 : f32
    %37 = vector.broadcast %cst_39 : f32 to vector<2x1x16xf32>
    %38 = arith.cmpf ogt, %36, %37 : vector<2x1x16xf32>
    %cst_40 = arith.constant -1.000000e+09 : f32
    %39 = vector.shape_cast %38 : vector<2x1x16xi1> to vector<2x1x16xi1>
    %40 = vector.broadcast %39 : vector<2x1x16xi1> to vector<2x16x16xi1>
    %41 = vector.broadcast %cst_40 : f32 to vector<2x16x16xf32>
    %42 = arith.select %40, %35, %41 : vector<2x16x16xi1>, vector<2x16x16xf32>
    %cst_41 = arith.constant dense<0xFF800000> : vector<2x16xf32>
    %43 = vector.multi_reduction <maximumf>, %42, %cst_41 [2] : vector<2x16x16xf32> to vector<2x16xf32>
    %cst_42 = arith.constant 0xFF800000 : f32
    %44 = vector.broadcast %cst_42 : f32 to vector<2x16xf32>
    %45 = arith.maximumf %44, %43 : vector<2x16xf32>
    %46 = vector.shape_cast %45 : vector<2x16xf32> to vector<2x16x1xf32>
    %47 = vector.broadcast %46 : vector<2x16x1xf32> to vector<2x16x16xf32>
    %48 = arith.subf %42, %47 : vector<2x16x16xf32>
    %49 = math.exp %48 : vector<2x16x16xf32>
    %cst_43 = arith.constant dense<0.000000e+00> : vector<2x16xf32>
    %50 = vector.multi_reduction <add>, %49, %cst_43 [2] : vector<2x16x16xf32> to vector<2x16xf32>
    %51 = vector.shape_cast %50 : vector<2x16xf32> to vector<2x16x1xf32>
    %52 = vector.broadcast %51 : vector<2x16x1xf32> to vector<2x16x16xf32>
    %53 = arith.divf %49, %52 : vector<2x16x16xf32>
    %54 = arith.truncf %53 : vector<2x16x16xf32> to vector<2x16x16xbf16>
    "tpu.trace_start"() <{level = 10 : i32, message = "bqk,bkd->bqd"}> : () -> ()
    %cst_44 = arith.constant dense<0.000000e+00> : vector<2x16x32xf32>
    %55 = tpu.matmul %54, %34, %cst_44 {dimension_numbers = #tpu.dot_dimension_numbers<[2], [1], [1], [2], [0, 0, 0, 1, 1, 2], [0], [0]>} : vector<2x16x16xbf16>, vector<2x16x32xbf16>, vector<2x16x32xf32> -> vector<2x16x32xf32>
    "tpu.trace_stop"() : () -> ()
    %56 = vector.shape_cast %55 : vector<2x16x32xf32> to vector<32x32xf32>
    %57 = arith.truncf %56 : vector<32x32xf32> to vector<32x32xbf16>
    %cst_45 = arith.constant dense<0.000000e+00> : vector<32x32xf32>
    %58 = tpu.matmul %57, %6, %cst_45 {dimension_numbers = #tpu.dot_dimension_numbers<[1], [0], [0], [1], [0, 0, 1, 1], [], []>} : vector<32x32xbf16>, vector<32x32xbf16>, vector<32x32xf32> -> vector<32x32xf32>
    %59 = vector.broadcast %7 : vector<1x32xf32> to vector<32x32xf32>
    %60 = arith.addf %58, %59 : vector<32x32xf32>
    %61 = arith.addf %18, %60 : vector<32x32xf32>
    %cst_46 = arith.constant dense<0.000000e+00> : vector<32xf32>
    %62 = vector.multi_reduction <add>, %61, %cst_46 [1] : vector<32x32xf32> to vector<32xf32>
    %63 = vector.shape_cast %62 : vector<32xf32> to vector<32x1xf32>
    %cst_47 = arith.constant 3.200000e+01 : f32
    %64 = vector.broadcast %cst_47 : f32 to vector<32x1xf32>
    %65 = arith.divf %63, %64 : vector<32x1xf32>
    %66 = vector.broadcast %65 : vector<32x1xf32> to vector<32x32xf32>
    %67 = arith.subf %61, %66 : vector<32x32xf32>
    %68 = arith.mulf %67, %67 : vector<32x32xf32>
    %cst_48 = arith.constant dense<0.000000e+00> : vector<32xf32>
    %69 = vector.multi_reduction <add>, %68, %cst_48 [1] : vector<32x32xf32> to vector<32xf32>
    %70 = vector.shape_cast %69 : vector<32xf32> to vector<32x1xf32>
    %cst_49 = arith.constant 3.200000e+01 : f32
    %71 = vector.broadcast %cst_49 : f32 to vector<32x1xf32>
    %72 = arith.divf %70, %71 : vector<32x1xf32>
    %73 = vector.broadcast %65 : vector<32x1xf32> to vector<32x32xf32>
    %74 = arith.subf %61, %73 : vector<32x32xf32>
    %cst_50 = arith.constant 9.99999996E-13 : f32
    %75 = vector.broadcast %cst_50 : f32 to vector<32x1xf32>
    %76 = arith.addf %72, %75 : vector<32x1xf32>
    %77 = math.rsqrt %76 : vector<32x1xf32>
    %78 = vector.broadcast %77 : vector<32x1xf32> to vector<32x32xf32>
    %79 = arith.mulf %74, %78 : vector<32x32xf32>
    %80 = vector.broadcast %8 : vector<1x32xf32> to vector<32x32xf32>
    %81 = arith.mulf %79, %80 : vector<32x32xf32>
    %82 = vector.broadcast %9 : vector<1x32xf32> to vector<32x32xf32>
    %83 = arith.addf %81, %82 : vector<32x32xf32>
    %84 = arith.truncf %83 : vector<32x32xf32> to vector<32x32xbf16>
    %cst_51 = arith.constant dense<0.000000e+00> : vector<32x64xf32>
    %85 = tpu.matmul %84, %10, %cst_51 {dimension_numbers = #tpu.dot_dimension_numbers<[1], [0], [0], [1], [0, 0, 1, 1], [], []>} : vector<32x32xbf16>, vector<32x64xbf16>, vector<32x64xf32> -> vector<32x64xf32>
    %86 = vector.broadcast %11 : vector<1x64xf32> to vector<32x64xf32>
    %87 = arith.addf %85, %86 : vector<32x64xf32>
    %88 = arith.mulf %87, %87 : vector<32x64xf32>
    %89 = arith.mulf %87, %88 : vector<32x64xf32>
    %cst_52 = arith.constant 4.471500e-02 : f32
    %90 = vector.broadcast %cst_52 : f32 to vector<32x64xf32>
    %91 = arith.mulf %90, %89 : vector<32x64xf32>
    %92 = arith.addf %87, %91 : vector<32x64xf32>
    %cst_53 = arith.constant 0.797884583 : f32
    %93 = vector.broadcast %cst_53 : f32 to vector<32x64xf32>
    %94 = arith.mulf %93, %92 : vector<32x64xf32>
    %95 = math.tanh %94 : vector<32x64xf32>
    %cst_54 = arith.constant 1.000000e+00 : f32
    %96 = vector.broadcast %cst_54 : f32 to vector<32x64xf32>
    %97 = arith.addf %96, %95 : vector<32x64xf32>
    %cst_55 = arith.constant 5.000000e-01 : f32
    %98 = vector.broadcast %cst_55 : f32 to vector<32x64xf32>
    %99 = arith.mulf %98, %97 : vector<32x64xf32>
    %100 = arith.mulf %87, %99 : vector<32x64xf32>
    %101 = arith.truncf %100 : vector<32x64xf32> to vector<32x64xbf16>
    %cst_56 = arith.constant dense<0.000000e+00> : vector<32x32xf32>
    %102 = tpu.matmul %101, %12, %cst_56 {dimension_numbers = #tpu.dot_dimension_numbers<[1], [0], [0], [1], [0, 0, 1, 1], [], []>} : vector<32x64xbf16>, vector<64x32xbf16>, vector<32x32xf32> -> vector<32x32xf32>
    %103 = vector.broadcast %13 : vector<1x32xf32> to vector<32x32xf32>
    %104 = arith.addf %102, %103 : vector<32x32xf32>
    %105 = arith.addf %83, %104 : vector<32x32xf32>
    %cst_57 = arith.constant dense<0.000000e+00> : vector<32xf32>
    %106 = vector.multi_reduction <add>, %105, %cst_57 [1] : vector<32x32xf32> to vector<32xf32>
    %107 = vector.shape_cast %106 : vector<32xf32> to vector<32x1xf32>
    %cst_58 = arith.constant 3.200000e+01 : f32
    %108 = vector.broadcast %cst_58 : f32 to vector<32x1xf32>
    %109 = arith.divf %107, %108 : vector<32x1xf32>
    %110 = vector.broadcast %109 : vector<32x1xf32> to vector<32x32xf32>
    %111 = arith.subf %105, %110 : vector<32x32xf32>
    %112 = arith.mulf %111, %111 : vector<32x32xf32>
    %cst_59 = arith.constant dense<0.000000e+00> : vector<32xf32>
    %113 = vector.multi_reduction <add>, %112, %cst_59 [1] : vector<32x32xf32> to vector<32xf32>
    %114 = vector.shape_cast %113 : vector<32xf32> to vector<32x1xf32>
    %cst_60 = arith.constant 3.200000e+01 : f32
    %115 = vector.broadcast %cst_60 : f32 to vector<32x1xf32>
    %116 = arith.divf %114, %115 : vector<32x1xf32>
    %117 = vector.broadcast %109 : vector<32x1xf32> to vector<32x32xf32>
    %118 = arith.subf %105, %117 : vector<32x32xf32>
    %cst_61 = arith.constant 9.99999996E-13 : f32
    %119 = vector.broadcast %cst_61 : f32 to vector<32x1xf32>
    %120 = arith.addf %116, %119 : vector<32x1xf32>
    %121 = math.rsqrt %120 : vector<32x1xf32>
    %122 = vector.broadcast %121 : vector<32x1xf32> to vector<32x32xf32>
    %123 = arith.mulf %118, %122 : vector<32x32xf32>
    %124 = vector.broadcast %14 : vector<1x32xf32> to vector<32x32xf32>
    %125 = arith.mulf %123, %124 : vector<32x32xf32>
    %126 = vector.broadcast %15 : vector<1x32xf32> to vector<32x32xf32>
    %127 = arith.addf %125, %126 : vector<32x32xf32>
    %128 = vector.shape_cast %127 : vector<32x32xf32> to vector<2x16x32xf32>
    %c0_62 = arith.constant 0 : index
    %c0_63 = arith.constant 0 : index
    %c0_64 = arith.constant 0 : index
    %129 = vector.load %arg18[%c0_62, %c0_63, %c0_64] : memref<2x16x32xf32, #tpu.memory_space<vmem>>, vector<2x16x32xf32>
    tpu.vector_store %arg18[%c0_62, %c0_63, %c0_64], %128 {strides = array<i32>} : memref<2x16x32xf32, #tpu.memory_space<vmem>>, vector<2x16x32xf32>,
    return
  }
}

module attributes {stable_mosaic.version = 11 : i64} {
  func.func @encode_pool_kernel(%arg0: memref<2x16x32xf32, #tpu.memory_space<vmem>>, %arg1: memref<2x16xf32, #tpu.memory_space<vmem>>, %arg2: memref<2x16xf32, #tpu.memory_space<vmem>>, %arg3: memref<2x32xf32, #tpu.memory_space<vmem>>, %arg4: memref<32x32xbf16, #tpu.memory_space<vmem>>, %arg5: memref<1x32xf32, #tpu.memory_space<vmem>>, %arg6: memref<32x32xbf16, #tpu.memory_space<vmem>>, %arg7: memref<1x32xf32, #tpu.memory_space<vmem>>, %arg8: memref<32x32xbf16, #tpu.memory_space<vmem>>, %arg9: memref<1x32xf32, #tpu.memory_space<vmem>>, %arg10: memref<32x32xbf16, #tpu.memory_space<vmem>>, %arg11: memref<1x32xf32, #tpu.memory_space<vmem>>, %arg12: memref<1x32xf32, #tpu.memory_space<vmem>>, %arg13: memref<1x32xf32, #tpu.memory_space<vmem>>, %arg14: memref<32x64xbf16, #tpu.memory_space<vmem>>, %arg15: memref<1x64xf32, #tpu.memory_space<vmem>>, %arg16: memref<64x32xbf16, #tpu.memory_space<vmem>>, %arg17: memref<1x32xf32, #tpu.memory_space<vmem>>, %arg18: memref<1x32xf32, #tpu.memory_space<vmem>>, %arg19: memref<1x32xf32, #tpu.memory_space<vmem>>, %arg20: memref<32x32xbf16, #tpu.memory_space<vmem>>, %arg21: memref<1x32xf32, #tpu.memory_space<vmem>>, %arg22: memref<2x32xf32, #tpu.memory_space<vmem>>, %arg23: memref<2x16xf32, #tpu.memory_space<vmem>>) attributes {dimension_semantics = [], scalar_prefetch = 0 : i64, scratch_operands = 0 : i64, tpu.core_type = #tpu.core_type<tc>} {
    %c0 = arith.constant 0 : index
    %c0_0 = arith.constant 0 : index
    %0 = vector.load %arg4[%c0, %c0_0] : memref<32x32xbf16, #tpu.memory_space<vmem>>, vector<32x32xbf16>
    %c0_1 = arith.constant 0 : index
    %c0_2 = arith.constant 0 : index
    %1 = vector.load %arg5[%c0_1, %c0_2] : memref<1x32xf32, #tpu.memory_space<vmem>>, vector<1x32xf32>
    %c0_3 = arith.constant 0 : index
    %c0_4 = arith.constant 0 : index
    %2 = vector.load %arg6[%c0_3, %c0_4] : memref<32x32xbf16, #tpu.memory_space<vmem>>, vector<32x32xbf16>
    %c0_5 = arith.constant 0 : index
    %c0_6 = arith.constant 0 : index
    %3 = vector.load %arg7[%c0_5, %c0_6] : memref<1x32xf32, #tpu.memory_space<vmem>>, vector<1x32xf32>
    %c0_7 = arith.constant 0 : index
    %c0_8 = arith.constant 0 : index
    %4 = vector.load %arg8[%c0_7, %c0_8] : memref<32x32xbf16, #tpu.memory_space<vmem>>, vector<32x32xbf16>
    %c0_9 = arith.constant 0 : index
    %c0_10 = arith.constant 0 : index
    %5 = vector.load %arg9[%c0_9, %c0_10] : memref<1x32xf32, #tpu.memory_space<vmem>>, vector<1x32xf32>
    %c0_11 = arith.constant 0 : index
    %c0_12 = arith.constant 0 : index
    %6 = vector.load %arg10[%c0_11, %c0_12] : memref<32x32xbf16, #tpu.memory_space<vmem>>, vector<32x32xbf16>
    %c0_13 = arith.constant 0 : index
    %c0_14 = arith.constant 0 : index
    %7 = vector.load %arg11[%c0_13, %c0_14] : memref<1x32xf32, #tpu.memory_space<vmem>>, vector<1x32xf32>
    %c0_15 = arith.constant 0 : index
    %c0_16 = arith.constant 0 : index
    %8 = vector.load %arg12[%c0_15, %c0_16] : memref<1x32xf32, #tpu.memory_space<vmem>>, vector<1x32xf32>
    %c0_17 = arith.constant 0 : index
    %c0_18 = arith.constant 0 : index
    %9 = vector.load %arg13[%c0_17, %c0_18] : memref<1x32xf32, #tpu.memory_space<vmem>>, vector<1x32xf32>
    %c0_19 = arith.constant 0 : index
    %c0_20 = arith.constant 0 : index
    %10 = vector.load %arg14[%c0_19, %c0_20] : memref<32x64xbf16, #tpu.memory_space<vmem>>, vector<32x64xbf16>
    %c0_21 = arith.constant 0 : index
    %c0_22 = arith.constant 0 : index
    %11 = vector.load %arg15[%c0_21, %c0_22] : memref<1x64xf32, #tpu.memory_space<vmem>>, vector<1x64xf32>
    %c0_23 = arith.constant 0 : index
    %c0_24 = arith.constant 0 : index
    %12 = vector.load %arg16[%c0_23, %c0_24] : memref<64x32xbf16, #tpu.memory_space<vmem>>, vector<64x32xbf16>
    %c0_25 = arith.constant 0 : index
    %c0_26 = arith.constant 0 : index
    %13 = vector.load %arg17[%c0_25, %c0_26] : memref<1x32xf32, #tpu.memory_space<vmem>>, vector<1x32xf32>
    %c0_27 = arith.constant 0 : index
    %c0_28 = arith.constant 0 : index
    %14 = vector.load %arg18[%c0_27, %c0_28] : memref<1x32xf32, #tpu.memory_space<vmem>>, vector<1x32xf32>
    %c0_29 = arith.constant 0 : index
    %c0_30 = arith.constant 0 : index
    %15 = vector.load %arg19[%c0_29, %c0_30] : memref<1x32xf32, #tpu.memory_space<vmem>>, vector<1x32xf32>
    %c0_31 = arith.constant 0 : index
    %c0_32 = arith.constant 0 : index
    %16 = vector.load %arg20[%c0_31, %c0_32] : memref<32x32xbf16, #tpu.memory_space<vmem>>, vector<32x32xbf16>
    %c0_33 = arith.constant 0 : index
    %c0_34 = arith.constant 0 : index
    %17 = vector.load %arg21[%c0_33, %c0_34] : memref<1x32xf32, #tpu.memory_space<vmem>>, vector<1x32xf32>
    %c0_35 = arith.constant 0 : index
    %c0_36 = arith.constant 0 : index
    %c0_37 = arith.constant 0 : index
    %18 = vector.load %arg0[%c0_35, %c0_36, %c0_37] : memref<2x16x32xf32, #tpu.memory_space<vmem>>, vector<2x16x32xf32>
    %c0_38 = arith.constant 0 : index
    %c0_39 = arith.constant 0 : index
    %19 = vector.load %arg1[%c0_38, %c0_39] : memref<2x16xf32, #tpu.memory_space<vmem>>, vector<2x16xf32>
    %20 = vector.shape_cast %18 : vector<2x16x32xf32> to vector<32x32xf32>
    %21 = arith.truncf %20 : vector<32x32xf32> to vector<32x32xbf16>
    %cst = arith.constant dense<0.000000e+00> : vector<32x32xf32>
    %22 = tpu.matmul %21, %0, %cst {dimension_numbers = #tpu.dot_dimension_numbers<[1], [0], [0], [1], [0, 0, 1, 1], [], []>} : vector<32x32xbf16>, vector<32x32xbf16>, vector<32x32xf32> -> vector<32x32xf32>
    %23 = vector.broadcast %1 : vector<1x32xf32> to vector<32x32xf32>
    %24 = arith.addf %22, %23 : vector<32x32xf32>
    %cst_40 = arith.constant dense<0.000000e+00> : vector<32x32xf32>
    %25 = tpu.matmul %21, %2, %cst_40 {dimension_numbers = #tpu.dot_dimension_numbers<[1], [0], [0], [1], [0, 0, 1, 1], [], []>} : vector<32x32xbf16>, vector<32x32xbf16>, vector<32x32xf32> -> vector<32x32xf32>
    %26 = vector.broadcast %3 : vector<1x32xf32> to vector<32x32xf32>
    %27 = arith.addf %25, %26 : vector<32x32xf32>
    %cst_41 = arith.constant dense<0.000000e+00> : vector<32x32xf32>
    %28 = tpu.matmul %21, %4, %cst_41 {dimension_numbers = #tpu.dot_dimension_numbers<[1], [0], [0], [1], [0, 0, 1, 1], [], []>} : vector<32x32xbf16>, vector<32x32xbf16>, vector<32x32xf32> -> vector<32x32xf32>
    %29 = vector.broadcast %5 : vector<1x32xf32> to vector<32x32xf32>
    %30 = arith.addf %28, %29 : vector<32x32xf32>
    %31 = vector.shape_cast %24 : vector<32x32xf32> to vector<2x16x32xf32>
    %32 = arith.truncf %31 : vector<2x16x32xf32> to vector<2x16x32xbf16>
    %33 = vector.shape_cast %27 : vector<32x32xf32> to vector<2x16x32xf32>
    %34 = arith.truncf %33 : vector<2x16x32xf32> to vector<2x16x32xbf16>
    %35 = vector.shape_cast %30 : vector<32x32xf32> to vector<2x16x32xf32>
    %36 = arith.truncf %35 : vector<2x16x32xf32> to vector<2x16x32xbf16>
    "tpu.trace_start"() <{level = 10 : i32, message = "bqd,bkd->bqk"}> : () -> ()
    %cst_42 = arith.constant dense<0.000000e+00> : vector<2x16x16xf32>
    %37 = tpu.matmul %32, %34, %cst_42 {dimension_numbers = #tpu.dot_dimension_numbers<[2], [2], [1], [1], [0, 0, 0, 1, 1, 1], [0], [0]>} : vector<2x16x32xbf16>, vector<2x16x32xbf16>, vector<2x16x16xf32> -> vector<2x16x16xf32>
    "tpu.trace_stop"() : () -> ()
    %38 = vector.shape_cast %19 : vector<2x16xf32> to vector<2x1x16xf32>
    %cst_43 = arith.constant 5.000000e-01 : f32
    %39 = vector.broadcast %cst_43 : f32 to vector<2x1x16xf32>
    %40 = arith.cmpf ogt, %38, %39 : vector<2x1x16xf32>
    %cst_44 = arith.constant -1.000000e+09 : f32
    %41 = vector.shape_cast %40 : vector<2x1x16xi1> to vector<2x1x16xi1>
    %42 = vector.broadcast %41 : vector<2x1x16xi1> to vector<2x16x16xi1>
    %43 = vector.broadcast %cst_44 : f32 to vector<2x16x16xf32>
    %44 = arith.select %42, %37, %43 : vector<2x16x16xi1>, vector<2x16x16xf32>
    %cst_45 = arith.constant dense<0xFF800000> : vector<2x16xf32>
    %45 = vector.multi_reduction <maximumf>, %44, %cst_45 [2] : vector<2x16x16xf32> to vector<2x16xf32>
    %cst_46 = arith.constant 0xFF800000 : f32
    %46 = vector.broadcast %cst_46 : f32 to vector<2x16xf32>
    %47 = arith.maximumf %46, %45 : vector<2x16xf32>
    %48 = vector.shape_cast %47 : vector<2x16xf32> to vector<2x16x1xf32>
    %49 = vector.broadcast %48 : vector<2x16x1xf32> to vector<2x16x16xf32>
    %50 = arith.subf %44, %49 : vector<2x16x16xf32>
    %51 = math.exp %50 : vector<2x16x16xf32>
    %cst_47 = arith.constant dense<0.000000e+00> : vector<2x16xf32>
    %52 = vector.multi_reduction <add>, %51, %cst_47 [2] : vector<2x16x16xf32> to vector<2x16xf32>
    %53 = vector.shape_cast %52 : vector<2x16xf32> to vector<2x16x1xf32>
    %54 = vector.broadcast %53 : vector<2x16x1xf32> to vector<2x16x16xf32>
    %55 = arith.divf %51, %54 : vector<2x16x16xf32>
    %56 = arith.truncf %55 : vector<2x16x16xf32> to vector<2x16x16xbf16>
    "tpu.trace_start"() <{level = 10 : i32, message = "bqk,bkd->bqd"}> : () -> ()
    %cst_48 = arith.constant dense<0.000000e+00> : vector<2x16x32xf32>
    %57 = tpu.matmul %56, %36, %cst_48 {dimension_numbers = #tpu.dot_dimension_numbers<[2], [1], [1], [2], [0, 0, 0, 1, 1, 2], [0], [0]>} : vector<2x16x16xbf16>, vector<2x16x32xbf16>, vector<2x16x32xf32> -> vector<2x16x32xf32>
    "tpu.trace_stop"() : () -> ()
    %58 = vector.shape_cast %57 : vector<2x16x32xf32> to vector<32x32xf32>
    %59 = arith.truncf %58 : vector<32x32xf32> to vector<32x32xbf16>
    %cst_49 = arith.constant dense<0.000000e+00> : vector<32x32xf32>
    %60 = tpu.matmul %59, %6, %cst_49 {dimension_numbers = #tpu.dot_dimension_numbers<[1], [0], [0], [1], [0, 0, 1, 1], [], []>} : vector<32x32xbf16>, vector<32x32xbf16>, vector<32x32xf32> -> vector<32x32xf32>
    %61 = vector.broadcast %7 : vector<1x32xf32> to vector<32x32xf32>
    %62 = arith.addf %60, %61 : vector<32x32xf32>
    %63 = arith.addf %20, %62 : vector<32x32xf32>
    %cst_50 = arith.constant dense<0.000000e+00> : vector<32xf32>
    %64 = vector.multi_reduction <add>, %63, %cst_50 [1] : vector<32x32xf32> to vector<32xf32>
    %65 = vector.shape_cast %64 : vector<32xf32> to vector<32x1xf32>
    %cst_51 = arith.constant 3.200000e+01 : f32
    %66 = vector.broadcast %cst_51 : f32 to vector<32x1xf32>
    %67 = arith.divf %65, %66 : vector<32x1xf32>
    %68 = vector.broadcast %67 : vector<32x1xf32> to vector<32x32xf32>
    %69 = arith.subf %63, %68 : vector<32x32xf32>
    %70 = arith.mulf %69, %69 : vector<32x32xf32>
    %cst_52 = arith.constant dense<0.000000e+00> : vector<32xf32>
    %71 = vector.multi_reduction <add>, %70, %cst_52 [1] : vector<32x32xf32> to vector<32xf32>
    %72 = vector.shape_cast %71 : vector<32xf32> to vector<32x1xf32>
    %cst_53 = arith.constant 3.200000e+01 : f32
    %73 = vector.broadcast %cst_53 : f32 to vector<32x1xf32>
    %74 = arith.divf %72, %73 : vector<32x1xf32>
    %75 = vector.broadcast %67 : vector<32x1xf32> to vector<32x32xf32>
    %76 = arith.subf %63, %75 : vector<32x32xf32>
    %cst_54 = arith.constant 9.99999996E-13 : f32
    %77 = vector.broadcast %cst_54 : f32 to vector<32x1xf32>
    %78 = arith.addf %74, %77 : vector<32x1xf32>
    %79 = math.rsqrt %78 : vector<32x1xf32>
    %80 = vector.broadcast %79 : vector<32x1xf32> to vector<32x32xf32>
    %81 = arith.mulf %76, %80 : vector<32x32xf32>
    %82 = vector.broadcast %8 : vector<1x32xf32> to vector<32x32xf32>
    %83 = arith.mulf %81, %82 : vector<32x32xf32>
    %84 = vector.broadcast %9 : vector<1x32xf32> to vector<32x32xf32>
    %85 = arith.addf %83, %84 : vector<32x32xf32>
    %86 = arith.truncf %85 : vector<32x32xf32> to vector<32x32xbf16>
    %cst_55 = arith.constant dense<0.000000e+00> : vector<32x64xf32>
    %87 = tpu.matmul %86, %10, %cst_55 {dimension_numbers = #tpu.dot_dimension_numbers<[1], [0], [0], [1], [0, 0, 1, 1], [], []>} : vector<32x32xbf16>, vector<32x64xbf16>, vector<32x64xf32> -> vector<32x64xf32>
    %88 = vector.broadcast %11 : vector<1x64xf32> to vector<32x64xf32>
    %89 = arith.addf %87, %88 : vector<32x64xf32>
    %90 = arith.mulf %89, %89 : vector<32x64xf32>
    %91 = arith.mulf %89, %90 : vector<32x64xf32>
    %cst_56 = arith.constant 4.471500e-02 : f32
    %92 = vector.broadcast %cst_56 : f32 to vector<32x64xf32>
    %93 = arith.mulf %92, %91 : vector<32x64xf32>
    %94 = arith.addf %89, %93 : vector<32x64xf32>
    %cst_57 = arith.constant 0.797884583 : f32
    %95 = vector.broadcast %cst_57 : f32 to vector<32x64xf32>
    %96 = arith.mulf %95, %94 : vector<32x64xf32>
    %97 = math.tanh %96 : vector<32x64xf32>
    %cst_58 = arith.constant 1.000000e+00 : f32
    %98 = vector.broadcast %cst_58 : f32 to vector<32x64xf32>
    %99 = arith.addf %98, %97 : vector<32x64xf32>
    %cst_59 = arith.constant 5.000000e-01 : f32
    %100 = vector.broadcast %cst_59 : f32 to vector<32x64xf32>
    %101 = arith.mulf %100, %99 : vector<32x64xf32>
    %102 = arith.mulf %89, %101 : vector<32x64xf32>
    %103 = arith.truncf %102 : vector<32x64xf32> to vector<32x64xbf16>
    %cst_60 = arith.constant dense<0.000000e+00> : vector<32x32xf32>
    %104 = tpu.matmul %103, %12, %cst_60 {dimension_numbers = #tpu.dot_dimension_numbers<[1], [0], [0], [1], [0, 0, 1, 1], [], []>} : vector<32x64xbf16>, vector<64x32xbf16>, vector<32x32xf32> -> vector<32x32xf32>
    %105 = vector.broadcast %13 : vector<1x32xf32> to vector<32x32xf32>
    %106 = arith.addf %104, %105 : vector<32x32xf32>
    %107 = arith.addf %85, %106 : vector<32x32xf32>
    %cst_61 = arith.constant dense<0.000000e+00> : vector<32xf32>
    %108 = vector.multi_reduction <add>, %107, %cst_61 [1] : vector<32x32xf32> to vector<32xf32>
    %109 = vector.shape_cast %108 : vector<32xf32> to vector<32x1xf32>
    %cst_62 = arith.constant 3.200000e+01 : f32
    %110 = vector.broadcast %cst_62 : f32 to vector<32x1xf32>
    %111 = arith.divf %109, %110 : vector<32x1xf32>
    %112 = vector.broadcast %111 : vector<32x1xf32> to vector<32x32xf32>
    %113 = arith.subf %107, %112 : vector<32x32xf32>
    %114 = arith.mulf %113, %113 : vector<32x32xf32>
    %cst_63 = arith.constant dense<0.000000e+00> : vector<32xf32>
    %115 = vector.multi_reduction <add>, %114, %cst_63 [1] : vector<32x32xf32> to vector<32xf32>
    %116 = vector.shape_cast %115 : vector<32xf32> to vector<32x1xf32>
    %cst_64 = arith.constant 3.200000e+01 : f32
    %117 = vector.broadcast %cst_64 : f32 to vector<32x1xf32>
    %118 = arith.divf %116, %117 : vector<32x1xf32>
    %119 = vector.broadcast %111 : vector<32x1xf32> to vector<32x32xf32>
    %120 = arith.subf %107, %119 : vector<32x32xf32>
    %cst_65 = arith.constant 9.99999996E-13 : f32
    %121 = vector.broadcast %cst_65 : f32 to vector<32x1xf32>
    %122 = arith.addf %118, %121 : vector<32x1xf32>
    %123 = math.rsqrt %122 : vector<32x1xf32>
    %124 = vector.broadcast %123 : vector<32x1xf32> to vector<32x32xf32>
    %125 = arith.mulf %120, %124 : vector<32x32xf32>
    %126 = vector.broadcast %14 : vector<1x32xf32> to vector<32x32xf32>
    %127 = arith.mulf %125, %126 : vector<32x32xf32>
    %128 = vector.broadcast %15 : vector<1x32xf32> to vector<32x32xf32>
    %129 = arith.addf %127, %128 : vector<32x32xf32>
    %130 = arith.truncf %129 : vector<32x32xf32> to vector<32x32xbf16>
    %cst_66 = arith.constant dense<0.000000e+00> : vector<32x32xf32>
    %131 = tpu.matmul %130, %16, %cst_66 {dimension_numbers = #tpu.dot_dimension_numbers<[1], [0], [0], [1], [0, 0, 1, 1], [], []>} : vector<32x32xbf16>, vector<32x32xbf16>, vector<32x32xf32> -> vector<32x32xf32>
    %132 = vector.broadcast %17 : vector<1x32xf32> to vector<32x32xf32>
    %133 = arith.addf %131, %132 : vector<32x32xf32>
    %134 = math.tanh %133 : vector<32x32xf32>
    %135 = vector.shape_cast %134 : vector<32x32xf32> to vector<2x16x32xf32>
    %136 = arith.truncf %135 : vector<2x16x32xf32> to vector<2x16x32xbf16>
    %c0_67 = arith.constant 0 : index
    %c0_68 = arith.constant 0 : index
    %137 = vector.load %arg3[%c0_67, %c0_68] : memref<2x32xf32, #tpu.memory_space<vmem>>, vector<2x32xf32>
    %138 = arith.truncf %137 : vector<2x32xf32> to vector<2x32xbf16>
    %139 = vector.shape_cast %138 : vector<2x32xbf16> to vector<2x1x32xbf16>
    "tpu.trace_start"() <{level = 10 : i32, message = "bqd,bkd->bqk"}> : () -> ()
    %cst_69 = arith.constant dense<0.000000e+00> : vector<2x1x16xf32>
    %140 = tpu.matmul %139, %136, %cst_69 {dimension_numbers = #tpu.dot_dimension_numbers<[2], [2], [1], [1], [0, 0, 0, 1, 1, 1], [0], [0]>} : vector<2x1x32xbf16>, vector<2x16x32xbf16>, vector<2x1x16xf32> -> vector<2x1x16xf32>
    "tpu.trace_stop"() : () -> ()
    %141 = vector.shape_cast %140 : vector<2x1x16xf32> to vector<2x16xf32>
    %c0_70 = arith.constant 0 : index
    %c0_71 = arith.constant 0 : index
    %142 = vector.load %arg2[%c0_70, %c0_71] : memref<2x16xf32, #tpu.memory_space<vmem>>, vector<2x16xf32>
    %cst_72 = arith.constant 5.000000e-01 : f32
    %143 = vector.broadcast %cst_72 : f32 to vector<2x16xf32>
    %144 = arith.cmpf ogt, %142, %143 : vector<2x16xf32>
    %cst_73 = arith.constant -1.000000e+09 : f32
    %145 = vector.broadcast %cst_73 : f32 to vector<2x16xf32>
    %146 = arith.select %144, %141, %145 : vector<2x16xi1>, vector<2x16xf32>
    %cst_74 = arith.constant dense<0xFF800000> : vector<2xf32>
    %147 = vector.multi_reduction <maximumf>, %146, %cst_74 [1] : vector<2x16xf32> to vector<2xf32>
    %cst_75 = arith.constant 0xFF800000 : f32
    %148 = vector.broadcast %cst_75 : f32 to vector<2xf32>
    %149 = arith.maximumf %148, %147 : vector<2xf32>
    %150 = vector.shape_cast %149 : vector<2xf32> to vector<2x1xf32>
    %151 = vector.broadcast %150 : vector<2x1xf32> to vector<2x16xf32>
    %152 = arith.subf %146, %151 : vector<2x16xf32>
    %153 = math.exp %152 : vector<2x16xf32>
    %cst_76 = arith.constant dense<0.000000e+00> : vector<2xf32>
    %154 = vector.multi_reduction <add>, %153, %cst_76 [1] : vector<2x16xf32> to vector<2xf32>
    %155 = vector.shape_cast %154 : vector<2xf32> to vector<2x1xf32>
    %156 = vector.broadcast %155 : vector<2x1xf32> to vector<2x16xf32>
    %157 = arith.divf %153, %156 : vector<2x16xf32>
    %158 = vector.shape_cast %129 : vector<32x32xf32> to vector<2x16x32xf32>
    %159 = arith.truncf %158 : vector<2x16x32xf32> to vector<2x16x32xbf16>
    %160 = arith.truncf %157 : vector<2x16xf32> to vector<2x16xbf16>
    %161 = vector.shape_cast %160 : vector<2x16xbf16> to vector<2x1x16xbf16>
    "tpu.trace_start"() <{level = 10 : i32, message = "bqk,bkd->bqd"}> : () -> ()
    %cst_77 = arith.constant dense<0.000000e+00> : vector<2x1x32xf32>
    %162 = tpu.matmul %161, %159, %cst_77 {dimension_numbers = #tpu.dot_dimension_numbers<[2], [1], [1], [2], [0, 0, 0, 1, 1, 2], [0], [0]>} : vector<2x1x16xbf16>, vector<2x16x32xbf16>, vector<2x1x32xf32> -> vector<2x1x32xf32>
    "tpu.trace_stop"() : () -> ()
    %163 = vector.shape_cast %162 : vector<2x1x32xf32> to vector<2x32xf32>
    %c0_78 = arith.constant 0 : index
    %c0_79 = arith.constant 0 : index
    %164 = vector.load %arg22[%c0_78, %c0_79] : memref<2x32xf32, #tpu.memory_space<vmem>>, vector<2x32xf32>
    tpu.vector_store %arg22[%c0_78, %c0_79], %163 {strides = array<i32>} : memref<2x32xf32, #tpu.memory_space<vmem>>, vector<2x32xf32>,
    %c0_80 = arith.constant 0 : index
    %c0_81 = arith.constant 0 : index
    %165 = vector.load %arg23[%c0_80, %c0_81] : memref<2x16xf32, #tpu.memory_space<vmem>>, vector<2x16xf32>
    tpu.vector_store %arg23[%c0_80, %c0_81], %157 {strides = array<i32>} : memref<2x16xf32, #tpu.memory_space<vmem>>, vector<2x16xf32>,
    return
  }
}

module attributes {stable_mosaic.version = 11 : i64} {
  func.func @encoder_kernel(%arg0: memref<8x16x32xf32, #tpu.memory_space<vmem>>, %arg1: memref<8x16xf32, #tpu.memory_space<vmem>>, %arg2: memref<32x32xbf16, #tpu.memory_space<vmem>>, %arg3: memref<1x32xf32, #tpu.memory_space<vmem>>, %arg4: memref<32x32xbf16, #tpu.memory_space<vmem>>, %arg5: memref<1x32xf32, #tpu.memory_space<vmem>>, %arg6: memref<32x32xbf16, #tpu.memory_space<vmem>>, %arg7: memref<1x32xf32, #tpu.memory_space<vmem>>, %arg8: memref<32x32xbf16, #tpu.memory_space<vmem>>, %arg9: memref<1x32xf32, #tpu.memory_space<vmem>>, %arg10: memref<1x32xf32, #tpu.memory_space<vmem>>, %arg11: memref<1x32xf32, #tpu.memory_space<vmem>>, %arg12: memref<32x64xbf16, #tpu.memory_space<vmem>>, %arg13: memref<1x64xf32, #tpu.memory_space<vmem>>, %arg14: memref<64x32xbf16, #tpu.memory_space<vmem>>, %arg15: memref<1x32xf32, #tpu.memory_space<vmem>>, %arg16: memref<1x32xf32, #tpu.memory_space<vmem>>, %arg17: memref<1x32xf32, #tpu.memory_space<vmem>>, %arg18: memref<8x16x32xf32, #tpu.memory_space<vmem>>) attributes {dimension_semantics = [], scalar_prefetch = 0 : i64, scratch_operands = 0 : i64, tpu.core_type = #tpu.core_type<tc>} {
    %c0 = arith.constant 0 : index
    %c0_0 = arith.constant 0 : index
    %0 = vector.load %arg2[%c0, %c0_0] : memref<32x32xbf16, #tpu.memory_space<vmem>>, vector<32x32xbf16>
    %c0_1 = arith.constant 0 : index
    %c0_2 = arith.constant 0 : index
    %1 = vector.load %arg3[%c0_1, %c0_2] : memref<1x32xf32, #tpu.memory_space<vmem>>, vector<1x32xf32>
    %c0_3 = arith.constant 0 : index
    %c0_4 = arith.constant 0 : index
    %2 = vector.load %arg4[%c0_3, %c0_4] : memref<32x32xbf16, #tpu.memory_space<vmem>>, vector<32x32xbf16>
    %c0_5 = arith.constant 0 : index
    %c0_6 = arith.constant 0 : index
    %3 = vector.load %arg5[%c0_5, %c0_6] : memref<1x32xf32, #tpu.memory_space<vmem>>, vector<1x32xf32>
    %c0_7 = arith.constant 0 : index
    %c0_8 = arith.constant 0 : index
    %4 = vector.load %arg6[%c0_7, %c0_8] : memref<32x32xbf16, #tpu.memory_space<vmem>>, vector<32x32xbf16>
    %c0_9 = arith.constant 0 : index
    %c0_10 = arith.constant 0 : index
    %5 = vector.load %arg7[%c0_9, %c0_10] : memref<1x32xf32, #tpu.memory_space<vmem>>, vector<1x32xf32>
    %c0_11 = arith.constant 0 : index
    %c0_12 = arith.constant 0 : index
    %6 = vector.load %arg8[%c0_11, %c0_12] : memref<32x32xbf16, #tpu.memory_space<vmem>>, vector<32x32xbf16>
    %c0_13 = arith.constant 0 : index
    %c0_14 = arith.constant 0 : index
    %7 = vector.load %arg9[%c0_13, %c0_14] : memref<1x32xf32, #tpu.memory_space<vmem>>, vector<1x32xf32>
    %c0_15 = arith.constant 0 : index
    %c0_16 = arith.constant 0 : index
    %8 = vector.load %arg10[%c0_15, %c0_16] : memref<1x32xf32, #tpu.memory_space<vmem>>, vector<1x32xf32>
    %c0_17 = arith.constant 0 : index
    %c0_18 = arith.constant 0 : index
    %9 = vector.load %arg11[%c0_17, %c0_18] : memref<1x32xf32, #tpu.memory_space<vmem>>, vector<1x32xf32>
    %c0_19 = arith.constant 0 : index
    %c0_20 = arith.constant 0 : index
    %10 = vector.load %arg12[%c0_19, %c0_20] : memref<32x64xbf16, #tpu.memory_space<vmem>>, vector<32x64xbf16>
    %c0_21 = arith.constant 0 : index
    %c0_22 = arith.constant 0 : index
    %11 = vector.load %arg13[%c0_21, %c0_22] : memref<1x64xf32, #tpu.memory_space<vmem>>, vector<1x64xf32>
    %c0_23 = arith.constant 0 : index
    %c0_24 = arith.constant 0 : index
    %12 = vector.load %arg14[%c0_23, %c0_24] : memref<64x32xbf16, #tpu.memory_space<vmem>>, vector<64x32xbf16>
    %c0_25 = arith.constant 0 : index
    %c0_26 = arith.constant 0 : index
    %13 = vector.load %arg15[%c0_25, %c0_26] : memref<1x32xf32, #tpu.memory_space<vmem>>, vector<1x32xf32>
    %c0_27 = arith.constant 0 : index
    %c0_28 = arith.constant 0 : index
    %14 = vector.load %arg16[%c0_27, %c0_28] : memref<1x32xf32, #tpu.memory_space<vmem>>, vector<1x32xf32>
    %c0_29 = arith.constant 0 : index
    %c0_30 = arith.constant 0 : index
    %15 = vector.load %arg17[%c0_29, %c0_30] : memref<1x32xf32, #tpu.memory_space<vmem>>, vector<1x32xf32>
    %c0_31 = arith.constant 0 : index
    %c0_32 = arith.constant 0 : index
    %c0_33 = arith.constant 0 : index
    %16 = vector.load %arg0[%c0_31, %c0_32, %c0_33] : memref<8x16x32xf32, #tpu.memory_space<vmem>>, vector<8x16x32xf32>
    %c0_34 = arith.constant 0 : index
    %c0_35 = arith.constant 0 : index
    %17 = vector.load %arg1[%c0_34, %c0_35] : memref<8x16xf32, #tpu.memory_space<vmem>>, vector<8x16xf32>
    %18 = vector.shape_cast %16 : vector<8x16x32xf32> to vector<128x32xf32>
    %19 = arith.truncf %18 : vector<128x32xf32> to vector<128x32xbf16>
    %cst = arith.constant dense<0.000000e+00> : vector<128x32xf32>
    %20 = tpu.matmul %19, %0, %cst {dimension_numbers = #tpu.dot_dimension_numbers<[1], [0], [0], [1], [0, 0, 1, 1], [], []>} : vector<128x32xbf16>, vector<32x32xbf16>, vector<128x32xf32> -> vector<128x32xf32>
    %21 = vector.broadcast %1 : vector<1x32xf32> to vector<128x32xf32>
    %22 = arith.addf %20, %21 : vector<128x32xf32>
    %cst_36 = arith.constant dense<0.000000e+00> : vector<128x32xf32>
    %23 = tpu.matmul %19, %2, %cst_36 {dimension_numbers = #tpu.dot_dimension_numbers<[1], [0], [0], [1], [0, 0, 1, 1], [], []>} : vector<128x32xbf16>, vector<32x32xbf16>, vector<128x32xf32> -> vector<128x32xf32>
    %24 = vector.broadcast %3 : vector<1x32xf32> to vector<128x32xf32>
    %25 = arith.addf %23, %24 : vector<128x32xf32>
    %cst_37 = arith.constant dense<0.000000e+00> : vector<128x32xf32>
    %26 = tpu.matmul %19, %4, %cst_37 {dimension_numbers = #tpu.dot_dimension_numbers<[1], [0], [0], [1], [0, 0, 1, 1], [], []>} : vector<128x32xbf16>, vector<32x32xbf16>, vector<128x32xf32> -> vector<128x32xf32>
    %27 = vector.broadcast %5 : vector<1x32xf32> to vector<128x32xf32>
    %28 = arith.addf %26, %27 : vector<128x32xf32>
    %29 = vector.shape_cast %22 : vector<128x32xf32> to vector<8x16x32xf32>
    %30 = arith.truncf %29 : vector<8x16x32xf32> to vector<8x16x32xbf16>
    %31 = vector.shape_cast %25 : vector<128x32xf32> to vector<8x16x32xf32>
    %32 = arith.truncf %31 : vector<8x16x32xf32> to vector<8x16x32xbf16>
    %33 = vector.shape_cast %28 : vector<128x32xf32> to vector<8x16x32xf32>
    %34 = arith.truncf %33 : vector<8x16x32xf32> to vector<8x16x32xbf16>
    "tpu.trace_start"() <{level = 10 : i32, message = "bqd,bkd->bqk"}> : () -> ()
    %cst_38 = arith.constant dense<0.000000e+00> : vector<8x16x16xf32>
    %35 = tpu.matmul %30, %32, %cst_38 {dimension_numbers = #tpu.dot_dimension_numbers<[2], [2], [1], [1], [0, 0, 0, 1, 1, 1], [0], [0]>} : vector<8x16x32xbf16>, vector<8x16x32xbf16>, vector<8x16x16xf32> -> vector<8x16x16xf32>
    "tpu.trace_stop"() : () -> ()
    %36 = vector.shape_cast %17 : vector<8x16xf32> to vector<8x1x16xf32>
    %cst_39 = arith.constant 5.000000e-01 : f32
    %37 = vector.broadcast %cst_39 : f32 to vector<8x1x16xf32>
    %38 = arith.cmpf ogt, %36, %37 : vector<8x1x16xf32>
    %cst_40 = arith.constant -1.000000e+09 : f32
    %39 = vector.shape_cast %38 : vector<8x1x16xi1> to vector<8x1x16xi1>
    %40 = vector.broadcast %39 : vector<8x1x16xi1> to vector<8x16x16xi1>
    %41 = vector.broadcast %cst_40 : f32 to vector<8x16x16xf32>
    %42 = arith.select %40, %35, %41 : vector<8x16x16xi1>, vector<8x16x16xf32>
    %cst_41 = arith.constant dense<0xFF800000> : vector<8x16xf32>
    %43 = vector.multi_reduction <maximumf>, %42, %cst_41 [2] : vector<8x16x16xf32> to vector<8x16xf32>
    %cst_42 = arith.constant 0xFF800000 : f32
    %44 = vector.broadcast %cst_42 : f32 to vector<8x16xf32>
    %45 = arith.maximumf %44, %43 : vector<8x16xf32>
    %46 = vector.shape_cast %45 : vector<8x16xf32> to vector<8x16x1xf32>
    %47 = vector.broadcast %46 : vector<8x16x1xf32> to vector<8x16x16xf32>
    %48 = arith.subf %42, %47 : vector<8x16x16xf32>
    %49 = math.exp %48 : vector<8x16x16xf32>
    %cst_43 = arith.constant dense<0.000000e+00> : vector<8x16xf32>
    %50 = vector.multi_reduction <add>, %49, %cst_43 [2] : vector<8x16x16xf32> to vector<8x16xf32>
    %51 = vector.shape_cast %50 : vector<8x16xf32> to vector<8x16x1xf32>
    %52 = vector.broadcast %51 : vector<8x16x1xf32> to vector<8x16x16xf32>
    %53 = arith.divf %49, %52 : vector<8x16x16xf32>
    %54 = arith.truncf %53 : vector<8x16x16xf32> to vector<8x16x16xbf16>
    "tpu.trace_start"() <{level = 10 : i32, message = "bqk,bkd->bqd"}> : () -> ()
    %cst_44 = arith.constant dense<0.000000e+00> : vector<8x16x32xf32>
    %55 = tpu.matmul %54, %34, %cst_44 {dimension_numbers = #tpu.dot_dimension_numbers<[2], [1], [1], [2], [0, 0, 0, 1, 1, 2], [0], [0]>} : vector<8x16x16xbf16>, vector<8x16x32xbf16>, vector<8x16x32xf32> -> vector<8x16x32xf32>
    "tpu.trace_stop"() : () -> ()
    %56 = vector.shape_cast %55 : vector<8x16x32xf32> to vector<128x32xf32>
    %57 = arith.truncf %56 : vector<128x32xf32> to vector<128x32xbf16>
    %cst_45 = arith.constant dense<0.000000e+00> : vector<128x32xf32>
    %58 = tpu.matmul %57, %6, %cst_45 {dimension_numbers = #tpu.dot_dimension_numbers<[1], [0], [0], [1], [0, 0, 1, 1], [], []>} : vector<128x32xbf16>, vector<32x32xbf16>, vector<128x32xf32> -> vector<128x32xf32>
    %59 = vector.broadcast %7 : vector<1x32xf32> to vector<128x32xf32>
    %60 = arith.addf %58, %59 : vector<128x32xf32>
    %61 = arith.addf %18, %60 : vector<128x32xf32>
    %cst_46 = arith.constant dense<0.000000e+00> : vector<128xf32>
    %62 = vector.multi_reduction <add>, %61, %cst_46 [1] : vector<128x32xf32> to vector<128xf32>
    %63 = vector.shape_cast %62 : vector<128xf32> to vector<128x1xf32>
    %cst_47 = arith.constant 3.200000e+01 : f32
    %64 = vector.broadcast %cst_47 : f32 to vector<128x1xf32>
    %65 = arith.divf %63, %64 : vector<128x1xf32>
    %66 = vector.broadcast %65 : vector<128x1xf32> to vector<128x32xf32>
    %67 = arith.subf %61, %66 : vector<128x32xf32>
    %68 = arith.mulf %67, %67 : vector<128x32xf32>
    %cst_48 = arith.constant dense<0.000000e+00> : vector<128xf32>
    %69 = vector.multi_reduction <add>, %68, %cst_48 [1] : vector<128x32xf32> to vector<128xf32>
    %70 = vector.shape_cast %69 : vector<128xf32> to vector<128x1xf32>
    %cst_49 = arith.constant 3.200000e+01 : f32
    %71 = vector.broadcast %cst_49 : f32 to vector<128x1xf32>
    %72 = arith.divf %70, %71 : vector<128x1xf32>
    %73 = vector.broadcast %65 : vector<128x1xf32> to vector<128x32xf32>
    %74 = arith.subf %61, %73 : vector<128x32xf32>
    %cst_50 = arith.constant 9.99999996E-13 : f32
    %75 = vector.broadcast %cst_50 : f32 to vector<128x1xf32>
    %76 = arith.addf %72, %75 : vector<128x1xf32>
    %77 = math.rsqrt %76 : vector<128x1xf32>
    %78 = vector.broadcast %77 : vector<128x1xf32> to vector<128x32xf32>
    %79 = arith.mulf %74, %78 : vector<128x32xf32>
    %80 = vector.broadcast %8 : vector<1x32xf32> to vector<128x32xf32>
    %81 = arith.mulf %79, %80 : vector<128x32xf32>
    %82 = vector.broadcast %9 : vector<1x32xf32> to vector<128x32xf32>
    %83 = arith.addf %81, %82 : vector<128x32xf32>
    %84 = arith.truncf %83 : vector<128x32xf32> to vector<128x32xbf16>
    %cst_51 = arith.constant dense<0.000000e+00> : vector<128x64xf32>
    %85 = tpu.matmul %84, %10, %cst_51 {dimension_numbers = #tpu.dot_dimension_numbers<[1], [0], [0], [1], [0, 0, 1, 1], [], []>} : vector<128x32xbf16>, vector<32x64xbf16>, vector<128x64xf32> -> vector<128x64xf32>
    %86 = vector.broadcast %11 : vector<1x64xf32> to vector<128x64xf32>
    %87 = arith.addf %85, %86 : vector<128x64xf32>
    %88 = arith.mulf %87, %87 : vector<128x64xf32>
    %89 = arith.mulf %87, %88 : vector<128x64xf32>
    %cst_52 = arith.constant 4.471500e-02 : f32
    %90 = vector.broadcast %cst_52 : f32 to vector<128x64xf32>
    %91 = arith.mulf %90, %89 : vector<128x64xf32>
    %92 = arith.addf %87, %91 : vector<128x64xf32>
    %cst_53 = arith.constant 0.797884583 : f32
    %93 = vector.broadcast %cst_53 : f32 to vector<128x64xf32>
    %94 = arith.mulf %93, %92 : vector<128x64xf32>
    %95 = math.tanh %94 : vector<128x64xf32>
    %cst_54 = arith.constant 1.000000e+00 : f32
    %96 = vector.broadcast %cst_54 : f32 to vector<128x64xf32>
    %97 = arith.addf %96, %95 : vector<128x64xf32>
    %cst_55 = arith.constant 5.000000e-01 : f32
    %98 = vector.broadcast %cst_55 : f32 to vector<128x64xf32>
    %99 = arith.mulf %98, %97 : vector<128x64xf32>
    %100 = arith.mulf %87, %99 : vector<128x64xf32>
    %101 = arith.truncf %100 : vector<128x64xf32> to vector<128x64xbf16>
    %cst_56 = arith.constant dense<0.000000e+00> : vector<128x32xf32>
    %102 = tpu.matmul %101, %12, %cst_56 {dimension_numbers = #tpu.dot_dimension_numbers<[1], [0], [0], [1], [0, 0, 1, 1], [], []>} : vector<128x64xbf16>, vector<64x32xbf16>, vector<128x32xf32> -> vector<128x32xf32>
    %103 = vector.broadcast %13 : vector<1x32xf32> to vector<128x32xf32>
    %104 = arith.addf %102, %103 : vector<128x32xf32>
    %105 = arith.addf %83, %104 : vector<128x32xf32>
    %cst_57 = arith.constant dense<0.000000e+00> : vector<128xf32>
    %106 = vector.multi_reduction <add>, %105, %cst_57 [1] : vector<128x32xf32> to vector<128xf32>
    %107 = vector.shape_cast %106 : vector<128xf32> to vector<128x1xf32>
    %cst_58 = arith.constant 3.200000e+01 : f32
    %108 = vector.broadcast %cst_58 : f32 to vector<128x1xf32>
    %109 = arith.divf %107, %108 : vector<128x1xf32>
    %110 = vector.broadcast %109 : vector<128x1xf32> to vector<128x32xf32>
    %111 = arith.subf %105, %110 : vector<128x32xf32>
    %112 = arith.mulf %111, %111 : vector<128x32xf32>
    %cst_59 = arith.constant dense<0.000000e+00> : vector<128xf32>
    %113 = vector.multi_reduction <add>, %112, %cst_59 [1] : vector<128x32xf32> to vector<128xf32>
    %114 = vector.shape_cast %113 : vector<128xf32> to vector<128x1xf32>
    %cst_60 = arith.constant 3.200000e+01 : f32
    %115 = vector.broadcast %cst_60 : f32 to vector<128x1xf32>
    %116 = arith.divf %114, %115 : vector<128x1xf32>
    %117 = vector.broadcast %109 : vector<128x1xf32> to vector<128x32xf32>
    %118 = arith.subf %105, %117 : vector<128x32xf32>
    %cst_61 = arith.constant 9.99999996E-13 : f32
    %119 = vector.broadcast %cst_61 : f32 to vector<128x1xf32>
    %120 = arith.addf %116, %119 : vector<128x1xf32>
    %121 = math.rsqrt %120 : vector<128x1xf32>
    %122 = vector.broadcast %121 : vector<128x1xf32> to vector<128x32xf32>
    %123 = arith.mulf %118, %122 : vector<128x32xf32>
    %124 = vector.broadcast %14 : vector<1x32xf32> to vector<128x32xf32>
    %125 = arith.mulf %123, %124 : vector<128x32xf32>
    %126 = vector.broadcast %15 : vector<1x32xf32> to vector<128x32xf32>
    %127 = arith.addf %125, %126 : vector<128x32xf32>
    %128 = vector.shape_cast %127 : vector<128x32xf32> to vector<8x16x32xf32>
    %c0_62 = arith.constant 0 : index
    %c0_63 = arith.constant 0 : index
    %c0_64 = arith.constant 0 : index
    %129 = vector.load %arg18[%c0_62, %c0_63, %c0_64] : memref<8x16x32xf32, #tpu.memory_space<vmem>>, vector<8x16x32xf32>
    tpu.vector_store %arg18[%c0_62, %c0_63, %c0_64], %128 {strides = array<i32>} : memref<8x16x32xf32, #tpu.memory_space<vmem>>, vector<8x16x32xf32>,
    return
  }
}

module attributes {stable_mosaic.version = 11 : i64} {
  func.func @graph_distill_pool_kernel(%arg0: memref<8x32xf32, #tpu.memory_space<vmem>>, %arg1: memref<8x8xbf16, #tpu.memory_space<vmem>>, %arg2: memref<2x64x32xbf16, #tpu.memory_space<vmem>>, %arg3: memref<2x1x32xf32, #tpu.memory_space<vmem>>, %arg4: memref<8x4xf32, #tpu.memory_space<vmem>>, %arg5: memref<4x64xf32, #tpu.memory_space<vmem>>) attributes {dimension_semantics = [], scalar_prefetch = 0 : i64, scratch_operands = 0 : i64, tpu.core_type = #tpu.core_type<tc>} {
    %c0 = arith.constant 0 : index
    %c0_0 = arith.constant 0 : index
    %0 = vector.load %arg0[%c0, %c0_0] : memref<8x32xf32, #tpu.memory_space<vmem>>, vector<8x32xf32>
    %c0_1 = arith.constant 0 : index
    %c0_2 = arith.constant 0 : index
    %1 = vector.load %arg1[%c0_1, %c0_2] : memref<8x8xbf16, #tpu.memory_space<vmem>>, vector<8x8xbf16>
    %2 = arith.truncf %0 : vector<8x32xf32> to vector<8x32xbf16>
    %cst = arith.constant dense<0.000000e+00> : vector<8x32xf32>
    %3 = tpu.matmul %1, %2, %cst {dimension_numbers = #tpu.dot_dimension_numbers<[1], [0], [0], [1], [0, 0, 1, 1], [], []>} : vector<8x8xbf16>, vector<8x32xbf16>, vector<8x32xf32> -> vector<8x32xf32>
    %4 = arith.subf %0, %3 : vector<8x32xf32>
    %5 = tpu.concatenate %0, %4 in 1 : vector<8x32xf32>, vector<8x32xf32> -> vector<8x64xf32>
    %6 = arith.truncf %5 : vector<8x64xf32> to vector<8x64xbf16>
    %c0_3 = arith.constant 0 : index
    %c0_4 = arith.constant 0 : index
    %c0_5 = arith.constant 0 : index
    %7 = vector.load %arg2[%c0_3, %c0_4, %c0_5] : memref<2x64x32xbf16, #tpu.memory_space<vmem>>, vector<1x64x32xbf16>
    %8 = vector.shape_cast %7 : vector<1x64x32xbf16> to vector<64x32xbf16>
    %cst_6 = arith.constant dense<0.000000e+00> : vector<8x32xf32>
    %9 = tpu.matmul %6, %8, %cst_6 {dimension_numbers = #tpu.dot_dimension_numbers<[1], [0], [0], [1], [0, 0, 1, 1], [], []>} : vector<8x64xbf16>, vector<64x32xbf16>, vector<8x32xf32> -> vector<8x32xf32>
    %c0_7 = arith.constant 0 : index
    %c0_8 = arith.constant 0 : index
    %c0_9 = arith.constant 0 : index
    %10 = vector.load %arg3[%c0_7, %c0_8, %c0_9] : memref<2x1x32xf32, #tpu.memory_space<vmem>>, vector<1x1x32xf32>
    %11 = vector.shape_cast %10 : vector<1x1x32xf32> to vector<1x32xf32>
    %12 = vector.broadcast %11 : vector<1x32xf32> to vector<8x32xf32>
    %13 = arith.addf %9, %12 : vector<8x32xf32>
    %cst_10 = arith.constant 0.000000e+00 : f32
    %14 = vector.broadcast %cst_10 : f32 to vector<8x32xf32>
    %15 = arith.maximumf %13, %14 : vector<8x32xf32>
    %16 = arith.truncf %15 : vector<8x32xf32> to vector<8x32xbf16>
    %cst_11 = arith.constant dense<0.000000e+00> : vector<8x32xf32>
    %17 = tpu.matmul %1, %16, %cst_11 {dimension_numbers = #tpu.dot_dimension_numbers<[1], [0], [0], [1], [0, 0, 1, 1], [], []>} : vector<8x8xbf16>, vector<8x32xbf16>, vector<8x32xf32> -> vector<8x32xf32>
    %18 = arith.subf %15, %17 : vector<8x32xf32>
    %19 = tpu.concatenate %15, %18 in 1 : vector<8x32xf32>, vector<8x32xf32> -> vector<8x64xf32>
    %20 = arith.truncf %19 : vector<8x64xf32> to vector<8x64xbf16>
    %c1 = arith.constant 1 : index
    %c0_12 = arith.constant 0 : index
    %c0_13 = arith.constant 0 : index
    %21 = vector.load %arg2[%c1, %c0_12, %c0_13] : memref<2x64x32xbf16, #tpu.memory_space<vmem>>, vector<1x64x32xbf16>
    %22 = vector.shape_cast %21 : vector<1x64x32xbf16> to vector<64x32xbf16>
    %cst_14 = arith.constant dense<0.000000e+00> : vector<8x32xf32>
    %23 = tpu.matmul %20, %22, %cst_14 {dimension_numbers = #tpu.dot_dimension_numbers<[1], [0], [0], [1], [0, 0, 1, 1], [], []>} : vector<8x64xbf16>, vector<64x32xbf16>, vector<8x32xf32> -> vector<8x32xf32>
    %c1_15 = arith.constant 1 : index
    %c0_16 = arith.constant 0 : index
    %c0_17 = arith.constant 0 : index
    %24 = vector.load %arg3[%c1_15, %c0_16, %c0_17] : memref<2x1x32xf32, #tpu.memory_space<vmem>>, vector<1x1x32xf32>
    %25 = vector.shape_cast %24 : vector<1x1x32xf32> to vector<1x32xf32>
    %26 = vector.broadcast %25 : vector<1x32xf32> to vector<8x32xf32>
    %27 = arith.addf %23, %26 : vector<8x32xf32>
    %cst_18 = arith.constant 0.000000e+00 : f32
    %28 = vector.broadcast %cst_18 : f32 to vector<8x32xf32>
    %29 = arith.maximumf %27, %28 : vector<8x32xf32>
    %c0_19 = arith.constant 0 : index
    %c0_20 = arith.constant 0 : index
    %30 = vector.load %arg4[%c0_19, %c0_20] : memref<8x4xf32, #tpu.memory_space<vmem>>, vector<8x4xf32>
    %31 = vector.extract_strided_slice %30 {offsets = [0, 0], sizes = [8, 1], strides = [1, 1]} : vector<8x4xf32> to vector<8x1xf32>
    %cst_21 = arith.constant 5.000000e-01 : f32
    %32 = vector.broadcast %cst_21 : f32 to vector<8x1xf32>
    %33 = arith.cmpf ogt, %31, %32 : vector<8x1xf32>
    %cst_22 = arith.constant 0.000000e+00 : f32
    %cst_23 = arith.constant 3.000000e+38 : f32
    %34 = arith.subf %cst_22, %cst_23 : f32
    %35 = vector.shape_cast %33 : vector<8x1xi1> to vector<8x1xi1>
    %36 = vector.broadcast %35 : vector<8x1xi1> to vector<8x32xi1>
    %37 = vector.broadcast %34 : f32 to vector<8x32xf32>
    %38 = arith.select %36, %29, %37 : vector<8x32xi1>, vector<8x32xf32>
    %cst_24 = arith.constant dense<0xFF800000> : vector<32xf32>
    %39 = vector.multi_reduction <maximumf>, %38, %cst_24 [0] : vector<8x32xf32> to vector<32xf32>
    %40 = vector.shape_cast %39 : vector<32xf32> to vector<1x32xf32>
    %cst_25 = arith.constant 3.000000e+38 : f32
    %41 = vector.shape_cast %33 : vector<8x1xi1> to vector<8x1xi1>
    %42 = vector.broadcast %41 : vector<8x1xi1> to vector<8x32xi1>
    %43 = vector.broadcast %cst_25 : f32 to vector<8x32xf32>
    %44 = arith.select %42, %29, %43 : vector<8x32xi1>, vector<8x32xf32>
    %cst_26 = arith.constant dense<0x7F800000> : vector<32xf32>
    %45 = vector.multi_reduction <minimumf>, %44, %cst_26 [0] : vector<8x32xf32> to vector<32xf32>
    %46 = vector.shape_cast %45 : vector<32xf32> to vector<1x32xf32>
    %47 = tpu.concatenate %40, %46 in 1 : vector<1x32xf32>, vector<1x32xf32> -> vector<1x64xf32>
    %48 = vector.extract_strided_slice %30 {offsets = [0, 1], sizes = [8, 1], strides = [1, 1]} : vector<8x4xf32> to vector<8x1xf32>
    %cst_27 = arith.constant 5.000000e-01 : f32
    %49 = vector.broadcast %cst_27 : f32 to vector<8x1xf32>
    %50 = arith.cmpf ogt, %48, %49 : vector<8x1xf32>
    %cst_28 = arith.constant 0.000000e+00 : f32
    %cst_29 = arith.constant 3.000000e+38 : f32
    %51 = arith.subf %cst_28, %cst_29 : f32
    %52 = vector.shape_cast %50 : vector<8x1xi1> to vector<8x1xi1>
    %53 = vector.broadcast %52 : vector<8x1xi1> to vector<8x32xi1>
    %54 = vector.broadcast %51 : f32 to vector<8x32xf32>
    %55 = arith.select %53, %29, %54 : vector<8x32xi1>, vector<8x32xf32>
    %cst_30 = arith.constant dense<0xFF800000> : vector<32xf32>
    %56 = vector.multi_reduction <maximumf>, %55, %cst_30 [0] : vector<8x32xf32> to vector<32xf32>
    %57 = vector.shape_cast %56 : vector<32xf32> to vector<1x32xf32>
    %cst_31 = arith.constant 3.000000e+38 : f32
    %58 = vector.shape_cast %50 : vector<8x1xi1> to vector<8x1xi1>
    %59 = vector.broadcast %58 : vector<8x1xi1> to vector<8x32xi1>
    %60 = vector.broadcast %cst_31 : f32 to vector<8x32xf32>
    %61 = arith.select %59, %29, %60 : vector<8x32xi1>, vector<8x32xf32>
    %cst_32 = arith.constant dense<0x7F800000> : vector<32xf32>
    %62 = vector.multi_reduction <minimumf>, %61, %cst_32 [0] : vector<8x32xf32> to vector<32xf32>
    %63 = vector.shape_cast %62 : vector<32xf32> to vector<1x32xf32>
    %64 = tpu.concatenate %57, %63 in 1 : vector<1x32xf32>, vector<1x32xf32> -> vector<1x64xf32>
    %65 = vector.extract_strided_slice %30 {offsets = [0, 2], sizes = [8, 1], strides = [1, 1]} : vector<8x4xf32> to vector<8x1xf32>
    %cst_33 = arith.constant 5.000000e-01 : f32
    %66 = vector.broadcast %cst_33 : f32 to vector<8x1xf32>
    %67 = arith.cmpf ogt, %65, %66 : vector<8x1xf32>
    %cst_34 = arith.constant 0.000000e+00 : f32
    %cst_35 = arith.constant 3.000000e+38 : f32
    %68 = arith.subf %cst_34, %cst_35 : f32
    %69 = vector.shape_cast %67 : vector<8x1xi1> to vector<8x1xi1>
    %70 = vector.broadcast %69 : vector<8x1xi1> to vector<8x32xi1>
    %71 = vector.broadcast %68 : f32 to vector<8x32xf32>
    %72 = arith.select %70, %29, %71 : vector<8x32xi1>, vector<8x32xf32>
    %cst_36 = arith.constant dense<0xFF800000> : vector<32xf32>
    %73 = vector.multi_reduction <maximumf>, %72, %cst_36 [0] : vector<8x32xf32> to vector<32xf32>
    %74 = vector.shape_cast %73 : vector<32xf32> to vector<1x32xf32>
    %cst_37 = arith.constant 3.000000e+38 : f32
    %75 = vector.shape_cast %67 : vector<8x1xi1> to vector<8x1xi1>
    %76 = vector.broadcast %75 : vector<8x1xi1> to vector<8x32xi1>
    %77 = vector.broadcast %cst_37 : f32 to vector<8x32xf32>
    %78 = arith.select %76, %29, %77 : vector<8x32xi1>, vector<8x32xf32>
    %cst_38 = arith.constant dense<0x7F800000> : vector<32xf32>
    %79 = vector.multi_reduction <minimumf>, %78, %cst_38 [0] : vector<8x32xf32> to vector<32xf32>
    %80 = vector.shape_cast %79 : vector<32xf32> to vector<1x32xf32>
    %81 = tpu.concatenate %74, %80 in 1 : vector<1x32xf32>, vector<1x32xf32> -> vector<1x64xf32>
    %82 = vector.extract_strided_slice %30 {offsets = [0, 3], sizes = [8, 1], strides = [1, 1]} : vector<8x4xf32> to vector<8x1xf32>
    %cst_39 = arith.constant 5.000000e-01 : f32
    %83 = vector.broadcast %cst_39 : f32 to vector<8x1xf32>
    %84 = arith.cmpf ogt, %82, %83 : vector<8x1xf32>
    %cst_40 = arith.constant 0.000000e+00 : f32
    %cst_41 = arith.constant 3.000000e+38 : f32
    %85 = arith.subf %cst_40, %cst_41 : f32
    %86 = vector.shape_cast %84 : vector<8x1xi1> to vector<8x1xi1>
    %87 = vector.broadcast %86 : vector<8x1xi1> to vector<8x32xi1>
    %88 = vector.broadcast %85 : f32 to vector<8x32xf32>
    %89 = arith.select %87, %29, %88 : vector<8x32xi1>, vector<8x32xf32>
    %cst_42 = arith.constant dense<0xFF800000> : vector<32xf32>
    %90 = vector.multi_reduction <maximumf>, %89, %cst_42 [0] : vector<8x32xf32> to vector<32xf32>
    %91 = vector.shape_cast %90 : vector<32xf32> to vector<1x32xf32>
    %cst_43 = arith.constant 3.000000e+38 : f32
    %92 = vector.shape_cast %84 : vector<8x1xi1> to vector<8x1xi1>
    %93 = vector.broadcast %92 : vector<8x1xi1> to vector<8x32xi1>
    %94 = vector.broadcast %cst_43 : f32 to vector<8x32xf32>
    %95 = arith.select %93, %29, %94 : vector<8x32xi1>, vector<8x32xf32>
    %cst_44 = arith.constant dense<0x7F800000> : vector<32xf32>
    %96 = vector.multi_reduction <minimumf>, %95, %cst_44 [0] : vector<8x32xf32> to vector<32xf32>
    %97 = vector.shape_cast %96 : vector<32xf32> to vector<1x32xf32>
    %98 = tpu.concatenate %91, %97 in 1 : vector<1x32xf32>, vector<1x32xf32> -> vector<1x64xf32>
    %99 = tpu.concatenate %47, %64, %81, %98 in 0 : vector<1x64xf32>, vector<1x64xf32>, vector<1x64xf32>, vector<1x64xf32> -> vector<4x64xf32>
    %c0_45 = arith.constant 0 : index
    %c0_46 = arith.constant 0 : index
    %100 = vector.load %arg5[%c0_45, %c0_46] : memref<4x64xf32, #tpu.memory_space<vmem>>, vector<4x64xf32>
    tpu.vector_store %arg5[%c0_45, %c0_46], %99 {strides = array<i32>} : memref<4x64xf32, #tpu.memory_space<vmem>>, vector<4x64xf32>,
    return
  }
}

module attributes {stable_mosaic.version = 11 : i64} {
  func.func @encode_pool_kernel(%arg0: memref<8x16x32xf32, #tpu.memory_space<vmem>>, %arg1: memref<8x16xf32, #tpu.memory_space<vmem>>, %arg2: memref<8x16xf32, #tpu.memory_space<vmem>>, %arg3: memref<8x32xf32, #tpu.memory_space<vmem>>, %arg4: memref<32x32xbf16, #tpu.memory_space<vmem>>, %arg5: memref<1x32xf32, #tpu.memory_space<vmem>>, %arg6: memref<32x32xbf16, #tpu.memory_space<vmem>>, %arg7: memref<1x32xf32, #tpu.memory_space<vmem>>, %arg8: memref<32x32xbf16, #tpu.memory_space<vmem>>, %arg9: memref<1x32xf32, #tpu.memory_space<vmem>>, %arg10: memref<32x32xbf16, #tpu.memory_space<vmem>>, %arg11: memref<1x32xf32, #tpu.memory_space<vmem>>, %arg12: memref<1x32xf32, #tpu.memory_space<vmem>>, %arg13: memref<1x32xf32, #tpu.memory_space<vmem>>, %arg14: memref<32x64xbf16, #tpu.memory_space<vmem>>, %arg15: memref<1x64xf32, #tpu.memory_space<vmem>>, %arg16: memref<64x32xbf16, #tpu.memory_space<vmem>>, %arg17: memref<1x32xf32, #tpu.memory_space<vmem>>, %arg18: memref<1x32xf32, #tpu.memory_space<vmem>>, %arg19: memref<1x32xf32, #tpu.memory_space<vmem>>, %arg20: memref<32x32xbf16, #tpu.memory_space<vmem>>, %arg21: memref<1x32xf32, #tpu.memory_space<vmem>>, %arg22: memref<8x32xf32, #tpu.memory_space<vmem>>, %arg23: memref<8x16xf32, #tpu.memory_space<vmem>>) attributes {dimension_semantics = [], scalar_prefetch = 0 : i64, scratch_operands = 0 : i64, tpu.core_type = #tpu.core_type<tc>} {
    %c0 = arith.constant 0 : index
    %c0_0 = arith.constant 0 : index
    %0 = vector.load %arg4[%c0, %c0_0] : memref<32x32xbf16, #tpu.memory_space<vmem>>, vector<32x32xbf16>
    %c0_1 = arith.constant 0 : index
    %c0_2 = arith.constant 0 : index
    %1 = vector.load %arg5[%c0_1, %c0_2] : memref<1x32xf32, #tpu.memory_space<vmem>>, vector<1x32xf32>
    %c0_3 = arith.constant 0 : index
    %c0_4 = arith.constant 0 : index
    %2 = vector.load %arg6[%c0_3, %c0_4] : memref<32x32xbf16, #tpu.memory_space<vmem>>, vector<32x32xbf16>
    %c0_5 = arith.constant 0 : index
    %c0_6 = arith.constant 0 : index
    %3 = vector.load %arg7[%c0_5, %c0_6] : memref<1x32xf32, #tpu.memory_space<vmem>>, vector<1x32xf32>
    %c0_7 = arith.constant 0 : index
    %c0_8 = arith.constant 0 : index
    %4 = vector.load %arg8[%c0_7, %c0_8] : memref<32x32xbf16, #tpu.memory_space<vmem>>, vector<32x32xbf16>
    %c0_9 = arith.constant 0 : index
    %c0_10 = arith.constant 0 : index
    %5 = vector.load %arg9[%c0_9, %c0_10] : memref<1x32xf32, #tpu.memory_space<vmem>>, vector<1x32xf32>
    %c0_11 = arith.constant 0 : index
    %c0_12 = arith.constant 0 : index
    %6 = vector.load %arg10[%c0_11, %c0_12] : memref<32x32xbf16, #tpu.memory_space<vmem>>, vector<32x32xbf16>
    %c0_13 = arith.constant 0 : index
    %c0_14 = arith.constant 0 : index
    %7 = vector.load %arg11[%c0_13, %c0_14] : memref<1x32xf32, #tpu.memory_space<vmem>>, vector<1x32xf32>
    %c0_15 = arith.constant 0 : index
    %c0_16 = arith.constant 0 : index
    %8 = vector.load %arg12[%c0_15, %c0_16] : memref<1x32xf32, #tpu.memory_space<vmem>>, vector<1x32xf32>
    %c0_17 = arith.constant 0 : index
    %c0_18 = arith.constant 0 : index
    %9 = vector.load %arg13[%c0_17, %c0_18] : memref<1x32xf32, #tpu.memory_space<vmem>>, vector<1x32xf32>
    %c0_19 = arith.constant 0 : index
    %c0_20 = arith.constant 0 : index
    %10 = vector.load %arg14[%c0_19, %c0_20] : memref<32x64xbf16, #tpu.memory_space<vmem>>, vector<32x64xbf16>
    %c0_21 = arith.constant 0 : index
    %c0_22 = arith.constant 0 : index
    %11 = vector.load %arg15[%c0_21, %c0_22] : memref<1x64xf32, #tpu.memory_space<vmem>>, vector<1x64xf32>
    %c0_23 = arith.constant 0 : index
    %c0_24 = arith.constant 0 : index
    %12 = vector.load %arg16[%c0_23, %c0_24] : memref<64x32xbf16, #tpu.memory_space<vmem>>, vector<64x32xbf16>
    %c0_25 = arith.constant 0 : index
    %c0_26 = arith.constant 0 : index
    %13 = vector.load %arg17[%c0_25, %c0_26] : memref<1x32xf32, #tpu.memory_space<vmem>>, vector<1x32xf32>
    %c0_27 = arith.constant 0 : index
    %c0_28 = arith.constant 0 : index
    %14 = vector.load %arg18[%c0_27, %c0_28] : memref<1x32xf32, #tpu.memory_space<vmem>>, vector<1x32xf32>
    %c0_29 = arith.constant 0 : index
    %c0_30 = arith.constant 0 : index
    %15 = vector.load %arg19[%c0_29, %c0_30] : memref<1x32xf32, #tpu.memory_space<vmem>>, vector<1x32xf32>
    %c0_31 = arith.constant 0 : index
    %c0_32 = arith.constant 0 : index
    %16 = vector.load %arg20[%c0_31, %c0_32] : memref<32x32xbf16, #tpu.memory_space<vmem>>, vector<32x32xbf16>
    %c0_33 = arith.constant 0 : index
    %c0_34 = arith.constant 0 : index
    %17 = vector.load %arg21[%c0_33, %c0_34] : memref<1x32xf32, #tpu.memory_space<vmem>>, vector<1x32xf32>
    %c0_35 = arith.constant 0 : index
    %c0_36 = arith.constant 0 : index
    %c0_37 = arith.constant 0 : index
    %18 = vector.load %arg0[%c0_35, %c0_36, %c0_37] : memref<8x16x32xf32, #tpu.memory_space<vmem>>, vector<8x16x32xf32>
    %c0_38 = arith.constant 0 : index
    %c0_39 = arith.constant 0 : index
    %19 = vector.load %arg1[%c0_38, %c0_39] : memref<8x16xf32, #tpu.memory_space<vmem>>, vector<8x16xf32>
    %20 = vector.shape_cast %18 : vector<8x16x32xf32> to vector<128x32xf32>
    %21 = arith.truncf %20 : vector<128x32xf32> to vector<128x32xbf16>
    %cst = arith.constant dense<0.000000e+00> : vector<128x32xf32>
    %22 = tpu.matmul %21, %0, %cst {dimension_numbers = #tpu.dot_dimension_numbers<[1], [0], [0], [1], [0, 0, 1, 1], [], []>} : vector<128x32xbf16>, vector<32x32xbf16>, vector<128x32xf32> -> vector<128x32xf32>
    %23 = vector.broadcast %1 : vector<1x32xf32> to vector<128x32xf32>
    %24 = arith.addf %22, %23 : vector<128x32xf32>
    %cst_40 = arith.constant dense<0.000000e+00> : vector<128x32xf32>
    %25 = tpu.matmul %21, %2, %cst_40 {dimension_numbers = #tpu.dot_dimension_numbers<[1], [0], [0], [1], [0, 0, 1, 1], [], []>} : vector<128x32xbf16>, vector<32x32xbf16>, vector<128x32xf32> -> vector<128x32xf32>
    %26 = vector.broadcast %3 : vector<1x32xf32> to vector<128x32xf32>
    %27 = arith.addf %25, %26 : vector<128x32xf32>
    %cst_41 = arith.constant dense<0.000000e+00> : vector<128x32xf32>
    %28 = tpu.matmul %21, %4, %cst_41 {dimension_numbers = #tpu.dot_dimension_numbers<[1], [0], [0], [1], [0, 0, 1, 1], [], []>} : vector<128x32xbf16>, vector<32x32xbf16>, vector<128x32xf32> -> vector<128x32xf32>
    %29 = vector.broadcast %5 : vector<1x32xf32> to vector<128x32xf32>
    %30 = arith.addf %28, %29 : vector<128x32xf32>
    %31 = vector.shape_cast %24 : vector<128x32xf32> to vector<8x16x32xf32>
    %32 = arith.truncf %31 : vector<8x16x32xf32> to vector<8x16x32xbf16>
    %33 = vector.shape_cast %27 : vector<128x32xf32> to vector<8x16x32xf32>
    %34 = arith.truncf %33 : vector<8x16x32xf32> to vector<8x16x32xbf16>
    %35 = vector.shape_cast %30 : vector<128x32xf32> to vector<8x16x32xf32>
    %36 = arith.truncf %35 : vector<8x16x32xf32> to vector<8x16x32xbf16>
    "tpu.trace_start"() <{level = 10 : i32, message = "bqd,bkd->bqk"}> : () -> ()
    %cst_42 = arith.constant dense<0.000000e+00> : vector<8x16x16xf32>
    %37 = tpu.matmul %32, %34, %cst_42 {dimension_numbers = #tpu.dot_dimension_numbers<[2], [2], [1], [1], [0, 0, 0, 1, 1, 1], [0], [0]>} : vector<8x16x32xbf16>, vector<8x16x32xbf16>, vector<8x16x16xf32> -> vector<8x16x16xf32>
    "tpu.trace_stop"() : () -> ()
    %38 = vector.shape_cast %19 : vector<8x16xf32> to vector<8x1x16xf32>
    %cst_43 = arith.constant 5.000000e-01 : f32
    %39 = vector.broadcast %cst_43 : f32 to vector<8x1x16xf32>
    %40 = arith.cmpf ogt, %38, %39 : vector<8x1x16xf32>
    %cst_44 = arith.constant -1.000000e+09 : f32
    %41 = vector.shape_cast %40 : vector<8x1x16xi1> to vector<8x1x16xi1>
    %42 = vector.broadcast %41 : vector<8x1x16xi1> to vector<8x16x16xi1>
    %43 = vector.broadcast %cst_44 : f32 to vector<8x16x16xf32>
    %44 = arith.select %42, %37, %43 : vector<8x16x16xi1>, vector<8x16x16xf32>
    %cst_45 = arith.constant dense<0xFF800000> : vector<8x16xf32>
    %45 = vector.multi_reduction <maximumf>, %44, %cst_45 [2] : vector<8x16x16xf32> to vector<8x16xf32>
    %cst_46 = arith.constant 0xFF800000 : f32
    %46 = vector.broadcast %cst_46 : f32 to vector<8x16xf32>
    %47 = arith.maximumf %46, %45 : vector<8x16xf32>
    %48 = vector.shape_cast %47 : vector<8x16xf32> to vector<8x16x1xf32>
    %49 = vector.broadcast %48 : vector<8x16x1xf32> to vector<8x16x16xf32>
    %50 = arith.subf %44, %49 : vector<8x16x16xf32>
    %51 = math.exp %50 : vector<8x16x16xf32>
    %cst_47 = arith.constant dense<0.000000e+00> : vector<8x16xf32>
    %52 = vector.multi_reduction <add>, %51, %cst_47 [2] : vector<8x16x16xf32> to vector<8x16xf32>
    %53 = vector.shape_cast %52 : vector<8x16xf32> to vector<8x16x1xf32>
    %54 = vector.broadcast %53 : vector<8x16x1xf32> to vector<8x16x16xf32>
    %55 = arith.divf %51, %54 : vector<8x16x16xf32>
    %56 = arith.truncf %55 : vector<8x16x16xf32> to vector<8x16x16xbf16>
    "tpu.trace_start"() <{level = 10 : i32, message = "bqk,bkd->bqd"}> : () -> ()
    %cst_48 = arith.constant dense<0.000000e+00> : vector<8x16x32xf32>
    %57 = tpu.matmul %56, %36, %cst_48 {dimension_numbers = #tpu.dot_dimension_numbers<[2], [1], [1], [2], [0, 0, 0, 1, 1, 2], [0], [0]>} : vector<8x16x16xbf16>, vector<8x16x32xbf16>, vector<8x16x32xf32> -> vector<8x16x32xf32>
    "tpu.trace_stop"() : () -> ()
    %58 = vector.shape_cast %57 : vector<8x16x32xf32> to vector<128x32xf32>
    %59 = arith.truncf %58 : vector<128x32xf32> to vector<128x32xbf16>
    %cst_49 = arith.constant dense<0.000000e+00> : vector<128x32xf32>
    %60 = tpu.matmul %59, %6, %cst_49 {dimension_numbers = #tpu.dot_dimension_numbers<[1], [0], [0], [1], [0, 0, 1, 1], [], []>} : vector<128x32xbf16>, vector<32x32xbf16>, vector<128x32xf32> -> vector<128x32xf32>
    %61 = vector.broadcast %7 : vector<1x32xf32> to vector<128x32xf32>
    %62 = arith.addf %60, %61 : vector<128x32xf32>
    %63 = arith.addf %20, %62 : vector<128x32xf32>
    %cst_50 = arith.constant dense<0.000000e+00> : vector<128xf32>
    %64 = vector.multi_reduction <add>, %63, %cst_50 [1] : vector<128x32xf32> to vector<128xf32>
    %65 = vector.shape_cast %64 : vector<128xf32> to vector<128x1xf32>
    %cst_51 = arith.constant 3.200000e+01 : f32
    %66 = vector.broadcast %cst_51 : f32 to vector<128x1xf32>
    %67 = arith.divf %65, %66 : vector<128x1xf32>
    %68 = vector.broadcast %67 : vector<128x1xf32> to vector<128x32xf32>
    %69 = arith.subf %63, %68 : vector<128x32xf32>
    %70 = arith.mulf %69, %69 : vector<128x32xf32>
    %cst_52 = arith.constant dense<0.000000e+00> : vector<128xf32>
    %71 = vector.multi_reduction <add>, %70, %cst_52 [1] : vector<128x32xf32> to vector<128xf32>
    %72 = vector.shape_cast %71 : vector<128xf32> to vector<128x1xf32>
    %cst_53 = arith.constant 3.200000e+01 : f32
    %73 = vector.broadcast %cst_53 : f32 to vector<128x1xf32>
    %74 = arith.divf %72, %73 : vector<128x1xf32>
    %75 = vector.broadcast %67 : vector<128x1xf32> to vector<128x32xf32>
    %76 = arith.subf %63, %75 : vector<128x32xf32>
    %cst_54 = arith.constant 9.99999996E-13 : f32
    %77 = vector.broadcast %cst_54 : f32 to vector<128x1xf32>
    %78 = arith.addf %74, %77 : vector<128x1xf32>
    %79 = math.rsqrt %78 : vector<128x1xf32>
    %80 = vector.broadcast %79 : vector<128x1xf32> to vector<128x32xf32>
    %81 = arith.mulf %76, %80 : vector<128x32xf32>
    %82 = vector.broadcast %8 : vector<1x32xf32> to vector<128x32xf32>
    %83 = arith.mulf %81, %82 : vector<128x32xf32>
    %84 = vector.broadcast %9 : vector<1x32xf32> to vector<128x32xf32>
    %85 = arith.addf %83, %84 : vector<128x32xf32>
    %86 = arith.truncf %85 : vector<128x32xf32> to vector<128x32xbf16>
    %cst_55 = arith.constant dense<0.000000e+00> : vector<128x64xf32>
    %87 = tpu.matmul %86, %10, %cst_55 {dimension_numbers = #tpu.dot_dimension_numbers<[1], [0], [0], [1], [0, 0, 1, 1], [], []>} : vector<128x32xbf16>, vector<32x64xbf16>, vector<128x64xf32> -> vector<128x64xf32>
    %88 = vector.broadcast %11 : vector<1x64xf32> to vector<128x64xf32>
    %89 = arith.addf %87, %88 : vector<128x64xf32>
    %90 = arith.mulf %89, %89 : vector<128x64xf32>
    %91 = arith.mulf %89, %90 : vector<128x64xf32>
    %cst_56 = arith.constant 4.471500e-02 : f32
    %92 = vector.broadcast %cst_56 : f32 to vector<128x64xf32>
    %93 = arith.mulf %92, %91 : vector<128x64xf32>
    %94 = arith.addf %89, %93 : vector<128x64xf32>
    %cst_57 = arith.constant 0.797884583 : f32
    %95 = vector.broadcast %cst_57 : f32 to vector<128x64xf32>
    %96 = arith.mulf %95, %94 : vector<128x64xf32>
    %97 = math.tanh %96 : vector<128x64xf32>
    %cst_58 = arith.constant 1.000000e+00 : f32
    %98 = vector.broadcast %cst_58 : f32 to vector<128x64xf32>
    %99 = arith.addf %98, %97 : vector<128x64xf32>
    %cst_59 = arith.constant 5.000000e-01 : f32
    %100 = vector.broadcast %cst_59 : f32 to vector<128x64xf32>
    %101 = arith.mulf %100, %99 : vector<128x64xf32>
    %102 = arith.mulf %89, %101 : vector<128x64xf32>
    %103 = arith.truncf %102 : vector<128x64xf32> to vector<128x64xbf16>
    %cst_60 = arith.constant dense<0.000000e+00> : vector<128x32xf32>
    %104 = tpu.matmul %103, %12, %cst_60 {dimension_numbers = #tpu.dot_dimension_numbers<[1], [0], [0], [1], [0, 0, 1, 1], [], []>} : vector<128x64xbf16>, vector<64x32xbf16>, vector<128x32xf32> -> vector<128x32xf32>
    %105 = vector.broadcast %13 : vector<1x32xf32> to vector<128x32xf32>
    %106 = arith.addf %104, %105 : vector<128x32xf32>
    %107 = arith.addf %85, %106 : vector<128x32xf32>
    %cst_61 = arith.constant dense<0.000000e+00> : vector<128xf32>
    %108 = vector.multi_reduction <add>, %107, %cst_61 [1] : vector<128x32xf32> to vector<128xf32>
    %109 = vector.shape_cast %108 : vector<128xf32> to vector<128x1xf32>
    %cst_62 = arith.constant 3.200000e+01 : f32
    %110 = vector.broadcast %cst_62 : f32 to vector<128x1xf32>
    %111 = arith.divf %109, %110 : vector<128x1xf32>
    %112 = vector.broadcast %111 : vector<128x1xf32> to vector<128x32xf32>
    %113 = arith.subf %107, %112 : vector<128x32xf32>
    %114 = arith.mulf %113, %113 : vector<128x32xf32>
    %cst_63 = arith.constant dense<0.000000e+00> : vector<128xf32>
    %115 = vector.multi_reduction <add>, %114, %cst_63 [1] : vector<128x32xf32> to vector<128xf32>
    %116 = vector.shape_cast %115 : vector<128xf32> to vector<128x1xf32>
    %cst_64 = arith.constant 3.200000e+01 : f32
    %117 = vector.broadcast %cst_64 : f32 to vector<128x1xf32>
    %118 = arith.divf %116, %117 : vector<128x1xf32>
    %119 = vector.broadcast %111 : vector<128x1xf32> to vector<128x32xf32>
    %120 = arith.subf %107, %119 : vector<128x32xf32>
    %cst_65 = arith.constant 9.99999996E-13 : f32
    %121 = vector.broadcast %cst_65 : f32 to vector<128x1xf32>
    %122 = arith.addf %118, %121 : vector<128x1xf32>
    %123 = math.rsqrt %122 : vector<128x1xf32>
    %124 = vector.broadcast %123 : vector<128x1xf32> to vector<128x32xf32>
    %125 = arith.mulf %120, %124 : vector<128x32xf32>
    %126 = vector.broadcast %14 : vector<1x32xf32> to vector<128x32xf32>
    %127 = arith.mulf %125, %126 : vector<128x32xf32>
    %128 = vector.broadcast %15 : vector<1x32xf32> to vector<128x32xf32>
    %129 = arith.addf %127, %128 : vector<128x32xf32>
    %130 = arith.truncf %129 : vector<128x32xf32> to vector<128x32xbf16>
    %cst_66 = arith.constant dense<0.000000e+00> : vector<128x32xf32>
    %131 = tpu.matmul %130, %16, %cst_66 {dimension_numbers = #tpu.dot_dimension_numbers<[1], [0], [0], [1], [0, 0, 1, 1], [], []>} : vector<128x32xbf16>, vector<32x32xbf16>, vector<128x32xf32> -> vector<128x32xf32>
    %132 = vector.broadcast %17 : vector<1x32xf32> to vector<128x32xf32>
    %133 = arith.addf %131, %132 : vector<128x32xf32>
    %134 = math.tanh %133 : vector<128x32xf32>
    %135 = vector.shape_cast %134 : vector<128x32xf32> to vector<8x16x32xf32>
    %136 = arith.truncf %135 : vector<8x16x32xf32> to vector<8x16x32xbf16>
    %c0_67 = arith.constant 0 : index
    %c0_68 = arith.constant 0 : index
    %137 = vector.load %arg3[%c0_67, %c0_68] : memref<8x32xf32, #tpu.memory_space<vmem>>, vector<8x32xf32>
    %138 = arith.truncf %137 : vector<8x32xf32> to vector<8x32xbf16>
    %139 = vector.shape_cast %138 : vector<8x32xbf16> to vector<8x1x32xbf16>
    "tpu.trace_start"() <{level = 10 : i32, message = "bqd,bkd->bqk"}> : () -> ()
    %cst_69 = arith.constant dense<0.000000e+00> : vector<8x1x16xf32>
    %140 = tpu.matmul %139, %136, %cst_69 {dimension_numbers = #tpu.dot_dimension_numbers<[2], [2], [1], [1], [0, 0, 0, 1, 1, 1], [0], [0]>} : vector<8x1x32xbf16>, vector<8x16x32xbf16>, vector<8x1x16xf32> -> vector<8x1x16xf32>
    "tpu.trace_stop"() : () -> ()
    %141 = vector.shape_cast %140 : vector<8x1x16xf32> to vector<8x16xf32>
    %c0_70 = arith.constant 0 : index
    %c0_71 = arith.constant 0 : index
    %142 = vector.load %arg2[%c0_70, %c0_71] : memref<8x16xf32, #tpu.memory_space<vmem>>, vector<8x16xf32>
    %cst_72 = arith.constant 5.000000e-01 : f32
    %143 = vector.broadcast %cst_72 : f32 to vector<8x16xf32>
    %144 = arith.cmpf ogt, %142, %143 : vector<8x16xf32>
    %cst_73 = arith.constant -1.000000e+09 : f32
    %145 = vector.broadcast %cst_73 : f32 to vector<8x16xf32>
    %146 = arith.select %144, %141, %145 : vector<8x16xi1>, vector<8x16xf32>
    %cst_74 = arith.constant dense<0xFF800000> : vector<8xf32>
    %147 = vector.multi_reduction <maximumf>, %146, %cst_74 [1] : vector<8x16xf32> to vector<8xf32>
    %cst_75 = arith.constant 0xFF800000 : f32
    %148 = vector.broadcast %cst_75 : f32 to vector<8xf32>
    %149 = arith.maximumf %148, %147 : vector<8xf32>
    %150 = vector.shape_cast %149 : vector<8xf32> to vector<8x1xf32>
    %151 = vector.broadcast %150 : vector<8x1xf32> to vector<8x16xf32>
    %152 = arith.subf %146, %151 : vector<8x16xf32>
    %153 = math.exp %152 : vector<8x16xf32>
    %cst_76 = arith.constant dense<0.000000e+00> : vector<8xf32>
    %154 = vector.multi_reduction <add>, %153, %cst_76 [1] : vector<8x16xf32> to vector<8xf32>
    %155 = vector.shape_cast %154 : vector<8xf32> to vector<8x1xf32>
    %156 = vector.broadcast %155 : vector<8x1xf32> to vector<8x16xf32>
    %157 = arith.divf %153, %156 : vector<8x16xf32>
    %158 = vector.shape_cast %129 : vector<128x32xf32> to vector<8x16x32xf32>
    %159 = arith.truncf %158 : vector<8x16x32xf32> to vector<8x16x32xbf16>
    %160 = arith.truncf %157 : vector<8x16xf32> to vector<8x16xbf16>
    %161 = vector.shape_cast %160 : vector<8x16xbf16> to vector<8x1x16xbf16>
    "tpu.trace_start"() <{level = 10 : i32, message = "bqk,bkd->bqd"}> : () -> ()
    %cst_77 = arith.constant dense<0.000000e+00> : vector<8x1x32xf32>
    %162 = tpu.matmul %161, %159, %cst_77 {dimension_numbers = #tpu.dot_dimension_numbers<[2], [1], [1], [2], [0, 0, 0, 1, 1, 2], [0], [0]>} : vector<8x1x16xbf16>, vector<8x16x32xbf16>, vector<8x1x32xf32> -> vector<8x1x32xf32>
    "tpu.trace_stop"() : () -> ()
    %163 = vector.shape_cast %162 : vector<8x1x32xf32> to vector<8x32xf32>
    %c0_78 = arith.constant 0 : index
    %c0_79 = arith.constant 0 : index
    %164 = vector.load %arg22[%c0_78, %c0_79] : memref<8x32xf32, #tpu.memory_space<vmem>>, vector<8x32xf32>
    tpu.vector_store %arg22[%c0_78, %c0_79], %163 {strides = array<i32>} : memref<8x32xf32, #tpu.memory_space<vmem>>, vector<8x32xf32>,
    %c0_80 = arith.constant 0 : index
    %c0_81 = arith.constant 0 : index
    %165 = vector.load %arg23[%c0_80, %c0_81] : memref<8x16xf32, #tpu.memory_space<vmem>>, vector<8x16xf32>
    tpu.vector_store %arg23[%c0_80, %c0_81], %157 {strides = array<i32>} : memref<8x16xf32, #tpu.memory_space<vmem>>, vector<8x16xf32>,
    return
  }
}

module attributes {stable_mosaic.version = 11 : i64} {
  func.func @group_context_kernel(%arg0: memref<2x32xf32, #tpu.memory_space<vmem>>, %arg1: memref<4x64xbf16, #tpu.memory_space<vmem>>, %arg2: memref<32x32xbf16, #tpu.memory_space<vmem>>, %arg3: memref<1x32xf32, #tpu.memory_space<vmem>>, %arg4: memref<32x4xbf16, #tpu.memory_space<vmem>>, %arg5: memref<1x4xf32, #tpu.memory_space<vmem>>, %arg6: memref<64x32xbf16, #tpu.memory_space<vmem>>, %arg7: memref<1x32xf32, #tpu.memory_space<vmem>>, %arg8: memref<2x4xf32, #tpu.memory_space<vmem>>, %arg9: memref<2x32xf32, #tpu.memory_space<vmem>>) attributes {dimension_semantics = [], scalar_prefetch = 0 : i64, scratch_operands = 0 : i64, tpu.core_type = #tpu.core_type<tc>} {
    %c0 = arith.constant 0 : index
    %c0_0 = arith.constant 0 : index
    %0 = vector.load %arg0[%c0, %c0_0] : memref<2x32xf32, #tpu.memory_space<vmem>>, vector<2x32xf32>
    %1 = arith.truncf %0 : vector<2x32xf32> to vector<2x32xbf16>
    %c0_1 = arith.constant 0 : index
    %c0_2 = arith.constant 0 : index
    %2 = vector.load %arg2[%c0_1, %c0_2] : memref<32x32xbf16, #tpu.memory_space<vmem>>, vector<32x32xbf16>
    %cst = arith.constant dense<0.000000e+00> : vector<2x32xf32>
    %3 = tpu.matmul %1, %2, %cst {dimension_numbers = #tpu.dot_dimension_numbers<[1], [0], [0], [1], [0, 0, 1, 1], [], []>} : vector<2x32xbf16>, vector<32x32xbf16>, vector<2x32xf32> -> vector<2x32xf32>
    %c0_3 = arith.constant 0 : index
    %c0_4 = arith.constant 0 : index
    %4 = vector.load %arg3[%c0_3, %c0_4] : memref<1x32xf32, #tpu.memory_space<vmem>>, vector<1x32xf32>
    %5 = vector.broadcast %4 : vector<1x32xf32> to vector<2x32xf32>
    %6 = arith.addf %3, %5 : vector<2x32xf32>
    %7 = arith.truncf %6 : vector<2x32xf32> to vector<2x32xbf16>
    %c0_5 = arith.constant 0 : index
    %c0_6 = arith.constant 0 : index
    %8 = vector.load %arg4[%c0_5, %c0_6] : memref<32x4xbf16, #tpu.memory_space<vmem>>, vector<32x4xbf16>
    %cst_7 = arith.constant dense<0.000000e+00> : vector<2x4xf32>
    %9 = tpu.matmul %7, %8, %cst_7 {dimension_numbers = #tpu.dot_dimension_numbers<[1], [0], [0], [1], [0, 0, 1, 1], [], []>} : vector<2x32xbf16>, vector<32x4xbf16>, vector<2x4xf32> -> vector<2x4xf32>
    %c0_8 = arith.constant 0 : index
    %c0_9 = arith.constant 0 : index
    %10 = vector.load %arg5[%c0_8, %c0_9] : memref<1x4xf32, #tpu.memory_space<vmem>>, vector<1x4xf32>
    %11 = vector.broadcast %10 : vector<1x4xf32> to vector<2x4xf32>
    %12 = arith.addf %9, %11 : vector<2x4xf32>
    %cst_10 = arith.constant dense<0xFF800000> : vector<2xf32>
    %13 = vector.multi_reduction <maximumf>, %12, %cst_10 [1] : vector<2x4xf32> to vector<2xf32>
    %cst_11 = arith.constant 0xFF800000 : f32
    %14 = vector.broadcast %cst_11 : f32 to vector<2xf32>
    %15 = arith.maximumf %14, %13 : vector<2xf32>
    %16 = vector.shape_cast %15 : vector<2xf32> to vector<2x1xf32>
    %17 = vector.broadcast %16 : vector<2x1xf32> to vector<2x4xf32>
    %18 = arith.subf %12, %17 : vector<2x4xf32>
    %19 = math.exp %18 : vector<2x4xf32>
    %cst_12 = arith.constant dense<0.000000e+00> : vector<2xf32>
    %20 = vector.multi_reduction <add>, %19, %cst_12 [1] : vector<2x4xf32> to vector<2xf32>
    %21 = vector.shape_cast %20 : vector<2xf32> to vector<2x1xf32>
    %22 = vector.broadcast %21 : vector<2x1xf32> to vector<2x4xf32>
    %23 = arith.divf %19, %22 : vector<2x4xf32>
    %24 = arith.truncf %23 : vector<2x4xf32> to vector<2x4xbf16>
    %c0_13 = arith.constant 0 : index
    %c0_14 = arith.constant 0 : index
    %25 = vector.load %arg1[%c0_13, %c0_14] : memref<4x64xbf16, #tpu.memory_space<vmem>>, vector<4x64xbf16>
    %cst_15 = arith.constant dense<0.000000e+00> : vector<2x64xf32>
    %26 = tpu.matmul %24, %25, %cst_15 {dimension_numbers = #tpu.dot_dimension_numbers<[1], [0], [0], [1], [0, 0, 1, 1], [], []>} : vector<2x4xbf16>, vector<4x64xbf16>, vector<2x64xf32> -> vector<2x64xf32>
    %27 = arith.truncf %26 : vector<2x64xf32> to vector<2x64xbf16>
    %c0_16 = arith.constant 0 : index
    %c0_17 = arith.constant 0 : index
    %28 = vector.load %arg6[%c0_16, %c0_17] : memref<64x32xbf16, #tpu.memory_space<vmem>>, vector<64x32xbf16>
    %cst_18 = arith.constant dense<0.000000e+00> : vector<2x32xf32>
    %29 = tpu.matmul %27, %28, %cst_18 {dimension_numbers = #tpu.dot_dimension_numbers<[1], [0], [0], [1], [0, 0, 1, 1], [], []>} : vector<2x64xbf16>, vector<64x32xbf16>, vector<2x32xf32> -> vector<2x32xf32>
    %c0_19 = arith.constant 0 : index
    %c0_20 = arith.constant 0 : index
    %30 = vector.load %arg7[%c0_19, %c0_20] : memref<1x32xf32, #tpu.memory_space<vmem>>, vector<1x32xf32>
    %31 = vector.broadcast %30 : vector<1x32xf32> to vector<2x32xf32>
    %32 = arith.addf %29, %31 : vector<2x32xf32>
    %c0_21 = arith.constant 0 : index
    %c0_22 = arith.constant 0 : index
    %33 = vector.load %arg8[%c0_21, %c0_22] : memref<2x4xf32, #tpu.memory_space<vmem>>, vector<2x4xf32>
    tpu.vector_store %arg8[%c0_21, %c0_22], %12 {strides = array<i32>} : memref<2x4xf32, #tpu.memory_space<vmem>>, vector<2x4xf32>,
    %c0_23 = arith.constant 0 : index
    %c0_24 = arith.constant 0 : index
    %34 = vector.load %arg9[%c0_23, %c0_24] : memref<2x32xf32, #tpu.memory_space<vmem>>, vector<2x32xf32>
    tpu.vector_store %arg9[%c0_23, %c0_24], %32 {strides = array<i32>} : memref<2x32xf32, #tpu.memory_space<vmem>>, vector<2x32xf32>,
    return
  }
}

</mosaic_0001>

<bundles_post_ra>
// kernel: ladan_forward.10
= control target key start
LH: loop header
LB: loop body
LE: loop exit
PB: predicated region body
PF: predicated region fallthrough
CT: control target
= control target key end

     0   :  { %vm123_vm0 = vcmask 261120   ;;  %v1235_v12 = vmov 0.0   ;;  %vm1236_vm1 = vmmov 0   ;;  %v1237_v48 = vmov 1966171168   ;;  %s1513_s4 = inlined_call_operand.vmem [shape: bf16[32,32], index: 4, kind: input, shape index: {}]   ;;  %s1514_s2 = inlined_call_operand.vmem [shape: bf16[32,32], index: 2, kind: input, shape index: {}]   ;;  %s1515_s0 = inlined_call_operand.vmem [shape: f32[2,16,32], index: 0, kind: input, shape index: {}]   ;;  %s1516_s6 = inlined_call_operand.vmem [shape: bf16[32,32], index: 6, kind: input, shape index: {}]   ;;  %s1517_s5 = inlined_call_operand.vmem [shape: f32[1,32], index: 5, kind: input, shape index: {}]   ;;  %s1518_s3 = inlined_call_operand.vmem [shape: f32[1,32], index: 3, kind: input, shape index: {}]   ;;  %s1519_s7 = inlined_call_operand.vmem [shape: f32[1,32], index: 7, kind: input, shape index: {}]   ;;  %s1520_s1 = inlined_call_operand.vmem [shape: f32[2,16], index: 1, kind: input, shape index: {}]   ;;  %s1521_s8 = inlined_call_operand.vmem [shape: bf16[32,32], index: 8, kind: input, shape index: {}]   ;;  %s1522_s9 = inlined_call_operand.vmem [shape: f32[1,32], index: 9, kind: input, shape index: {}]   ;;  %s1523_s12 = inlined_call_operand.vmem [shape: bf16[32,64], index: 12, kind: input, shape index: {}]   ;;  %s1524_s10 = inlined_call_operand.vmem [shape: f32[1,32], index: 10, kind: input, shape index: {}]   ;;  %s1525_s11 = inlined_call_operand.vmem [shape: f32[1,32], index: 11, kind: input, shape index: {}]   ;;  %s1526_s14 = inlined_call_operand.vmem [shape: bf16[64,32], index: 14, kind: input, shape index: {}]   ;;  %s1527_s13 = inlined_call_operand.vmem [shape: f32[1,64], index: 13, kind: input, shape index: {}]   ;;  %s1528_s15 = inlined_call_operand.vmem [shape: f32[1,32], index: 15, kind: input, shape index: {}]   ;;  %s1529_s16 = inlined_call_operand.vmem [shape: f32[1,32], index: 16, kind: input, shape index: {}]   ;;  %s1530_s17 = inlined_call_operand.vmem [shape: f32[1,32], index: 17, kind: input, shape index: {}]   ;;  %s1531_s18 = inlined_call_operand.vmem [shape: f32[2,16,32], index: 18, kind: output, shape index: {}]  }
   0x1   :  { %1536 = sst [smem:[#allocation2_spill]] %s1513_s4  ;;  %v1185_v10 = vld [vmem:[%s1516_s6 + $0x8] sm:$0xff]   ;;  %v1186_v11 = vld [vmem:[%s1516_s6] sm:$0xff]   ;;  %v423_v49 = vunpack.c.l.s4 %v1237_v48  ;;  %v425_v50 = vlaneseq  ;;  %v1238_v59 = vmov 0   ;;  %vm456_vm5 = vcmask 130048  }
   0x2   :  { %1537 = sst [smem:[#allocation3_spill]] %s1514_s2  ;;  %v1031_v15 = vld [vmem:[%s1517_s5] ss:$0 sm:$0xff]  ;;  %vm886_vm7 = vcmask 523264  }
   0x3   :  { %1538 = sst [smem:[#allocation4_spill]] %s1515_s0  ;;  %v1026_v26 = vld [vmem:[%s1518_s3] ss:$0 sm:$0xff]  ;;  %v424_v51 = vunpack.c.0.s8 %v423_v49  ;;  %v426_v52 = vshrl.u32 %v425_v50, 7 }
   0x4   :  { %1539 = sst [smem:[#allocation5_spill]] %s1526_s14  ;;  %v1036_v38 = vld [vmem:[%s1519_s7] ss:$0 sm:$0xff] }
   0x5   :  { %s1540_s29 = sld [smem:[#allocation2_spill]]  ;;  %v1043_v53 = vld.sshfl [vmem:[%s1520_s1] sm:$0x11 pattern:$0x75316420]  ;;  %v427_v55 = vsub.s32 %v424_v51, %v426_v52  ;;  %v444_v58 = vsub.s32 0, %v426_v52 }
   0x6   :  { %s1541_s14 = sld [smem:[#allocation3_spill]]  ;;  %v421_v54 = vcombine.high %v1043_v53, %v1043_v53 }
   0x7   :  { %s1542_s23 = sld [smem:[#allocation4_spill]]  ;;  %v428_v57 = vrot.slane %v1043_v53, %v427_v55 }
   0x8   :  { %v435_v56 = vrot.slane %v421_v54, %v427_v55  ;;  %v1187_v54 = vld [vmem:[%s1521_s8 + $0x8] sm:$0xff]   ;;  %v1188_v55 = vld [vmem:[%s1521_s8] sm:$0xff]   ;;  %s1543_s4 = sld [smem:[#allocation5_spill]] }
   0x9   :  { %vm438_vm3 = vcmp.gt.f32.partialorder %v428_v57, 0.5 }
   0xa   :  { %vm439_vm2 = vcmp.gt.f32.partialorder %v435_v56, 0.5  ;;  %v440_v61 = vsel %vm438_vm3, 1, %v1238_v59 }
   0xb   :  { %v1181_v0 = vld [vmem:[%s1540_s29 + $0x8] sm:$0xff]   ;;  %v1183_v2 = vld [vmem:[%s1540_s29] sm:$0xff]   ;;  %v441_v60 = vsel %vm439_vm2, 1, %v1238_v59  ;;  %v445_v63 = vrot.slane %v440_v61, %v444_v58 }
   0xc   :  { %v1182_v1 = vld [vmem:[%s1541_s14 + $0x8] sm:$0xff]   ;;  %1109 = vmatprep.subr.bf16.mxu1 %v1181_v0  ;;  %v1184_v3 = vld [vmem:[%s1541_s14] sm:$0xff]   ;;  %v449_v62 = vrot.slane %v441_v60, %v444_v58 }
   0xd   :  { %1110 = vmatpush3.bf16.msra.mxu1 %v1181_v0  ;;  %1101 = vmatprep.subr.bf16.mxu0 %v1182_v1  ;;  %v1349_v4 = vld [vmem:[%s1542_s23] sm:$0xff]  ;;  %v1354_v5 = vld [vmem:[%s1542_s23 + $0x8] sm:$0xff]  ;;  %v1359_v6 = vld [vmem:[%s1542_s23 + $0x10] sm:$0xff]  ;;  %vm450_vm6 = vcmp.eq.s32.totalorder %v445_v63, 1 }
   0xe   :  { %1102 = vmatpush3.bf16.msra.mxu0 %v1182_v1  ;;  %1111 = vmatprep.subr.bf16.mxu1 %v1183_v2  ;;  %v103_v7 = vpack.c.bf16 %v1354_v5, %v1349_v4  ;;  %v1366_v8 = vld [vmem:[%s1542_s23 + $0x18] sm:$0xff]  ;;  %vm451_vm4 = vcmp.eq.s32.totalorder %v449_v62, 1 }
   0xf   :  { %1103 = vmatprep.subr.bf16.mxu0 %v1184_v3  ;;  %v104_v9 = vpack.c.bf16 %v1366_v8, %v1359_v6 }
  0x10   :  { %1113 = vmatprep.mubr.msk.bf16.mxu1 %vm123_vm0, %v103_v7  ;;  %1105 = vmatprep.mubr.msk.bf16.mxu0 %vm123_vm0, %v103_v7 }
  0x11   :  { %1112 = vmatpush3.bf16.msra.mxu1 %v1183_v2 }
  0x12   :  { %1104 = vmatpush3.bf16.msra.mxu0 %v1184_v3  ;;  %1125 = vmatprep.subr.bf16.mxu1 %v1235_v12 }
  0x13   :  { %1117 = vmatprep.subr.bf16.mxu0 %v1185_v10 }
  0x14   :  { %1114 = vmatmul.mubr.msk.bf16.vlgmr.msra.gmra.mxu1 %vm123_vm0, %v104_v9 }
  0x15   :  { %1106 = vmatmul.mubr.msk.bf16.vlgmr.msra.gmra.mxu0 %vm123_vm0, %v104_v9  ;;  %1127 = vmatprep.mubr.msk.bf16.mxu1 %vm1236_vm1, %v1235_v12 }
  0x16   :  { %1121 = vmatprep.mubr.msk.bf16.mxu0 %vm123_vm0, %v103_v7  ;;  %1118 = vmatpush3.bf16.msra.mxu0 %v1185_v10 }
  0x17   :  { %1119 = vmatprep.subr.bf16.mxu0 %v1186_v11 }
  0x1a   :  { %1120 = vmatpush3.bf16.msra.mxu0 %v1186_v11 }
  0x1b   :  { %1131 = vmatprep.subr.bf16.mxu0 %v1235_v12 }
  0x1d   :  { %1122 = vmatmul.mubr.msk.bf16.vlgmr.msra.gmra.mxu0 %vm123_vm0, %v104_v9 }
  0x1e   :  { %1133 = vmatprep.mubr.msk.bf16.mxu0 %vm1236_vm1, %v1235_v12 }
  0xd4   :  { %v1115_v13 = vpop.f32.mrf.mxu1 }
  0xd5   :  { %v1107_v14 = vpop.f32.mrf.mxu0  ;;  %v240_v19 = vadd.f32 %v1115_v13, %v1031_v15 }
  0xd6   :  { %v231_v16 = vpop.f32.mrf.mxu1  ;;  %v173_v30 = vadd.f32 %v1107_v14, %v1026_v26 }
  0xd7   :  { %v164_v17 = vpop.f32.mrf.mxu0  ;;  %v232_v23 = vadd.f32 %v1031_v15, %v231_v16 }
  0xd8   :  { %v1116_v18 = vpop.f32.mrf.mxu1  ;;  %v165_v33 = vadd.f32 %v1026_v26, %v164_v17 }
  0xd9   :  { %v243_v20 = vadd.f32 %v1116_v18, %v1031_v15  ;;  %v1108_v22 = vpop.f32.mrf.mxu0 }
  0xda   :  { %v234_v21 = vpop.f32.mrf.mxu1  ;;  %v176_v31 = vadd.f32 %v1108_v22, %v1026_v26 }
  0xdb   :  { %v316_v24 = vpack.c.bf16 %v243_v20, %v240_v19  ;;  %v235_v25 = vadd.f32 %v1031_v15, %v234_v21  ;;  %v167_v29 = vpop.f32.mrf.mxu0 }
  0xdc   :  { %v168_v34 = vadd.f32 %v1026_v26, %v167_v29  ;;  %v314_v35 = vpack.c.bf16 %v176_v31, %v173_v30 }
  0xdd   :  { %v315_v27 = vpack.c.bf16 %v235_v25, %v232_v23  ;;  %v370_v28 = vsel %vm123_vm0, %v316_v24, 0  ;;  %v1123_v37 = vpop.f32.mrf.mxu0 }
  0xde   :  { %1132 = vmatpush3.bf16.xpose.msra.mxu0 %v370_v28  ;;  %v313_v36 = vpack.c.bf16 %v168_v34, %v165_v33  ;;  %v307_v40 = vadd.f32 %v1123_v37, %v1036_v38 }
  0xdf   :  { %v323_v32 = vsel %vm123_vm0, %v315_v27, 0  ;;  %1143 = vmatprep.subr.bf16.mxu0 %v1235_v12  ;;  %v298_v39 = vpop.f32.mrf.mxu0 }
  0xe0   :  { %1126 = vmatpush3.bf16.xpose.msra.mxu1 %v323_v32  ;;  %v299_v42 = vadd.f32 %v1036_v38, %v298_v39 }
  0xe1   :  { %1137 = vmatprep.subr.bf16.mxu1 %v1235_v12  ;;  %v1124_v41 = vpop.f32.mrf.mxu0 }
  0xe2   :  { %v310_v43 = vadd.f32 %v1124_v41, %v1036_v38 }
  0xe3   :  { %v301_v44 = vpop.f32.mrf.mxu0 }
  0xe4   :  { %v318_v45 = vpack.c.bf16 %v310_v43, %v307_v40  ;;  %v302_v46 = vadd.f32 %v1036_v38, %v301_v44 }
  0xe5   :  { %1134 = vmatmul.mubr.msk.bf16.vlgmr.msra.gmra.mxu0 %vm123_vm0, %v314_v35 }
  0xe6   :  { %1145 = vmatprep.mubr.msk.bf16.mxu0 %vm1236_vm1, %v1235_v12  ;;  %v317_v47 = vpack.c.bf16 %v302_v46, %v299_v42  ;;  %1144 = vmatpush3.bf16.msra.mxu0 %v318_v45 }
  0xe7   :  { %1128 = vmatmul.mubr.msk.bf16.vlgmr.msra.gmra.mxu1 %vm123_vm0, %v313_v36 }
  0xe8   :  { %1139 = vmatprep.mubr.msk.bf16.mxu1 %vm1236_vm1, %v1235_v12  ;;  %1138 = vmatpush3.bf16.msra.mxu1 %v317_v47 }
  0xe9   :  { %1149 = vmatprep.subr.bf16.mxu1 %v1187_v54 }
 0x1a5   :  { %v406_v0 = vpop.f32.mrf.mxu0 }
 0x1a6   :  { %v454_v1 = vsel %vm451_vm4, %v406_v0, -1e+09 }
 0x1a7   :  { %v359_v2 = vpop.f32.mrf.mxu1  ;;  %v1135_v3 = vpop.f32.mrf.mxu0  ;;  %v463_v7 = vsel %vm456_vm5, %v454_v1, -inf }
 0x1a8   :  { %v452_v9 = vsel %vm450_vm6, %v359_v2, -1e+09  ;;  %464 = vmax.xlane.f32.xlu1 %v463_v7  ;;  %v1046_v3 = vld [vmem:[%s1522_s9] ss:$0 sm:$0xff] }
 0x1a9   :  { %v1129_v10 = vpop.f32.mrf.mxu1  ;;  %v409_v11 = vpop.f32.mrf.mxu0  ;;  %v457_v12 = vsel %vm456_vm5, %v452_v9, -inf }
 0x1aa   :  { %v455_v13 = vsel %vm451_vm4, %v409_v11, -1e+09  ;;  %458 = vmax.xlane.f32.xlu0 %v457_v12 }
 0x1ab   :  { %v362_v14 = vpop.f32.mrf.mxu1  ;;  %v1136_v15 = vpop.f32.mrf.mxu0  ;;  %v466_v16 = vsel %vm456_vm5, %v455_v13, -inf }
 0x1ac   :  { %v453_v17 = vsel %vm450_vm6, %v362_v14, -1e+09  ;;  %467 = vmax.xlane.f32.xlu1 %v466_v16 }
 0x1ad   :  { %v1130_v18 = vpop.f32.mrf.mxu1  ;;  %v460_v19 = vsel %vm456_vm5, %v453_v17, -inf }
 0x1ae   :  { %461 = vmax.xlane.f32.xlu0 %v460_v19 }
 0x231   :  { %v465_v20 = vpop.xlane.xlu1 %464 }
 0x232   :  { %v471_v21 = vsub.f32 %v454_v1, %v465_v20 }
 0x233   :  { %v459_v22 = vpop.xlane.xlu0 %458 }
 0x234   :  { %v469_v23 = vsub.f32 %v452_v9, %v459_v22  ;;  %v477_v25 = vmul.f32 1.442695, %v471_v21 }
 0x235   :  { %v468_v24 = vpop.xlane.xlu1 %467 }
 0x236   :  { %v473_v26 = vmul.f32 1.442695, %v469_v23  ;;  %v472_v27 = vsub.f32 %v455_v13, %v468_v24 }
 0x237   :  { %v462_v28 = vpop.xlane.xlu0 %461 }
 0x238   :  { %1195 = vpow2.f32 %v473_v26  ;;  %v470_v29 = vsub.f32 %v453_v17, %v462_v28  ;;  %v479_v30 = vmul.f32 1.442695, %v472_v27 }
 0x239   :  { %1197 = vpow2.f32 %v477_v25 }
 0x23a   :  { %v475_v31 = vmul.f32 1.442695, %v470_v29 }
 0x23c   :  { %1199 = vpow2.f32 %v475_v31 }
 0x23d   :  { %1201 = vpow2.f32 %v479_v30 }
 0x245   :  { %v1196_v32 = vpop.eup %1195 }
 0x246   :  { %v481_v33 = vsel %vm456_vm5, %v1196_v32, 0.0  ;;  %v1198_v34 = vpop.eup %1197 }
 0x247   :  { %482 = vadd.xlane.f32.xlu0 %v481_v33  ;;  %v487_v36 = vsel %vm456_vm5, %v1198_v34, 0.0 }
 0x249   :  { %v1200_v35 = vpop.eup %1199 }
 0x24a   :  { %v484_v37 = vsel %vm456_vm5, %v1200_v35, 0.0  ;;  %v1202_v38 = vpop.eup %1201 }
 0x24b   :  { %488 = vadd.xlane.f32.xlu0 %v487_v36  ;;  %485 = vadd.xlane.f32.xlu1 %v484_v37  ;;  %v490_v39 = vsel %vm456_vm5, %v1202_v38, 0.0 }
 0x24f   :  { %491 = vadd.xlane.f32.xlu1 %v490_v39  ;;  %v1189_v39 = vld [vmem:[%s1523_s12 + $0x8] sm:$0xff]  }
 0x250   :  { %1157 = vmatprep.subr.bf16.mxu0 %v1189_v39 }
 0x2d0   :  { %v483_v40 = vpop.xlane.xlu0 %482 }
 0x2d1   :  { %1203 = vrcp.f32 %v483_v40  ;;  %v1190_v40 = vld [vmem:[%s1523_s12] sm:$0xff]  }
 0x2d4   :  { %v486_v41 = vpop.xlane.xlu1 %485  ;;  %v489_v42 = vpop.xlane.xlu0 %488 }
 0x2d5   :  { %1205 = vrcp.f32 %v486_v41 }
 0x2d6   :  { %1207 = vrcp.f32 %v489_v42 }
 0x2d8   :  { %v492_v43 = vpop.xlane.xlu1 %491 }
 0x2d9   :  { %1209 = vrcp.f32 %v492_v43 }
 0x2de   :  { %v1204_v44 = vpop.eup %1203 }
 0x2df   :  { %v494_v46 = vmul.f32 %v1204_v44, %v1196_v32 }
 0x2e2   :  { %v1206_v45 = vpop.eup %1205 }
 0x2e3   :  { %v496_v47 = vmul.f32 %v1206_v45, %v1200_v35  ;;  %v1208_v48 = vpop.eup %1207 }
 0x2e4   :  { %v498_v51 = vmul.f32 %v1208_v48, %v1198_v34 }
 0x2e5   :  { %v501_v49 = vpack.c.bf16 %v496_v47, %v494_v46 }
 0x2e6   :  { %v1210_v50 = vpop.eup %1209 }
 0x2e7   :  { %1140 = vmatmul.mubr.msk.bf16.vlgmr.msra.gmra.mxu1 %vm456_vm5, %v501_v49  ;;  %v500_v52 = vmul.f32 %v1210_v50, %v1202_v38 }
 0x2e8   :  { %1150 = vmatpush3.bf16.msra.mxu1 %v1187_v54 }
 0x2e9   :  { %v502_v53 = vpack.c.bf16 %v500_v52, %v498_v51  ;;  %1151 = vmatprep.subr.bf16.mxu1 %v1188_v55 }
 0x2eb   :  { %1146 = vmatmul.mubr.msk.bf16.vlgmr.msra.gmra.mxu0 %vm456_vm5, %v502_v53 }
 0x2ec   :  { %1152 = vmatpush3.bf16.msra.mxu1 %v1188_v55  ;;  %1158 = vmatpush3.bf16.msra.mxu0 %v1189_v39  ;;  %v1051_v55 = vld [vmem:[%s1524_s10] ss:$0 sm:$0xff] }
 0x2ed   :  { %1159 = vmatprep.subr.bf16.mxu0 %v1190_v40 }
 0x2f0   :  { %1160 = vmatpush3.bf16.msra.mxu0 %v1190_v40 }
 0x3a7   :  { %v540_v56 = vpop.f32.mrf.mxu1 }
 0x3a9   :  { %v1141_v57 = vpop.f32.mrf.mxu1 }
 0x3ab   :  { %v543_v58 = vpop.f32.mrf.mxu1  ;;  %v584_v59 = vpop.f32.mrf.mxu0 }
 0x3ac   :  { %v591_v60 = vpack.c.bf16 %v543_v58, %v540_v56 }
 0x3ad   :  { %v1142_v61 = vpop.f32.mrf.mxu1  ;;  %v1147_v62 = vpop.f32.mrf.mxu0 }
 0x3ae   :  { %1153 = vmatprep.mubr.msk.bf16.mxu1 %vm123_vm0, %v591_v60  ;;  %v1052_v61 = vld [vmem:[%s1525_s11] ss:$0 sm:$0xff] }
 0x3af   :  { %v587_v63 = vpop.f32.mrf.mxu0 }
 0x3b0   :  { %v592_v0 = vpack.c.bf16 %v587_v63, %v584_v59 }
 0x3b1   :  { %v1148_v1 = vpop.f32.mrf.mxu0 }
 0x3b2   :  { %1154 = vmatmul.mubr.msk.bf16.vlgmr.msra.gmra.mxu1 %vm123_vm0, %v592_v0 }
 0x472   :  { %v1155_v2 = vpop.f32.mrf.mxu1 }
 0x473   :  { %v660_v9 = vadd.f32 %v1155_v2, %v1046_v3 }
 0x474   :  { %v651_v7 = vpop.f32.mrf.mxu1 }
 0x475   :  { %v652_v10 = vadd.f32 %v1046_v3, %v651_v7  ;;  %v668_v17 = vadd.f32 %v660_v9, %v1359_v6 }
 0x476   :  { %v1156_v11 = vpop.f32.mrf.mxu1 }
 0x477   :  { %v666_v12 = vadd.f32 %v652_v10, %v1349_v4  ;;  %v663_v14 = vadd.f32 %v1156_v11, %v1046_v3  ;;  %v676_v20 = vsel %vm123_vm0, %v668_v17, 0.0 }
 0x478   :  { %v654_v13 = vpop.f32.mrf.mxu1 }
 0x479   :  { %v655_v15 = vadd.f32 %v1046_v3, %v654_v13  ;;  %v670_v16 = vsel %vm123_vm0, %v666_v12, 0.0  ;;  %v669_v21 = vadd.f32 %v663_v14, %v1366_v8  ;;  %v1191_v13 = vld [vmem:[%s1543_s4 + $0x18] sm:$0xff]   ;;  %v1192_v14 = vld [vmem:[%s1543_s4 + $0x10] sm:$0xff]  }
 0x47a   :  { %671 = vadd.xlane.f32.xlu0 %v670_v16  ;;  %1165 = vmatprep.subr.bf16.mxu1 %v1191_v13  ;;  %v1194_v16 = vld [vmem:[%s1543_s4] sm:$0xff]  }
 0x47b   :  { %v667_v18 = vadd.f32 %v655_v15, %v1354_v5  ;;  %v679_v4 = vsel %vm123_vm0, %v669_v21, 0.0  ;;  %1166 = vmatpush3.bf16.msra.mxu1 %v1191_v13  ;;  %v1193_v15 = vld [vmem:[%s1543_s4 + $0x8] sm:$0xff]  }
 0x47c   :  { %1167 = vmatprep.subr.bf16.mxu1 %v1192_v14 }
 0x47d   :  { %v673_v19 = vsel %vm123_vm0, %v667_v18, 0.0 }
 0x47e   :  { %674 = vadd.xlane.f32.xlu1 %v673_v19  ;;  %677 = vadd.xlane.f32.xlu0 %v676_v20 }
 0x47f   :  { %1168 = vmatpush3.bf16.msra.mxu1 %v1192_v14 }
 0x480   :  { %1169 = vmatprep.subr.bf16.mxu1 %v1193_v15 }
 0x482   :  { %680 = vadd.xlane.f32.xlu1 %v679_v4 }
 0x483   :  { %1170 = vmatpush3.bf16.msra.mxu1 %v1193_v15 }
 0x484   :  { %1171 = vmatprep.subr.bf16.mxu1 %v1194_v16 }
 0x487   :  { %1172 = vmatpush3.bf16.msra.mxu1 %v1194_v16 }
 0x503   :  { %v672_v22 = vpop.xlane.xlu0 %671 }
 0x504   :  { %v683_v23 = vmul.f32 0.03125, %v672_v22 }
 0x506   :  { %v687_v24 = vsub.f32 %v666_v12, %v683_v23 }
 0x507   :  { %v675_v25 = vpop.xlane.xlu1 %674  ;;  %v678_v26 = vpop.xlane.xlu0 %677 }
 0x508   :  { %v684_v6 = vmul.f32 0.03125, %v675_v25  ;;  %v685_v27 = vmul.f32 0.03125, %v678_v26  ;;  %v691_v28 = vmul.f32 %v687_v24, %v687_v24 }
 0x50a   :  { %v688_v5 = vsub.f32 %v667_v18, %v684_v6  ;;  %v689_v29 = vsub.f32 %v668_v17, %v685_v27  ;;  %v695_v30 = vsel %vm123_vm0, %v691_v28, 0.0  ;;  %v1053_v17 = vld [vmem:[%s1527_s13] ss:$0 sm:$0xff] }
 0x50b   :  { %v681_v31 = vpop.xlane.xlu1 %680  ;;  %696 = vadd.xlane.f32.xlu0 %v695_v30 }
 0x50c   :  { %v686_v8 = vmul.f32 0.03125, %v681_v31  ;;  %v692_v32 = vmul.f32 %v688_v5, %v688_v5  ;;  %v693_v33 = vmul.f32 %v689_v29, %v689_v29 }
 0x50e   :  { %v690_v34 = vsub.f32 %v669_v21, %v686_v8  ;;  %v698_v35 = vsel %vm123_vm0, %v692_v32, 0.0  ;;  %v701_v36 = vsel %vm123_vm0, %v693_v33, 0.0 }
 0x50f   :  { %699 = vadd.xlane.f32.xlu1 %v698_v35  ;;  %702 = vadd.xlane.f32.xlu0 %v701_v36 }
 0x510   :  { %v694_v37 = vmul.f32 %v690_v34, %v690_v34 }
 0x512   :  { %v704_v38 = vsel %vm123_vm0, %v694_v37, 0.0 }
 0x513   :  { %705 = vadd.xlane.f32.xlu1 %v704_v38 }
 0x594   :  { %v697_v41 = vpop.xlane.xlu0 %696 }
 0x595   :  { %v707_v42 = vmul.f32 0.03125, %v697_v41 }
 0x597   :  { %v711_v43 = vadd.f32 1e-12, %v707_v42 }
 0x598   :  { %v700_v44 = vpop.xlane.xlu1 %699  ;;  %v703_v45 = vpop.xlane.xlu0 %702 }
 0x599   :  { %1211 = vrsqrt.f32 %v711_v43  ;;  %v708_v46 = vmul.f32 0.03125, %v700_v44  ;;  %v709_v47 = vmul.f32 0.03125, %v703_v45 }
 0x59b   :  { %v712_v48 = vadd.f32 1e-12, %v708_v46  ;;  %v713_v49 = vadd.f32 1e-12, %v709_v47 }
 0x59c   :  { %v706_v50 = vpop.xlane.xlu1 %705 }
 0x59d   :  { %1213 = vrsqrt.f32 %v712_v48  ;;  %v710_v51 = vmul.f32 0.03125, %v706_v50 }
 0x59e   :  { %1215 = vrsqrt.f32 %v713_v49 }
 0x59f   :  { %v714_v52 = vadd.f32 1e-12, %v710_v51 }
 0x5a1   :  { %1217 = vrsqrt.f32 %v714_v52 }
 0x5a6   :  { %v1212_v53 = vpop.eup %1211 }
 0x5a7   :  { %v719_v54 = vmul.f32 %v1212_v53, %v687_v24 }
 0x5a9   :  { %v729_v59 = vmul.f32 %v1051_v55, %v719_v54 }
 0x5aa   :  { %v1214_v56 = vpop.eup %1213 }
 0x5ab   :  { %v1216_v57 = vpop.eup %1215  ;;  %v720_v58 = vmul.f32 %v1214_v56, %v688_v5  ;;  %v1447_v1 = vadd.f32 %v1052_v61, %v729_v59 }
 0x5ac   :  { %v721_v60 = vmul.f32 %v1216_v57, %v689_v29 }
 0x5ad   :  { %v730_v62 = vmul.f32 %v1051_v55, %v720_v58 }
 0x5ae   :  { %v1218_v63 = vpop.eup %1217  ;;  %v731_v3 = vmul.f32 %v1051_v55, %v721_v60 }
 0x5af   :  { %v722_v0 = vmul.f32 %v1218_v63, %v690_v34  ;;  %v1449_v2 = vadd.f32 %v1052_v61, %v730_v62 }
 0x5b0   :  { %v1454_v10 = vadd.f32 %v1052_v61, %v731_v3 }
 0x5b1   :  { %v743_v7 = vpack.c.bf16 %v1449_v2, %v1447_v1  ;;  %v732_v9 = vmul.f32 %v1051_v55, %v722_v0 }
 0x5b3   :  { %1161 = vmatprep.mubr.msk.bf16.mxu0 %vm123_vm0, %v743_v7  ;;  %v1456_v11 = vadd.f32 %v1052_v61, %v732_v9  ;;  %v1058_v61 = vld [vmem:[%s1528_s15] ss:$0 sm:$0xff] }
 0x5b5   :  { %v744_v12 = vpack.c.bf16 %v1456_v11, %v1454_v10 }
 0x5b7   :  { %1162 = vmatmul.mubr.msk.bf16.vlgmr.msra.gmra.mxu0 %vm123_vm0, %v744_v12 }
 0x677   :  { %v1163_v18 = vpop.f32.mrf.mxu0 }
 0x678   :  { %v812_v19 = vadd.f32 %v1163_v18, %v1053_v17 }
 0x679   :  { %v803_v20 = vpop.f32.mrf.mxu0 }
 0x67a   :  { %v820_v21 = vmul.f32 %v812_v19, %v812_v19  ;;  %v804_v4 = vadd.f32 %v1053_v17, %v803_v20 }
 0x67b   :  { %v1164_v22 = vpop.f32.mrf.mxu0 }
 0x67c   :  { %v824_v23 = vmul.f32 %v820_v21, %v812_v19  ;;  %v818_v24 = vmul.f32 %v804_v4, %v804_v4  ;;  %v815_v25 = vadd.f32 %v1164_v22, %v1053_v17 }
 0x67d   :  { %v806_v26 = vpop.f32.mrf.mxu0 }
 0x67e   :  { %v828_v6 = vmul.f32 0.044715, %v824_v23  ;;  %v822_v27 = vmul.f32 %v818_v24, %v804_v4  ;;  %v821_v28 = vmul.f32 %v815_v25, %v815_v25  ;;  %v807_v5 = vadd.f32 %v1053_v17, %v806_v26 }
 0x680   :  { %v832_v29 = vadd.f32 %v828_v6, %v812_v19  ;;  %v826_v30 = vmul.f32 0.044715, %v822_v27  ;;  %v825_v31 = vmul.f32 %v821_v28, %v815_v25  ;;  %v819_v8 = vmul.f32 %v807_v5, %v807_v5 }
 0x682   :  { %v836_v32 = vmul.f32 0.7978846, %v832_v29  ;;  %v830_v33 = vadd.f32 %v826_v30, %v804_v4  ;;  %v829_v34 = vmul.f32 0.044715, %v825_v31  ;;  %v823_v35 = vmul.f32 %v819_v8, %v807_v5 }
 0x684   :  { %v834_v36 = vmul.f32 0.7978846, %v830_v33  ;;  %v833_v37 = vadd.f32 %v829_v34, %v815_v25  ;;  %v827_v38 = vmul.f32 0.044715, %v823_v35  ;;  %1219 = vtanh.f32 %v836_v32 }
 0x686   :  { %1221 = vtanh.f32 %v834_v36  ;;  %v837_v39 = vmul.f32 0.7978846, %v833_v37  ;;  %v831_v40 = vadd.f32 %v827_v38, %v807_v5 }
 0x688   :  { %1223 = vtanh.f32 %v837_v39  ;;  %v835_v41 = vmul.f32 0.7978846, %v831_v40 }
 0x68a   :  { %1225 = vtanh.f32 %v835_v41 }
 0x691   :  { %v1220_v42 = vpop.eup %1219 }
 0x692   :  { %v844_v46 = vadd.f32 1.0, %v1220_v42 }
 0x693   :  { %v1222_v43 = vpop.eup %1221 }
 0x694   :  { %v842_v44 = vadd.f32 1.0, %v1222_v43  ;;  %v848_v52 = vmul.f32 0.5, %v844_v46  ;;  %v1065_v46 = vld [vmem:[%s1529_s16] ss:$0 sm:$0xff] }
 0x695   :  { %v1224_v45 = vpop.eup %1223 }
 0x696   :  { %v845_v47 = vadd.f32 1.0, %v1224_v45  ;;  %v846_v49 = vmul.f32 0.5, %v842_v44  ;;  %v852_v57 = vmul.f32 %v848_v52, %v812_v19 }
 0x697   :  { %v1226_v48 = vpop.eup %1225 }
 0x698   :  { %v849_v50 = vmul.f32 0.5, %v845_v47  ;;  %v843_v51 = vadd.f32 1.0, %v1226_v48  ;;  %v850_v55 = vmul.f32 %v846_v49, %v804_v4  ;;  %v1066_v48 = vld [vmem:[%s1530_s17] ss:$0 sm:$0xff] }
 0x69a   :  { %v847_v53 = vmul.f32 0.5, %v843_v51  ;;  %v853_v54 = vmul.f32 %v849_v50, %v815_v25 }
 0x69c   :  { %v851_v56 = vmul.f32 %v847_v53, %v807_v5  ;;  %v855_v59 = vpack.c.bf16 %v853_v54, %v852_v57 }
 0x69e   :  { %v854_v58 = vpack.c.bf16 %v851_v56, %v850_v55 }
 0x6a0   :  { %1173 = vmatprep.mubr.msk.bf16.mxu1 %vm886_vm7, %v854_v58 }
 0x6a1   :  { %1174 = vmatmul.mubr.msk.bf16.vlgmr.msra.gmra.mxu1 %vm886_vm7, %v855_v59 }
 0x761   :  { %v1175_v60 = vpop.f32.mrf.mxu1 }
 0x762   :  { %v936_v63 = vadd.f32 %v1175_v60, %v1058_v61 }
 0x763   :  { %v927_v62 = vpop.f32.mrf.mxu1 }
 0x764   :  { %v928_v0 = vadd.f32 %v1058_v61, %v927_v62  ;;  %v944_v15 = vadd.f32 %v936_v63, %v1454_v10 }
 0x765   :  { %v1176_v3 = vpop.f32.mrf.mxu1 }
 0x766   :  { %v942_v7 = vadd.f32 %v928_v0, %v1447_v1  ;;  %v939_v12 = vadd.f32 %v1176_v3, %v1058_v61  ;;  %v952_v18 = vsel %vm123_vm0, %v944_v15, 0.0 }
 0x767   :  { %v930_v9 = vpop.f32.mrf.mxu1 }
 0x768   :  { %v931_v13 = vadd.f32 %v1058_v61, %v930_v9  ;;  %v946_v14 = vsel %vm123_vm0, %v942_v7, 0.0  ;;  %v945_v19 = vadd.f32 %v939_v12, %v1456_v11 }
 0x769   :  { %947 = vadd.xlane.f32.xlu0 %v946_v14 }
 0x76a   :  { %v943_v16 = vadd.f32 %v931_v13, %v1449_v2  ;;  %v955_v1 = vsel %vm123_vm0, %v945_v19, 0.0 }
 0x76c   :  { %v949_v17 = vsel %vm123_vm0, %v943_v16, 0.0 }
 0x76d   :  { %950 = vadd.xlane.f32.xlu1 %v949_v17  ;;  %953 = vadd.xlane.f32.xlu0 %v952_v18 }
 0x771   :  { %956 = vadd.xlane.f32.xlu1 %v955_v1 }
 0x7f2   :  { %v948_v20 = vpop.xlane.xlu0 %947 }
 0x7f3   :  { %v958_v21 = vmul.f32 0.03125, %v948_v20 }
 0x7f5   :  { %v962_v4 = vsub.f32 %v942_v7, %v958_v21 }
 0x7f6   :  { %v951_v22 = vpop.xlane.xlu1 %950  ;;  %v954_v23 = vpop.xlane.xlu0 %953 }
 0x7f7   :  { %v959_v10 = vmul.f32 0.03125, %v951_v22  ;;  %v960_v24 = vmul.f32 0.03125, %v954_v23  ;;  %v966_v25 = vmul.f32 %v962_v4, %v962_v4 }
 0x7f9   :  { %v963_v2 = vsub.f32 %v943_v16, %v959_v10  ;;  %v964_v26 = vsub.f32 %v944_v15, %v960_v24  ;;  %v970_v6 = vsel %vm123_vm0, %v966_v25, 0.0 }
 0x7fa   :  { %v957_v27 = vpop.xlane.xlu1 %956  ;;  %971 = vadd.xlane.f32.xlu0 %v970_v6 }
 0x7fb   :  { %v961_v11 = vmul.f32 0.03125, %v957_v27  ;;  %v967_v28 = vmul.f32 %v963_v2, %v963_v2  ;;  %v968_v5 = vmul.f32 %v964_v26, %v964_v26 }
 0x7fd   :  { %v965_v29 = vsub.f32 %v945_v19, %v961_v11  ;;  %v973_v30 = vsel %vm123_vm0, %v967_v28, 0.0  ;;  %v976_v31 = vsel %vm123_vm0, %v968_v5, 0.0 }
 0x7fe   :  { %974 = vadd.xlane.f32.xlu1 %v973_v30  ;;  %977 = vadd.xlane.f32.xlu0 %v976_v31 }
 0x7ff   :  { %v969_v8 = vmul.f32 %v965_v29, %v965_v29 }
 0x801   :  { %v979_v32 = vsel %vm123_vm0, %v969_v8, 0.0 }
 0x802   :  { %980 = vadd.xlane.f32.xlu1 %v979_v32 }
 0x883   :  { %v972_v33 = vpop.xlane.xlu0 %971 }
 0x884   :  { %v982_v34 = vmul.f32 0.03125, %v972_v33 }
 0x886   :  { %v986_v35 = vadd.f32 1e-12, %v982_v34 }
 0x887   :  { %v975_v36 = vpop.xlane.xlu1 %974  ;;  %v978_v37 = vpop.xlane.xlu0 %977 }
 0x888   :  { %1227 = vrsqrt.f32 %v986_v35  ;;  %v983_v38 = vmul.f32 0.03125, %v975_v36  ;;  %v984_v39 = vmul.f32 0.03125, %v978_v37 }
 0x88a   :  { %v987_v40 = vadd.f32 1e-12, %v983_v38  ;;  %v988_v41 = vadd.f32 1e-12, %v984_v39 }
 0x88b   :  { %v981_v42 = vpop.xlane.xlu1 %980 }
 0x88c   :  { %1229 = vrsqrt.f32 %v987_v40  ;;  %v985_v43 = vmul.f32 0.03125, %v981_v42 }
 0x88d   :  { %1231 = vrsqrt.f32 %v988_v41 }
 0x88e   :  { %v989_v44 = vadd.f32 1e-12, %v985_v43 }
 0x890   :  { %1233 = vrsqrt.f32 %v989_v44 }
 0x895   :  { %v1228_v45 = vpop.eup %1227 }
 0x896   :  { %v994_v47 = vmul.f32 %v1228_v45, %v962_v4 }
 0x898   :  { %v1004_v49 = vmul.f32 %v1065_v46, %v994_v47 }
 0x899   :  { %v1230_v50 = vpop.eup %1229 }
 0x89a   :  { %v1232_v51 = vpop.eup %1231  ;;  %v1014_v52 = vadd.f32 %v1066_v48, %v1004_v49  ;;  %v995_v53 = vmul.f32 %v1230_v50, %v963_v2 }
 0x89b   :  { %v996_v54 = vmul.f32 %v1232_v51, %v964_v26 }
 0x89c   :  { %1018 = vst.msk [vmem:[%s1531_s18] sm:$0xff] %vm123_vm0, %v1014_v52  ;;  %v1005_v55 = vmul.f32 %v1065_v46, %v995_v53 }
 0x89d   :  { %v1234_v56 = vpop.eup %1233  ;;  %v1006_v57 = vmul.f32 %v1065_v46, %v996_v54 }
 0x89e   :  { %v1015_v58 = vadd.f32 %v1066_v48, %v1005_v55  ;;  %v997_v59 = vmul.f32 %v1234_v56, %v965_v29 }
 0x89f   :  { %v1016_v60 = vadd.f32 %v1066_v48, %v1006_v57 }
 0x8a0   :  { %1019 = vst.msk [vmem:[%s1531_s18 + $0x8] sm:$0xff] %vm123_vm0, %v1015_v58  ;;  %v1007_v61 = vmul.f32 %v1065_v46, %v997_v59 }
 0x8a1   :  { %1020 = vst.msk [vmem:[%s1531_s18 + $0x10] sm:$0xff] %vm123_vm0, %v1016_v60 }
 0x8a2   :  { %v1017_v62 = vadd.f32 %v1066_v48, %v1007_v61 }
 0x8a4   :  { %1021 = vst.msk [vmem:[%s1531_s18 + $0x18] sm:$0xff] %vm123_vm0, %v1017_v62 }

// kernel: ladan_forward.11
= control target key start
LH: loop header
LB: loop body
LE: loop exit
PB: predicated region body
PF: predicated region fallthrough
CT: control target
= control target key end

     0   :  { %s2060_s0 = inlined_call_operand.vmem [shape: f32[2,16,32], index: 0, kind: input, shape index: {}]   ;;  %s2061_s1 = inlined_call_operand.vmem [shape: f32[2,16], index: 1, kind: input, shape index: {}]   ;;  %s2062_s2 = inlined_call_operand.vmem [shape: f32[2,16], index: 2, kind: input, shape index: {}]   ;;  %s2063_s3 = inlined_call_operand.vmem [shape: f32[2,32], index: 3, kind: input, shape index: {}]   ;;  %s2064_s4 = inlined_call_operand.vmem [shape: bf16[32,32], index: 4, kind: input, shape index: {}]   ;;  %s2065_s5 = inlined_call_operand.vmem [shape: f32[1,32], index: 5, kind: input, shape index: {}]   ;;  %s2066_s6 = inlined_call_operand.vmem [shape: bf16[32,32], index: 6, kind: input, shape index: {}]   ;;  %s2067_s7 = inlined_call_operand.vmem [shape: f32[1,32], index: 7, kind: input, shape index: {}]   ;;  %s2068_s8 = inlined_call_operand.vmem [shape: bf16[32,32], index: 8, kind: input, shape index: {}]   ;;  %s2069_s9 = inlined_call_operand.vmem [shape: f32[1,32], index: 9, kind: input, shape index: {}]   ;;  %s2070_s10 = inlined_call_operand.vmem [shape: bf16[32,32], index: 10, kind: input, shape index: {}]   ;;  %s2071_s11 = inlined_call_operand.vmem [shape: f32[1,32], index: 11, kind: input, shape index: {}]   ;;  %s2072_s12 = inlined_call_operand.vmem [shape: f32[1,32], index: 12, kind: input, shape index: {}]   ;;  %s2073_s13 = inlined_call_operand.vmem [shape: f32[1,32], index: 13, kind: input, shape index: {}]   ;;  %s2074_s14 = inlined_call_operand.vmem [shape: bf16[32,64], index: 14, kind: input, shape index: {}]   ;;  %s2075_s15 = inlined_call_operand.vmem [shape: f32[1,64], index: 15, kind: input, shape index: {}]   ;;  %s2076_s16 = inlined_call_operand.vmem [shape: bf16[64,32], index: 16, kind: input, shape index: {}]   ;;  %s2077_s17 = inlined_call_operand.vmem [shape: f32[1,32], index: 17, kind: input, shape index: {}]   ;;  %s2078_s18 = inlined_call_operand.vmem [shape: f32[1,32], index: 18, kind: input, shape index: {}]   ;;  %s2079_s19 = inlined_call_operand.vmem [shape: f32[1,32], index: 19, kind: input, shape index: {}]   ;;  %s2080_s20 = inlined_call_operand.vmem [shape: bf16[32,32], index: 20, kind: input, shape index: {}]   ;;  %s2081_s21 = inlined_call_operand.vmem [shape: f32[1,32], index: 21, kind: input, shape index: {}]   ;;  %s2082_s22 = inlined_call_operand.vmem [shape: f32[2,32], index: 22, kind: output, shape index: {0}]   ;;  %s2083_s23 = inlined_call_operand.hbm [shape: f32[2,16], index: 23, kind: output, shape index: {1}]  }
   0x1   :  { %2087 = sst [smem:[#allocation5_spill]] %s2060_s0 }
   0x2   :  { %2088 = sst [smem:[#allocation6_spill]] %s2061_s1 }
   0x3   :  { %2089 = sst [smem:[#allocation7_spill]] %s2062_s2 }
   0x4   :  { %2090 = sst [smem:[#allocation8_spill]] %s2063_s3 }
   0x5   :  { %2091 = sst [smem:[#allocation9_spill]] %s2064_s4 }
   0x6   :  { %2092 = sst [smem:[#allocation10_spill]] %s2065_s5 }
   0x7   :  { %2093 = sst [smem:[#allocation11_spill]] %s2066_s6 }
   0x8   :  { %2094 = sst [smem:[#allocation12_spill]] %s2067_s7 }
   0x9   :  { %2095 = sst [smem:[#allocation13_spill]] %s2078_s18 }
   0xa   :  { %s2096_s24 = sld [smem:[#allocation11_spill]]  ;;  %vm143_vm0 = vcmask 261120  }
   0xb   :  { %s2097_s18 = sld [smem:[#allocation9_spill]] }
   0xc   :  { %s2098_s28 = sld [smem:[#allocation5_spill]] }
  0x10   :  { %v1612_v0 = vld [vmem:[%s2096_s24 + $0x8] sm:$0xff]   ;;  %v1614_v2 = vld [vmem:[%s2096_s24] sm:$0xff]  }
  0x11   :  { %v1613_v1 = vld [vmem:[%s2097_s18 + $0x8] sm:$0xff]   ;;  %1507 = vmatprep.subr.bf16.mxu1 %v1612_v0  ;;  %v1615_v3 = vld [vmem:[%s2097_s18] sm:$0xff]  }
  0x12   :  { %1508 = vmatpush3.bf16.msra.mxu1 %v1612_v0  ;;  %1499 = vmatprep.subr.bf16.mxu0 %v1613_v1  ;;  %v1842_v4 = vld [vmem:[%s2098_s28] sm:$0xff]  ;;  %v1847_v5 = vld [vmem:[%s2098_s28 + $0x8] sm:$0xff]  ;;  %v1852_v6 = vld [vmem:[%s2098_s28 + $0x10] sm:$0xff] }
  0x13   :  { %1500 = vmatpush3.bf16.msra.mxu0 %v1613_v1  ;;  %1509 = vmatprep.subr.bf16.mxu1 %v1614_v2  ;;  %v123_v7 = vpack.c.bf16 %v1847_v5, %v1842_v4  ;;  %v1859_v8 = vld [vmem:[%s2098_s28 + $0x18] sm:$0xff] }
  0x14   :  { %1501 = vmatprep.subr.bf16.mxu0 %v1615_v3  ;;  %v124_v9 = vpack.c.bf16 %v1859_v8, %v1852_v6 }
  0x15   :  { %1511 = vmatprep.mubr.msk.bf16.mxu1 %vm143_vm0, %v123_v7  ;;  %1503 = vmatprep.mubr.msk.bf16.mxu0 %vm143_vm0, %v123_v7 }
  0x16   :  { %1510 = vmatpush3.bf16.msra.mxu1 %v1614_v2 }
  0x17   :  { %1502 = vmatpush3.bf16.msra.mxu0 %v1615_v3 }
  0x19   :  { %1512 = vmatmul.mubr.msk.bf16.vlgmr.msra.gmra.mxu1 %vm143_vm0, %v124_v9 }
  0x1a   :  { %1504 = vmatmul.mubr.msk.bf16.vlgmr.msra.gmra.mxu0 %vm143_vm0, %v124_v9 }
  0x1b   :  { %1519 = vmatprep.mubr.msk.bf16.mxu0 %vm143_vm0, %v123_v7 }
  0x1c   :  { %29 = vsyncpa [#allocation3], 0  ;;  %v1616_v10 = vld [vmem:[%s2068_s8 + $0x8] sm:$0xff]   ;;  %v1617_v11 = vld [vmem:[%s2068_s8] sm:$0xff]   ;;  %v1702_v12 = vmov 0.0   ;;  %vm1703_vm1 = vmmov 0   ;;  %v445_v50 = vlaneseq }
  0x1d   :  { %1515 = vmatprep.subr.bf16.mxu0 %v1616_v10  ;;  %1523 = vmatprep.subr.bf16.mxu1 %v1702_v12  ;;  %s2099_s2 = sld [smem:[#allocation12_spill]]  ;;  %v1411_v38 = vld [vmem:[%s2069_s9] ss:$0 sm:$0xff]  ;;  %v1704_v48 = vmov 1966171168   ;;  %v1705_v59 = vmov 0  }
  0x1e   :  { %1516 = vmatpush3.bf16.msra.mxu0 %v1616_v10  ;;  %1525 = vmatprep.mubr.msk.bf16.mxu1 %vm1703_vm1, %v1702_v12  ;;  %s2100_s7 = sld [smem:[#allocation10_spill]]  ;;  %v443_v49 = vunpack.c.l.s4 %v1704_v48  ;;  %v446_v52 = vshrl.u32 %v445_v50, 7  ;;  %vm476_vm5 = vcmask 130048   ;;  %vm906_vm7 = vcmask 523264  }
  0x1f   :  { %1517 = vmatprep.subr.bf16.mxu0 %v1617_v11  ;;  %s2101_s4 = sld [smem:[#allocation6_spill]]  ;;  %vm1245_vm8 = vcmask 1041409   ;;  %vm1249_vm10 = vcmask 123904  }
  0x20   :  { %v444_v51 = vunpack.c.0.s8 %v443_v49  ;;  %v1907_v58 = vsub.s32 0, %v446_v52  ;;  %s2102_s5 = sld [smem:[#allocation13_spill]] }
  0x21   :  { %s2103_s8 = sld [smem:[#allocation8_spill]] }
  0x22   :  { %1518 = vmatpush3.bf16.msra.mxu0 %v1617_v11  ;;  %v1903_v55 = vsub.s32 %v444_v51, %v446_v52  ;;  %s2104_s6 = sld [smem:[#allocation7_spill]] }
  0x23   :  { %1529 = vmatprep.subr.bf16.mxu0 %v1702_v12  ;;  %v1406_v15 = vld [vmem:[%s2099_s2] ss:$0 sm:$0xff] }
  0x24   :  { %v1401_v26 = vld [vmem:[%s2100_s7] ss:$0 sm:$0xff] }
  0x25   :  { %1520 = vmatmul.mubr.msk.bf16.vlgmr.msra.gmra.mxu0 %vm143_vm0, %v124_v9  ;;  %v1418_v53 = vld.sshfl [vmem:[%s2101_s4] sm:$0x11 pattern:$0x75316420] }
  0x26   :  { %1531 = vmatprep.mubr.msk.bf16.mxu0 %vm1703_vm1, %v1702_v12  ;;  %v441_v54 = vcombine.high %v1418_v53, %v1418_v53  ;;  %v448_v57 = vrot.slane %v1418_v53, %v1903_v55 }
  0x28   :  { %v455_v56 = vrot.slane %v441_v54, %v1903_v55  ;;  %vm458_vm3 = vcmp.gt.f32.partialorder %v448_v57, 0.5  ;;  %v1619_v57 = vld [vmem:[%s2070_s10] sm:$0xff]  }
  0x29   :  { %v460_v61 = vsel %vm458_vm3, 1, %v1705_v59 }
  0x2a   :  { %vm459_vm2 = vcmp.gt.f32.partialorder %v455_v56, 0.5  ;;  %v465_v63 = vrot.slane %v460_v61, %v1907_v58  ;;  %v1618_v56 = vld [vmem:[%s2070_s10 + $0x8] sm:$0xff]  }
  0x2b   :  { %v461_v60 = vsel %vm459_vm2, 1, %v1705_v59 }
  0x2c   :  { %v469_v62 = vrot.slane %v461_v60, %v1907_v58  ;;  %vm470_vm6 = vcmp.eq.s32.totalorder %v465_v63, 1 }
  0x2e   :  { %vm471_vm4 = vcmp.eq.s32.totalorder %v469_v62, 1 }
  0xd9   :  { %v1513_v13 = vpop.f32.mrf.mxu1 }
  0xda   :  { %v1505_v14 = vpop.f32.mrf.mxu0  ;;  %v260_v19 = vadd.f32 %v1513_v13, %v1406_v15 }
  0xdb   :  { %v251_v16 = vpop.f32.mrf.mxu1  ;;  %v193_v30 = vadd.f32 %v1505_v14, %v1401_v26 }
  0xdc   :  { %v184_v17 = vpop.f32.mrf.mxu0  ;;  %v252_v23 = vadd.f32 %v1406_v15, %v251_v16 }
  0xdd   :  { %v1514_v18 = vpop.f32.mrf.mxu1  ;;  %v185_v33 = vadd.f32 %v1401_v26, %v184_v17 }
  0xde   :  { %v263_v20 = vadd.f32 %v1514_v18, %v1406_v15  ;;  %v1506_v21 = vpop.f32.mrf.mxu0 }
  0xdf   :  { %v254_v22 = vpop.f32.mrf.mxu1  ;;  %v196_v31 = vadd.f32 %v1506_v21, %v1401_v26 }
  0xe0   :  { %v336_v24 = vpack.c.bf16 %v263_v20, %v260_v19  ;;  %v255_v25 = vadd.f32 %v1406_v15, %v254_v22  ;;  %v187_v29 = vpop.f32.mrf.mxu0 }
  0xe1   :  { %v188_v34 = vadd.f32 %v1401_v26, %v187_v29  ;;  %v334_v35 = vpack.c.bf16 %v196_v31, %v193_v30 }
  0xe2   :  { %v335_v27 = vpack.c.bf16 %v255_v25, %v252_v23  ;;  %v390_v28 = vsel %vm143_vm0, %v336_v24, 0 }
  0xe3   :  { %1530 = vmatpush3.bf16.xpose.msra.mxu0 %v390_v28  ;;  %v333_v36 = vpack.c.bf16 %v188_v34, %v185_v33 }
  0xe4   :  { %v343_v32 = vsel %vm143_vm0, %v335_v27, 0  ;;  %1541 = vmatprep.subr.bf16.mxu0 %v1702_v12 }
  0xe5   :  { %1524 = vmatpush3.bf16.xpose.msra.mxu1 %v343_v32  ;;  %v1521_v37 = vpop.f32.mrf.mxu0 }
  0xe6   :  { %1535 = vmatprep.subr.bf16.mxu1 %v1702_v12  ;;  %v327_v40 = vadd.f32 %v1521_v37, %v1411_v38 }
  0xe7   :  { %v318_v39 = vpop.f32.mrf.mxu0 }
  0xe8   :  { %v319_v42 = vadd.f32 %v1411_v38, %v318_v39 }
  0xe9   :  { %v1522_v41 = vpop.f32.mrf.mxu0 }
  0xea   :  { %1532 = vmatmul.mubr.msk.bf16.vlgmr.msra.gmra.mxu0 %vm143_vm0, %v334_v35  ;;  %v330_v43 = vadd.f32 %v1522_v41, %v1411_v38 }
  0xeb   :  { %1543 = vmatprep.mubr.msk.bf16.mxu0 %vm1703_vm1, %v1702_v12  ;;  %v321_v44 = vpop.f32.mrf.mxu0 }
  0xec   :  { %1526 = vmatmul.mubr.msk.bf16.vlgmr.msra.gmra.mxu1 %vm143_vm0, %v333_v36  ;;  %v338_v45 = vpack.c.bf16 %v330_v43, %v327_v40  ;;  %v322_v46 = vadd.f32 %v1411_v38, %v321_v44 }
  0xed   :  { %1537 = vmatprep.mubr.msk.bf16.mxu1 %vm1703_vm1, %v1702_v12 }
  0xee   :  { %v337_v47 = vpack.c.bf16 %v322_v46, %v319_v42  ;;  %1542 = vmatpush3.bf16.msra.mxu0 %v338_v45 }
  0xf0   :  { %1536 = vmatpush3.bf16.msra.mxu1 %v337_v47 }
  0xf1   :  { %1547 = vmatprep.subr.bf16.mxu1 %v1618_v56 }
 0x1aa   :  { %v426_v0 = vpop.f32.mrf.mxu0 }
 0x1ab   :  { %v474_v1 = vsel %vm471_vm4, %v426_v0, -1e+09 }
 0x1ac   :  { %v379_v2 = vpop.f32.mrf.mxu1  ;;  %v1533_v3 = vpop.f32.mrf.mxu0  ;;  %v483_v7 = vsel %vm476_vm5, %v474_v1, -inf }
 0x1ad   :  { %v472_v9 = vsel %vm470_vm6, %v379_v2, -1e+09  ;;  %484 = vmax.xlane.f32.xlu1 %v483_v7 }
 0x1ae   :  { %v1527_v10 = vpop.f32.mrf.mxu1  ;;  %v429_v11 = vpop.f32.mrf.mxu0  ;;  %v477_v13 = vsel %vm476_vm5, %v472_v9, -inf }
 0x1af   :  { %v475_v14 = vsel %vm471_vm4, %v429_v11, -1e+09  ;;  %478 = vmax.xlane.f32.xlu0 %v477_v13  ;;  %v1421_v10 = vld [vmem:[%s2071_s11] ss:$0 sm:$0xff] }
 0x1b0   :  { %v382_v15 = vpop.f32.mrf.mxu1  ;;  %v1534_v16 = vpop.f32.mrf.mxu0  ;;  %v486_v17 = vsel %vm476_vm5, %v475_v14, -inf }
 0x1b1   :  { %v473_v18 = vsel %vm470_vm6, %v382_v15, -1e+09  ;;  %487 = vmax.xlane.f32.xlu1 %v486_v17 }
 0x1b2   :  { %v1528_v19 = vpop.f32.mrf.mxu1  ;;  %v480_v20 = vsel %vm476_vm5, %v473_v18, -inf }
 0x1b3   :  { %481 = vmax.xlane.f32.xlu0 %v480_v20 }
 0x236   :  { %v485_v21 = vpop.xlane.xlu1 %484 }
 0x237   :  { %v491_v22 = vsub.f32 %v474_v1, %v485_v21 }
 0x238   :  { %v479_v23 = vpop.xlane.xlu0 %478 }
 0x239   :  { %v489_v24 = vsub.f32 %v472_v9, %v479_v23  ;;  %v497_v26 = vmul.f32 1.442695, %v491_v22 }
 0x23a   :  { %v488_v25 = vpop.xlane.xlu1 %487 }
 0x23b   :  { %v493_v27 = vmul.f32 1.442695, %v489_v24  ;;  %v492_v28 = vsub.f32 %v475_v14, %v488_v25 }
 0x23c   :  { %v482_v29 = vpop.xlane.xlu0 %481 }
 0x23d   :  { %1628 = vpow2.f32 %v493_v27  ;;  %v490_v30 = vsub.f32 %v473_v18, %v482_v29  ;;  %v499_v31 = vmul.f32 1.442695, %v492_v28 }
 0x23e   :  { %1630 = vpow2.f32 %v497_v26 }
 0x23f   :  { %v495_v32 = vmul.f32 1.442695, %v490_v30 }
 0x241   :  { %1632 = vpow2.f32 %v495_v32 }
 0x242   :  { %1634 = vpow2.f32 %v499_v31 }
 0x24a   :  { %v1629_v33 = vpop.eup %1628 }
 0x24b   :  { %v501_v34 = vsel %vm476_vm5, %v1629_v33, 0.0  ;;  %v1631_v35 = vpop.eup %1630 }
 0x24c   :  { %502 = vadd.xlane.f32.xlu0 %v501_v34  ;;  %v507_v37 = vsel %vm476_vm5, %v1631_v35, 0.0 }
 0x24e   :  { %v1633_v36 = vpop.eup %1632 }
 0x24f   :  { %v504_v38 = vsel %vm476_vm5, %v1633_v36, 0.0  ;;  %v1635_v39 = vpop.eup %1634 }
 0x250   :  { %508 = vadd.xlane.f32.xlu0 %v507_v37  ;;  %505 = vadd.xlane.f32.xlu1 %v504_v38  ;;  %v510_v40 = vsel %vm476_vm5, %v1635_v39, 0.0 }
 0x254   :  { %511 = vadd.xlane.f32.xlu1 %v510_v40 }
 0x2d5   :  { %v503_v41 = vpop.xlane.xlu0 %502 }
 0x2d6   :  { %1636 = vrcp.f32 %v503_v41 }
 0x2d9   :  { %v506_v42 = vpop.xlane.xlu1 %505  ;;  %v509_v43 = vpop.xlane.xlu0 %508 }
 0x2da   :  { %1638 = vrcp.f32 %v506_v42 }
 0x2db   :  { %1640 = vrcp.f32 %v509_v43  ;;  %v1620_v43 = vld [vmem:[%s2074_s14 + $0x8] sm:$0xff]  }
 0x2dc   :  { %1555 = vmatprep.subr.bf16.mxu0 %v1620_v43 }
 0x2dd   :  { %v512_v44 = vpop.xlane.xlu1 %511 }
 0x2de   :  { %1642 = vrcp.f32 %v512_v44  ;;  %v1621_v44 = vld [vmem:[%s2074_s14] sm:$0xff]  }
 0x2e3   :  { %v1637_v45 = vpop.eup %1636 }
 0x2e4   :  { %v514_v47 = vmul.f32 %v1637_v45, %v1629_v33 }
 0x2e7   :  { %v1639_v46 = vpop.eup %1638 }
 0x2e8   :  { %v516_v48 = vmul.f32 %v1639_v46, %v1633_v36  ;;  %v1641_v49 = vpop.eup %1640 }
 0x2e9   :  { %v518_v52 = vmul.f32 %v1641_v49, %v1631_v35 }
 0x2ea   :  { %v521_v50 = vpack.c.bf16 %v516_v48, %v514_v47 }
 0x2eb   :  { %v1643_v51 = vpop.eup %1642 }
 0x2ec   :  { %1538 = vmatmul.mubr.msk.bf16.vlgmr.msra.gmra.mxu1 %vm476_vm5, %v521_v50  ;;  %v520_v53 = vmul.f32 %v1643_v51, %v1635_v39 }
 0x2ed   :  { %1548 = vmatpush3.bf16.msra.mxu1 %v1618_v56 }
 0x2ee   :  { %v522_v54 = vpack.c.bf16 %v520_v53, %v518_v52  ;;  %1549 = vmatprep.subr.bf16.mxu1 %v1619_v57 }
 0x2f0   :  { %1544 = vmatmul.mubr.msk.bf16.vlgmr.msra.gmra.mxu0 %vm476_vm5, %v522_v54 }
 0x2f1   :  { %1550 = vmatpush3.bf16.msra.mxu1 %v1619_v57  ;;  %1556 = vmatpush3.bf16.msra.mxu0 %v1620_v43 }
 0x2f2   :  { %1557 = vmatprep.subr.bf16.mxu0 %v1621_v44 }
 0x2f5   :  { %1558 = vmatpush3.bf16.msra.mxu0 %v1621_v44 }
 0x3ac   :  { %v560_v59 = vpop.f32.mrf.mxu1 }
 0x3ae   :  { %v1539_v60 = vpop.f32.mrf.mxu1 }
 0x3b0   :  { %v563_v61 = vpop.f32.mrf.mxu1  ;;  %v604_v62 = vpop.f32.mrf.mxu0 }
 0x3b1   :  { %v611_v63 = vpack.c.bf16 %v563_v61, %v560_v59  ;;  %v1426_v61 = vld [vmem:[%s2072_s12] ss:$0 sm:$0xff]  ;;  %s1706_s12 = smov [#allocation2]  }
 0x3b2   :  { %v1540_v0 = vpop.f32.mrf.mxu1  ;;  %v1545_v1 = vpop.f32.mrf.mxu0 }
 0x3b3   :  { %1551 = vmatprep.mubr.msk.bf16.mxu1 %vm143_vm0, %v611_v63 }
 0x3b4   :  { %v607_v2 = vpop.f32.mrf.mxu0 }
 0x3b5   :  { %v612_v3 = vpack.c.bf16 %v607_v2, %v604_v62 }
 0x3b6   :  { %v1546_v7 = vpop.f32.mrf.mxu0 }
 0x3b7   :  { %1552 = vmatmul.mubr.msk.bf16.vlgmr.msra.gmra.mxu1 %vm143_vm0, %v612_v3  ;;  %v1427_v3 = vld [vmem:[%s2073_s13] ss:$0 sm:$0xff]  ;;  %s1391_s13 = sshll.u32 %s1706_s12, 4  ;;  %s1392_s13 = int_to_ptr.vmem [resolvable:$true] %s1391_s13 }
 0x3b8   :  { %s1680_s27 = scalar_lea.vmem %s1392_s13, 32  ;;  %p1685_p1 = scmp.lt.s32.totalorder %s1392_s13, %s1392_s13 }
 0x3b9   :  { %p1681_p0 = scmp.ne.s32.totalorder %s1392_s13, %s1680_s27  ;;  %p1686_p2 = scmp.lt.s32.totalorder %s1680_s27, %s1680_s27 }
 0x3bb   :  { %p1687_p3 = por %p1686_p2, %p1685_p1 }
 0x3bd   :  { %p1688_p4 = pnand %p1687_p3, %p1681_p0 }
 0x477   :  { %v1553_v9 = vpop.f32.mrf.mxu1 }
 0x478   :  { %v680_v13 = vadd.f32 %v1553_v9, %v1421_v10 }
 0x479   :  { %v671_v11 = vpop.f32.mrf.mxu1 }
 0x47a   :  { %v672_v14 = vadd.f32 %v1421_v10, %v671_v11  ;;  %v688_v21 = vadd.f32 %v680_v13, %v1852_v6 }
 0x47b   :  { %v1554_v15 = vpop.f32.mrf.mxu1 }
 0x47c   :  { %v686_v16 = vadd.f32 %v672_v14, %v1842_v4  ;;  %v683_v18 = vadd.f32 %v1554_v15, %v1421_v10  ;;  %v696_v24 = vsel %vm143_vm0, %v688_v21, 0.0 }
 0x47d   :  { %v674_v17 = vpop.f32.mrf.mxu1 }
 0x47e   :  { %v675_v19 = vadd.f32 %v1421_v10, %v674_v17  ;;  %v690_v20 = vsel %vm143_vm0, %v686_v16, 0.0  ;;  %v689_v25 = vadd.f32 %v683_v18, %v1859_v8 }
 0x47f   :  { %691 = vadd.xlane.f32.xlu0 %v690_v20  ;;  %v1622_v20 = vld [vmem:[%s2076_s16 + $0x18] sm:$0xff]  }
 0x480   :  { %v687_v22 = vadd.f32 %v675_v19, %v1847_v5  ;;  %v699_v4 = vsel %vm143_vm0, %v689_v25, 0.0  ;;  %1563 = vmatprep.subr.bf16.mxu1 %v1622_v20 }
 0x481   :  { %1564 = vmatpush3.bf16.msra.mxu1 %v1622_v20 }
 0x482   :  { %v693_v23 = vsel %vm143_vm0, %v687_v22, 0.0 }
 0x483   :  { %694 = vadd.xlane.f32.xlu1 %v693_v23  ;;  %697 = vadd.xlane.f32.xlu0 %v696_v24  ;;  %v1625_v23 = vld [vmem:[%s2076_s16] sm:$0xff]  }
 0x484   :  { %v1428_v24 = vld [vmem:[%s2075_s15] ss:$0 sm:$0xff] }
 0x487   :  { %700 = vadd.xlane.f32.xlu1 %v699_v4 }
 0x508   :  { %v692_v26 = vpop.xlane.xlu0 %691 }
 0x509   :  { %v703_v27 = vmul.f32 0.03125, %v692_v26 }
 0x50b   :  { %v707_v28 = vsub.f32 %v686_v16, %v703_v27 }
 0x50c   :  { %v695_v29 = vpop.xlane.xlu1 %694  ;;  %v698_v30 = vpop.xlane.xlu0 %697 }
 0x50d   :  { %v704_v6 = vmul.f32 0.03125, %v695_v29  ;;  %v705_v31 = vmul.f32 0.03125, %v698_v30  ;;  %v711_v32 = vmul.f32 %v707_v28, %v707_v28 }
 0x50f   :  { %v708_v5 = vsub.f32 %v687_v22, %v704_v6  ;;  %v709_v33 = vsub.f32 %v688_v21, %v705_v31  ;;  %v715_v34 = vsel %vm143_vm0, %v711_v32, 0.0  ;;  %v1623_v21 = vld [vmem:[%s2076_s16 + $0x10] sm:$0xff]   ;;  %v1624_v22 = vld [vmem:[%s2076_s16 + $0x8] sm:$0xff]  }
 0x510   :  { %v701_v35 = vpop.xlane.xlu1 %700  ;;  %716 = vadd.xlane.f32.xlu0 %v715_v34  ;;  %1565 = vmatprep.subr.bf16.mxu1 %v1623_v21 }
 0x511   :  { %v706_v8 = vmul.f32 0.03125, %v701_v35  ;;  %v712_v36 = vmul.f32 %v708_v5, %v708_v5  ;;  %v713_v37 = vmul.f32 %v709_v33, %v709_v33  ;;  %1566 = vmatpush3.bf16.msra.mxu1 %v1623_v21 }
 0x512   :  { %1567 = vmatprep.subr.bf16.mxu1 %v1624_v22 }
 0x513   :  { %v710_v38 = vsub.f32 %v689_v25, %v706_v8  ;;  %v718_v39 = vsel %vm143_vm0, %v712_v36, 0.0  ;;  %v721_v40 = vsel %vm143_vm0, %v713_v37, 0.0 }
 0x514   :  { %719 = vadd.xlane.f32.xlu1 %v718_v39  ;;  %722 = vadd.xlane.f32.xlu0 %v721_v40 }
 0x515   :  { %v714_v41 = vmul.f32 %v710_v38, %v710_v38  ;;  %1568 = vmatpush3.bf16.msra.mxu1 %v1624_v22 }
 0x516   :  { %1569 = vmatprep.subr.bf16.mxu1 %v1625_v23 }
 0x517   :  { %v724_v42 = vsel %vm143_vm0, %v714_v41, 0.0 }
 0x518   :  { %725 = vadd.xlane.f32.xlu1 %v724_v42 }
 0x519   :  { %1570 = vmatpush3.bf16.msra.mxu1 %v1625_v23 }
 0x51a   :  { %1589 = vmatprep.subr.bf16.mxu1 %v1702_v12 }
 0x599   :  { %v717_v45 = vpop.xlane.xlu0 %716 }
 0x59a   :  { %v727_v46 = vmul.f32 0.03125, %v717_v45 }
 0x59c   :  { %v731_v47 = vadd.f32 1e-12, %v727_v46 }
 0x59d   :  { %v720_v48 = vpop.xlane.xlu1 %719  ;;  %v723_v49 = vpop.xlane.xlu0 %722 }
 0x59e   :  { %1644 = vrsqrt.f32 %v731_v47  ;;  %v728_v50 = vmul.f32 0.03125, %v720_v48  ;;  %v729_v51 = vmul.f32 0.03125, %v723_v49 }
 0x5a0   :  { %v732_v52 = vadd.f32 1e-12, %v728_v50  ;;  %v733_v53 = vadd.f32 1e-12, %v729_v51 }
 0x5a1   :  { %v726_v54 = vpop.xlane.xlu1 %725 }
 0x5a2   :  { %1646 = vrsqrt.f32 %v732_v52  ;;  %v730_v56 = vmul.f32 0.03125, %v726_v54 }
 0x5a3   :  { %1648 = vrsqrt.f32 %v733_v53 }
 0x5a4   :  { %v734_v57 = vadd.f32 1e-12, %v730_v56 }
 0x5a6   :  { %1650 = vrsqrt.f32 %v734_v57 }
 0x5ab   :  { %v1645_v59 = vpop.eup %1644 }
 0x5ac   :  { %v739_v60 = vmul.f32 %v1645_v59, %v707_v28 }
 0x5ae   :  { %v749_v1 = vmul.f32 %v1426_v61, %v739_v60 }
 0x5af   :  { %v1647_v62 = vpop.eup %1646 }
 0x5b0   :  { %v1649_v63 = vpop.eup %1648  ;;  %v740_v0 = vmul.f32 %v1647_v62, %v708_v5  ;;  %v1956_v11 = vadd.f32 %v1427_v3, %v749_v1 }
 0x5b1   :  { %v741_v2 = vmul.f32 %v1649_v63, %v709_v33 }
 0x5b2   :  { %v750_v7 = vmul.f32 %v1426_v61, %v740_v0 }
 0x5b3   :  { %v1651_v9 = vpop.eup %1650  ;;  %v751_v14 = vmul.f32 %v1426_v61, %v741_v2 }
 0x5b4   :  { %v742_v10 = vmul.f32 %v1651_v9, %v710_v38  ;;  %v1958_v13 = vadd.f32 %v1427_v3, %v750_v7 }
 0x5b5   :  { %v1963_v17 = vadd.f32 %v1427_v3, %v751_v14 }
 0x5b6   :  { %v763_v15 = vpack.c.bf16 %v1958_v13, %v1956_v11  ;;  %v752_v16 = vmul.f32 %v1426_v61, %v742_v10  ;;  %v1433_v10 = vld [vmem:[%s2077_s17] ss:$0 sm:$0xff] }
 0x5b8   :  { %1559 = vmatprep.mubr.msk.bf16.mxu0 %vm143_vm0, %v763_v15  ;;  %v1965_v18 = vadd.f32 %v1427_v3, %v752_v16 }
 0x5ba   :  { %v764_v19 = vpack.c.bf16 %v1965_v18, %v1963_v17 }
 0x5bc   :  { %1560 = vmatmul.mubr.msk.bf16.vlgmr.msra.gmra.mxu0 %vm143_vm0, %v764_v19 }
 0x67c   :  { %v1561_v25 = vpop.f32.mrf.mxu0 }
 0x67d   :  { %v832_v4 = vadd.f32 %v1561_v25, %v1428_v24 }
 0x67e   :  { %v823_v26 = vpop.f32.mrf.mxu0 }
 0x67f   :  { %v840_v27 = vmul.f32 %v832_v4, %v832_v4  ;;  %v824_v28 = vadd.f32 %v1428_v24, %v823_v26 }
 0x680   :  { %v1562_v29 = vpop.f32.mrf.mxu0 }
 0x681   :  { %v844_v30 = vmul.f32 %v840_v27, %v832_v4  ;;  %v838_v6 = vmul.f32 %v824_v28, %v824_v28  ;;  %v835_v31 = vadd.f32 %v1562_v29, %v1428_v24 }
 0x682   :  { %v826_v32 = vpop.f32.mrf.mxu0 }
 0x683   :  { %v848_v5 = vmul.f32 0.044715, %v844_v30  ;;  %v842_v33 = vmul.f32 %v838_v6, %v824_v28  ;;  %v841_v34 = vmul.f32 %v835_v31, %v835_v31  ;;  %v827_v35 = vadd.f32 %v1428_v24, %v826_v32 }
 0x685   :  { %v852_v8 = vadd.f32 %v848_v5, %v832_v4  ;;  %v846_v36 = vmul.f32 0.044715, %v842_v33  ;;  %v845_v37 = vmul.f32 %v841_v34, %v835_v31  ;;  %v839_v38 = vmul.f32 %v827_v35, %v827_v35 }
 0x687   :  { %v856_v39 = vmul.f32 0.7978846, %v852_v8  ;;  %v850_v40 = vadd.f32 %v846_v36, %v824_v28  ;;  %v849_v41 = vmul.f32 0.044715, %v845_v37  ;;  %v843_v42 = vmul.f32 %v839_v38, %v827_v35 }
 0x689   :  { %v854_v43 = vmul.f32 0.7978846, %v850_v40  ;;  %v853_v44 = vadd.f32 %v849_v41, %v835_v31  ;;  %v847_v45 = vmul.f32 0.044715, %v843_v42  ;;  %1652 = vtanh.f32 %v856_v39 }
 0x68b   :  { %1654 = vtanh.f32 %v854_v43  ;;  %v857_v46 = vmul.f32 0.7978846, %v853_v44  ;;  %v851_v47 = vadd.f32 %v847_v45, %v827_v35  ;;  %v1626_v43 = vld [vmem:[%s2080_s20 + $0x8] sm:$0xff]   ;;  %v1627_v44 = vld [vmem:[%s2080_s20] sm:$0xff]  }
 0x68c   :  { %1575 = vmatprep.subr.bf16.mxu0 %v1626_v43 }
 0x68d   :  { %1656 = vtanh.f32 %v857_v46  ;;  %v855_v48 = vmul.f32 0.7978846, %v851_v47  ;;  %1576 = vmatpush3.bf16.msra.mxu0 %v1626_v43 }
 0x68e   :  { %1577 = vmatprep.subr.bf16.mxu0 %v1627_v44 }
 0x68f   :  { %1658 = vtanh.f32 %v855_v48 }
 0x691   :  { %1578 = vmatpush3.bf16.msra.mxu0 %v1627_v44 }
 0x692   :  { %1583 = vmatprep.subr.bf16.mxu0 %v1702_v12 }
 0x696   :  { %v1653_v49 = vpop.eup %1652 }
 0x697   :  { %v864_v53 = vadd.f32 1.0, %v1653_v49 }
 0x698   :  { %v1655_v50 = vpop.eup %1654 }
 0x699   :  { %v862_v51 = vadd.f32 1.0, %v1655_v50  ;;  %v868_v61 = vmul.f32 0.5, %v864_v53 }
 0x69a   :  { %v1657_v52 = vpop.eup %1656 }
 0x69b   :  { %v865_v54 = vadd.f32 1.0, %v1657_v52  ;;  %v866_v57 = vmul.f32 0.5, %v862_v51  ;;  %v872_v2 = vmul.f32 %v868_v61, %v832_v4  ;;  %v1440_v61 = vld [vmem:[%s2102_s5] ss:$0 sm:$0xff] }
 0x69c   :  { %v1659_v56 = vpop.eup %1658 }
 0x69d   :  { %v869_v59 = vmul.f32 0.5, %v865_v54  ;;  %v863_v60 = vadd.f32 1.0, %v1659_v56  ;;  %v870_v0 = vmul.f32 %v866_v57, %v824_v28 }
 0x69f   :  { %v867_v62 = vmul.f32 0.5, %v863_v60  ;;  %v873_v63 = vmul.f32 %v869_v59, %v835_v31 }
 0x6a1   :  { %v871_v1 = vmul.f32 %v867_v62, %v827_v35  ;;  %v875_v7 = vpack.c.bf16 %v873_v63, %v872_v2 }
 0x6a3   :  { %v874_v3 = vpack.c.bf16 %v871_v1, %v870_v0 }
 0x6a5   :  { %1571 = vmatprep.mubr.msk.bf16.mxu1 %vm906_vm7, %v874_v3  ;;  %v1441_v3 = vld [vmem:[%s2079_s19] ss:$0 sm:$0xff] }
 0x6a6   :  { %1572 = vmatmul.mubr.msk.bf16.vlgmr.msra.gmra.mxu1 %vm906_vm7, %v875_v7 }
 0x6a7   :  { %1591 = vmatprep.mubr.msk.bf16.mxu1 %vm1703_vm1, %v1702_v12 }
 0x766   :  { %v1573_v9 = vpop.f32.mrf.mxu1 }
 0x767   :  { %v956_v15 = vadd.f32 %v1573_v9, %v1433_v10 }
 0x768   :  { %v947_v14 = vpop.f32.mrf.mxu1 }
 0x769   :  { %v948_v16 = vadd.f32 %v1433_v10, %v947_v14  ;;  %v964_v25 = vadd.f32 %v956_v15, %v1963_v17 }
 0x76a   :  { %v1574_v19 = vpop.f32.mrf.mxu1 }
 0x76b   :  { %v962_v20 = vadd.f32 %v948_v16, %v1956_v11  ;;  %v959_v22 = vadd.f32 %v1574_v19, %v1433_v10  ;;  %v972_v27 = vsel %vm143_vm0, %v964_v25, 0.0 }
 0x76c   :  { %v950_v21 = vpop.f32.mrf.mxu1 }
 0x76d   :  { %v951_v23 = vadd.f32 %v1433_v10, %v950_v21  ;;  %v966_v24 = vsel %vm143_vm0, %v962_v20, 0.0  ;;  %v965_v28 = vadd.f32 %v959_v22, %v1965_v18 }
 0x76e   :  { %967 = vadd.xlane.f32.xlu0 %v966_v24  ;;  %v1442_v24 = vld [vmem:[%s2081_s21] ss:$0 sm:$0xff] }
 0x76f   :  { %v963_v4 = vadd.f32 %v951_v23, %v1958_v13  ;;  %v975_v11 = vsel %vm143_vm0, %v965_v28, 0.0 }
 0x771   :  { %v969_v26 = vsel %vm143_vm0, %v963_v4, 0.0 }
 0x772   :  { %970 = vadd.xlane.f32.xlu1 %v969_v26  ;;  %973 = vadd.xlane.f32.xlu0 %v972_v27 }
 0x776   :  { %976 = vadd.xlane.f32.xlu1 %v975_v11  ;;  %v1119_v11 = vld [vmem:[%s2103_s8] sm:$0x3] }
 0x7f7   :  { %v968_v29 = vpop.xlane.xlu0 %967 }
 0x7f8   :  { %v978_v30 = vmul.f32 0.03125, %v968_v29 }
 0x7fa   :  { %v982_v6 = vsub.f32 %v962_v20, %v978_v30 }
 0x7fb   :  { %v971_v31 = vpop.xlane.xlu1 %970  ;;  %v974_v32 = vpop.xlane.xlu0 %973 }
 0x7fc   :  { %v979_v17 = vmul.f32 0.03125, %v971_v31  ;;  %v980_v5 = vmul.f32 0.03125, %v974_v32  ;;  %v986_v33 = vmul.f32 %v982_v6, %v982_v6  ;;  %v1120_v31 = vpack.c.bf16 %v1119_v11, %v1119_v11 }
 0x7fe   :  { %v983_v13 = vsub.f32 %v963_v4, %v979_v17  ;;  %v984_v34 = vsub.f32 %v964_v25, %v980_v5  ;;  %v990_v35 = vsel %vm143_vm0, %v986_v33, 0.0  ;;  %v1128_v32 = vrot.slane %v1120_v31, %v1903_v55 }
 0x7ff   :  { %v977_v8 = vpop.xlane.xlu1 %976  ;;  %991 = vadd.xlane.f32.xlu0 %v990_v35 }
 0x800   :  { %v981_v18 = vmul.f32 0.03125, %v977_v8  ;;  %v987_v36 = vmul.f32 %v983_v13, %v983_v13  ;;  %v988_v37 = vmul.f32 %v984_v34, %v984_v34  ;;  %v1135_v17 = vrot.slane %v1128_v32, %v1903_v55 }
 0x802   :  { %v985_v38 = vsub.f32 %v965_v28, %v981_v18  ;;  %v993_v39 = vsel %vm143_vm0, %v987_v36, 0.0  ;;  %v996_v40 = vsel %vm143_vm0, %v988_v37, 0.0  ;;  %v1137_v33 = vunpack.i.h.s16 %v1135_v17 }
 0x803   :  { %994 = vadd.xlane.f32.xlu1 %v993_v39  ;;  %997 = vadd.xlane.f32.xlu0 %v996_v40  ;;  %v1447_v39 = vpack.i.b16 %v1135_v17, %v1135_v17 }
 0x804   :  { %v989_v41 = vmul.f32 %v985_v38, %v985_v38  ;;  %v1189_v37 = vpack.i.b16 %v1137_v33, %v1137_v33 }
 0x806   :  { %v999_v42 = vsel %vm143_vm0, %v989_v41, 0.0  ;;  %v1193_v40 = vrot.slane %v1189_v37, %v1907_v58  ;;  %v1142_v41 = vrot.slane %v1447_v39, %v1907_v58 }
 0x807   :  { %1000 = vadd.xlane.f32.xlu1 %v999_v42  ;;  %v1240_v42 = vld [vmem:[%s2104_s6] sm:$0x3] }
 0x808   :  { %vm1241_vm9 = vcmp.gt.f32.partialorder %v1240_v42, 0.5 }
 0x888   :  { %v992_v45 = vpop.xlane.xlu0 %991 }
 0x889   :  { %v1002_v46 = vmul.f32 0.03125, %v992_v45 }
 0x88b   :  { %v1006_v47 = vadd.f32 1e-12, %v1002_v46 }
 0x88c   :  { %v995_v48 = vpop.xlane.xlu1 %994  ;;  %v998_v49 = vpop.xlane.xlu0 %997 }
 0x88d   :  { %1660 = vrsqrt.f32 %v1006_v47  ;;  %v1003_v50 = vmul.f32 0.03125, %v995_v48  ;;  %v1004_v51 = vmul.f32 0.03125, %v998_v49 }
 0x88f   :  { %v1007_v52 = vadd.f32 1e-12, %v1003_v50  ;;  %v1008_v53 = vadd.f32 1e-12, %v1004_v51 }
 0x890   :  { %v1001_v54 = vpop.xlane.xlu1 %1000 }
 0x891   :  { %1662 = vrsqrt.f32 %v1007_v52  ;;  %v1005_v56 = vmul.f32 0.03125, %v1001_v54 }
 0x892   :  { %1664 = vrsqrt.f32 %v1008_v53 }
 0x893   :  { %v1009_v57 = vadd.f32 1e-12, %v1005_v56 }
 0x895   :  { %1666 = vrsqrt.f32 %v1009_v57 }
 0x89a   :  { %v1661_v59 = vpop.eup %1660 }
 0x89b   :  { %v1014_v60 = vmul.f32 %v1661_v59, %v982_v6 }
 0x89d   :  { %v1024_v1 = vmul.f32 %v1440_v61, %v1014_v60 }
 0x89e   :  { %v1663_v62 = vpop.eup %1662 }
 0x89f   :  { %v1665_v63 = vpop.eup %1664  ;;  %v1015_v0 = vmul.f32 %v1663_v62, %v983_v13  ;;  %v1034_v14 = vadd.f32 %v1441_v3, %v1024_v1 }
 0x8a0   :  { %v1016_v2 = vmul.f32 %v1665_v63, %v984_v34 }
 0x8a1   :  { %v1025_v7 = vmul.f32 %v1440_v61, %v1015_v0 }
 0x8a2   :  { %v1667_v9 = vpop.eup %1666  ;;  %v1026_v16 = vmul.f32 %v1440_v61, %v1016_v2 }
 0x8a3   :  { %v1017_v10 = vmul.f32 %v1667_v9, %v985_v38  ;;  %v1035_v15 = vadd.f32 %v1441_v3, %v1025_v7 }
 0x8a4   :  { %v1036_v21 = vadd.f32 %v1441_v3, %v1026_v16 }
 0x8a5   :  { %v1038_v19 = vpack.c.bf16 %v1035_v15, %v1034_v14  ;;  %v1027_v20 = vmul.f32 %v1440_v61, %v1017_v10 }
 0x8a7   :  { %1579 = vmatprep.mubr.msk.bf16.mxu0 %vm143_vm0, %v1038_v19  ;;  %v1037_v22 = vadd.f32 %v1441_v3, %v1027_v20 }
 0x8a9   :  { %v1039_v23 = vpack.c.bf16 %v1037_v22, %v1036_v21 }
 0x8ab   :  { %1580 = vmatmul.mubr.msk.bf16.vlgmr.msra.gmra.mxu0 %vm143_vm0, %v1039_v23 }
 0x8ac   :  { %1585 = vmatprep.mubr.msk.bf16.mxu0 %vm1703_vm1, %v1702_v12 }
 0x96b   :  { %v1581_v25 = vpop.f32.mrf.mxu0 }
 0x96c   :  { %v1107_v4 = vadd.f32 %v1581_v25, %v1442_v24 }
 0x96d   :  { %v1098_v26 = vpop.f32.mrf.mxu0 }
 0x96e   :  { %v1099_v27 = vadd.f32 %v1442_v24, %v1098_v26  ;;  %1668 = vtanh.f32 %v1107_v4 }
 0x96f   :  { %v1582_v28 = vpop.f32.mrf.mxu0 }
 0x970   :  { %v1110_v29 = vadd.f32 %v1582_v28, %v1442_v24 }
 0x971   :  { %v1101_v30 = vpop.f32.mrf.mxu0 }
 0x972   :  { %1670 = vtanh.f32 %v1110_v29  ;;  %v1102_v6 = vadd.f32 %v1442_v24, %v1101_v30 }
 0x973   :  { %1672 = vtanh.f32 %v1099_v27 }
 0x974   :  { %1674 = vtanh.f32 %v1102_v6 }
 0x97b   :  { %v1669_v5 = vpop.eup %1668 }
 0x97f   :  { %v1671_v13 = vpop.eup %1670 }
 0x980   :  { %v1673_v34 = vpop.eup %1672  ;;  %v1118_v35 = vpack.c.bf16 %v1671_v13, %v1669_v5 }
 0x981   :  { %v1675_v8 = vpop.eup %1674 }
 0x982   :  { %v1198_v18 = vsel %vm143_vm0, %v1118_v35, 0  ;;  %v1117_v36 = vpack.c.bf16 %v1675_v8, %v1673_v34 }
 0x983   :  { %1590 = vmatpush3.bf16.xpose.msra.mxu1 %v1198_v18 }
 0x984   :  { %v1147_v38 = vsel %vm143_vm0, %v1117_v36, 0  ;;  %1601 = vmatprep.subr.bf16.mxu1 %v1702_v12 }
 0x985   :  { %1584 = vmatpush3.bf16.xpose.msra.mxu0 %v1147_v38 }
 0x986   :  { %1595 = vmatprep.subr.bf16.mxu0 %v1702_v12 }
 0x98a   :  { %1592 = vmatmul.mubr.msk.bf16.vlgmr.msra.gmra.mxu1 %vm143_vm0, %v1193_v40 }
 0x98b   :  { %1602 = vmatpush3.bf16.msra.mxu1 %v1039_v23  ;;  %1603 = vmatprep.mubr.msk.bf16.mxu1 %vm1703_vm1, %v1702_v12 }
 0x98c   :  { %1586 = vmatmul.mubr.msk.bf16.vlgmr.msra.gmra.mxu0 %vm143_vm0, %v1142_v41 }
 0x98d   :  { %1596 = vmatpush3.bf16.msra.mxu0 %v1038_v19  ;;  %1597 = vmatprep.mubr.msk.bf16.mxu0 %vm1703_vm1, %v1702_v12 }
 0xa4a   :  { %v1234_v43 = vpop.f32.mrf.mxu1 }
 0xa4b   :  { %v1244_v44 = vrot.slane %v1234_v43, 7 }
 0xa4c   :  { %v1183_v45 = vpop.f32.mrf.mxu0  ;;  %v1593_v46 = vpop.f32.mrf.mxu1 }
 0xa4d   :  { %v1246_v47 = vsel %vm1245_vm8, %v1244_v44, %v1183_v45 }
 0xa4e   :  { %v1587_v48 = vpop.f32.mrf.mxu0  ;;  %v1237_v49 = vpop.f32.mrf.mxu1  ;;  %v1248_v50 = vsel %vm1241_vm9, %v1246_v47, -1e+09 }
 0xa4f   :  { %v1250_v51 = vsel %vm1249_vm10, %v1248_v50, -inf }
 0xa50   :  { %v1594_v52 = vpop.f32.mrf.mxu1  ;;  %1251 = vmax.xlane.f32.xlu0 %v1250_v51  ;;  %v1186_v12 = vpop.f32.mrf.mxu0 }
 0xa52   :  { %v1588_v53 = vpop.f32.mrf.mxu0 }
 0xad9   :  { %v1252_v54 = vpop.xlane.xlu0 %1251 }
 0xada   :  { %v1253_v56 = vsub.f32 %v1248_v50, %v1252_v54 }
 0xadc   :  { %v1254_v57 = vmul.f32 1.442695, %v1253_v56 }
 0xade   :  { %1676 = vpow2.f32 %v1254_v57 }
 0xaeb   :  { %v1677_v59 = vpop.eup %1676 }
 0xaec   :  { %v1256_v60 = vsel %vm1249_vm10, %v1677_v59, 0.0 }
 0xaed   :  { %1257 = vadd.xlane.f32.xlu1 %v1256_v60 }
 0xb76   :  { %v1258_v61 = vpop.xlane.xlu1 %1257 }
 0xb77   :  { %1678 = vrcp.f32 %v1258_v61 }
 0xb84   :  { %v1679_v62 = vpop.eup %1678 }
 0xb85   :  { %v1260_v63 = vmul.f32 %v1679_v62, %v1677_v59 }
 0xb87   :  { %v1261_v0 = vpack.c.bf16 %v1260_v63, %v1260_v63  ;;  %1382 = vst.msk [vmem:[#allocation2] sm:$0x3] %vm1249_vm10, %v1260_v63 }
 0xb89   :  { %v1269_v1 = vrot.slane %v1261_v0, %v1903_v55 }
 0xb8b   :  { %v1276_v2 = vrot.slane %v1269_v1, %v1903_v55 }
 0xb8d   :  { %v1450_v3 = vpack.i.b16 %v1276_v2, %v1276_v2  ;;  %v1278_v7 = vunpack.i.h.s16 %v1276_v2 }
 0xb8f   :  { %v1283_v9 = vrot.slane %v1450_v3, %v1907_v58  ;;  %v1327_v10 = vpack.i.b16 %v1278_v7, %v1278_v7 }
 0xb91   :  { %1598 = vmatmul.mubr.msk.bf16.vlgmr.msra.gmra.mxu0 %vm476_vm5, %v1283_v9  ;;  %v1331_v14 = vrot.slane %v1327_v10, %v1907_v58 }
 0xb93   :  { %1604 = vmatmul.mubr.msk.bf16.vlgmr.msra.gmra.mxu1 %vm476_vm5, %v1331_v14 }
 0xb94   :  { %1691 = shalt.err (!%p1688_p4)
}
 0xb95   :  { %1394 = dma.vmem_to_hbm [thread:$0]  %s1392_s13, 32, %s2083_s23, [#allocation3]   ;;  %vm1380_vm11 = vcmask 254976  }
 0xc51   :  { %v1321_v55 = vpop.f32.mrf.mxu0 }
 0xc53   :  { %v1599_v15 = vpop.f32.mrf.mxu0  ;;  %v1369_v16 = vpop.f32.mrf.mxu1 }
 0xc54   :  { %v1377_v58 = vrot.slane %v1369_v16, 7 }
 0xc55   :  { %v1324_v19 = vpop.f32.mrf.mxu0  ;;  %v1605_v20 = vpop.f32.mrf.mxu1 }
 0xc56   :  { %v1378_v21 = vsel %vm1245_vm8, %v1377_v58, %v1321_v55 }
 0xc57   :  { %1381 = vst.msk [vmem:[%s2082_s22] sm:$0x3] %vm1380_vm11, %v1378_v21  ;;  %v1600_v22 = vpop.f32.mrf.mxu0  ;;  %v1372_v23 = vpop.f32.mrf.mxu1 }
 0xc59   :  { %v1606_v24 = vpop.f32.mrf.mxu1 }
 0xc5a   :  { %1700 = dma.done.wait [#allocation3], 32  }
 0xc5b   :  { %1701 = vsyncadd [#allocation3], 4294967264 }
 0xc5c   :  { %1400 = vsyncpa [#allocation3], 1 }

// kernel: ladan_forward.7
= control target key start
LH: loop header
LB: loop body
LE: loop exit
PB: predicated region body
PF: predicated region fallthrough
CT: control target
= control target key end

     0   :  { %vm141_vm0 = vcmask 261120   ;;  %v3316_v30 = vmov 0.0   ;;  %vm3317_vm1 = vmmov 0   ;;  %vm1023_vm5 = vcmask 130048   ;;  %s4753_s2 = inlined_call_operand.vmem [shape: bf16[32,32], index: 2, kind: input, shape index: {}]   ;;  %s4754_s0 = inlined_call_operand.vmem [shape: f32[8,16,32], index: 0, kind: input, shape index: {}]   ;;  %s4755_s4 = inlined_call_operand.vmem [shape: bf16[32,32], index: 4, kind: input, shape index: {}]   ;;  %s4756_s6 = inlined_call_operand.vmem [shape: bf16[32,32], index: 6, kind: input, shape index: {}]   ;;  %s4757_s5 = inlined_call_operand.vmem [shape: f32[1,32], index: 5, kind: input, shape index: {}]   ;;  %s4758_s3 = inlined_call_operand.vmem [shape: f32[1,32], index: 3, kind: input, shape index: {}]   ;;  %s4759_s7 = inlined_call_operand.vmem [shape: f32[1,32], index: 7, kind: input, shape index: {}]   ;;  %s4760_s1 = inlined_call_operand.vmem [shape: f32[8,16], index: 1, kind: input, shape index: {}]   ;;  %s4761_s8 = inlined_call_operand.vmem [shape: bf16[32,32], index: 8, kind: input, shape index: {}]   ;;  %s4762_s9 = inlined_call_operand.vmem [shape: f32[1,32], index: 9, kind: input, shape index: {}]   ;;  %s4763_s12 = inlined_call_operand.vmem [shape: bf16[32,64], index: 12, kind: input, shape index: {}]   ;;  %s4764_s10 = inlined_call_operand.vmem [shape: f32[1,32], index: 10, kind: input, shape index: {}]   ;;  %s4765_s11 = inlined_call_operand.vmem [shape: f32[1,32], index: 11, kind: input, shape index: {}]   ;;  %s4766_s14 = inlined_call_operand.vmem [shape: bf16[64,32], index: 14, kind: input, shape index: {}]   ;;  %s4767_s13 = inlined_call_operand.vmem [shape: f32[1,64], index: 13, kind: input, shape index: {}]   ;;  %s4768_s15 = inlined_call_operand.vmem [shape: f32[1,32], index: 15, kind: input, shape index: {}]   ;;  %s4769_s16 = inlined_call_operand.vmem [shape: f32[1,32], index: 16, kind: input, shape index: {}]   ;;  %s4770_s17 = inlined_call_operand.vmem [shape: f32[1,32], index: 17, kind: input, shape index: {}]   ;;  %s4771_s18 = inlined_call_operand.vmem [shape: f32[8,16,32], index: 18, kind: output, shape index: {}]  }
   0x1   :  { %4775 = sst [smem:[#allocation2_spill]] %s4753_s2  ;;  %v3129_v28 = vld [vmem:[%s4756_s6 + $0x8] sm:$0xff]   ;;  %v3130_v29 = vld [vmem:[%s4756_s6] sm:$0xff]  }
   0x2   :  { %4776 = sst [smem:[#allocation3_spill]] %s4754_s0  ;;  %v3528_v44 = vld [vmem:[%s4757_s5] ss:$0 sm:$0xff] }
   0x3   :  { %4777 = sst [smem:[#allocation4_spill]] %s4755_s4  ;;  %v3537_v55 = vld [vmem:[%s4758_s3] ss:$0 sm:$0xff] }
   0x4   :  { %s4778_s29 = sld [smem:[#allocation2_spill]] }
   0x5   :  { %s4779_s20 = sld [smem:[#allocation3_spill]] }
   0x6   :  { %s4780_s19 = sld [smem:[#allocation4_spill]] }
   0xa   :  { %v3125_v0 = vld [vmem:[%s4778_s29 + $0x8] sm:$0xff]   ;;  %v3126_v1 = vld [vmem:[%s4778_s29] sm:$0xff]  }
   0xb   :  { %3117 = vmatprep.subr.bf16.mxu1 %v3125_v0  ;;  %v106_v2 = vld [vmem:[%s4779_s20 + $0x40] sm:$0xff]  ;;  %v107_v3 = vld [vmem:[%s4779_s20 + $0x48] sm:$0xff]  ;;  %2897 = vmatprep.subr.bf16.mxu0 %v3125_v0  ;;  %v108_v5 = vld [vmem:[%s4779_s20 + $0x50] sm:$0xff] }
   0xc   :  { %3119 = vmatpush3.bf16.msra.mxu1 %v3125_v0  ;;  %v119_v4 = vpack.c.bf16 %v107_v3, %v106_v2  ;;  %v109_v6 = vld [vmem:[%s4779_s20 + $0x58] sm:$0xff]  ;;  %2898 = vmatpush3.bf16.msra.mxu0 %v3125_v0  ;;  %v110_v7 = vld [vmem:[%s4779_s20 + $0x60] sm:$0xff]  ;;  %v111_v8 = vld [vmem:[%s4779_s20 + $0x68] sm:$0xff] }
   0xd   :  { %3118 = vmatprep.subr.bf16.mxu1 %v3126_v1  ;;  %2899 = vmatprep.subr.bf16.mxu0 %v3126_v1  ;;  %v3127_v9 = vld [vmem:[%s4780_s19 + $0x8] sm:$0xff]   ;;  %v120_v10 = vpack.c.bf16 %v109_v6, %v108_v5  ;;  %v98_v11 = vld [vmem:[%s4779_s20] sm:$0xff]  ;;  %v121_v12 = vpack.c.bf16 %v111_v8, %v110_v7  ;;  %v100_v14 = vld [vmem:[%s4779_s20 + $0x10] sm:$0xff] }
   0xe   :  { %2909 = vmatprep.mubr.msk.bf16.mxu1 %vm141_vm0, %v119_v4  ;;  %v99_v13 = vld [vmem:[%s4779_s20 + $0x8] sm:$0xff]  ;;  %v101_v15 = vld [vmem:[%s4779_s20 + $0x18] sm:$0xff]  ;;  %v3128_v16 = vld [vmem:[%s4780_s19] sm:$0xff]  }
   0xf   :  { %v115_v17 = vpack.c.bf16 %v99_v13, %v98_v11  ;;  %v102_v18 = vld [vmem:[%s4779_s20 + $0x20] sm:$0xff]  ;;  %v103_v19 = vld [vmem:[%s4779_s20 + $0x28] sm:$0xff]  ;;  %v116_v20 = vpack.c.bf16 %v101_v15, %v100_v14  ;;  %v112_v21 = vld [vmem:[%s4779_s20 + $0x70] sm:$0xff] }
  0x10   :  { %3120 = vmatpush3.bf16.msra.mxu1 %v3126_v1  ;;  %2900 = vmatpush3.bf16.msra.mxu0 %v3126_v1  ;;  %v113_v22 = vld [vmem:[%s4779_s20 + $0x78] sm:$0xff]  ;;  %v117_v23 = vpack.c.bf16 %v103_v19, %v102_v18  ;;  %v104_v25 = vld [vmem:[%s4779_s20 + $0x30] sm:$0xff] }
  0x11   :  { %2917 = vmatprep.subr.bf16.mxu1 %v3127_v9  ;;  %2901 = vmatprep.mubr.msk.bf16.mxu0 %vm141_vm0, %v115_v17  ;;  %v122_v24 = vpack.c.bf16 %v113_v22, %v112_v21  ;;  %v105_v26 = vld [vmem:[%s4779_s20 + $0x38] sm:$0xff] }
  0x12   :  { %v118_v27 = vpack.c.bf16 %v105_v26, %v104_v25  ;;  %2937 = vmatprep.subr.bf16.mxu0 %v3129_v28 }
  0x13   :  { %2910 = vmatmul.mubr.msk.bf16.vlgmr.msra.gmra.mxu1 %vm141_vm0, %v120_v10  ;;  %2902 = vmatmul.mubr.msk.bf16.vlgmr.msra.gmra.mxu0 %vm141_vm0, %v116_v20 }
  0x14   :  { %2913 = vmatprep.mubr.msk.bf16.mxu1 %vm141_vm0, %v121_v12  ;;  %2918 = vmatpush3.bf16.msra.mxu1 %v3127_v9 }
  0x15   :  { %2919 = vmatprep.subr.bf16.mxu1 %v3128_v16  ;;  %2905 = vmatprep.mubr.msk.bf16.mxu0 %vm141_vm0, %v117_v23 }
  0x16   :  { %2938 = vmatpush3.bf16.msra.mxu0 %v3129_v28 }
  0x17   :  { %2939 = vmatprep.subr.bf16.mxu0 %v3130_v29 }
  0x18   :  { %2920 = vmatpush3.bf16.msra.mxu1 %v3128_v16 }
  0x19   :  { %2957 = vmatprep.subr.bf16.mxu1 %v3316_v30 }
  0x1a   :  { %2940 = vmatpush3.bf16.msra.mxu0 %v3130_v29 }
  0x1b   :  { %2914 = vmatmul.mubr.msk.bf16.gmra.mxu1 %vm141_vm0, %v122_v24  ;;  %2906 = vmatmul.mubr.msk.bf16.gmra.mxu0 %vm141_vm0, %v118_v27 }
  0x1c   :  { %2921 = vmatprep.mubr.msk.bf16.mxu1 %vm141_vm0, %v115_v17  ;;  %2941 = vmatprep.mubr.msk.bf16.mxu0 %vm141_vm0, %v115_v17 }
  0x1d   :  { %2981 = vmatprep.subr.bf16.mxu0 %v3316_v30 }
  0x23   :  { %2922 = vmatmul.mubr.msk.bf16.vlgmr.msra.gmra.mxu1 %vm141_vm0, %v116_v20  ;;  %2942 = vmatmul.mubr.msk.bf16.vlgmr.msra.gmra.mxu0 %vm141_vm0, %v116_v20 }
  0x24   :  { %2925 = vmatprep.mubr.msk.bf16.mxu1 %vm141_vm0, %v117_v23  ;;  %2945 = vmatprep.mubr.msk.bf16.mxu0 %vm141_vm0, %v117_v23 }
  0x2b   :  { %2926 = vmatmul.mubr.msk.bf16.gmra.mxu1 %vm141_vm0, %v118_v27  ;;  %2946 = vmatmul.mubr.msk.bf16.gmra.mxu0 %vm141_vm0, %v118_v27 }
  0x2c   :  { %2929 = vmatprep.mubr.msk.bf16.mxu1 %vm141_vm0, %v119_v4  ;;  %2949 = vmatprep.mubr.msk.bf16.mxu0 %vm141_vm0, %v119_v4 }
  0x33   :  { %2930 = vmatmul.mubr.msk.bf16.gmra.mxu1 %vm141_vm0, %v120_v10  ;;  %2950 = vmatmul.mubr.msk.bf16.gmra.mxu0 %vm141_vm0, %v120_v10 }
  0x34   :  { %2933 = vmatprep.mubr.msk.bf16.mxu1 %vm141_vm0, %v121_v12  ;;  %2953 = vmatprep.mubr.msk.bf16.mxu0 %vm141_vm0, %v121_v12 }
  0x3b   :  { %2934 = vmatmul.mubr.msk.bf16.gmra.mxu1 %vm141_vm0, %v122_v24  ;;  %2954 = vmatmul.mubr.msk.bf16.gmra.mxu0 %vm141_vm0, %v122_v24 }
  0x3c   :  { %2959 = vmatprep.mubr.msk.bf16.mxu1 %vm3317_vm1, %v3316_v30  ;;  %2983 = vmatprep.mubr.msk.bf16.mxu0 %vm3317_vm1, %v3316_v30 }
  0xd3   :  { %v3511_v31 = vpop.f32.mrf.mxu1  ;;  %v2903_v39 = vpop.f32.mrf.mxu0 }
  0xd4   :  { %v209_v7 = vadd.f32 %v2903_v39, %v3537_v55 }
  0xd5   :  { %v3513_v32 = vpop.f32.mrf.mxu1  ;;  %v200_v42 = vpop.f32.mrf.mxu0 }
  0xd6   :  { %v201_v58 = vadd.f32 %v3537_v55, %v200_v42  ;;  %v233_v29 = vadd.f32 %v3537_v55, %v3513_v32 }
  0xd7   :  { %v3515_v33 = vpop.f32.mrf.mxu1  ;;  %v2904_v46 = vpop.f32.mrf.mxu0 }
  0xd8   :  { %v212_v8 = vadd.f32 %v2904_v46, %v3537_v55 }
  0xd9   :  { %v235_v34 = vpop.f32.mrf.mxu1  ;;  %v203_v52 = vpop.f32.mrf.mxu0 }
  0xda   :  { %v204_v59 = vadd.f32 %v3537_v55, %v203_v52  ;;  %v494_v15 = vpack.c.bf16 %v212_v8, %v209_v7  ;;  %v236_v23 = vadd.f32 %v3537_v55, %v235_v34 }
  0xdb   :  { %v3517_v35 = vpop.f32.mrf.mxu1  ;;  %v2907_v61 = vpop.f32.mrf.mxu0 }
  0xdc   :  { %v493_v0 = vpack.c.bf16 %v204_v59, %v201_v58 }
  0xdd   :  { %v3519_v36 = vpop.f32.mrf.mxu1  ;;  %v216_v2 = vpop.f32.mrf.mxu0 }
  0xde   :  { %v217_v25 = vadd.f32 %v3537_v55, %v216_v2 }
  0xdf   :  { %v3521_v37 = vpop.f32.mrf.mxu1  ;;  %v2908_v11 = vpop.f32.mrf.mxu0 }
  0xe1   :  { %v3523_v38 = vpop.f32.mrf.mxu1  ;;  %v219_v18 = vpop.f32.mrf.mxu0 }
  0xe2   :  { %v220_v27 = vadd.f32 %v3537_v55, %v219_v18  ;;  %v252_v32 = vadd.f32 %v3537_v55, %v3523_v38 }
  0xe3   :  { %v2923_v40 = vpop.f32.mrf.mxu1 }
  0xe4   :  { %v324_v57 = vadd.f32 %v2923_v40, %v3528_v44  ;;  %v497_v40 = vpack.c.bf16 %v236_v23, %v233_v29 }
  0xe5   :  { %v315_v41 = vpop.f32.mrf.mxu1 }
  0xe6   :  { %v316_v47 = vadd.f32 %v3528_v44, %v315_v41  ;;  %v495_v41 = vpack.c.bf16 %v220_v27, %v217_v25 }
  0xe7   :  { %v2924_v43 = vpop.f32.mrf.mxu1 }
  0xe8   :  { %v327_v53 = vadd.f32 %v2924_v43, %v3528_v44 }
  0xe9   :  { %v318_v45 = vpop.f32.mrf.mxu1 }
  0xea   :  { %v319_v48 = vadd.f32 %v3528_v44, %v318_v45  ;;  %v502_v62 = vpack.c.bf16 %v327_v53, %v324_v57 }
  0xeb   :  { %v2927_v49 = vpop.f32.mrf.mxu1 }
  0xec   :  { %v501_v50 = vpack.c.bf16 %v319_v48, %v316_v47  ;;  %v568_v5 = vsel %vm141_vm0, %v502_v62, 0  ;;  %v340_v19 = vadd.f32 %v2927_v49, %v3528_v44  ;;  %v225_v48 = vadd.f32 %v2907_v61, %v3537_v55  ;;  %v2737_v62 = vld [vmem:[%s4759_s7] ss:$0 sm:$0xff] }
  0xed   :  { %v331_v51 = vpop.f32.mrf.mxu1  ;;  %v228_v49 = vadd.f32 %v2908_v11, %v3537_v55 }
  0xee   :  { %v521_v54 = vsel %vm141_vm0, %v501_v50, 0  ;;  %v332_v3 = vadd.f32 %v3528_v44, %v331_v51  ;;  %v249_v50 = vadd.f32 %v3537_v55, %v3519_v36  ;;  %v244_v36 = vadd.f32 %v3515_v33, %v3537_v55 }
  0xef   :  { %v2928_v56 = vpop.f32.mrf.mxu1  ;;  %2958 = vmatpush3.bf16.xpose.msra.mxu1 %v521_v54  ;;  %v496_v38 = vpack.c.bf16 %v228_v49, %v225_v48  ;;  %v260_v33 = vadd.f32 %v3521_v37, %v3537_v55  ;;  %v114_v49 = vld [vmem:[%s4760_s1] sm:$0xff] }
  0xf0   :  { %2963 = vmatprep.subr.bf16.mxu1 %v3316_v30  ;;  %v343_v20 = vadd.f32 %v2928_v56, %v3528_v44  ;;  %v499_v52 = vpack.c.bf16 %v252_v32, %v249_v50 }
  0xf1   :  { %v334_v60 = vpop.f32.mrf.mxu1 }
  0xf2   :  { %v335_v4 = vadd.f32 %v3528_v44, %v334_v60  ;;  %v504_v34 = vpack.c.bf16 %v343_v20, %v340_v19  ;;  %v257_v60 = vadd.f32 %v3517_v35, %v3537_v55 }
  0xf3   :  { %v2931_v63 = vpop.f32.mrf.mxu1 }
  0xf4   :  { %v503_v12 = vpack.c.bf16 %v335_v4, %v332_v3  ;;  %v356_v43 = vadd.f32 %v2931_v63, %v3528_v44  ;;  %v662_v46 = vsel %vm141_vm0, %v504_v34, 0  ;;  %v500_v61 = vpack.c.bf16 %v260_v33, %v257_v60 }
  0xf5   :  { %v347_v1 = vpop.f32.mrf.mxu1 }
  0xf6   :  { %2960 = vmatmul.mubr.msk.bf16.vlgmr.msra.gmra.mxu1 %vm141_vm0, %v493_v0  ;;  %v348_v9 = vadd.f32 %v3528_v44, %v347_v1  ;;  %v615_v21 = vsel %vm141_vm0, %v503_v12, 0 }
  0xf7   :  { %v2932_v6 = vpop.f32.mrf.mxu1  ;;  %2964 = vmatpush3.bf16.xpose.msra.mxu1 %v568_v5  ;;  %2965 = vmatprep.mubr.msk.bf16.mxu1 %vm3317_vm1, %v3316_v30 }
  0xf8   :  { %2969 = vmatprep.subr.bf16.mxu1 %v3316_v30  ;;  %v359_v45 = vadd.f32 %v2932_v6, %v3528_v44 }
  0xf9   :  { %v350_v10 = vpop.f32.mrf.mxu1 }
  0xfa   :  { %v351_v13 = vadd.f32 %v3528_v44, %v350_v10  ;;  %v506_v51 = vpack.c.bf16 %v359_v45, %v356_v43  ;;  %v3318_v43 = vmov 1966171168  }
  0xfb   :  { %v2935_v14 = vpop.f32.mrf.mxu1  ;;  %v896_v45 = vunpack.c.l.s4 %v3318_v43 }
  0xfc   :  { %v505_v16 = vpack.c.bf16 %v351_v13, %v348_v9  ;;  %v372_v53 = vadd.f32 %v2935_v14, %v3528_v44  ;;  %v756_v56 = vsel %vm141_vm0, %v506_v51, 0 }
  0xfd   :  { %v363_v17 = vpop.f32.mrf.mxu1 }
  0xfe   :  { %2966 = vmatmul.mubr.msk.bf16.vlgmr.msra.gmra.mxu1 %vm141_vm0, %v494_v15  ;;  %v709_v22 = vsel %vm141_vm0, %v505_v16, 0  ;;  %v364_v26 = vadd.f32 %v3528_v44, %v363_v17 }
  0xff   :  { %v2936_v24 = vpop.f32.mrf.mxu1  ;;  %2970 = vmatpush3.bf16.xpose.msra.mxu1 %v615_v21  ;;  %2982 = vmatpush3.bf16.xpose.msra.mxu0 %v709_v22 }
 0x100   :  { %2971 = vmatprep.mubr.msk.bf16.mxu1 %vm3317_vm1, %v3316_v30  ;;  %2975 = vmatprep.subr.bf16.mxu1 %v3316_v30  ;;  %v375_v54 = vadd.f32 %v2936_v24, %v3528_v44 }
 0x101   :  { %v366_v28 = vpop.f32.mrf.mxu1  ;;  %2993 = vmatprep.subr.bf16.mxu0 %v3316_v30 }
 0x102   :  { %v367_v39 = vadd.f32 %v3528_v44, %v366_v28  ;;  %v241_v44 = vadd.f32 %v3511_v31, %v3537_v55  ;;  %v508_v57 = vpack.c.bf16 %v375_v54, %v372_v53  ;;  %v2943_v31 = vpop.f32.mrf.mxu0  ;;  %v3319_v53 = vmov 0  }
 0x103   :  { %v439_v0 = vadd.f32 %v2943_v31, %v2737_v62  ;;  %v894_v31 = vcombine.high %v114_v49, %v114_v49 }
 0x104   :  { %v507_v42 = vpack.c.bf16 %v367_v39, %v364_v26  ;;  %v498_v58 = vpack.c.bf16 %v244_v36, %v241_v44  ;;  %v850_v59 = vsel %vm141_vm0, %v508_v57, 0  ;;  %v430_v63 = vpop.f32.mrf.mxu0 }
 0x105   :  { %v431_v37 = vadd.f32 %v2737_v62, %v430_v63 }
 0x106   :  { %2972 = vmatmul.mubr.msk.bf16.vlgmr.msra.gmra.mxu1 %vm141_vm0, %v495_v41  ;;  %2984 = vmatmul.mubr.msk.bf16.vlgmr.msra.gmra.mxu0 %vm141_vm0, %v497_v40  ;;  %v803_v47 = vsel %vm141_vm0, %v507_v42, 0  ;;  %v2944_v1 = vpop.f32.mrf.mxu0 }
 0x107   :  { %2976 = vmatpush3.bf16.xpose.msra.mxu1 %v662_v46  ;;  %2994 = vmatpush3.bf16.xpose.msra.mxu0 %v803_v47  ;;  %v442_v2 = vadd.f32 %v2944_v1, %v2737_v62  ;;  %v898_v46 = vlaneseq  ;;  %v897_v47 = vunpack.c.0.s8 %v896_v45 }
 0x108   :  { %2977 = vmatprep.mubr.msk.bf16.mxu1 %vm3317_vm1, %v3316_v30  ;;  %2995 = vmatprep.mubr.msk.bf16.mxu0 %vm3317_vm1, %v3316_v30  ;;  %v433_v3 = vpop.f32.mrf.mxu0 }
 0x109   :  { %2987 = vmatprep.subr.bf16.mxu1 %v3316_v30  ;;  %3005 = vmatprep.subr.bf16.mxu0 %v3316_v30  ;;  %v510_v4 = vpack.c.bf16 %v442_v2, %v439_v0  ;;  %v434_v5 = vadd.f32 %v2737_v62, %v433_v3  ;;  %v899_v32 = vshrl.u32 %v898_v46, 7 }
 0x10a   :  { %v2947_v35 = vpop.f32.mrf.mxu0 }
 0x10b   :  { %v509_v55 = vpack.c.bf16 %v434_v5, %v431_v37  ;;  %v3617_v6 = vadd.f32 %v2947_v35, %v2737_v62  ;;  %v900_v48 = vsub.s32 %v897_v47, %v899_v32 }
 0x10c   :  { %v446_v7 = vpop.f32.mrf.mxu0 }
 0x10d   :  { %v3620_v8 = vadd.f32 %v2737_v62, %v446_v7  ;;  %v901_v50 = vrot.slane %v114_v49, %v900_v48  ;;  %v908_v37 = vrot.slane %v894_v31, %v900_v48 }
 0x10e   :  { %2978 = vmatmul.mubr.msk.bf16.vlgmr.msra.gmra.mxu1 %vm141_vm0, %v496_v38  ;;  %2996 = vmatmul.mubr.msk.bf16.vlgmr.msra.gmra.mxu0 %vm141_vm0, %v499_v52  ;;  %v2948_v9 = vpop.f32.mrf.mxu0  ;;  %v3658_v38 = vsub.s32 0, %v899_v32 }
 0x10f   :  { %2988 = vmatpush3.bf16.xpose.msra.mxu1 %v756_v56  ;;  %2989 = vmatprep.mubr.msk.bf16.mxu1 %vm3317_vm1, %v3316_v30  ;;  %v3623_v10 = vadd.f32 %v2948_v9, %v2737_v62  ;;  %v917_v51 = vrot.slane %v901_v50, %v900_v48  ;;  %v909_v52 = vcombine.high %v901_v50, %v901_v50 }
 0x110   :  { %2999 = vmatprep.subr.bf16.mxu1 %v3316_v30  ;;  %3007 = vmatprep.mubr.msk.bf16.mxu0 %vm3317_vm1, %v3316_v30  ;;  %v449_v11 = vpop.f32.mrf.mxu0  ;;  %v924_v9 = vrot.slane %v908_v37, %v900_v48 }
 0x111   :  { %3006 = vmatpush3.bf16.msra.mxu0 %v509_v55  ;;  %v512_v12 = vpack.c.bf16 %v3623_v10, %v3617_v6  ;;  %v3627_v13 = vadd.f32 %v2737_v62, %v449_v11  ;;  %vm951_vm2 = vcmp.gt.f32.partialorder %v917_v51, 0.5  ;;  %v931_v56 = vrot.slane %v909_v52, %v900_v48 }
 0x112   :  { %3017 = vmatprep.subr.bf16.mxu0 %v3316_v30  ;;  %v2951_v14 = vpop.f32.mrf.mxu0  ;;  %v959_v54 = vsel %vm951_vm2, 1, %v3319_v53  ;;  %vm955_vm10 = vcmp.gt.f32.partialorder %v924_v9, 0.5 }
 0x113   :  { %v511_v15 = vpack.c.bf16 %v3627_v13, %v3620_v8  ;;  %v3631_v16 = vadd.f32 %v2951_v14, %v2737_v62  ;;  %v970_v36 = vrot.slane %v959_v54, %v3658_v38  ;;  %vm952_vm3 = vcmp.gt.f32.partialorder %v931_v56, 0.5 }
 0x114   :  { %v462_v17 = vpop.f32.mrf.mxu0  ;;  %v960_v44 = vsel %vm952_vm3, 1, %v3319_v53  ;;  %v910_v14 = vcombine.high %v908_v37, %v908_v37  ;;  %v963_v46 = vsel %vm955_vm10, 1, %v3319_v53 }
 0x115   :  { %v3633_v18 = vadd.f32 %v2737_v62, %v462_v17  ;;  %vm999_vm4 = vcmp.eq.s32.totalorder %v970_v36, 1  ;;  %v986_v52 = vrot.slane %v963_v46, %v3658_v38 }
 0x116   :  { %2990 = vmatmul.mubr.msk.bf16.vlgmr.msra.gmra.mxu1 %vm141_vm0, %v498_v58  ;;  %v2952_v19 = vpop.f32.mrf.mxu0  ;;  %v939_v58 = vcombine.high %v917_v51, %v917_v51  ;;  %v938_v43 = vrot.slane %v910_v14, %v900_v48  ;;  %v940_v51 = vcombine.high %v924_v9, %v924_v9 }
 0x117   :  { %3000 = vmatpush3.bf16.xpose.msra.mxu1 %v850_v59  ;;  %3001 = vmatprep.mubr.msk.bf16.mxu1 %vm3317_vm1, %v3316_v30  ;;  %v3635_v20 = vadd.f32 %v2952_v19, %v2737_v62  ;;  %vm3707_vm14 = vcmp.eq.s32.totalorder %v986_v52, 1 }
 0x118   :  { %3011 = vmatprep.subr.bf16.mxu1 %v3316_v30  ;;  %v465_v21 = vpop.f32.mrf.mxu0  ;;  %vm953_vm6 = vcmp.gt.f32.partialorder %v939_v58, 0.5  ;;  %vm956_vm11 = vcmp.gt.f32.partialorder %v938_v43, 0.5  ;;  %vm957_vm13 = vcmp.gt.f32.partialorder %v940_v51, 0.5 }
 0x119   :  { %v514_v22 = vpack.c.bf16 %v3635_v20, %v3631_v16  ;;  %v3639_v23 = vadd.f32 %v2737_v62, %v465_v21  ;;  %v961_v2 = vsel %vm953_vm6, 1, %v3319_v53 }
 0x11a   :  { %v2955_v24 = vpop.f32.mrf.mxu0  ;;  %v978_v7 = vrot.slane %v961_v2, %v3658_v38 }
 0x11b   :  { %v513_v25 = vpack.c.bf16 %v3639_v23, %v3633_v18  ;;  %v3643_v26 = vadd.f32 %v2955_v24, %v2737_v62 }
 0x11c   :  { %v478_v27 = vpop.f32.mrf.mxu0  ;;  %vm3682_vm9 = vcmp.eq.s32.totalorder %v978_v7, 1 }
 0x11d   :  { %v3645_v28 = vadd.f32 %v2737_v62, %v478_v27 }
 0x11e   :  { %3002 = vmatmul.mubr.msk.bf16.vlgmr.msra.gmra.mxu1 %vm141_vm0, %v500_v61  ;;  %v2956_v29 = vpop.f32.mrf.mxu0  ;;  %v974_v61 = vrot.slane %v960_v44, %v3658_v38 }
 0x11f   :  { %3013 = vmatprep.mubr.msk.bf16.mxu1 %vm3317_vm1, %v3316_v30  ;;  %3012 = vmatpush3.bf16.msra.mxu1 %v510_v4  ;;  %v3647_v34 = vadd.f32 %v2956_v29, %v2737_v62  ;;  %v941_v4 = vcombine.high %v931_v56, %v931_v56 }
 0x120   :  { %3023 = vmatprep.subr.bf16.mxu1 %v3316_v30  ;;  %v481_v39 = vpop.f32.mrf.mxu0  ;;  %vm1000_vm7 = vcmp.eq.s32.totalorder %v974_v61, 1 }
 0x121   :  { %v516_v40 = vpack.c.bf16 %v3647_v34, %v3643_v26  ;;  %v3651_v41 = vadd.f32 %v2737_v62, %v481_v39  ;;  %vm954_vm8 = vcmp.gt.f32.partialorder %v941_v4, 0.5 }
 0x122   :  { %v962_v27 = vsel %vm954_vm8, 1, %v3319_v53 }
 0x123   :  { %v515_v42 = vpack.c.bf16 %v3651_v41, %v3645_v28  ;;  %v982_v50 = vrot.slane %v962_v27, %v3658_v38 }
 0x125   :  { %vm3702_vm12 = vcmp.eq.s32.totalorder %v982_v50, 1 }
 0x1b6   :  { %v557_v57 = vpop.f32.mrf.mxu1 }
 0x1b7   :  { %v3663_v59 = vsel %vm999_vm4, %v557_v57, -1e+09 }
 0x1b8   :  { %v2961_v33 = vpop.f32.mrf.mxu1  ;;  %v1024_v60 = vsel %vm1023_vm5, %v3663_v59, -inf }
 0x1b9   :  { %1025 = vmax.xlane.f32.xlu0 %v1024_v60  ;;  %v964_v33 = vsel %vm956_vm11, 1, %v3319_v53 }
 0x1ba   :  { %v560_v62 = vpop.f32.mrf.mxu1  ;;  %v990_v4 = vrot.slane %v964_v33, %v3658_v38 }
 0x1bb   :  { %v3668_v63 = vsel %vm999_vm4, %v560_v62, -1e+09  ;;  %v942_v62 = vcombine.high %v938_v43, %v938_v43 }
 0x1bc   :  { %v2962_v0 = vpop.f32.mrf.mxu1  ;;  %v1027_v1 = vsel %vm1023_vm5, %v3668_v63, -inf  ;;  %vm3732_vm2 = vcmp.eq.s32.totalorder %v990_v4, 1 }
 0x1bd   :  { %1028 = vmax.xlane.f32.xlu0 %v1027_v1  ;;  %v965_v1 = vsel %vm957_vm13, 1, %v3319_v53  ;;  %vm958_vm15 = vcmp.gt.f32.partialorder %v942_v62, 0.5 }
 0x1be   :  { %v604_v3 = vpop.f32.mrf.mxu1 }
 0x1bf   :  { %v3673_v5 = vsel %vm1000_vm7, %v604_v3, -1e+09 }
 0x1c0   :  { %v2967_v35 = vpop.f32.mrf.mxu1  ;;  %v1030_v55 = vsel %vm1023_vm5, %v3673_v5, -inf }
 0x1c1   :  { %1031 = vmax.xlane.f32.xlu1 %v1030_v55  ;;  %v994_v55 = vrot.slane %v965_v1, %v3658_v38 }
 0x1c2   :  { %v607_v11 = vpop.f32.mrf.mxu1 }
 0x1c3   :  { %v3678_v17 = vsel %vm1000_vm7, %v607_v11, -1e+09  ;;  %vm3741_vm3 = vcmp.eq.s32.totalorder %v994_v55, 1 }
 0x1c4   :  { %v2968_v19 = vpop.f32.mrf.mxu1  ;;  %v1033_v21 = vsel %vm1023_vm5, %v3678_v17, -inf }
 0x1c5   :  { %1034 = vmax.xlane.f32.xlu1 %v1033_v21 }
 0x1c6   :  { %v651_v29 = vpop.f32.mrf.mxu1  ;;  %v745_v39 = vpop.f32.mrf.mxu0 }
 0x1c7   :  { %v3689_v45 = vsel %vm3682_vm9, %v651_v29, -1e+09  ;;  %v3721_v35 = vsel %vm3707_vm14, %v745_v39, -1e+09  ;;  %v966_v39 = vsel %vm958_vm15, 1, %v3319_v53 }
 0x1c8   :  { %v2973_v47 = vpop.f32.mrf.mxu1  ;;  %v2985_v32 = vpop.f32.mrf.mxu0  ;;  %v1036_v49 = vsel %vm1023_vm5, %v3689_v45, -inf  ;;  %v1048_v21 = vsel %vm1023_vm5, %v3721_v35, -inf  ;;  %v998_v51 = vrot.slane %v966_v39, %v3658_v38 }
 0x1c9   :  { %1037 = vmax.xlane.f32.xlu0 %v1036_v49 }
 0x1ca   :  { %v654_v54 = vpop.f32.mrf.mxu1  ;;  %v748_v56 = vpop.f32.mrf.mxu0  ;;  %vm1006_vm4 = vcmp.eq.s32.totalorder %v998_v51, 1 }
 0x1cb   :  { %v3698_v48 = vsel %vm3682_vm9, %v654_v54, -1e+09  ;;  %v3738_v29 = vsel %vm3707_vm14, %v748_v56, -1e+09 }
 0x1cc   :  { %v2974_v36 = vpop.f32.mrf.mxu1  ;;  %v2986_v44 = vpop.f32.mrf.mxu0  ;;  %v1039_v57 = vsel %vm1023_vm5, %v3698_v48, -inf  ;;  %v1051_v49 = vsel %vm1023_vm5, %v3738_v29, -inf }
 0x1cd   :  { %1040 = vmax.xlane.f32.xlu1 %v1039_v57 }
 0x1ce   :  { %v698_v61 = vpop.f32.mrf.mxu1  ;;  %v839_v31 = vpop.f32.mrf.mxu0 }
 0x1cf   :  { %v3713_v0 = vsel %vm3702_vm12, %v698_v61, -1e+09  ;;  %v3756_v53 = vsel %vm3741_vm3, %v839_v31, -1e+09 }
 0x1d0   :  { %v2979_v37 = vpop.f32.mrf.mxu1  ;;  %v2997_v2 = vpop.f32.mrf.mxu0  ;;  %v1042_v3 = vsel %vm1023_vm5, %v3713_v0, -inf  ;;  %v1060_v36 = vsel %vm1023_vm5, %v3756_v53, -inf }
 0x1d1   :  { %1043 = vmax.xlane.f32.xlu0 %v1042_v3 }
 0x1d2   :  { %v701_v7 = vpop.f32.mrf.mxu1  ;;  %v842_v9 = vpop.f32.mrf.mxu0 }
 0x1d3   :  { %v3726_v11 = vsel %vm3702_vm12, %v701_v7, -1e+09  ;;  %v3768_v38 = vsel %vm3741_vm3, %v842_v9, -1e+09 }
 0x1d4   :  { %v2980_v14 = vpop.f32.mrf.mxu1  ;;  %v2998_v19 = vpop.f32.mrf.mxu0  ;;  %v1045_v24 = vsel %vm1023_vm5, %v3726_v11, -inf  ;;  %v1063_v60 = vsel %vm1023_vm5, %v3768_v38, -inf }
 0x1d5   :  { %1049 = vmax.xlane.f32.xlu0 %v1048_v21  ;;  %1046 = vmax.xlane.f32.xlu1 %v1045_v24 }
 0x1d6   :  { %v792_v46 = vpop.f32.mrf.mxu1 }
 0x1d7   :  { %v3747_v47 = vsel %vm3732_vm2, %v792_v46, -1e+09 }
 0x1d8   :  { %v2991_v32 = vpop.f32.mrf.mxu1  ;;  %v1054_v50 = vsel %vm1023_vm5, %v3747_v47, -inf }
 0x1d9   :  { %1052 = vmax.xlane.f32.xlu1 %v1051_v49  ;;  %1055 = vmax.xlane.f32.xlu0 %v1054_v50 }
 0x1da   :  { %v795_v52 = vpop.f32.mrf.mxu1 }
 0x1db   :  { %v3760_v54 = vsel %vm3732_vm2, %v795_v52, -1e+09 }
 0x1dc   :  { %v2992_v56 = vpop.f32.mrf.mxu1  ;;  %v1057_v44 = vsel %vm1023_vm5, %v3760_v54, -inf }
 0x1dd   :  { %1061 = vmax.xlane.f32.xlu0 %v1060_v36  ;;  %1058 = vmax.xlane.f32.xlu1 %v1057_v44 }
 0x1de   :  { %v886_v57 = vpop.f32.mrf.mxu1 }
 0x1df   :  { %v3770_v58 = vsel %vm1006_vm4, %v886_v57, -1e+09 }
 0x1e0   :  { %v3003_v33 = vpop.f32.mrf.mxu1  ;;  %v1066_v61 = vsel %vm1023_vm5, %v3770_v58, -inf }
 0x1e1   :  { %1064 = vmax.xlane.f32.xlu1 %v1063_v60  ;;  %1067 = vmax.xlane.f32.xlu0 %v1066_v61 }
 0x1e2   :  { %v889_v31 = vpop.f32.mrf.mxu1 }
 0x1e3   :  { %v3776_v62 = vsel %vm1006_vm4, %v889_v31, -1e+09 }
 0x1e4   :  { %v3004_v1 = vpop.f32.mrf.mxu1  ;;  %v1069_v37 = vsel %vm1023_vm5, %v3776_v62, -inf }
 0x1e5   :  { %1070 = vmax.xlane.f32.xlu1 %v1069_v37 }
 0x242   :  { %v1026_v2 = vpop.xlane.xlu0 %1025 }
 0x243   :  { %v1072_v3 = vsub.f32 %v3663_v59, %v1026_v2 }
 0x245   :  { %v1088_v4 = vmul.f32 1.442695, %v1072_v3 }
 0x246   :  { %v1029_v55 = vpop.xlane.xlu0 %1028 }
 0x247   :  { %3140 = vpow2.f32 %v1088_v4  ;;  %v1073_v7 = vsub.f32 %v3668_v63, %v1029_v55 }
 0x249   :  { %v1090_v9 = vmul.f32 1.442695, %v1073_v7 }
 0x24a   :  { %v1032_v14 = vpop.xlane.xlu1 %1031 }
 0x24b   :  { %3142 = vpow2.f32 %v1090_v9  ;;  %v1074_v19 = vsub.f32 %v3673_v5, %v1032_v14 }
 0x24d   :  { %v1092_v21 = vmul.f32 1.442695, %v1074_v19 }
 0x24e   :  { %v1035_v24 = vpop.xlane.xlu1 %1034 }
 0x24f   :  { %3144 = vpow2.f32 %v1092_v21  ;;  %v1075_v27 = vsub.f32 %v3678_v17, %v1035_v24 }
 0x251   :  { %v1094_v39 = vmul.f32 1.442695, %v1075_v27 }
 0x252   :  { %v1038_v43 = vpop.xlane.xlu0 %1037 }
 0x253   :  { %3146 = vpow2.f32 %v1094_v39  ;;  %v1076_v59 = vsub.f32 %v3689_v45, %v1038_v43 }
 0x254   :  { %v3785_v46 = vpop.eup %3140 }
 0x255   :  { %v1096_v32 = vmul.f32 1.442695, %v1076_v59  ;;  %v1120_v63 = vsel %vm1023_vm5, %v3785_v46, 0.0 }
 0x256   :  { %v1041_v49 = vpop.xlane.xlu1 %1040  ;;  %1121 = vadd.xlane.f32.xlu0 %v1120_v63 }
 0x257   :  { %3148 = vpow2.f32 %v1096_v32  ;;  %v1077_v5 = vsub.f32 %v3698_v48, %v1041_v49 }
 0x258   :  { %v3790_v50 = vpop.eup %3142 }
 0x259   :  { %v1098_v51 = vmul.f32 1.442695, %v1077_v5  ;;  %v1123_v17 = vsel %vm1023_vm5, %v3790_v50, 0.0 }
 0x25a   :  { %v1044_v52 = vpop.xlane.xlu0 %1043  ;;  %1124 = vadd.xlane.f32.xlu1 %v1123_v17 }
 0x25b   :  { %3150 = vpow2.f32 %v1098_v51  ;;  %v1078_v45 = vsub.f32 %v3713_v0, %v1044_v52 }
 0x25c   :  { %v3795_v56 = vpop.eup %3144 }
 0x25d   :  { %v1100_v36 = vmul.f32 1.442695, %v1078_v45  ;;  %v1126_v44 = vsel %vm1023_vm5, %v3795_v56, 0.0 }
 0x25e   :  { %v1050_v57 = vpop.xlane.xlu0 %1049  ;;  %v1047_v33 = vpop.xlane.xlu1 %1046  ;;  %1127 = vadd.xlane.f32.xlu0 %v1126_v44 }
 0x25f   :  { %3152 = vpow2.f32 %v1100_v36  ;;  %v1080_v48 = vsub.f32 %v3721_v35, %v1050_v57  ;;  %v1079_v60 = vsub.f32 %v3726_v11, %v1047_v33 }
 0x260   :  { %v3801_v61 = vpop.eup %3146 }
 0x261   :  { %v1104_v31 = vmul.f32 1.442695, %v1080_v48  ;;  %v1102_v1 = vmul.f32 1.442695, %v1079_v60  ;;  %v1129_v0 = vsel %vm1023_vm5, %v3801_v61, 0.0 }
 0x262   :  { %v1053_v37 = vpop.xlane.xlu1 %1052  ;;  %v1056_v2 = vpop.xlane.xlu0 %1055  ;;  %1130 = vadd.xlane.f32.xlu1 %v1129_v0 }
 0x263   :  { %3154 = vpow2.f32 %v1104_v31  ;;  %v1081_v3 = vsub.f32 %v3738_v29, %v1053_v37  ;;  %v1082_v4 = vsub.f32 %v3747_v47, %v1056_v2 }
 0x264   :  { %v3807_v55 = vpop.eup %3148  ;;  %3156 = vpow2.f32 %v1102_v1 }
 0x265   :  { %v1106_v35 = vmul.f32 1.442695, %v1081_v3  ;;  %v1108_v11 = vmul.f32 1.442695, %v1082_v4  ;;  %v1132_v7 = vsel %vm1023_vm5, %v3807_v55, 0.0 }
 0x266   :  { %v1062_v9 = vpop.xlane.xlu0 %1061  ;;  %v1059_v14 = vpop.xlane.xlu1 %1058  ;;  %1133 = vadd.xlane.f32.xlu0 %v1132_v7 }
 0x267   :  { %3158 = vpow2.f32 %v1106_v35  ;;  %v1084_v19 = vsub.f32 %v3756_v53, %v1062_v9  ;;  %v1083_v21 = vsub.f32 %v3760_v54, %v1059_v14 }
 0x268   :  { %v3813_v24 = vpop.eup %3150  ;;  %3160 = vpow2.f32 %v1108_v11 }
 0x269   :  { %v1112_v29 = vmul.f32 1.442695, %v1084_v19  ;;  %v1110_v47 = vmul.f32 1.442695, %v1083_v21  ;;  %v1135_v27 = vsel %vm1023_vm5, %v3813_v24, 0.0 }
 0x26a   :  { %v1065_v39 = vpop.xlane.xlu1 %1064  ;;  %v1068_v43 = vpop.xlane.xlu0 %1067  ;;  %1136 = vadd.xlane.f32.xlu1 %v1135_v27 }
 0x26b   :  { %3162 = vpow2.f32 %v1112_v29  ;;  %v1085_v59 = vsub.f32 %v3768_v38, %v1065_v39  ;;  %v1086_v32 = vsub.f32 %v3770_v58, %v1068_v43 }
 0x26c   :  { %v3819_v63 = vpop.eup %3152  ;;  %3164 = vpow2.f32 %v1110_v47 }
 0x26d   :  { %v1114_v53 = vmul.f32 1.442695, %v1085_v59  ;;  %v1116_v54 = vmul.f32 1.442695, %v1086_v32  ;;  %v1138_v49 = vsel %vm1023_vm5, %v3819_v63, 0.0 }
 0x26e   :  { %1139 = vadd.xlane.f32.xlu0 %v1138_v49  ;;  %v1071_v5 = vpop.xlane.xlu1 %1070 }
 0x26f   :  { %3166 = vpow2.f32 %v1114_v53  ;;  %v1087_v51 = vsub.f32 %v3776_v62, %v1071_v5 }
 0x270   :  { %v3824_v17 = vpop.eup %3154  ;;  %3168 = vpow2.f32 %v1116_v54 }
 0x271   :  { %v3826_v52 = vpop.eup %3156  ;;  %v1118_v38 = vmul.f32 1.442695, %v1087_v51  ;;  %v1144_v58 = vsel %vm1023_vm5, %v3824_v17, 0.0 }
 0x272   :  { %1145 = vadd.xlane.f32.xlu0 %v1144_v58  ;;  %v1141_v45 = vsel %vm1023_vm5, %v3826_v52, 0.0 }
 0x273   :  { %3170 = vpow2.f32 %v1118_v38  ;;  %1142 = vadd.xlane.f32.xlu1 %v1141_v45 }
 0x274   :  { %v3832_v36 = vpop.eup %3158 }
 0x275   :  { %v3834_v44 = vpop.eup %3160  ;;  %v1147_v62 = vsel %vm1023_vm5, %v3832_v36, 0.0 }
 0x276   :  { %v1150_v57 = vsel %vm1023_vm5, %v3834_v44, 0.0 }
 0x277   :  { %1151 = vadd.xlane.f32.xlu0 %v1150_v57  ;;  %1148 = vadd.xlane.f32.xlu1 %v1147_v62 }
 0x278   :  { %v3840_v33 = vpop.eup %3162 }
 0x279   :  { %v3842_v48 = vpop.eup %3164  ;;  %v1156_v60 = vsel %vm1023_vm5, %v3840_v33, 0.0 }
 0x27a   :  { %v1153_v31 = vsel %vm1023_vm5, %v3842_v48, 0.0 }
 0x27b   :  { %1157 = vadd.xlane.f32.xlu0 %v1156_v60  ;;  %1154 = vadd.xlane.f32.xlu1 %v1153_v31 }
 0x27c   :  { %v3848_v1 = vpop.eup %3166 }
 0x27d   :  { %v3850_v0 = vpop.eup %3168  ;;  %v1159_v37 = vsel %vm1023_vm5, %v3848_v1, 0.0 }
 0x27e   :  { %v1162_v2 = vsel %vm1023_vm5, %v3850_v0, 0.0 }
 0x27f   :  { %1163 = vadd.xlane.f32.xlu0 %v1162_v2  ;;  %1160 = vadd.xlane.f32.xlu1 %v1159_v37 }
 0x280   :  { %v3856_v3 = vpop.eup %3170 }
 0x281   :  { %v1165_v4 = vsel %vm1023_vm5, %v3856_v3, 0.0 }
 0x283   :  { %1166 = vadd.xlane.f32.xlu1 %v1165_v4 }
 0x2df   :  { %v1122_v35 = vpop.xlane.xlu0 %1121 }
 0x2e0   :  { %3172 = vrcp.f32 %v1122_v35 }
 0x2e3   :  { %v1125_v11 = vpop.xlane.xlu1 %1124 }
 0x2e4   :  { %3174 = vrcp.f32 %v1125_v11 }
 0x2e7   :  { %v1128_v7 = vpop.xlane.xlu0 %1127 }
 0x2e8   :  { %3176 = vrcp.f32 %v1128_v7 }
 0x2eb   :  { %v1131_v9 = vpop.xlane.xlu1 %1130 }
 0x2ec   :  { %3178 = vrcp.f32 %v1131_v9 }
 0x2ed   :  { %v3173_v14 = vpop.eup %3172 }
 0x2ee   :  { %v1169_v29 = vmul.f32 %v3173_v14, %v3785_v46 }
 0x2ef   :  { %v1134_v19 = vpop.xlane.xlu0 %1133 }
 0x2f0   :  { %3180 = vrcp.f32 %v1134_v19 }
 0x2f1   :  { %v3175_v21 = vpop.eup %3174 }
 0x2f2   :  { %v1171_v47 = vmul.f32 %v3175_v21, %v3790_v50 }
 0x2f3   :  { %v1137_v27 = vpop.xlane.xlu1 %1136 }
 0x2f4   :  { %3182 = vrcp.f32 %v1137_v27  ;;  %v1200_v39 = vpack.c.bf16 %v1171_v47, %v1169_v29 }
 0x2f5   :  { %v3177_v43 = vpop.eup %3176 }
 0x2f6   :  { %3008 = vmatmul.mubr.msk.bf16.vlgmr.msra.gmra.mxu0 %vm1023_vm5, %v1200_v39  ;;  %v1173_v46 = vmul.f32 %v3177_v43, %v3795_v56 }
 0x2f7   :  { %3018 = vmatpush3.bf16.msra.mxu0 %v511_v15  ;;  %v1140_v59 = vpop.xlane.xlu0 %1139  ;;  %3019 = vmatprep.mubr.msk.bf16.mxu0 %vm3317_vm1, %v3316_v30 }
 0x2f8   :  { %3029 = vmatprep.subr.bf16.mxu0 %v3316_v30  ;;  %3184 = vrcp.f32 %v1140_v59 }
 0x2f9   :  { %v3179_v32 = vpop.eup %3178 }
 0x2fa   :  { %v1175_v50 = vmul.f32 %v3179_v32, %v3801_v61 }
 0x2fb   :  { %v1146_v53 = vpop.xlane.xlu0 %1145 }
 0x2fc   :  { %v1143_v54 = vpop.xlane.xlu1 %1142  ;;  %v1201_v49 = vpack.c.bf16 %v1175_v50, %v1173_v46 }
 0x2fd   :  { %3186 = vrcp.f32 %v1143_v54  ;;  %v3181_v8 = vpop.eup %3180 }
 0x2fe   :  { %3014 = vmatmul.mubr.msk.bf16.vlgmr.msra.gmra.mxu1 %vm1023_vm5, %v1201_v49  ;;  %3188 = vrcp.f32 %v1146_v53  ;;  %v1177_v61 = vmul.f32 %v3181_v8, %v3807_v55 }
 0x2ff   :  { %3024 = vmatpush3.bf16.msra.mxu1 %v512_v12  ;;  %3025 = vmatprep.mubr.msk.bf16.mxu1 %vm3317_vm1, %v3316_v30 }
 0x300   :  { %v1152_v13 = vpop.xlane.xlu0 %1151  ;;  %v1149_v15 = vpop.xlane.xlu1 %1148  ;;  %3035 = vmatprep.subr.bf16.mxu1 %v3316_v30 }
 0x301   :  { %v3183_v56 = vpop.eup %3182  ;;  %3190 = vrcp.f32 %v1149_v15 }
 0x302   :  { %v1179_v5 = vmul.f32 %v3183_v56, %v3813_v24  ;;  %3192 = vrcp.f32 %v1152_v13 }
 0x304   :  { %v1158_v51 = vpop.xlane.xlu0 %1157  ;;  %v1155_v38 = vpop.xlane.xlu1 %1154  ;;  %v1202_v58 = vpack.c.bf16 %v1179_v5, %v1177_v61 }
 0x305   :  { %3194 = vrcp.f32 %v1155_v38  ;;  %v3185_v6 = vpop.eup %3184 }
 0x306   :  { %3020 = vmatmul.mubr.msk.bf16.vlgmr.msra.gmra.mxu0 %vm1023_vm5, %v1202_v58  ;;  %3196 = vrcp.f32 %v1158_v51  ;;  %v1181_v24 = vmul.f32 %v3185_v6, %v3819_v63 }
 0x307   :  { %3030 = vmatpush3.bf16.msra.mxu0 %v513_v25  ;;  %3031 = vmatprep.mubr.msk.bf16.mxu0 %vm3317_vm1, %v3316_v30 }
 0x308   :  { %v1164_v10 = vpop.xlane.xlu0 %1163  ;;  %v1161_v12 = vpop.xlane.xlu1 %1160  ;;  %3041 = vmatprep.subr.bf16.mxu0 %v3316_v30 }
 0x309   :  { %3198 = vrcp.f32 %v1161_v12 }
 0x30a   :  { %v3187_v55 = vpop.eup %3186  ;;  %3200 = vrcp.f32 %v1164_v10 }
 0x30b   :  { %v1183_v45 = vmul.f32 %v3187_v55, %v3826_v52  ;;  %v3189_v57 = vpop.eup %3188 }
 0x30c   :  { %v1167_v62 = vpop.xlane.xlu1 %1166  ;;  %v1185_v25 = vmul.f32 %v3189_v57, %v3824_v17  ;;  %v3935_v57 = vld [vmem:[%s4762_s9] ss:$0 sm:$0xff] }
 0x30d   :  { %3202 = vrcp.f32 %v1167_v62  ;;  %v1203_v18 = vpack.c.bf16 %v1183_v45, %v1181_v24 }
 0x30e   :  { %v3191_v23 = vpop.eup %3190 }
 0x30f   :  { %3026 = vmatmul.mubr.msk.bf16.vlgmr.msra.gmra.mxu1 %vm1023_vm5, %v1203_v18  ;;  %v1187_v60 = vmul.f32 %v3191_v23, %v3832_v36  ;;  %v3193_v63 = vpop.eup %3192 }
 0x310   :  { %3036 = vmatpush3.bf16.msra.mxu1 %v514_v22  ;;  %3037 = vmatprep.mubr.msk.bf16.mxu1 %vm3317_vm1, %v3316_v30  ;;  %v1189_v37 = vmul.f32 %v3193_v63, %v3834_v44  ;;  %v3300_v63 = vld [vmem:[%s4779_s20] sm:$0xff] }
 0x311   :  { %3047 = vmatprep.subr.bf16.mxu1 %v3316_v30  ;;  %v1204_v52 = vpack.c.bf16 %v1187_v60, %v1185_v25 }
 0x312   :  { %v3195_v31 = vpop.eup %3194 }
 0x313   :  { %3032 = vmatmul.mubr.msk.bf16.vlgmr.msra.gmra.mxu0 %vm1023_vm5, %v1204_v52  ;;  %v1191_v2 = vmul.f32 %v3195_v31, %v3842_v48  ;;  %v3197_v16 = vpop.eup %3196 }
 0x314   :  { %3042 = vmatpush3.bf16.msra.mxu0 %v515_v42  ;;  %3043 = vmatprep.mubr.msk.bf16.mxu0 %vm3317_vm1, %v3316_v30  ;;  %v1193_v36 = vmul.f32 %v3197_v16, %v3840_v33  ;;  %v3132_v33 = vld [vmem:[%s4761_s8 + $0x8] sm:$0xff]  }
 0x315   :  { %v1205_v20 = vpack.c.bf16 %v1191_v2, %v1189_v37  ;;  %3053 = vmatprep.subr.bf16.mxu0 %v3132_v33 }
 0x316   :  { %v3199_v22 = vpop.eup %3198 }
 0x317   :  { %v3201_v17 = vpop.eup %3200  ;;  %3038 = vmatmul.mubr.msk.bf16.vlgmr.msra.gmra.mxu1 %vm1023_vm5, %v1205_v20  ;;  %v1195_v4 = vmul.f32 %v3199_v22, %v3848_v1  ;;  %v3301_v20 = vld [vmem:[%s4779_s20 + $0x10] sm:$0xff] }
 0x318   :  { %3048 = vmatpush3.bf16.msra.mxu1 %v516_v40  ;;  %3049 = vmatprep.mubr.msk.bf16.mxu1 %vm3317_vm1, %v3316_v30  ;;  %v1197_v42 = vmul.f32 %v3201_v17, %v3850_v0  ;;  %v3133_v30 = vld [vmem:[%s4761_s8] sm:$0xff]   ;;  %v3302_v17 = vld [vmem:[%s4779_s20 + $0x8] sm:$0xff]  ;;  %vm2305_vm1 = vcmask 523264  }
 0x319   :  { %v1206_v41 = vpack.c.bf16 %v1195_v4, %v1193_v36 }
 0x31a   :  { %v3203_v28 = vpop.eup %3202 }
 0x31b   :  { %v1199_v44 = vmul.f32 %v3203_v28, %v3856_v3  ;;  %3044 = vmatmul.mubr.msk.bf16.vlgmr.msra.gmra.mxu0 %vm1023_vm5, %v1206_v41  ;;  %v3303_v41 = vld [vmem:[%s4779_s20 + $0x18] sm:$0xff] }
 0x31c   :  { %3054 = vmatpush3.bf16.msra.mxu0 %v3132_v33 }
 0x31d   :  { %v1207_v48 = vpack.c.bf16 %v1199_v44, %v1197_v42  ;;  %3055 = vmatprep.subr.bf16.mxu0 %v3133_v30 }
 0x31f   :  { %3050 = vmatmul.mubr.msk.bf16.vlgmr.msra.gmra.mxu1 %vm1023_vm5, %v1207_v48 }
 0x320   :  { %3056 = vmatpush3.bf16.msra.mxu0 %v3133_v30 }
 0x3b6   :  { %v1245_v26 = vpop.f32.mrf.mxu0 }
 0x3b8   :  { %v3009_v34 = vpop.f32.mrf.mxu0 }
 0x3ba   :  { %v1248_v40 = vpop.f32.mrf.mxu0 }
 0x3bb   :  { %v1560_v1 = vpack.c.bf16 %v1248_v40, %v1245_v26  ;;  %v3304_v40 = vld [vmem:[%s4779_s20 + $0x20] sm:$0xff] }
 0x3bc   :  { %v3010_v0 = vpop.f32.mrf.mxu0 }
 0x3bd   :  { %3057 = vmatprep.mubr.msk.bf16.mxu0 %vm141_vm0, %v1560_v1 }
 0x3be   :  { %v1289_v3 = vpop.f32.mrf.mxu1 }
 0x3c0   :  { %v3015_v35 = vpop.f32.mrf.mxu1 }
 0x3c2   :  { %v1292_v11 = vpop.f32.mrf.mxu1 }
 0x3c3   :  { %v1561_v7 = vpack.c.bf16 %v1292_v11, %v1289_v3 }
 0x3c4   :  { %v3016_v9 = vpop.f32.mrf.mxu1 }
 0x3c5   :  { %3058 = vmatmul.mubr.msk.bf16.vlgmr.msra.gmra.mxu0 %vm141_vm0, %v1561_v7  ;;  %v3305_v7 = vld [vmem:[%s4779_s20 + $0x30] sm:$0xff] }
 0x3c6   :  { %v1333_v14 = vpop.f32.mrf.mxu0 }
 0x3c8   :  { %v3021_v19 = vpop.f32.mrf.mxu0 }
 0x3c9   :  { %v3306_v19 = vld [vmem:[%s4779_s20 + $0x28] sm:$0xff] }
 0x3ca   :  { %v1336_v21 = vpop.f32.mrf.mxu0 }
 0x3cb   :  { %v1562_v29 = vpack.c.bf16 %v1336_v21, %v1333_v14 }
 0x3cc   :  { %v3022_v47 = vpop.f32.mrf.mxu0 }
 0x3cd   :  { %3061 = vmatprep.mubr.msk.bf16.mxu0 %vm141_vm0, %v1562_v29 }
 0x3cf   :  { %v1377_v27 = vpop.f32.mrf.mxu1 }
 0x3d1   :  { %v3027_v39 = vpop.f32.mrf.mxu1 }
 0x3d2   :  { %v3307_v39 = vld [vmem:[%s4779_s20 + $0x38] sm:$0xff] }
 0x3d3   :  { %v1380_v43 = vpop.f32.mrf.mxu1  ;;  %v1421_v32 = vpop.f32.mrf.mxu0 }
 0x3d4   :  { %v1563_v59 = vpack.c.bf16 %v1380_v43, %v1377_v27 }
 0x3d5   :  { %v3028_v46 = vpop.f32.mrf.mxu1  ;;  %v3033_v50 = vpop.f32.mrf.mxu0 }
 0x3d6   :  { %3062 = vmatmul.mubr.msk.bf16.gmra.mxu0 %vm141_vm0, %v1563_v59  ;;  %v3308_v50 = vld [vmem:[%s4779_s20 + $0x40] sm:$0xff] }
 0x3d7   :  { %v1424_v53 = vpop.f32.mrf.mxu0  ;;  %v1465_v54 = vpop.f32.mrf.mxu1 }
 0x3d8   :  { %v1564_v49 = vpack.c.bf16 %v1424_v53, %v1421_v32 }
 0x3d9   :  { %v3034_v8 = vpop.f32.mrf.mxu0  ;;  %v3039_v13 = vpop.f32.mrf.mxu1 }
 0x3da   :  { %3065 = vmatprep.mubr.msk.bf16.mxu0 %vm141_vm0, %v1564_v49 }
 0x3db   :  { %v1468_v15 = vpop.f32.mrf.mxu1  ;;  %v1509_v56 = vpop.f32.mrf.mxu0 }
 0x3dc   :  { %v1565_v61 = vpack.c.bf16 %v1468_v15, %v1465_v54 }
 0x3dd   :  { %v3040_v5 = vpop.f32.mrf.mxu1  ;;  %v3045_v51 = vpop.f32.mrf.mxu0 }
 0x3de   :  { %3066 = vmatmul.mubr.msk.bf16.gmra.mxu0 %vm141_vm0, %v1565_v61  ;;  %v3310_v51 = vld [vmem:[%s4779_s20 + $0x48] sm:$0xff] }
 0x3df   :  { %v1512_v38 = vpop.f32.mrf.mxu0  ;;  %v1553_v58 = vpop.f32.mrf.mxu1 }
 0x3e0   :  { %v1566_v6 = vpack.c.bf16 %v1512_v38, %v1509_v56  ;;  %v3309_v56 = vld [vmem:[%s4779_s20 + $0x50] sm:$0xff] }
 0x3e1   :  { %v3046_v10 = vpop.f32.mrf.mxu0  ;;  %v3051_v12 = vpop.f32.mrf.mxu1 }
 0x3e2   :  { %3069 = vmatprep.mubr.msk.bf16.mxu0 %vm141_vm0, %v1566_v6  ;;  %v3311_v6 = vld [vmem:[%s4779_s20 + $0x58] sm:$0xff] }
 0x3e3   :  { %v1556_v55 = vpop.f32.mrf.mxu1 }
 0x3e4   :  { %v1567_v24 = vpack.c.bf16 %v1556_v55, %v1553_v58 }
 0x3e5   :  { %v3052_v45 = vpop.f32.mrf.mxu1 }
 0x3e6   :  { %3070 = vmatmul.mubr.msk.bf16.gmra.mxu0 %vm141_vm0, %v1567_v24 }
 0x485   :  { %v3059_v62 = vpop.f32.mrf.mxu0 }
 0x486   :  { %v1653_v23 = vadd.f32 %v3059_v62, %v3935_v57 }
 0x487   :  { %v1644_v18 = vpop.f32.mrf.mxu0 }
 0x488   :  { %v1645_v25 = vadd.f32 %v3935_v57, %v1644_v18  ;;  %v3951_v22 = vadd.f32 %v3301_v20, %v1653_v23  ;;  %v3312_v18 = vld [vmem:[%s4779_s20 + $0x60] sm:$0xff]  ;;  %v3314_v20 = vld [vmem:[%s4779_s20 + $0x68] sm:$0xff] }
 0x489   :  { %v3060_v60 = vpop.f32.mrf.mxu0 }
 0x48a   :  { %v3942_v52 = vadd.f32 %v3300_v63, %v1645_v25  ;;  %v1656_v37 = vadd.f32 %v3060_v60, %v3935_v57  ;;  %v1729_v28 = vsel %vm141_vm0, %v3951_v22, 0.0 }
 0x48b   :  { %v1647_v31 = vpop.f32.mrf.mxu0 }
 0x48c   :  { %v1648_v2 = vadd.f32 %v3935_v57, %v1647_v31  ;;  %v1723_v16 = vsel %vm141_vm0, %v3942_v52, 0.0  ;;  %v3965_v42 = vadd.f32 %v3303_v41, %v1656_v37 }
 0x48d   :  { %1724 = vadd.xlane.f32.xlu0 %v1723_v16 }
 0x48e   :  { %v3956_v36 = vadd.f32 %v3302_v17, %v1648_v2  ;;  %v1732_v44 = vsel %vm141_vm0, %v3965_v42, 0.0  ;;  %v3313_v2 = vld [vmem:[%s4779_s20 + $0x70] sm:$0xff] }
 0x490   :  { %v1726_v4 = vsel %vm141_vm0, %v3956_v36, 0.0 }
 0x491   :  { %1727 = vadd.xlane.f32.xlu1 %v1726_v4  ;;  %1730 = vadd.xlane.f32.xlu0 %v1729_v28  ;;  %v3315_v28 = vld [vmem:[%s4779_s20 + $0x78] sm:$0xff] }
 0x495   :  { %1733 = vadd.xlane.f32.xlu1 %v1732_v44 }
 0x496   :  { %v3063_v48 = vpop.f32.mrf.mxu0 }
 0x497   :  { %v1669_v30 = vadd.f32 %v3063_v48, %v3935_v57 }
 0x498   :  { %v1660_v33 = vpop.f32.mrf.mxu0 }
 0x499   :  { %v1661_v26 = vadd.f32 %v3935_v57, %v1660_v33  ;;  %v3983_v9 = vadd.f32 %v3305_v7, %v1669_v30 }
 0x49a   :  { %v3064_v34 = vpop.f32.mrf.mxu0 }
 0x49b   :  { %v3974_v1 = vadd.f32 %v3304_v40, %v1661_v26  ;;  %v1672_v3 = vadd.f32 %v3064_v34, %v3935_v57  ;;  %v1741_v27 = vsel %vm141_vm0, %v3983_v9, 0.0 }
 0x49c   :  { %v1663_v0 = vpop.f32.mrf.mxu0 }
 0x49d   :  { %v1664_v35 = vadd.f32 %v3935_v57, %v1663_v0  ;;  %v1735_v11 = vsel %vm141_vm0, %v3974_v1, 0.0  ;;  %v3997_v43 = vadd.f32 %v3307_v39, %v1672_v3 }
 0x49e   :  { %1736 = vadd.xlane.f32.xlu0 %v1735_v11  ;;  %v3067_v14 = vpop.f32.mrf.mxu0 }
 0x49f   :  { %v3988_v21 = vadd.f32 %v3306_v19, %v1664_v35  ;;  %v1685_v59 = vadd.f32 %v3067_v14, %v3935_v57  ;;  %v1744_v8 = vsel %vm141_vm0, %v3997_v43, 0.0 }
 0x4a0   :  { %v1676_v29 = vpop.f32.mrf.mxu0 }
 0x4a1   :  { %v1738_v47 = vsel %vm141_vm0, %v3988_v21, 0.0  ;;  %v1677_v32 = vadd.f32 %v3935_v57, %v1676_v29  ;;  %v4015_v61 = vadd.f32 %v3309_v56, %v1685_v59 }
 0x4a2   :  { %1739 = vadd.xlane.f32.xlu1 %v1738_v47  ;;  %1742 = vadd.xlane.f32.xlu0 %v1741_v27  ;;  %v3068_v46 = vpop.f32.mrf.mxu0 }
 0x4a3   :  { %v4004_v53 = vadd.f32 %v3308_v50, %v1677_v32  ;;  %v1688_v54 = vadd.f32 %v3068_v46, %v3935_v57  ;;  %v1753_v45 = vsel %vm141_vm0, %v4015_v61, 0.0 }
 0x4a4   :  { %v1679_v49 = vpop.f32.mrf.mxu0 }
 0x4a5   :  { %v1680_v13 = vadd.f32 %v3935_v57, %v1679_v49  ;;  %v1747_v15 = vsel %vm141_vm0, %v4004_v53, 0.0  ;;  %v4025_v10 = vadd.f32 %v3311_v6, %v1688_v54 }
 0x4a6   :  { %1745 = vadd.xlane.f32.xlu1 %v1744_v8  ;;  %1748 = vadd.xlane.f32.xlu0 %v1747_v15  ;;  %v3071_v5 = vpop.f32.mrf.mxu0 }
 0x4a7   :  { %v4020_v38 = vadd.f32 %v3310_v51, %v1680_v13  ;;  %v1701_v12 = vadd.f32 %v3071_v5, %v3935_v57  ;;  %v1756_v60 = vsel %vm141_vm0, %v4025_v10, 0.0 }
 0x4a8   :  { %v1692_v58 = vpop.f32.mrf.mxu0 }
 0x4a9   :  { %v1693_v55 = vadd.f32 %v3935_v57, %v1692_v58  ;;  %v1750_v24 = vsel %vm141_vm0, %v4020_v38, 0.0  ;;  %v4047_v16 = vadd.f32 %v3313_v2, %v1701_v12 }
 0x4aa   :  { %1751 = vadd.xlane.f32.xlu1 %v1750_v24  ;;  %1754 = vadd.xlane.f32.xlu0 %v1753_v45  ;;  %v3072_v62 = vpop.f32.mrf.mxu0 }
 0x4ab   :  { %v4036_v23 = vadd.f32 %v3312_v18, %v1693_v55  ;;  %v1704_v63 = vadd.f32 %v3072_v62, %v3935_v57  ;;  %v1765_v4 = vsel %vm141_vm0, %v4047_v16, 0.0 }
 0x4ac   :  { %v1695_v25 = vpop.f32.mrf.mxu0 }
 0x4ad   :  { %v1696_v31 = vadd.f32 %v3935_v57, %v1695_v25  ;;  %v1759_v37 = vsel %vm141_vm0, %v4036_v23, 0.0  ;;  %v4061_v41 = vadd.f32 %v3315_v28, %v1704_v63 }
 0x4ae   :  { %1757 = vadd.xlane.f32.xlu1 %v1756_v60  ;;  %1760 = vadd.xlane.f32.xlu0 %v1759_v37 }
 0x4af   :  { %v4052_v17 = vadd.f32 %v3314_v20, %v1696_v31  ;;  %v1768_v44 = vsel %vm141_vm0, %v4061_v41, 0.0 }
 0x4b1   :  { %v1762_v57 = vsel %vm141_vm0, %v4052_v17, 0.0 }
 0x4b2   :  { %1763 = vadd.xlane.f32.xlu1 %v1762_v57  ;;  %1766 = vadd.xlane.f32.xlu0 %v1765_v4 }
 0x4b6   :  { %1769 = vadd.xlane.f32.xlu1 %v1768_v44 }
 0x516   :  { %v1725_v48 = vpop.xlane.xlu0 %1724 }
 0x517   :  { %v1772_v33 = vmul.f32 0.03125, %v1725_v48 }
 0x519   :  { %v4066_v30 = vsub.f32 %v3942_v52, %v1772_v33 }
 0x51a   :  { %v1728_v26 = vpop.xlane.xlu1 %1727  ;;  %v1731_v34 = vpop.xlane.xlu0 %1730 }
 0x51b   :  { %v1773_v40 = vmul.f32 0.03125, %v1728_v26  ;;  %v1774_v0 = vmul.f32 0.03125, %v1731_v34  ;;  %v1804_v3 = vmul.f32 %v4066_v30, %v4066_v30 }
 0x51d   :  { %v4071_v35 = vsub.f32 %v3956_v36, %v1773_v40  ;;  %v4074_v11 = vsub.f32 %v3951_v22, %v1774_v0  ;;  %v1820_v7 = vsel %vm141_vm0, %v1804_v3, 0.0 }
 0x51e   :  { %v1734_v14 = vpop.xlane.xlu1 %1733  ;;  %1821 = vadd.xlane.f32.xlu0 %v1820_v7 }
 0x51f   :  { %v1775_v19 = vmul.f32 0.03125, %v1734_v14  ;;  %v1805_v52 = vmul.f32 %v4071_v35, %v4071_v35  ;;  %v1806_v29 = vmul.f32 %v4074_v11, %v4074_v11 }
 0x521   :  { %v4082_v47 = vsub.f32 %v3965_v42, %v1775_v19  ;;  %v1823_v36 = vsel %vm141_vm0, %v1805_v52, 0.0  ;;  %v1826_v27 = vsel %vm141_vm0, %v1806_v29, 0.0 }
 0x522   :  { %1824 = vadd.xlane.f32.xlu1 %v1823_v36  ;;  %1827 = vadd.xlane.f32.xlu0 %v1826_v27 }
 0x523   :  { %v1807_v22 = vmul.f32 %v4082_v47, %v4082_v47 }
 0x525   :  { %v1829_v39 = vsel %vm141_vm0, %v1807_v22, 0.0 }
 0x526   :  { %1830 = vadd.xlane.f32.xlu1 %v1829_v39  ;;  %v3134_v39 = vld [vmem:[%s4763_s12 + $0x8] sm:$0xff]  }
 0x527   :  { %v1737_v59 = vpop.xlane.xlu0 %1736  ;;  %3073 = vmatprep.subr.bf16.mxu1 %v3134_v39 }
 0x528   :  { %v1776_v32 = vmul.f32 0.03125, %v1737_v59  ;;  %3074 = vmatpush3.bf16.msra.mxu1 %v3134_v39 }
 0x52a   :  { %v4090_v46 = vsub.f32 %v3974_v1, %v1776_v32 }
 0x52b   :  { %v1740_v50 = vpop.xlane.xlu1 %1739  ;;  %v1743_v42 = vpop.xlane.xlu0 %1742 }
 0x52c   :  { %v1777_v54 = vmul.f32 0.03125, %v1740_v50  ;;  %v1778_v49 = vmul.f32 0.03125, %v1743_v42  ;;  %v1808_v8 = vmul.f32 %v4090_v46, %v4090_v46 }
 0x52e   :  { %v4095_v13 = vsub.f32 %v3988_v21, %v1777_v54  ;;  %v4098_v15 = vsub.f32 %v3983_v9, %v1778_v49  ;;  %v1832_v56 = vsel %vm141_vm0, %v1808_v8, 0.0 }
 0x52f   :  { %v1746_v5 = vpop.xlane.xlu1 %1745  ;;  %1833 = vadd.xlane.f32.xlu0 %v1832_v56  ;;  %v1749_v1 = vpop.xlane.xlu0 %1748 }
 0x530   :  { %v1779_v51 = vmul.f32 0.03125, %v1746_v5  ;;  %v1809_v58 = vmul.f32 %v4095_v13, %v4095_v13  ;;  %v1810_v6 = vmul.f32 %v4098_v15, %v4098_v15  ;;  %v1780_v12 = vmul.f32 0.03125, %v1749_v1 }
 0x532   :  { %v4106_v55 = vsub.f32 %v3997_v43, %v1779_v51  ;;  %v1835_v21 = vsel %vm141_vm0, %v1809_v58, 0.0  ;;  %v1838_v9 = vsel %vm141_vm0, %v1810_v6, 0.0  ;;  %v4111_v24 = vsub.f32 %v4004_v53, %v1780_v12 }
 0x533   :  { %1836 = vadd.xlane.f32.xlu1 %v1835_v21  ;;  %1839 = vadd.xlane.f32.xlu0 %v1838_v9  ;;  %v1752_v45 = vpop.xlane.xlu1 %1751  ;;  %v1755_v62 = vpop.xlane.xlu0 %1754 }
 0x534   :  { %v1811_v18 = vmul.f32 %v4106_v55, %v4106_v55  ;;  %v1781_v25 = vmul.f32 0.03125, %v1752_v45  ;;  %v1782_v60 = vmul.f32 0.03125, %v1755_v62  ;;  %v1812_v43 = vmul.f32 %v4111_v24, %v4111_v24  ;;  %v4170_v62 = vld [vmem:[%s4764_s10] ss:$0 sm:$0xff] }
 0x536   :  { %v1841_v63 = vsel %vm141_vm0, %v1811_v18, 0.0  ;;  %v4119_v31 = vsub.f32 %v4020_v38, %v1781_v25  ;;  %v4122_v53 = vsub.f32 %v4015_v61, %v1782_v60  ;;  %v1844_v37 = vsel %vm141_vm0, %v1812_v43, 0.0 }
 0x537   :  { %1842 = vadd.xlane.f32.xlu1 %v1841_v63  ;;  %v1758_v2 = vpop.xlane.xlu1 %1757  ;;  %1845 = vadd.xlane.f32.xlu0 %v1844_v37  ;;  %v1761_v20 = vpop.xlane.xlu0 %1760 }
 0x538   :  { %v1783_v57 = vmul.f32 0.03125, %v1758_v2  ;;  %v1784_v4 = vmul.f32 0.03125, %v1761_v20  ;;  %v1813_v28 = vmul.f32 %v4119_v31, %v4119_v31  ;;  %v1814_v44 = vmul.f32 %v4122_v53, %v4122_v53 }
 0x53a   :  { %v4130_v38 = vsub.f32 %v4025_v10, %v1783_v57  ;;  %v4133_v61 = vsub.f32 %v4036_v23, %v1784_v4  ;;  %v1847_v48 = vsel %vm141_vm0, %v1813_v28, 0.0  ;;  %v1850_v33 = vsel %vm141_vm0, %v1814_v44, 0.0  ;;  %v4177_v4 = vld [vmem:[%s4765_s11] ss:$0 sm:$0xff] }
 0x53b   :  { %1848 = vadd.xlane.f32.xlu1 %v1847_v48  ;;  %v1764_v26 = vpop.xlane.xlu1 %1763  ;;  %1851 = vadd.xlane.f32.xlu0 %v1850_v33  ;;  %v1767_v34 = vpop.xlane.xlu0 %1766 }
 0x53c   :  { %v1785_v40 = vmul.f32 0.03125, %v1764_v26  ;;  %v1786_v0 = vmul.f32 0.03125, %v1767_v34  ;;  %v1815_v3 = vmul.f32 %v4130_v38, %v4130_v38  ;;  %v1816_v10 = vmul.f32 %v4133_v61, %v4133_v61 }
 0x53e   :  { %v4142_v7 = vsub.f32 %v4052_v17, %v1785_v40  ;;  %v4145_v23 = vsub.f32 %v4047_v16, %v1786_v0  ;;  %v1853_v14 = vsel %vm141_vm0, %v1815_v3, 0.0  ;;  %v1856_v19 = vsel %vm141_vm0, %v1816_v10, 0.0 }
 0x53f   :  { %1854 = vadd.xlane.f32.xlu1 %v1853_v14  ;;  %v1770_v52 = vpop.xlane.xlu1 %1769  ;;  %1857 = vadd.xlane.f32.xlu0 %v1856_v19 }
 0x540   :  { %v1787_v29 = vmul.f32 0.03125, %v1770_v52  ;;  %v1817_v36 = vmul.f32 %v4142_v7, %v4142_v7  ;;  %v1818_v27 = vmul.f32 %v4145_v23, %v4145_v23 }
 0x542   :  { %v4154_v17 = vsub.f32 %v4061_v41, %v1787_v29  ;;  %v1859_v16 = vsel %vm141_vm0, %v1817_v36, 0.0  ;;  %v1862_v22 = vsel %vm141_vm0, %v1818_v27, 0.0  ;;  %v3135_v41 = vld [vmem:[%s4763_s12] sm:$0xff]  }
 0x543   :  { %1860 = vadd.xlane.f32.xlu1 %v1859_v16  ;;  %1863 = vadd.xlane.f32.xlu0 %v1862_v22 }
 0x544   :  { %v1819_v59 = vmul.f32 %v4154_v17, %v4154_v17  ;;  %3075 = vmatprep.subr.bf16.mxu1 %v3135_v41 }
 0x545   :  { %3076 = vmatpush3.bf16.msra.mxu1 %v3135_v41 }
 0x546   :  { %v1865_v32 = vsel %vm141_vm0, %v1819_v59, 0.0 }
 0x547   :  { %1866 = vadd.xlane.f32.xlu1 %v1865_v32 }
 0x5a7   :  { %v1822_v50 = vpop.xlane.xlu0 %1821 }
 0x5a8   :  { %v1868_v42 = vmul.f32 0.03125, %v1822_v50 }
 0x5aa   :  { %v1884_v54 = vadd.f32 1e-12, %v1868_v42 }
 0x5ab   :  { %v1825_v49 = vpop.xlane.xlu1 %1824  ;;  %v1828_v8 = vpop.xlane.xlu0 %1827 }
 0x5ac   :  { %3204 = vrsqrt.f32 %v1884_v54  ;;  %v1869_v56 = vmul.f32 0.03125, %v1825_v49  ;;  %v1870_v5 = vmul.f32 0.03125, %v1828_v8 }
 0x5ae   :  { %v1885_v51 = vadd.f32 1e-12, %v1869_v56  ;;  %v1886_v1 = vadd.f32 1e-12, %v1870_v5 }
 0x5af   :  { %v1831_v58 = vpop.xlane.xlu1 %1830 }
 0x5b0   :  { %3206 = vrsqrt.f32 %v1885_v51  ;;  %v1871_v6 = vmul.f32 0.03125, %v1831_v58 }
 0x5b1   :  { %3208 = vrsqrt.f32 %v1886_v1 }
 0x5b2   :  { %v1887_v12 = vadd.f32 1e-12, %v1871_v6 }
 0x5b4   :  { %3210 = vrsqrt.f32 %v1887_v12 }
 0x5b8   :  { %v1834_v21 = vpop.xlane.xlu0 %1833 }
 0x5b9   :  { %v3205_v9 = vpop.eup %3204  ;;  %v1872_v45 = vmul.f32 0.03125, %v1834_v21 }
 0x5ba   :  { %v1916_v18 = vmul.f32 %v3205_v9, %v4066_v30 }
 0x5bb   :  { %v1888_v25 = vadd.f32 1e-12, %v1872_v45 }
 0x5bc   :  { %v1837_v60 = vpop.xlane.xlu1 %1836  ;;  %v1840_v43 = vpop.xlane.xlu0 %1839  ;;  %v1938_v20 = vmul.f32 %v4170_v62, %v1916_v18 }
 0x5bd   :  { %v3207_v63 = vpop.eup %3206  ;;  %3212 = vrsqrt.f32 %v1888_v25  ;;  %v1873_v37 = vmul.f32 0.03125, %v1837_v60  ;;  %v1874_v2 = vmul.f32 0.03125, %v1840_v43 }
 0x5be   :  { %v3209_v57 = vpop.eup %3208  ;;  %v1917_v28 = vmul.f32 %v3207_v63, %v4071_v35  ;;  %v4183_v3 = vadd.f32 %v4177_v4, %v1938_v20 }
 0x5bf   :  { %v1918_v44 = vmul.f32 %v3209_v57, %v4074_v11  ;;  %v1889_v30 = vadd.f32 1e-12, %v1873_v37  ;;  %v1890_v48 = vadd.f32 1e-12, %v1874_v2 }
 0x5c0   :  { %v1843_v33 = vpop.xlane.xlu1 %1842  ;;  %v1939_v26 = vmul.f32 %v4170_v62, %v1917_v28  ;;  %v1846_v0 = vpop.xlane.xlu0 %1845 }
 0x5c1   :  { %v3211_v34 = vpop.eup %3210  ;;  %3214 = vrsqrt.f32 %v1889_v30  ;;  %v1875_v40 = vmul.f32 0.03125, %v1843_v33  ;;  %v1940_v10 = vmul.f32 %v4170_v62, %v1918_v44  ;;  %v1876_v35 = vmul.f32 0.03125, %v1846_v0 }
 0x5c2   :  { %v1919_v14 = vmul.f32 %v3211_v34, %v4082_v47  ;;  %3216 = vrsqrt.f32 %v1890_v48  ;;  %v4188_v11 = vadd.f32 %v4177_v4, %v1939_v26 }
 0x5c3   :  { %v1891_v19 = vadd.f32 1e-12, %v1875_v40  ;;  %v1892_v52 = vadd.f32 1e-12, %v1876_v35  ;;  %v4194_v22 = vadd.f32 %v4177_v4, %v1940_v10 }
 0x5c4   :  { %v1976_v29 = vpack.c.bf16 %v4188_v11, %v4183_v3  ;;  %v1941_v36 = vmul.f32 %v4170_v62, %v1919_v14  ;;  %v1849_v27 = vpop.xlane.xlu1 %1848  ;;  %v1852_v16 = vpop.xlane.xlu0 %1851 }
 0x5c5   :  { %3218 = vrsqrt.f32 %v1891_v19  ;;  %v1877_v47 = vmul.f32 0.03125, %v1849_v27  ;;  %v1878_v39 = vmul.f32 0.03125, %v1852_v16 }
 0x5c6   :  { %3220 = vrsqrt.f32 %v1892_v52  ;;  %3077 = vmatprep.mubr.msk.bf16.mxu1 %vm141_vm0, %v1976_v29  ;;  %v4198_v59 = vadd.f32 %v4177_v4, %v1941_v36 }
 0x5c7   :  { %v1893_v32 = vadd.f32 1e-12, %v1877_v47  ;;  %v1894_v41 = vadd.f32 1e-12, %v1878_v39 }
 0x5c8   :  { %v1977_v50 = vpack.c.bf16 %v4198_v59, %v4194_v22  ;;  %v1855_v42 = vpop.xlane.xlu1 %1854  ;;  %v1858_v54 = vpop.xlane.xlu0 %1857 }
 0x5c9   :  { %3222 = vrsqrt.f32 %v1893_v32  ;;  %v1879_v8 = vmul.f32 0.03125, %v1855_v42  ;;  %v1880_v56 = vmul.f32 0.03125, %v1858_v54 }
 0x5ca   :  { %v3213_v49 = vpop.eup %3212  ;;  %3078 = vmatmul.mubr.msk.bf16.vlgmr.msra.gmra.mxu1 %vm141_vm0, %v1977_v50  ;;  %3224 = vrsqrt.f32 %v1894_v41 }
 0x5cb   :  { %v1920_v5 = vmul.f32 %v3213_v49, %v4090_v46  ;;  %v1895_v51 = vadd.f32 1e-12, %v1879_v8  ;;  %v1896_v1 = vadd.f32 1e-12, %v1880_v56 }
 0x5cc   :  { %v1861_v58 = vpop.xlane.xlu1 %1860  ;;  %v1864_v6 = vpop.xlane.xlu0 %1863 }
 0x5cd   :  { %3226 = vrsqrt.f32 %v1895_v51  ;;  %v1881_v21 = vmul.f32 0.03125, %v1861_v58  ;;  %v1882_v9 = vmul.f32 0.03125, %v1864_v6  ;;  %v1942_v45 = vmul.f32 %v4170_v62, %v1920_v5 }
 0x5ce   :  { %v3215_v12 = vpop.eup %3214  ;;  %3228 = vrsqrt.f32 %v1896_v1 }
 0x5cf   :  { %v3217_v18 = vpop.eup %3216  ;;  %v1921_v25 = vmul.f32 %v3215_v12, %v4095_v13  ;;  %v1897_v60 = vadd.f32 1e-12, %v1881_v21  ;;  %v1898_v43 = vadd.f32 1e-12, %v1882_v9  ;;  %v4209_v57 = vadd.f32 %v4177_v4, %v1942_v45  ;;  %v3139_v9 = vld [vmem:[%s4766_s14] sm:$0xff]  }
 0x5d0   :  { %v1922_v63 = vmul.f32 %v3217_v18, %v4098_v15  ;;  %v1867_v37 = vpop.xlane.xlu1 %1866  ;;  %v4296_v45 = vld [vmem:[%s4767_s13] ss:$0 sm:$0xff] }
 0x5d1   :  { %v1943_v46 = vmul.f32 %v4170_v62, %v1921_v25  ;;  %3230 = vrsqrt.f32 %v1897_v60  ;;  %v1883_v20 = vmul.f32 0.03125, %v1867_v37 }
 0x5d2   :  { %v3219_v2 = vpop.eup %3218  ;;  %3232 = vrsqrt.f32 %v1898_v43  ;;  %v1944_v30 = vmul.f32 %v4170_v62, %v1922_v63 }
 0x5d3   :  { %v3221_v28 = vpop.eup %3220  ;;  %v4212_v44 = vadd.f32 %v4177_v4, %v1943_v46  ;;  %v1923_v13 = vmul.f32 %v3219_v2, %v4106_v55  ;;  %v1899_v48 = vadd.f32 1e-12, %v1883_v20 }
 0x5d4   :  { %v1924_v15 = vmul.f32 %v3221_v28, %v4111_v24  ;;  %v4222_v40 = vadd.f32 %v4177_v4, %v1944_v30 }
 0x5d5   :  { %v1978_v33 = vpack.c.bf16 %v4212_v44, %v4209_v57  ;;  %v1945_v26 = vmul.f32 %v4170_v62, %v1923_v13  ;;  %3234 = vrsqrt.f32 %v1899_v48 }
 0x5d6   :  { %v3223_v34 = vpop.eup %3222  ;;  %v1946_v24 = vmul.f32 %v4170_v62, %v1924_v15 }
 0x5d7   :  { %3081 = vmatprep.mubr.msk.bf16.mxu1 %vm141_vm0, %v1978_v33  ;;  %v4225_v0 = vadd.f32 %v4177_v4, %v1945_v26  ;;  %v3225_v55 = vpop.eup %3224  ;;  %v1925_v10 = vmul.f32 %v3223_v34, %v4119_v31 }
 0x5d8   :  { %v1926_v35 = vmul.f32 %v3225_v55, %v4122_v53  ;;  %v4235_v36 = vadd.f32 %v4177_v4, %v1946_v24 }
 0x5d9   :  { %v1979_v14 = vpack.c.bf16 %v4225_v0, %v4222_v40  ;;  %v1947_v19 = vmul.f32 %v4170_v62, %v1925_v10 }
 0x5da   :  { %v3227_v52 = vpop.eup %3226  ;;  %v1948_v16 = vmul.f32 %v4170_v62, %v1926_v35 }
 0x5db   :  { %3082 = vmatmul.mubr.msk.bf16.gmra.mxu1 %vm141_vm0, %v1979_v14  ;;  %v3229_v29 = vpop.eup %3228  ;;  %v4238_v27 = vadd.f32 %v4177_v4, %v1947_v19  ;;  %v1927_v31 = vmul.f32 %v3227_v52, %v4130_v38 }
 0x5dc   :  { %v1928_v47 = vmul.f32 %v3229_v29, %v4133_v61  ;;  %v4248_v50 = vadd.f32 %v4177_v4, %v1948_v16 }
 0x5dd   :  { %v1980_v53 = vpack.c.bf16 %v4238_v27, %v4235_v36  ;;  %v1949_v39 = vmul.f32 %v4170_v62, %v1927_v31 }
 0x5de   :  { %v3231_v32 = vpop.eup %3230  ;;  %v1950_v54 = vmul.f32 %v4170_v62, %v1928_v47 }
 0x5df   :  { %v3233_v41 = vpop.eup %3232  ;;  %3085 = vmatprep.mubr.msk.bf16.mxu1 %vm141_vm0, %v1980_v53  ;;  %v4251_v42 = vadd.f32 %v4177_v4, %v1949_v39  ;;  %v1929_v38 = vmul.f32 %v3231_v32, %v4142_v7 }
 0x5e0   :  { %v1930_v61 = vmul.f32 %v3233_v41, %v4145_v23  ;;  %v4261_v5 = vadd.f32 %v4177_v4, %v1950_v54 }
 0x5e1   :  { %v1981_v49 = vpack.c.bf16 %v4251_v42, %v4248_v50  ;;  %v1951_v8 = vmul.f32 %v4170_v62, %v1929_v38 }
 0x5e2   :  { %v3235_v56 = vpop.eup %3234  ;;  %v1952_v1 = vmul.f32 %v4170_v62, %v1930_v61 }
 0x5e3   :  { %3086 = vmatmul.mubr.msk.bf16.gmra.mxu1 %vm141_vm0, %v1981_v49  ;;  %v4264_v51 = vadd.f32 %v4177_v4, %v1951_v8  ;;  %v1931_v7 = vmul.f32 %v3235_v56, %v4154_v17  ;;  %v3136_v17 = vld [vmem:[%s4766_s14 + $0x18] sm:$0xff]  }
 0x5e4   :  { %v4273_v6 = vadd.f32 %v4177_v4, %v1952_v1  ;;  %3093 = vmatprep.subr.bf16.mxu0 %v3136_v17 }
 0x5e5   :  { %v1982_v23 = vpack.c.bf16 %v4264_v51, %v4261_v5  ;;  %v1953_v58 = vmul.f32 %v4170_v62, %v1931_v7  ;;  %3094 = vmatpush3.bf16.msra.mxu0 %v3136_v17  ;;  %v3137_v62 = vld [vmem:[%s4766_s14 + $0x10] sm:$0xff]  }
 0x5e6   :  { %3095 = vmatprep.subr.bf16.mxu0 %v3137_v62 }
 0x5e7   :  { %3089 = vmatprep.mubr.msk.bf16.mxu1 %vm141_vm0, %v1982_v23  ;;  %v4276_v12 = vadd.f32 %v4177_v4, %v1953_v58  ;;  %v3138_v4 = vld [vmem:[%s4766_s14 + $0x8] sm:$0xff]  }
 0x5e9   :  { %v1983_v21 = vpack.c.bf16 %v4276_v12, %v4273_v6  ;;  %3096 = vmatpush3.bf16.msra.mxu0 %v3137_v62 }
 0x5ea   :  { %3097 = vmatprep.subr.bf16.mxu0 %v3138_v4 }
 0x5eb   :  { %3090 = vmatmul.mubr.msk.bf16.gmra.mxu1 %vm141_vm0, %v1983_v21 }
 0x5ed   :  { %3098 = vmatpush3.bf16.msra.mxu0 %v3138_v4 }
 0x5ee   :  { %3099 = vmatprep.subr.bf16.mxu0 %v3139_v9 }
 0x5f1   :  { %3100 = vmatpush3.bf16.msra.mxu0 %v3139_v9 }
 0x68a   :  { %v3079_v18 = vpop.f32.mrf.mxu1 }
 0x68b   :  { %v4299_v25 = vadd.f32 %v3079_v18, %v4296_v45 }
 0x68c   :  { %v2060_v60 = vpop.f32.mrf.mxu1 }
 0x68d   :  { %v2125_v43 = vmul.f32 %v4299_v25, %v4299_v25  ;;  %v4304_v63 = vadd.f32 %v4296_v45, %v2060_v60 }
 0x68e   :  { %v3080_v37 = vpop.f32.mrf.mxu1 }
 0x68f   :  { %v2141_v46 = vmul.f32 %v2125_v43, %v4299_v25  ;;  %v2123_v2 = vmul.f32 %v4304_v63, %v4304_v63  ;;  %v4310_v20 = vadd.f32 %v3080_v37, %v4296_v45 }
 0x690   :  { %v2063_v28 = vpop.f32.mrf.mxu1 }
 0x691   :  { %v2157_v13 = vmul.f32 0.044715, %v2141_v46  ;;  %v2139_v30 = vmul.f32 %v2123_v2, %v4304_v63  ;;  %v2126_v48 = vmul.f32 %v4310_v20, %v4310_v20  ;;  %v4316_v15 = vadd.f32 %v4296_v45, %v2063_v28 }
 0x693   :  { %v2173_v33 = vadd.f32 %v2157_v13, %v4299_v25  ;;  %v2155_v26 = vmul.f32 0.044715, %v2139_v30  ;;  %v2142_v34 = vmul.f32 %v2126_v48, %v4310_v20  ;;  %v2124_v55 = vmul.f32 %v4316_v15, %v4316_v15 }
 0x695   :  { %v2189_v10 = vmul.f32 0.7978846, %v2173_v33  ;;  %v2171_v24 = vadd.f32 %v2155_v26, %v4304_v63  ;;  %v2158_v14 = vmul.f32 0.044715, %v2142_v34  ;;  %v2140_v35 = vmul.f32 %v2124_v55, %v4316_v15 }
 0x697   :  { %3236 = vtanh.f32 %v2189_v10  ;;  %v2187_v19 = vmul.f32 0.7978846, %v2171_v24  ;;  %v2174_v52 = vadd.f32 %v2158_v14, %v4310_v20  ;;  %v2156_v29 = vmul.f32 0.044715, %v2140_v35 }
 0x699   :  { %3238 = vtanh.f32 %v2187_v19  ;;  %v2190_v31 = vmul.f32 0.7978846, %v2174_v52  ;;  %v2172_v16 = vadd.f32 %v2156_v29, %v4316_v15 }
 0x69b   :  { %3240 = vtanh.f32 %v2190_v31  ;;  %v2188_v47 = vmul.f32 0.7978846, %v2172_v16  ;;  %v3083_v53 = vpop.f32.mrf.mxu1 }
 0x69c   :  { %v4327_v39 = vadd.f32 %v3083_v53, %v4296_v45 }
 0x69d   :  { %3242 = vtanh.f32 %v2188_v47  ;;  %v2076_v32 = vpop.f32.mrf.mxu1 }
 0x69e   :  { %v2129_v41 = vmul.f32 %v4327_v39, %v4327_v39  ;;  %v4332_v38 = vadd.f32 %v4296_v45, %v2076_v32 }
 0x69f   :  { %v3084_v54 = vpop.f32.mrf.mxu1 }
 0x6a0   :  { %v2145_v61 = vmul.f32 %v2129_v41, %v4327_v39  ;;  %v2127_v49 = vmul.f32 %v4332_v38, %v4332_v38  ;;  %v4338_v8 = vadd.f32 %v3084_v54, %v4296_v45 }
 0x6a1   :  { %v2079_v56 = vpop.f32.mrf.mxu1 }
 0x6a2   :  { %v2161_v7 = vmul.f32 0.044715, %v2145_v61  ;;  %v2143_v1 = vmul.f32 %v2127_v49, %v4332_v38  ;;  %v2130_v23 = vmul.f32 %v4338_v8, %v4338_v8  ;;  %v4344_v58 = vadd.f32 %v4296_v45, %v2079_v56 }
 0x6a3   :  { %v3087_v18 = vpop.f32.mrf.mxu1 }
 0x6a4   :  { %v3237_v21 = vpop.eup %3236  ;;  %v2177_v17 = vadd.f32 %v2161_v7, %v4327_v39  ;;  %v2159_v62 = vmul.f32 0.044715, %v2143_v1  ;;  %v2146_v4 = vmul.f32 %v2130_v23, %v4338_v8  ;;  %v2128_v9 = vmul.f32 %v4344_v58, %v4344_v58 }
 0x6a5   :  { %v2221_v60 = vadd.f32 1.0, %v3237_v21  ;;  %v4351_v43 = vadd.f32 %v3087_v18, %v4296_v45  ;;  %v2092_v30 = vpop.f32.mrf.mxu1 }
 0x6a6   :  { %v3239_v37 = vpop.eup %3238  ;;  %v2193_v46 = vmul.f32 0.7978846, %v2177_v17  ;;  %v2175_v2 = vadd.f32 %v2159_v62, %v4332_v38  ;;  %v2162_v28 = vmul.f32 0.044715, %v2146_v4  ;;  %v2144_v13 = vmul.f32 %v2128_v9, %v4344_v58 }
 0x6a7   :  { %v2237_v48 = vmul.f32 0.5, %v2221_v60  ;;  %v2219_v33 = vadd.f32 1.0, %v3239_v37  ;;  %v2133_v26 = vmul.f32 %v4351_v43, %v4351_v43  ;;  %v4358_v34 = vadd.f32 %v4296_v45, %v2092_v30  ;;  %v3088_v35 = vpop.f32.mrf.mxu1 }
 0x6a8   :  { %v3241_v55 = vpop.eup %3240  ;;  %3244 = vtanh.f32 %v2193_v46  ;;  %v2191_v10 = vmul.f32 0.7978846, %v2175_v2  ;;  %v2178_v24 = vadd.f32 %v2162_v28, %v4338_v8  ;;  %v2160_v14 = vmul.f32 0.044715, %v2144_v13 }
 0x6a9   :  { %v2253_v19 = vmul.f32 %v2237_v48, %v4299_v25  ;;  %v2222_v52 = vadd.f32 1.0, %v3241_v55  ;;  %v2149_v29 = vmul.f32 %v2133_v26, %v4351_v43  ;;  %v2131_v53 = vmul.f32 %v4358_v34, %v4358_v34  ;;  %v2095_v32 = vpop.f32.mrf.mxu1 }
 0x6aa   :  { %v3243_v31 = vpop.eup %3242  ;;  %3246 = vtanh.f32 %v2191_v10  ;;  %v2194_v16 = vmul.f32 0.7978846, %v2178_v24  ;;  %v2176_v47 = vadd.f32 %v2160_v14, %v4344_v58  ;;  %v2235_v41 = vmul.f32 0.5, %v2219_v33 }
 0x6ab   :  { %v2238_v54 = vmul.f32 0.5, %v2222_v52  ;;  %v2220_v61 = vadd.f32 1.0, %v3243_v31  ;;  %v2165_v49 = vmul.f32 0.044715, %v2149_v29  ;;  %v2147_v25 = vmul.f32 %v2131_v53, %v4358_v34  ;;  %v3091_v1 = vpop.f32.mrf.mxu1 }
 0x6ac   :  { %3248 = vtanh.f32 %v2194_v16  ;;  %v2192_v56 = vmul.f32 0.7978846, %v2176_v47  ;;  %v4368_v7 = vadd.f32 %v3088_v35, %v4296_v45  ;;  %v4373_v62 = vadd.f32 %v4296_v45, %v2095_v32 }
 0x6ad   :  { %v2254_v23 = vmul.f32 %v2238_v54, %v4310_v20  ;;  %v2236_v21 = vmul.f32 0.5, %v2220_v61  ;;  %v2181_v17 = vadd.f32 %v2165_v49, %v4351_v43  ;;  %v2163_v4 = vmul.f32 0.044715, %v2147_v25  ;;  %v2108_v60 = vpop.f32.mrf.mxu1 }
 0x6ae   :  { %3250 = vtanh.f32 %v2192_v56  ;;  %v2134_v9 = vmul.f32 %v4368_v7, %v4368_v7  ;;  %v4378_v18 = vadd.f32 %v3091_v1, %v4296_v45  ;;  %v2251_v37 = vmul.f32 %v2235_v41, %v4304_v63 }
 0x6af   :  { %v2252_v46 = vmul.f32 %v2236_v21, %v4316_v15  ;;  %v2197_v20 = vmul.f32 0.7978846, %v2181_v17  ;;  %v2132_v2 = vmul.f32 %v4373_v62, %v4373_v62  ;;  %v2179_v28 = vadd.f32 %v2163_v4, %v4358_v34  ;;  %v3092_v33 = vpop.f32.mrf.mxu1 }
 0x6b0   :  { %v2150_v13 = vmul.f32 %v2134_v9, %v4368_v7  ;;  %v2137_v30 = vmul.f32 %v4378_v18, %v4378_v18  ;;  %v4389_v48 = vadd.f32 %v4296_v45, %v2108_v60  ;;  %v2268_v26 = vpack.c.bf16 %v2254_v23, %v2253_v19 }
 0x6b1   :  { %v2148_v63 = vmul.f32 %v2132_v2, %v4373_v62  ;;  %v4393_v15 = vadd.f32 %v3092_v33, %v4296_v45  ;;  %v2267_v55 = vpack.c.bf16 %v2252_v46, %v2251_v37  ;;  %v2195_v10 = vmul.f32 0.7978846, %v2179_v28  ;;  %v2111_v52 = vpop.f32.mrf.mxu1 }
 0x6b2   :  { %v2166_v24 = vmul.f32 0.044715, %v2150_v13  ;;  %v2153_v14 = vmul.f32 %v2137_v30, %v4378_v18  ;;  %v2135_v35 = vmul.f32 %v4389_v48, %v4389_v48  ;;  %3252 = vtanh.f32 %v2197_v20 }
 0x6b3   :  { %v2164_v29 = vmul.f32 0.044715, %v2148_v63  ;;  %v2138_v31 = vmul.f32 %v4393_v15, %v4393_v15  ;;  %v4401_v19 = vadd.f32 %v4296_v45, %v2111_v52  ;;  %3101 = vmatprep.mubr.msk.bf16.mxu0 %vm2305_vm1, %v2267_v55  ;;  %3254 = vtanh.f32 %v2195_v10 }
 0x6b4   :  { %v2182_v16 = vadd.f32 %v2166_v24, %v4368_v7  ;;  %v2169_v47 = vmul.f32 0.044715, %v2153_v14  ;;  %v2151_v53 = vmul.f32 %v2135_v35, %v4389_v48  ;;  %3102 = vmatmul.mubr.msk.bf16.vlgmr.msra.gmra.mxu0 %vm2305_vm1, %v2268_v26 }
 0x6b5   :  { %v3245_v32 = vpop.eup %3244  ;;  %v2180_v41 = vadd.f32 %v2164_v29, %v4373_v62  ;;  %v2154_v54 = vmul.f32 %v2138_v31, %v4393_v15  ;;  %v2136_v61 = vmul.f32 %v4401_v19, %v4401_v19 }
 0x6b6   :  { %v2198_v45 = vmul.f32 0.7978846, %v2182_v16  ;;  %v2185_v49 = vadd.f32 %v2169_v47, %v4378_v18  ;;  %v2167_v56 = vmul.f32 0.044715, %v2151_v53  ;;  %v2225_v17 = vadd.f32 1.0, %v3245_v32 }
 0x6b7   :  { %v3247_v25 = vpop.eup %3246  ;;  %v2196_v1 = vmul.f32 0.7978846, %v2180_v41  ;;  %v2170_v23 = vmul.f32 0.044715, %v2154_v54  ;;  %v2152_v21 = vmul.f32 %v2136_v61, %v4401_v19 }
 0x6b8   :  { %v2223_v4 = vadd.f32 1.0, %v3247_v25  ;;  %3256 = vtanh.f32 %v2198_v45  ;;  %v2201_v9 = vmul.f32 0.7978846, %v2185_v49  ;;  %v2183_v37 = vadd.f32 %v2167_v56, %v4389_v48 }
 0x6b9   :  { %v3249_v60 = vpop.eup %3248  ;;  %3258 = vtanh.f32 %v2196_v1  ;;  %v2186_v46 = vadd.f32 %v2170_v23, %v4393_v15  ;;  %v2168_v20 = vmul.f32 0.044715, %v2152_v21  ;;  %v2241_v10 = vmul.f32 0.5, %v2225_v17 }
 0x6ba   :  { %v2226_v2 = vadd.f32 1.0, %v3249_v60  ;;  %v2199_v13 = vmul.f32 0.7978846, %v2183_v37  ;;  %v2239_v26 = vmul.f32 0.5, %v2223_v4  ;;  %3260 = vtanh.f32 %v2201_v9 }
 0x6bb   :  { %v3251_v28 = vpop.eup %3250  ;;  %v2202_v30 = vmul.f32 0.7978846, %v2186_v46  ;;  %v2184_v33 = vadd.f32 %v2168_v20, %v4401_v19  ;;  %v2257_v47 = vmul.f32 %v2241_v10, %v4327_v39 }
 0x6bc   :  { %v2242_v63 = vmul.f32 0.5, %v2226_v2  ;;  %v2224_v55 = vadd.f32 1.0, %v3251_v28  ;;  %3262 = vtanh.f32 %v2199_v13  ;;  %v2255_v29 = vmul.f32 %v2239_v26, %v4332_v38 }
 0x6bd   :  { %v2200_v24 = vmul.f32 0.7978846, %v2184_v33  ;;  %3264 = vtanh.f32 %v2202_v30 }
 0x6be   :  { %v2240_v14 = vmul.f32 0.5, %v2224_v55  ;;  %v2258_v35 = vmul.f32 %v2242_v63, %v4338_v8 }
 0x6bf   :  { %3266 = vtanh.f32 %v2200_v24  ;;  %v3253_v52 = vpop.eup %3252  ;;  %v4437_v24 = vld [vmem:[%s4768_s15] ss:$0 sm:$0xff] }
 0x6c0   :  { %v2256_v31 = vmul.f32 %v2240_v14, %v4344_v58  ;;  %v3255_v16 = vpop.eup %3254  ;;  %v2270_v41 = vpack.c.bf16 %v2258_v35, %v2257_v47  ;;  %v2229_v54 = vadd.f32 1.0, %v3253_v52 }
 0x6c1   :  { %v2227_v32 = vadd.f32 1.0, %v3255_v16 }
 0x6c2   :  { %v2269_v53 = vpack.c.bf16 %v2256_v31, %v2255_v29  ;;  %v2245_v25 = vmul.f32 0.5, %v2229_v54 }
 0x6c3   :  { %v2243_v49 = vmul.f32 0.5, %v2227_v32 }
 0x6c4   :  { %3105 = vmatprep.mubr.msk.bf16.mxu0 %vm2305_vm1, %v2269_v53  ;;  %v2261_v37 = vmul.f32 %v2245_v25, %v4351_v43 }
 0x6c5   :  { %v3257_v61 = vpop.eup %3256  ;;  %3106 = vmatmul.mubr.msk.bf16.gmra.mxu0 %vm2305_vm1, %v2270_v41  ;;  %v2259_v17 = vmul.f32 %v2243_v49, %v4358_v34 }
 0x6c6   :  { %v3259_v45 = vpop.eup %3258  ;;  %v2230_v8 = vadd.f32 1.0, %v3257_v61 }
 0x6c7   :  { %v2228_v56 = vadd.f32 1.0, %v3259_v45  ;;  %v3261_v1 = vpop.eup %3260 }
 0x6c8   :  { %v2246_v38 = vmul.f32 0.5, %v2230_v8  ;;  %v2233_v46 = vadd.f32 1.0, %v3261_v1 }
 0x6c9   :  { %v2244_v58 = vmul.f32 0.5, %v2228_v56  ;;  %v3263_v23 = vpop.eup %3262 }
 0x6ca   :  { %v2262_v39 = vmul.f32 %v2246_v38, %v4368_v7  ;;  %v3265_v21 = vpop.eup %3264  ;;  %v2231_v9 = vadd.f32 1.0, %v3263_v23  ;;  %v2249_v7 = vmul.f32 0.5, %v2233_v46 }
 0x6cb   :  { %v2260_v4 = vmul.f32 %v2244_v58, %v4373_v62  ;;  %v2234_v20 = vadd.f32 1.0, %v3265_v21 }
 0x6cc   :  { %v3267_v60 = vpop.eup %3266  ;;  %v2247_v2 = vmul.f32 0.5, %v2231_v9  ;;  %v2272_v33 = vpack.c.bf16 %v2262_v39, %v2261_v37  ;;  %v2265_v55 = vmul.f32 %v2249_v7, %v4378_v18 }
 0x6cd   :  { %v2232_v28 = vadd.f32 1.0, %v3267_v60  ;;  %v2271_v13 = vpack.c.bf16 %v2260_v4, %v2259_v17  ;;  %v2250_v30 = vmul.f32 0.5, %v2234_v20 }
 0x6ce   :  { %v2263_v34 = vmul.f32 %v2247_v2, %v4389_v48 }
 0x6cf   :  { %v2248_v26 = vmul.f32 0.5, %v2232_v28  ;;  %3109 = vmatprep.mubr.msk.bf16.mxu0 %vm2305_vm1, %v2271_v13  ;;  %v2266_v63 = vmul.f32 %v2250_v30, %v4393_v15 }
 0x6d0   :  { %3110 = vmatmul.mubr.msk.bf16.gmra.mxu0 %vm2305_vm1, %v2272_v33 }
 0x6d1   :  { %v2264_v62 = vmul.f32 %v2248_v26, %v4401_v19  ;;  %v2274_v10 = vpack.c.bf16 %v2266_v63, %v2265_v55 }
 0x6d3   :  { %v2273_v43 = vpack.c.bf16 %v2264_v62, %v2263_v34 }
 0x6d5   :  { %3113 = vmatprep.mubr.msk.bf16.mxu0 %vm2305_vm1, %v2273_v43 }
 0x6d8   :  { %3114 = vmatmul.mubr.msk.bf16.gmra.mxu0 %vm2305_vm1, %v2274_v10 }
 0x774   :  { %v3103_v14 = vpop.f32.mrf.mxu0 }
 0x775   :  { %v2373_v48 = vadd.f32 %v3103_v14, %v4437_v24 }
 0x776   :  { %v2364_v35 = vpop.f32.mrf.mxu0 }
 0x777   :  { %v2365_v19 = vadd.f32 %v4437_v24, %v2364_v35  ;;  %v4442_v15 = vadd.f32 %v2373_v48, %v4194_v22 }
 0x778   :  { %v3104_v18 = vpop.f32.mrf.mxu0 }
 0x779   :  { %v2376_v52 = vadd.f32 %v3104_v18, %v4437_v24  ;;  %v2449_v29 = vsel %vm141_vm0, %v4442_v15, 0.0  ;;  %v4448_v31 = vadd.f32 %v2365_v19, %v4183_v3 }
 0x77a   :  { %2450 = vadd.xlane.f32.xlu0 %v2449_v29  ;;  %v2367_v16 = vpop.f32.mrf.mxu0 }
 0x77b   :  { %v2368_v47 = vadd.f32 %v4437_v24, %v2367_v16  ;;  %v4452_v53 = vadd.f32 %v2376_v52, %v4198_v59  ;;  %v2443_v32 = vsel %vm141_vm0, %v4448_v31, 0.0 }
 0x77d   :  { %v2452_v22 = vsel %vm141_vm0, %v4452_v53, 0.0  ;;  %v4459_v41 = vadd.f32 %v2368_v47, %v4188_v11 }
 0x77e   :  { %2453 = vadd.xlane.f32.xlu1 %v2452_v22  ;;  %2444 = vadd.xlane.f32.xlu0 %v2443_v32 }
 0x77f   :  { %v2446_v3 = vsel %vm141_vm0, %v4459_v41, 0.0 }
 0x782   :  { %2447 = vadd.xlane.f32.xlu1 %v2446_v3 }
 0x785   :  { %v3107_v54 = vpop.f32.mrf.mxu0 }
 0x786   :  { %v2389_v61 = vadd.f32 %v3107_v54, %v4437_v24 }
 0x787   :  { %v2380_v59 = vpop.f32.mrf.mxu0 }
 0x788   :  { %v2381_v45 = vadd.f32 %v4437_v24, %v2380_v59  ;;  %v4466_v8 = vadd.f32 %v2389_v61, %v4222_v40 }
 0x789   :  { %v3108_v49 = vpop.f32.mrf.mxu0 }
 0x78a   :  { %v2392_v56 = vadd.f32 %v3108_v49, %v4437_v24  ;;  %v2461_v11 = vsel %vm141_vm0, %v4466_v8, 0.0  ;;  %v4472_v25 = vadd.f32 %v2381_v45, %v4209_v57 }
 0x78b   :  { %v2383_v38 = vpop.f32.mrf.mxu0  ;;  %2462 = vadd.xlane.f32.xlu0 %v2461_v11 }
 0x78c   :  { %v2384_v1 = vadd.f32 %v4437_v24, %v2383_v38  ;;  %v4476_v58 = vadd.f32 %v2392_v56, %v4225_v0  ;;  %v2455_v23 = vsel %vm141_vm0, %v4472_v25, 0.0 }
 0x78e   :  { %v2464_v40 = vsel %vm141_vm0, %v4476_v58, 0.0  ;;  %v4483_v39 = vadd.f32 %v2384_v1, %v4212_v44 }
 0x78f   :  { %2465 = vadd.xlane.f32.xlu1 %v2464_v40  ;;  %2456 = vadd.xlane.f32.xlu0 %v2455_v23 }
 0x790   :  { %v3111_v57 = vpop.f32.mrf.mxu0  ;;  %v2458_v4 = vsel %vm141_vm0, %v4483_v39, 0.0 }
 0x791   :  { %v2405_v21 = vadd.f32 %v3111_v57, %v4437_v24 }
 0x792   :  { %v2396_v17 = vpop.f32.mrf.mxu0 }
 0x793   :  { %v2397_v0 = vadd.f32 %v4437_v24, %v2396_v17  ;;  %2459 = vadd.xlane.f32.xlu1 %v2458_v4  ;;  %v4490_v9 = vadd.f32 %v2405_v21, %v4248_v50 }
 0x794   :  { %v3112_v60 = vpop.f32.mrf.mxu0 }
 0x795   :  { %v2408_v37 = vadd.f32 %v3112_v60, %v4437_v24  ;;  %v2473_v44 = vsel %vm141_vm0, %v4490_v9, 0.0  ;;  %v4496_v46 = vadd.f32 %v2397_v0, %v4235_v36 }
 0x796   :  { %v2399_v20 = vpop.f32.mrf.mxu0  ;;  %2474 = vadd.xlane.f32.xlu0 %v2473_v44 }
 0x797   :  { %v2400_v2 = vadd.f32 %v4437_v24, %v2399_v20  ;;  %v4500_v28 = vadd.f32 %v2408_v37, %v4251_v42  ;;  %v2467_v30 = vsel %vm141_vm0, %v4496_v46, 0.0 }
 0x798   :  { %v3115_v13 = vpop.f32.mrf.mxu0 }
 0x799   :  { %v2476_v50 = vsel %vm141_vm0, %v4500_v28, 0.0  ;;  %v4507_v33 = vadd.f32 %v2400_v2, %v4238_v27  ;;  %v2421_v36 = vadd.f32 %v3115_v13, %v4437_v24 }
 0x79a   :  { %v2412_v26 = vpop.f32.mrf.mxu0  ;;  %2477 = vadd.xlane.f32.xlu1 %v2476_v50  ;;  %2468 = vadd.xlane.f32.xlu0 %v2467_v30 }
 0x79b   :  { %v2413_v7 = vadd.f32 %v4437_v24, %v2412_v26  ;;  %v2470_v42 = vsel %vm141_vm0, %v4507_v33, 0.0  ;;  %v4521_v10 = vadd.f32 %v2421_v36, %v4273_v6 }
 0x79c   :  { %v3116_v34 = vpop.f32.mrf.mxu0 }
 0x79d   :  { %v4514_v62 = vadd.f32 %v2413_v7, %v4261_v5  ;;  %v2424_v43 = vadd.f32 %v3116_v34, %v4437_v24  ;;  %v2485_v48 = vsel %vm141_vm0, %v4521_v10, 0.0 }
 0x79e   :  { %v2415_v63 = vpop.f32.mrf.mxu0  ;;  %2471 = vadd.xlane.f32.xlu1 %v2470_v42 }
 0x79f   :  { %v2416_v27 = vadd.f32 %v4437_v24, %v2415_v63  ;;  %v2479_v55 = vsel %vm141_vm0, %v4514_v62, 0.0  ;;  %v4531_v35 = vadd.f32 %v2424_v43, %v4276_v12 }
 0x7a0   :  { %2480 = vadd.xlane.f32.xlu0 %v2479_v55 }
 0x7a1   :  { %v4524_v14 = vadd.f32 %v2416_v27, %v4264_v51  ;;  %v2488_v24 = vsel %vm141_vm0, %v4531_v35, 0.0 }
 0x7a3   :  { %v2482_v5 = vsel %vm141_vm0, %v4524_v14, 0.0 }
 0x7a4   :  { %2483 = vadd.xlane.f32.xlu1 %v2482_v5  ;;  %2486 = vadd.xlane.f32.xlu0 %v2485_v48 }
 0x7a8   :  { %2489 = vadd.xlane.f32.xlu1 %v2488_v24 }
 0x803   :  { %v2451_v6 = vpop.xlane.xlu0 %2450 }
 0x804   :  { %v2493_v19 = vmul.f32 0.03125, %v2451_v6 }
 0x806   :  { %v4536_v51 = vsub.f32 %v4442_v15, %v2493_v19 }
 0x807   :  { %v2454_v18 = vpop.xlane.xlu1 %2453  ;;  %v2445_v52 = vpop.xlane.xlu0 %2444 }
 0x808   :  { %v2494_v29 = vmul.f32 0.03125, %v2454_v18  ;;  %v2491_v16 = vmul.f32 0.03125, %v2445_v52  ;;  %v2525_v47 = vmul.f32 %v4536_v51, %v4536_v51 }
 0x80a   :  { %v4541_v12 = vsub.f32 %v4452_v53, %v2494_v29  ;;  %v4544_v22 = vsub.f32 %v4448_v31, %v2491_v16  ;;  %v2545_v32 = vsel %vm141_vm0, %v2525_v47, 0.0 }
 0x80b   :  { %v2448_v3 = vpop.xlane.xlu1 %2447  ;;  %2546 = vadd.xlane.f32.xlu0 %v2545_v32 }
 0x80c   :  { %v2492_v54 = vmul.f32 0.03125, %v2448_v3  ;;  %v2526_v15 = vmul.f32 %v4541_v12, %v4541_v12  ;;  %v2523_v61 = vmul.f32 %v4544_v22, %v4544_v22 }
 0x80e   :  { %v4552_v59 = vsub.f32 %v4459_v41, %v2492_v54  ;;  %v2548_v53 = vsel %vm141_vm0, %v2526_v15, 0.0  ;;  %v2539_v45 = vsel %vm141_vm0, %v2523_v61, 0.0 }
 0x80f   :  { %2549 = vadd.xlane.f32.xlu1 %v2548_v53  ;;  %2540 = vadd.xlane.f32.xlu0 %v2539_v45 }
 0x810   :  { %v2524_v31 = vmul.f32 %v4552_v59, %v4552_v59 }
 0x812   :  { %v2542_v49 = vsel %vm141_vm0, %v2524_v31, 0.0 }
 0x813   :  { %2543 = vadd.xlane.f32.xlu1 %v2542_v49 }
 0x814   :  { %v2463_v56 = vpop.xlane.xlu0 %2462 }
 0x815   :  { %v2497_v11 = vmul.f32 0.03125, %v2463_v56 }
 0x817   :  { %v4560_v38 = vsub.f32 %v4466_v8, %v2497_v11 }
 0x818   :  { %v2466_v1 = vpop.xlane.xlu1 %2465  ;;  %v2457_v41 = vpop.xlane.xlu0 %2456 }
 0x819   :  { %v2498_v40 = vmul.f32 0.03125, %v2466_v1  ;;  %v2495_v23 = vmul.f32 0.03125, %v2457_v41  ;;  %v2529_v57 = vmul.f32 %v4560_v38, %v4560_v38 }
 0x81b   :  { %v4565_v21 = vsub.f32 %v4476_v58, %v2498_v40  ;;  %v4568_v17 = vsub.f32 %v4472_v25, %v2495_v23  ;;  %v2557_v4 = vsel %vm141_vm0, %v2529_v57, 0.0 }
 0x81c   :  { %v2460_v0 = vpop.xlane.xlu1 %2459  ;;  %2558 = vadd.xlane.f32.xlu0 %v2557_v4 }
 0x81d   :  { %v2496_v60 = vmul.f32 0.03125, %v2460_v0  ;;  %v2530_v8 = vmul.f32 %v4565_v21, %v4565_v21  ;;  %v2527_v37 = vmul.f32 %v4568_v17, %v4568_v17 }
 0x81f   :  { %v4576_v44 = vsub.f32 %v4483_v39, %v2496_v60  ;;  %v2475_v20 = vpop.xlane.xlu0 %2474  ;;  %v2560_v58 = vsel %vm141_vm0, %v2530_v8, 0.0  ;;  %v2551_v25 = vsel %vm141_vm0, %v2527_v37, 0.0 }
 0x820   :  { %v2501_v2 = vmul.f32 0.03125, %v2475_v20  ;;  %2561 = vadd.xlane.f32.xlu1 %v2560_v58  ;;  %2552 = vadd.xlane.f32.xlu0 %v2551_v25  ;;  %v4634_v25 = vld [vmem:[%s4769_s16] ss:$0 sm:$0xff] }
 0x821   :  { %v2528_v13 = vmul.f32 %v4576_v44, %v4576_v44 }
 0x822   :  { %v4583_v50 = vsub.f32 %v4490_v9, %v2501_v2 }
 0x823   :  { %v2478_v30 = vpop.xlane.xlu1 %2477  ;;  %v2469_v26 = vpop.xlane.xlu0 %2468  ;;  %v2554_v36 = vsel %vm141_vm0, %v2528_v13, 0.0 }
 0x824   :  { %v2502_v39 = vmul.f32 0.03125, %v2478_v30  ;;  %v2499_v7 = vmul.f32 0.03125, %v2469_v26  ;;  %2555 = vadd.xlane.f32.xlu1 %v2554_v36  ;;  %v2533_v34 = vmul.f32 %v4583_v50, %v4583_v50  ;;  %v4640_v30 = vld [vmem:[%s4770_s17] ss:$0 sm:$0xff] }
 0x826   :  { %v4589_v42 = vsub.f32 %v4500_v28, %v2502_v39  ;;  %v4592_v63 = vsub.f32 %v4496_v46, %v2499_v7  ;;  %v2569_v43 = vsel %vm141_vm0, %v2533_v34, 0.0 }
 0x827   :  { %v2472_v9 = vpop.xlane.xlu1 %2471  ;;  %2570 = vadd.xlane.f32.xlu0 %v2569_v43 }
 0x828   :  { %v2500_v27 = vmul.f32 0.03125, %v2472_v9  ;;  %v2534_v55 = vmul.f32 %v4589_v42, %v4589_v42  ;;  %v2531_v5 = vmul.f32 %v4592_v63, %v4592_v63 }
 0x829   :  { %v2481_v48 = vpop.xlane.xlu0 %2480 }
 0x82a   :  { %v4600_v24 = vsub.f32 %v4507_v33, %v2500_v27  ;;  %v2503_v28 = vmul.f32 0.03125, %v2481_v48  ;;  %v2572_v6 = vsel %vm141_vm0, %v2534_v55, 0.0  ;;  %v2563_v46 = vsel %vm141_vm0, %v2531_v5, 0.0 }
 0x82b   :  { %2573 = vadd.xlane.f32.xlu1 %v2572_v6  ;;  %2564 = vadd.xlane.f32.xlu0 %v2563_v46 }
 0x82c   :  { %v4605_v19 = vsub.f32 %v4514_v62, %v2503_v28  ;;  %v2532_v18 = vmul.f32 %v4600_v24, %v4600_v24 }
 0x82d   :  { %v2484_v52 = vpop.xlane.xlu1 %2483  ;;  %v2487_v29 = vpop.xlane.xlu0 %2486 }
 0x82e   :  { %v2504_v16 = vmul.f32 0.03125, %v2484_v52  ;;  %v2505_v47 = vmul.f32 0.03125, %v2487_v29  ;;  %v2566_v33 = vsel %vm141_vm0, %v2532_v18, 0.0  ;;  %v2535_v32 = vmul.f32 %v4605_v19, %v4605_v19 }
 0x82f   :  { %2567 = vadd.xlane.f32.xlu1 %v2566_v33 }
 0x830   :  { %v4613_v3 = vsub.f32 %v4524_v14, %v2504_v16  ;;  %v4616_v54 = vsub.f32 %v4521_v10, %v2505_v47  ;;  %v2575_v62 = vsel %vm141_vm0, %v2535_v32, 0.0 }
 0x831   :  { %v2490_v15 = vpop.xlane.xlu1 %2489  ;;  %2576 = vadd.xlane.f32.xlu0 %v2575_v62 }
 0x832   :  { %v2506_v61 = vmul.f32 0.03125, %v2490_v15  ;;  %v2536_v53 = vmul.f32 %v4613_v3, %v4613_v3  ;;  %v2537_v45 = vmul.f32 %v4616_v54, %v4616_v54 }
 0x834   :  { %v4624_v31 = vsub.f32 %v4531_v35, %v2506_v61  ;;  %v2578_v14 = vsel %vm141_vm0, %v2536_v53, 0.0  ;;  %v2581_v49 = vsel %vm141_vm0, %v2537_v45, 0.0 }
 0x835   :  { %2579 = vadd.xlane.f32.xlu1 %v2578_v14  ;;  %2582 = vadd.xlane.f32.xlu0 %v2581_v49 }
 0x836   :  { %v2538_v10 = vmul.f32 %v4624_v31, %v4624_v31 }
 0x838   :  { %v2584_v56 = vsel %vm141_vm0, %v2538_v10, 0.0 }
 0x839   :  { %2585 = vadd.xlane.f32.xlu1 %v2584_v56 }
 0x894   :  { %v2547_v11 = vpop.xlane.xlu0 %2546 }
 0x895   :  { %v2589_v1 = vmul.f32 0.03125, %v2547_v11 }
 0x897   :  { %v2605_v41 = vadd.f32 1e-12, %v2589_v1 }
 0x898   :  { %v2550_v40 = vpop.xlane.xlu1 %2549  ;;  %v2541_v23 = vpop.xlane.xlu0 %2540 }
 0x899   :  { %3268 = vrsqrt.f32 %v2605_v41  ;;  %v2590_v35 = vmul.f32 0.03125, %v2550_v40  ;;  %v2587_v57 = vmul.f32 0.03125, %v2541_v23 }
 0x89b   :  { %v2606_v4 = vadd.f32 1e-12, %v2590_v35  ;;  %v2603_v0 = vadd.f32 1e-12, %v2587_v57 }
 0x89c   :  { %v2544_v60 = vpop.xlane.xlu1 %2543 }
 0x89d   :  { %3270 = vrsqrt.f32 %v2606_v4  ;;  %v2588_v8 = vmul.f32 0.03125, %v2544_v60 }
 0x89e   :  { %3272 = vrsqrt.f32 %v2603_v0 }
 0x89f   :  { %v2604_v37 = vadd.f32 1e-12, %v2588_v8 }
 0x8a1   :  { %3274 = vrsqrt.f32 %v2604_v37 }
 0x8a5   :  { %v2559_v20 = vpop.xlane.xlu0 %2558 }
 0x8a6   :  { %v3269_v58 = vpop.eup %3268  ;;  %v2593_v2 = vmul.f32 0.03125, %v2559_v20 }
 0x8a7   :  { %v2637_v13 = vmul.f32 %v3269_v58, %v4536_v51 }
 0x8a8   :  { %v2609_v26 = vadd.f32 1e-12, %v2593_v2 }
 0x8a9   :  { %v2659_v36 = vmul.f32 %v4634_v25, %v2637_v13  ;;  %v2562_v39 = vpop.xlane.xlu1 %2561  ;;  %v2553_v7 = vpop.xlane.xlu0 %2552 }
 0x8aa   :  { %v3271_v34 = vpop.eup %3270  ;;  %3276 = vrsqrt.f32 %v2609_v26  ;;  %v2594_v43 = vmul.f32 0.03125, %v2562_v39  ;;  %v2591_v9 = vmul.f32 0.03125, %v2553_v7 }
 0x8ab   :  { %v3273_v27 = vpop.eup %3272  ;;  %v2681_v55 = vadd.f32 %v4640_v30, %v2659_v36  ;;  %v2638_v5 = vmul.f32 %v3271_v34, %v4541_v12 }
 0x8ac   :  { %v2635_v51 = vmul.f32 %v3273_v27, %v4544_v22  ;;  %v2610_v48 = vadd.f32 1e-12, %v2594_v43  ;;  %v2607_v28 = vadd.f32 1e-12, %v2591_v9 }
 0x8ad   :  { %2697 = vst.msk [vmem:[%s4771_s18 + $0x10] sm:$0xff] %vm141_vm0, %v2681_v55  ;;  %v2660_v6 = vmul.f32 %v4634_v25, %v2638_v5  ;;  %v2556_v46 = vpop.xlane.xlu1 %2555 }
 0x8ae   :  { %v3275_v18 = vpop.eup %3274  ;;  %v2657_v52 = vmul.f32 %v4634_v25, %v2635_v51  ;;  %3278 = vrsqrt.f32 %v2610_v48  ;;  %v2592_v29 = vmul.f32 0.03125, %v2556_v46 }
 0x8af   :  { %v2682_v16 = vadd.f32 %v4640_v30, %v2660_v6  ;;  %v2636_v12 = vmul.f32 %v3275_v18, %v4552_v59  ;;  %3280 = vrsqrt.f32 %v2607_v28 }
 0x8b0   :  { %v2679_v22 = vadd.f32 %v4640_v30, %v2657_v52  ;;  %v2608_v47 = vadd.f32 1e-12, %v2592_v29  ;;  %v2571_v33 = vpop.xlane.xlu0 %2570 }
 0x8b1   :  { %2698 = vst.msk [vmem:[%s4771_s18 + $0x18] sm:$0xff] %vm141_vm0, %v2682_v16  ;;  %v2658_v32 = vmul.f32 %v4634_v25, %v2636_v12  ;;  %v2597_v62 = vmul.f32 0.03125, %v2571_v33 }
 0x8b2   :  { %2695 = vst.msk [vmem:[%s4771_s18] sm:$0xff] %vm141_vm0, %v2679_v22  ;;  %3282 = vrsqrt.f32 %v2608_v47 }
 0x8b3   :  { %v2680_v59 = vadd.f32 %v4640_v30, %v2658_v32  ;;  %v2613_v15 = vadd.f32 1e-12, %v2597_v62 }
 0x8b4   :  { %v2574_v61 = vpop.xlane.xlu1 %2573  ;;  %v2565_v53 = vpop.xlane.xlu0 %2564 }
 0x8b5   :  { %2696 = vst.msk [vmem:[%s4771_s18 + $0x8] sm:$0xff] %vm141_vm0, %v2680_v59  ;;  %3284 = vrsqrt.f32 %v2613_v15  ;;  %v2598_v45 = vmul.f32 0.03125, %v2574_v61  ;;  %v2595_v14 = vmul.f32 0.03125, %v2565_v53 }
 0x8b7   :  { %v3277_v49 = vpop.eup %3276  ;;  %v2614_v10 = vadd.f32 1e-12, %v2598_v45  ;;  %v2611_v56 = vadd.f32 1e-12, %v2595_v14 }
 0x8b8   :  { %v2641_v11 = vmul.f32 %v3277_v49, %v4560_v38  ;;  %v2568_v1 = vpop.xlane.xlu1 %2567 }
 0x8b9   :  { %3286 = vrsqrt.f32 %v2614_v10  ;;  %v2596_v41 = vmul.f32 0.03125, %v2568_v1 }
 0x8ba   :  { %v2663_v40 = vmul.f32 %v4634_v25, %v2641_v11  ;;  %3288 = vrsqrt.f32 %v2611_v56  ;;  %v2577_v23 = vpop.xlane.xlu0 %2576 }
 0x8bb   :  { %v3279_v35 = vpop.eup %3278  ;;  %v2612_v57 = vadd.f32 1e-12, %v2596_v41  ;;  %v2599_v4 = vmul.f32 0.03125, %v2577_v23 }
 0x8bc   :  { %v3281_v0 = vpop.eup %3280  ;;  %v2685_v60 = vadd.f32 %v4640_v30, %v2663_v40  ;;  %v2642_v8 = vmul.f32 %v3279_v35, %v4565_v21 }
 0x8bd   :  { %v2639_v37 = vmul.f32 %v3281_v0, %v4568_v17  ;;  %3290 = vrsqrt.f32 %v2612_v57  ;;  %v2615_v20 = vadd.f32 1e-12, %v2599_v4 }
 0x8be   :  { %2701 = vst.msk [vmem:[%s4771_s18 + $0x30] sm:$0xff] %vm141_vm0, %v2685_v60  ;;  %v2664_v38 = vmul.f32 %v4634_v25, %v2642_v8  ;;  %v2580_v58 = vpop.xlane.xlu1 %2579  ;;  %v2583_v2 = vpop.xlane.xlu0 %2582 }
 0x8bf   :  { %v3283_v13 = vpop.eup %3282  ;;  %v2661_v26 = vmul.f32 %v4634_v25, %v2639_v37  ;;  %3292 = vrsqrt.f32 %v2615_v20  ;;  %v2600_v36 = vmul.f32 0.03125, %v2580_v58  ;;  %v2601_v39 = vmul.f32 0.03125, %v2583_v2 }
 0x8c0   :  { %v2686_v21 = vadd.f32 %v4640_v30, %v2664_v38  ;;  %v2640_v17 = vmul.f32 %v3283_v13, %v4576_v44 }
 0x8c1   :  { %v2683_v7 = vadd.f32 %v4640_v30, %v2661_v26  ;;  %v2616_v34 = vadd.f32 1e-12, %v2600_v36  ;;  %v2617_v43 = vadd.f32 1e-12, %v2601_v39 }
 0x8c2   :  { %v3285_v9 = vpop.eup %3284  ;;  %2702 = vst.msk [vmem:[%s4771_s18 + $0x38] sm:$0xff] %vm141_vm0, %v2686_v21  ;;  %v2662_v27 = vmul.f32 %v4634_v25, %v2640_v17  ;;  %v2586_v55 = vpop.xlane.xlu1 %2585 }
 0x8c3   :  { %2699 = vst.msk [vmem:[%s4771_s18 + $0x20] sm:$0xff] %vm141_vm0, %v2683_v7  ;;  %v2645_v44 = vmul.f32 %v3285_v9, %v4583_v50  ;;  %3294 = vrsqrt.f32 %v2616_v34  ;;  %v2602_v5 = vmul.f32 0.03125, %v2586_v55 }
 0x8c4   :  { %v2684_v51 = vadd.f32 %v4640_v30, %v2662_v27  ;;  %3296 = vrsqrt.f32 %v2617_v43 }
 0x8c5   :  { %v2667_v48 = vmul.f32 %v4634_v25, %v2645_v44  ;;  %v2618_v28 = vadd.f32 1e-12, %v2602_v5 }
 0x8c6   :  { %v3287_v6 = vpop.eup %3286  ;;  %2700 = vst.msk [vmem:[%s4771_s18 + $0x28] sm:$0xff] %vm141_vm0, %v2684_v51 }
 0x8c7   :  { %v3289_v46 = vpop.eup %3288  ;;  %v2689_v18 = vadd.f32 %v4640_v30, %v2667_v48  ;;  %v2646_v52 = vmul.f32 %v3287_v6, %v4589_v42  ;;  %3298 = vrsqrt.f32 %v2618_v28 }
 0x8c8   :  { %v2643_v50 = vmul.f32 %v3289_v46, %v4592_v63 }
 0x8c9   :  { %2705 = vst.msk [vmem:[%s4771_s18 + $0x50] sm:$0xff] %vm141_vm0, %v2689_v18  ;;  %v2668_v29 = vmul.f32 %v4634_v25, %v2646_v52 }
 0x8ca   :  { %v3291_v16 = vpop.eup %3290  ;;  %v2665_v12 = vmul.f32 %v4634_v25, %v2643_v50 }
 0x8cb   :  { %v2690_v22 = vadd.f32 %v4640_v30, %v2668_v29  ;;  %v2644_v47 = vmul.f32 %v3291_v16, %v4600_v24 }
 0x8cc   :  { %v3293_v33 = vpop.eup %3292  ;;  %v2687_v42 = vadd.f32 %v4640_v30, %v2665_v12 }
 0x8cd   :  { %2706 = vst.msk [vmem:[%s4771_s18 + $0x58] sm:$0xff] %vm141_vm0, %v2690_v22  ;;  %v2666_v63 = vmul.f32 %v4634_v25, %v2644_v47  ;;  %v2647_v32 = vmul.f32 %v3293_v33, %v4605_v19 }
 0x8ce   :  { %2703 = vst.msk [vmem:[%s4771_s18 + $0x40] sm:$0xff] %vm141_vm0, %v2687_v42 }
 0x8cf   :  { %v2688_v62 = vadd.f32 %v4640_v30, %v2666_v63  ;;  %v2669_v24 = vmul.f32 %v4634_v25, %v2647_v32 }
 0x8d0   :  { %v3295_v59 = vpop.eup %3294 }
 0x8d1   :  { %v3297_v15 = vpop.eup %3296  ;;  %2704 = vst.msk [vmem:[%s4771_s18 + $0x48] sm:$0xff] %vm141_vm0, %v2688_v62  ;;  %v2691_v61 = vadd.f32 %v4640_v30, %v2669_v24  ;;  %v2648_v19 = vmul.f32 %v3295_v59, %v4613_v3 }
 0x8d2   :  { %v2649_v53 = vmul.f32 %v3297_v15, %v4616_v54 }
 0x8d3   :  { %2707 = vst.msk [vmem:[%s4771_s18 + $0x60] sm:$0xff] %vm141_vm0, %v2691_v61  ;;  %v2670_v45 = vmul.f32 %v4634_v25, %v2648_v19 }
 0x8d4   :  { %v3299_v14 = vpop.eup %3298  ;;  %v2671_v49 = vmul.f32 %v4634_v25, %v2649_v53 }
 0x8d5   :  { %v2692_v10 = vadd.f32 %v4640_v30, %v2670_v45  ;;  %v2650_v56 = vmul.f32 %v3299_v14, %v4624_v31 }
 0x8d6   :  { %v2693_v11 = vadd.f32 %v4640_v30, %v2671_v49 }
 0x8d7   :  { %2708 = vst.msk [vmem:[%s4771_s18 + $0x68] sm:$0xff] %vm141_vm0, %v2692_v10  ;;  %v2672_v3 = vmul.f32 %v4634_v25, %v2650_v56 }
 0x8d8   :  { %2709 = vst.msk [vmem:[%s4771_s18 + $0x70] sm:$0xff] %vm141_vm0, %v2693_v11 }
 0x8d9   :  { %v2694_v54 = vadd.f32 %v4640_v30, %v2672_v3 }
 0x8db   :  { %2710 = vst.msk [vmem:[%s4771_s18 + $0x78] sm:$0xff] %vm141_vm0, %v2694_v54 }

// kernel: ladan_forward.9
= control target key start
LH: loop header
LB: loop body
LE: loop exit
PB: predicated region body
PF: predicated region fallthrough
CT: control target
= control target key end

     0   :  { %v517_v0 = vmov 0.0   ;;  %vm28_vm0 = vcmask 1043456   ;;  %vm518_vm1 = vmmov 0   ;;  %vm24_vm2 = vcmask 64512   ;;  %s519_s28 = smov 32   ;;  %s642_s0 = inlined_call_operand.vmem [shape: f32[8,32], index: 0, kind: input, shape index: {}]   ;;  %s643_s1 = inlined_call_operand.vmem [shape: bf16[8,8], index: 1, kind: input, shape index: {}]   ;;  %s644_s2 = inlined_call_operand.vmem [shape: bf16[2,64,32], index: 2, kind: input, shape index: {}]   ;;  %s645_s3 = inlined_call_operand.vmem [shape: f32[2,1,32], index: 3, kind: input, shape index: {}]   ;;  %s646_s4 = inlined_call_operand.vmem [shape: f32[8,4], index: 4, kind: input, shape index: {}]   ;;  %s647_s5 = inlined_call_operand.vmem [shape: f32[4,64], index: 5, kind: output, shape index: {}]  }
   0x1   :  { %461 = vmatprep.subr.bf16.mxu1 %v517_v0  ;;  %v21_v1 = vld [vmem:[%s642_s0] sm:$0xff]  ;;  %463 = vmatprep.mubr.msk.bf16.mxu1 %vm518_vm1, %v517_v0  ;;  %v509_v5 = vld [vmem:[%s644_s2 + $0x18] sm:$0xff]   ;;  %v510_v6 = vld [vmem:[%s644_s2 + $0x10] sm:$0xff]   ;;  %vm77_vm3 = vcmask 261120   ;;  %vm119_vm4 = vcmask 523264   ;;  %v520_v30 = vmov 1  }
   0x2   :  { %v23_v2 = vpack.c.bf16 %v21_v1, %v21_v1  ;;  %479 = vmatprep.subr.bf16.mxu0 %v517_v0  ;;  %481 = vmatprep.mubr.msk.bf16.mxu0 %vm518_vm1, %v517_v0  ;;  %v22_v4 = vld [vmem:[%s643_s1] sm:$0xf]  ;;  %v511_v7 = vld [vmem:[%s644_s2 + $0x8] sm:$0xff]   ;;  %v513_v26 = vld [vmem:[%s644_s2 + $0x38] sm:$0xff]   ;;  %v521_v32 = vmov 0   ;;  %v522_v36 = vmov 2  }
   0x3   :  { %v512_v8 = vld [vmem:[%s644_s2] sm:$0xff]   ;;  %v514_v27 = vld [vmem:[%s644_s2 + $0x30] sm:$0xff]   ;;  %v515_v28 = vld [vmem:[%s644_s2 + $0x28] sm:$0xff]   ;;  %504 = vset.pattern.permute.xlu1 %v520_v30  ;;  %506 = vset.pattern.permute.xlu0 %v521_v32  ;;  %v523_v40 = vmov 3   ;;  %vm412_vm10 = vcmask 1040384   ;;  %vm414_vm11 = vcmask 1041408  }
   0x4   :  { %v30_v3 = vsel %vm28_vm0, %v23_v2, 0  ;;  %v425_v17 = vld [vmem:[%s645_s3] ss:$0 sm:$0xff]  ;;  %v441_v46 = vld [vmem:[%s645_s3 + $0x1] ss:$0 sm:$0xff]  ;;  %vm416_vm12 = vcmask 1042432  }
   0x5   :  { %462 = vmatpush3.bf16.msra.mxu1 %v30_v3  ;;  %v516_v29 = vld [vmem:[%s644_s2 + $0x20] sm:$0xff]   ;;  %vm418_vm13 = vcmask 519168  }
   0x6   :  { %467 = vmatprep.subr.bf16.mxu1 %v517_v0  ;;  %v300_v31 = vld [vmem:[%s646_s4] sm:$0xff] }
   0x7   :  { %vm301_vm5 = vcmp.gt.f32.partialorder %v300_v31, 0.5 }
   0x8   :  { %464 = vmatmul.mubr.msk.bf16.vlgmr.msra.gmra.mxu1 %vm24_vm2, %v22_v4  ;;  %v302_v33 = vsel %vm301_vm5, 1, %v521_v32 }
   0x9   :  { %475 = vmatprep.mubr.msk.bf16.mxu1 %vm518_vm1, %v517_v0  ;;  %468 = vmatpush3.bf16.msra.mxu1 %v509_v5 }
   0xa   :  { %469 = vmatprep.subr.bf16.mxu1 %v517_v0  ;;  %329 = vperm.xlu1 %504, %v302_v33  }
   0xd   :  { %470 = vmatpush3.bf16.msra.mxu1 %v510_v6 }
   0xe   :  { %471 = vmatprep.subr.bf16.mxu1 %v517_v0  ;;  %505 = vset.pattern.permute.xlu1 %v522_v36 }
   0xf   :  { %354 = vperm.xlu1 %505, %v302_v33  }
  0x11   :  { %472 = vmatpush3.bf16.msra.mxu1 %v511_v7 }
  0x12   :  { %473 = vmatprep.subr.bf16.mxu1 %v517_v0 }
  0x13   :  { %507 = vset.pattern.permute.xlu1 %v523_v40 }
  0x14   :  { %379 = vperm.xlu1 %507, %v302_v33  }
  0x15   :  { %474 = vmatpush3.bf16.msra.mxu1 %v512_v8 }
  0x85   :  { %v330_v44 = vpop.permute.xlu1 %329 }
  0x86   :  { %vm331_vm9 = vcmp.eq.s32.totalorder %v330_v44, 1 }
  0x8a   :  { %v355_v45 = vpop.permute.xlu1 %354 }
  0x8b   :  { %vm356_vm8 = vcmp.eq.s32.totalorder %v355_v45, 1 }
  0x8f   :  { %v380_v47 = vpop.permute.xlu1 %379 }
  0x90   :  { %vm381_vm6 = vcmp.eq.s32.totalorder %v380_v47, 1 }
  0xc8   :  { %v66_v9 = vpop.f32.mrf.mxu1 }
  0xc9   :  { %v72_v10 = vsub.f32 %v21_v1, %v66_v9 }
  0xca   :  { %v465_v11 = vpop.f32.mrf.mxu1 }
  0xcb   :  { %74 = vrot.lane.b32.xlu0 %v72_v10, %s519_s28 }
  0xcc   :  { %v69_v12 = vpop.f32.mrf.mxu1 }
  0xce   :  { %v466_v13 = vpop.f32.mrf.mxu1 }
 0x13d   :  { %v75_v14 = vpop.permute.xlu0 %74 }
 0x13e   :  { %v78_v15 = vsel %vm77_vm3, %v21_v1, %v75_v14 }
 0x13f   :  { %v79_v16 = vpack.c.bf16 %v78_v15, %v78_v15 }
 0x141   :  { %476 = vmatmul.mubr.msk.bf16.vlgmr.msra.gmra.mxu1 %vm119_vm4, %v79_v16 }
 0x201   :  { %v157_v18 = vpop.f32.mrf.mxu1 }
 0x202   :  { %v158_v19 = vadd.f32 %v425_v17, %v157_v18 }
 0x203   :  { %v477_v20 = vpop.f32.mrf.mxu1 }
 0x204   :  { %v163_v21 = vmax.f32 %v158_v19, 0.0 }
 0x205   :  { %v160_v22 = vpop.f32.mrf.mxu1 }
 0x206   :  { %v164_v23 = vpack.c.bf16 %v163_v21, %v163_v21 }
 0x207   :  { %v478_v24 = vpop.f32.mrf.mxu1 }
 0x208   :  { %v166_v25 = vsel %vm28_vm0, %v164_v23, 0 }
 0x209   :  { %480 = vmatpush3.bf16.msra.mxu0 %v166_v25 }
 0x20a   :  { %485 = vmatprep.subr.bf16.mxu0 %v517_v0 }
 0x20c   :  { %482 = vmatmul.mubr.msk.bf16.vlgmr.msra.gmra.mxu0 %vm24_vm2, %v22_v4 }
 0x20d   :  { %493 = vmatprep.mubr.msk.bf16.mxu0 %vm518_vm1, %v517_v0  ;;  %486 = vmatpush3.bf16.msra.mxu0 %v513_v26 }
 0x20e   :  { %487 = vmatprep.subr.bf16.mxu0 %v517_v0 }
 0x211   :  { %488 = vmatpush3.bf16.msra.mxu0 %v514_v27 }
 0x212   :  { %489 = vmatprep.subr.bf16.mxu0 %v517_v0 }
 0x215   :  { %490 = vmatpush3.bf16.msra.mxu0 %v515_v28 }
 0x216   :  { %491 = vmatprep.subr.bf16.mxu0 %v517_v0 }
 0x219   :  { %492 = vmatpush3.bf16.msra.mxu0 %v516_v29 }
 0x2cc   :  { %v202_v34 = vpop.f32.mrf.mxu0 }
 0x2cd   :  { %v208_v35 = vsub.f32 %v163_v21, %v202_v34 }
 0x2ce   :  { %v483_v37 = vpop.f32.mrf.mxu0 }
 0x2cf   :  { %210 = vrot.lane.b32.xlu0 %v208_v35, %s519_s28 }
 0x2d0   :  { %v205_v38 = vpop.f32.mrf.mxu0 }
 0x2d2   :  { %v484_v39 = vpop.f32.mrf.mxu0 }
 0x2d3   :  { %304 = vperm.xlu0 %506, %v302_v33  }
 0x2d7   :  { %508 = vset.pattern.permute.xlu0 %v523_v40 }
 0x341   :  { %v211_v41 = vpop.permute.xlu0 %210 }
 0x342   :  { %v213_v42 = vsel %vm77_vm3, %v163_v21, %v211_v41 }
 0x343   :  { %v214_v43 = vpack.c.bf16 %v213_v42, %v213_v42 }
 0x345   :  { %494 = vmatmul.mubr.msk.bf16.vlgmr.msra.gmra.mxu0 %vm119_vm4, %v214_v43 }
 0x34e   :  { %v305_v48 = vpop.permute.xlu0 %304 }
 0x34f   :  { %vm306_vm7 = vcmp.eq.s32.totalorder %v305_v48, 1 }
 0x405   :  { %v293_v49 = vpop.f32.mrf.mxu0 }
 0x406   :  { %v294_v50 = vadd.f32 %v441_v46, %v293_v49 }
 0x407   :  { %v495_v51 = vpop.f32.mrf.mxu0 }
 0x408   :  { %v299_v52 = vmax.f32 %v294_v50, 0.0 }
 0x409   :  { %v296_v53 = vpop.f32.mrf.mxu0 }
 0x40a   :  { %v382_v54 = vsel %vm381_vm6, %v299_v52, -3e+38  ;;  %v390_v55 = vsel %vm381_vm6, %v299_v52, 3e+38  ;;  %v307_v56 = vsel %vm306_vm7, %v299_v52, -3e+38 }
 0x40b   :  { %v391_v57 = vsel %vm77_vm3, %v390_v55, inf  ;;  %v315_v58 = vsel %vm306_vm7, %v299_v52, 3e+38  ;;  %v496_v59 = vpop.f32.mrf.mxu0  ;;  %v365_v63 = vsel %vm356_vm8, %v299_v52, 3e+38  ;;  %v383_v29 = vsel %vm77_vm3, %v382_v54, -inf }
 0x40c   :  { %v392_v60 = vrot.slane %v391_v57, 4  ;;  %v316_v61 = vsel %vm77_vm3, %v315_v58, inf  ;;  %v340_v0 = vsel %vm331_vm9, %v299_v52, 3e+38  ;;  %v366_v2 = vsel %vm77_vm3, %v365_v63, inf }
 0x40d   :  { %v317_v62 = vrot.slane %v316_v61, 4  ;;  %v367_v4 = vrot.slane %v366_v2, 4  ;;  %v341_v5 = vsel %vm77_vm3, %v340_v0, inf  ;;  %v357_v6 = vsel %vm356_vm8, %v299_v52, -3e+38 }
 0x40e   :  { %v393_v1 = vmin.f32 %v391_v57, %v392_v60  ;;  %v342_v7 = vrot.slane %v341_v5, 4  ;;  %v332_v10 = vsel %vm331_vm9, %v299_v52, -3e+38  ;;  %v358_v28 = vsel %vm77_vm3, %v357_v6, -inf }
 0x40f   :  { %v318_v3 = vmin.f32 %v316_v61, %v317_v62  ;;  %v368_v9 = vmin.f32 %v366_v2, %v367_v4  ;;  %v333_v27 = vsel %vm77_vm3, %v332_v10, -inf  ;;  %v308_v31 = vsel %vm77_vm3, %v307_v56, -inf }
 0x410   :  { %v394_v8 = vrot.slane %v393_v1, 2  ;;  %v343_v12 = vmin.f32 %v341_v5, %v342_v7  ;;  %v334_v30 = vrot.slane %v333_v27, 4  ;;  %v359_v32 = vrot.slane %v358_v28, 4 }
 0x411   :  { %v319_v11 = vrot.slane %v318_v3, 2  ;;  %v369_v13 = vrot.slane %v368_v9, 2  ;;  %v384_v33 = vrot.slane %v383_v29, 4  ;;  %v309_v34 = vrot.slane %v308_v31, 4 }
 0x412   :  { %v344_v14 = vrot.slane %v343_v12, 2  ;;  %v395_v15 = vmin.f32 %v393_v1, %v394_v8  ;;  %v335_v35 = vmax.f32 %v333_v27, %v334_v30  ;;  %v360_v36 = vmax.f32 %v358_v28, %v359_v32 }
 0x413   :  { %v370_v16 = vmin.f32 %v368_v9, %v369_v13  ;;  %v320_v17 = vmin.f32 %v318_v3, %v319_v11  ;;  %v385_v37 = vmax.f32 %v383_v29, %v384_v33  ;;  %v310_v38 = vmax.f32 %v308_v31, %v309_v34 }
 0x414   :  { %v345_v18 = vmin.f32 %v343_v12, %v344_v14  ;;  %v396_v22 = vrot.slane %v395_v15, 1  ;;  %v336_v39 = vrot.slane %v335_v35, 2  ;;  %v361_v40 = vrot.slane %v360_v36, 2 }
 0x415   :  { %v371_v19 = vrot.slane %v370_v16, 1  ;;  %v321_v24 = vrot.slane %v320_v17, 1  ;;  %v386_v41 = vrot.slane %v385_v37, 2  ;;  %v311_v42 = vrot.slane %v310_v38, 2 }
 0x416   :  { %v346_v20 = vrot.slane %v345_v18, 1  ;;  %v397_v25 = vmin.f32 %v395_v15, %v396_v22  ;;  %v337_v43 = vmax.f32 %v335_v35, %v336_v39  ;;  %v362_v44 = vmax.f32 %v360_v36, %v361_v40 }
 0x417   :  { %v372_v21 = vmin.f32 %v370_v16, %v371_v19  ;;  %v322_v26 = vmin.f32 %v320_v17, %v321_v24  ;;  %v387_v45 = vmax.f32 %v385_v37, %v386_v41  ;;  %v312_v46 = vmax.f32 %v310_v38, %v311_v42 }
 0x418   :  { %v347_v23 = vmin.f32 %v345_v18, %v346_v20  ;;  %v338_v47 = vrot.slane %v337_v43, 1  ;;  %v363_v48 = vrot.slane %v362_v44, 1 }
 0x419   :  { %374 = vrot.lane.b32.xlu0 %v372_v21, %s519_s28  ;;  %v388_v49 = vrot.slane %v387_v45, 1  ;;  %v313_v50 = vrot.slane %v312_v46, 1 }
 0x41a   :  { %349 = vrot.lane.b32.xlu1 %v347_v23, %s519_s28  ;;  %v339_v52 = vmax.f32 %v337_v43, %v338_v47  ;;  %v364_v53 = vmax.f32 %v362_v44, %v363_v48 }
 0x41b   :  { %v389_v57 = vmax.f32 %v387_v45, %v388_v49  ;;  %v314_v59 = vmax.f32 %v312_v46, %v313_v50 }
 0x41d   :  { %399 = vrot.lane.b32.xlu0 %v397_v25, %s519_s28 }
 0x41e   :  { %324 = vrot.lane.b32.xlu1 %v322_v26, %s519_s28 }
 0x48b   :  { %v375_v51 = vpop.permute.xlu0 %374 }
 0x48c   :  { %v350_v54 = vpop.permute.xlu1 %349  ;;  %v377_v56 = vsel %vm77_vm3, %v364_v53, %v375_v51 }
 0x48d   :  { %v352_v55 = vsel %vm77_vm3, %v339_v52, %v350_v54  ;;  %v407_v63 = vrot.slane %v377_v56, 6 }
 0x48e   :  { %v404_v60 = vrot.slane %v352_v55, 7 }
 0x48f   :  { %v400_v58 = vpop.permute.xlu0 %399 }
 0x490   :  { %v402_v61 = vsel %vm77_vm3, %v389_v57, %v400_v58  ;;  %v325_v62 = vpop.permute.xlu1 %324 }
 0x491   :  { %v410_v0 = vrot.slane %v402_v61, 5  ;;  %v327_v1 = vsel %vm77_vm3, %v314_v59, %v325_v62 }
 0x492   :  { %v413_v2 = vsel %vm412_vm10, %v327_v1, %v404_v60 }
 0x493   :  { %v415_v3 = vsel %vm414_vm11, %v413_v2, %v407_v63 }
 0x494   :  { %v417_v4 = vsel %vm416_vm12, %v415_v3, %v410_v0 }
 0x495   :  { %419 = vst.msk [vmem:[%s647_s5] sm:$0xf] %vm418_vm13, %v417_v4 }

// kernel: ladan_forward.12
= control target key start
LH: loop header
LB: loop body
LE: loop exit
PB: predicated region body
PF: predicated region fallthrough
CT: control target
= control target key end

     0   :  { %v435_v1 = vmov 0.0   ;;  %vm436_vm0 = vmmov 0   ;;  %vm58_vm1 = vcmask 261120   ;;  %s539_s0 = inlined_call_operand.vmem [shape: f32[2,32], index: 0, kind: input, shape index: {}]   ;;  %s540_s1 = inlined_call_operand.vmem [shape: bf16[4,64], index: 1, kind: input, shape index: {}]   ;;  %s541_s2 = inlined_call_operand.vmem [shape: bf16[32,32], index: 2, kind: input, shape index: {}]   ;;  %s542_s3 = inlined_call_operand.vmem [shape: f32[1,32], index: 3, kind: input, shape index: {}]   ;;  %s543_s4 = inlined_call_operand.vmem [shape: bf16[32,4], index: 4, kind: input, shape index: {}]   ;;  %s544_s5 = inlined_call_operand.vmem [shape: f32[1,4], index: 5, kind: input, shape index: {}]   ;;  %s545_s6 = inlined_call_operand.vmem [shape: bf16[64,32], index: 6, kind: input, shape index: {}]   ;;  %s546_s7 = inlined_call_operand.vmem [shape: f32[1,32], index: 7, kind: input, shape index: {}]   ;;  %s547_s8 = inlined_call_operand.hbm [shape: f32[2,4], index: 8, kind: output, shape index: {0}]   ;;  %s548_s9 = inlined_call_operand.vmem [shape: f32[2,32], index: 9, kind: output, shape index: {1}]  }
   0x1   :  { %v401_v0 = vld [vmem:[%s541_s2 + $0x8] sm:$0xff]   ;;  %364 = vmatprep.subr.bf16.mxu0 %v435_v1  ;;  %v402_v2 = vld [vmem:[%s541_s2] sm:$0xff]   ;;  %372 = vmatprep.subr.bf16.mxu1 %v435_v1 }
   0x2   :  { %365 = vmatpush3.bf16.msra.mxu0 %v401_v0  ;;  %368 = vmatprep.mubr.msk.bf16.mxu0 %vm436_vm0, %v435_v1  ;;  %v33_v3 = vld [vmem:[%s539_s0] sm:$0x3]  ;;  %v403_v4 = vld [vmem:[%s543_s4 + $0x8] sm:$0xff]  }
   0x3   :  { %366 = vmatprep.subr.bf16.mxu0 %v435_v1  ;;  %376 = vmatprep.mubr.msk.bf16.mxu1 %vm436_vm0, %v435_v1  ;;  %v34_v5 = vpack.c.bf16 %v33_v3, %v33_v3 }
   0x4   :  { %373 = vmatpush3.bf16.msra.mxu1 %v403_v4 }
   0x5   :  { %374 = vmatprep.subr.bf16.mxu1 %v435_v1 }
   0x6   :  { %367 = vmatpush3.bf16.msra.mxu0 %v402_v2 }
   0x7   :  { %380 = vmatprep.subr.bf16.mxu0 %v435_v1 }
   0x8   :  { %15 = vsyncpa [#allocation3], 0  ;;  %v404_v6 = vld [vmem:[%s543_s4] sm:$0xff]   ;;  %vm169_vm2 = vcmask 25600   ;;  %vm187_vm3 = vcmask 1041408   ;;  %v405_v28 = vld [vmem:[%s545_s6 + $0x18] sm:$0xff]  }
   0x9   :  { %369 = vmatmul.mubr.msk.bf16.vlgmr.msra.gmra.mxu0 %vm58_vm1, %v34_v5  ;;  %375 = vmatpush3.bf16.msra.mxu1 %v404_v6  ;;  %v336_v7 = vld [vmem:[%s542_s3] ss:$0 sm:$0xff]  ;;  %v406_v29 = vld [vmem:[%s545_s6 + $0x10] sm:$0xff]   ;;  %v407_v30 = vld [vmem:[%s545_s6 + $0x8] sm:$0xff]   ;;  %vm183_vm4 = vcmask 31744   ;;  %vm271_vm5 = vcmask 523264  }
   0xa   :  { %382 = vmatprep.mubr.msk.bf16.mxu0 %vm436_vm0, %v435_v1  ;;  %386 = vmatprep.subr.bf16.mxu1 %v435_v1  ;;  %v340_v14 = vld [vmem:[%s544_s5] ss:$0 sm:$0xff]  ;;  %s437_s27 = smov [#allocation2]  }
   0xb   :  { %v182_v26 = vld [vmem:[%s540_s1] sm:$0x3]  ;;  %s324_s28 = sshll.u32 %s437_s27, 4  ;;  %s325_s28 = int_to_ptr.vmem [resolvable:$true] %s324_s28 }
   0xc   :  { %v189_v27 = vsel %vm187_vm3, %v182_v26, 0  ;;  %v408_v35 = vld [vmem:[%s545_s6] sm:$0xff]   ;;  %s413_s29 = scalar_lea.vmem %s325_s28, 32  ;;  %p418_p1 = scmp.lt.s32.totalorder %s325_s28, %s325_s28 }
   0xd   :  { %381 = vmatpush3.bf16.msra.mxu0 %v189_v27  ;;  %p414_p0 = scmp.ne.s32.totalorder %s325_s28, %s413_s29  ;;  %p419_p2 = scmp.lt.s32.totalorder %s413_s29, %s413_s29 }
   0xf   :  { %p420_p3 = por %p419_p2, %p418_p1 }
  0x11   :  { %p421_p4 = pnand %p420_p3, %p414_p0 }
  0xc9   :  { %v96_v8 = vpop.f32.mrf.mxu0 }
  0xca   :  { %v97_v9 = vadd.f32 %v336_v7, %v96_v8 }
  0xcb   :  { %v370_v10 = vpop.f32.mrf.mxu0 }
  0xcc   :  { %v102_v11 = vpack.c.bf16 %v97_v9, %v97_v9 }
  0xcd   :  { %v99_v12 = vpop.f32.mrf.mxu0 }
  0xce   :  { %377 = vmatmul.mubr.msk.bf16.vlgmr.msra.gmra.mxu1 %vm58_vm1, %v102_v11 }
  0xcf   :  { %v371_v13 = vpop.f32.mrf.mxu0  ;;  %394 = vmatprep.mubr.msk.bf16.mxu1 %vm436_vm0, %v435_v1  ;;  %387 = vmatpush3.bf16.msra.mxu1 %v405_v28 }
  0xd0   :  { %388 = vmatprep.subr.bf16.mxu1 %v435_v1 }
  0xd3   :  { %389 = vmatpush3.bf16.msra.mxu1 %v406_v29 }
  0xd4   :  { %390 = vmatprep.subr.bf16.mxu1 %v435_v1 }
  0xd7   :  { %391 = vmatpush3.bf16.msra.mxu1 %v407_v30 }
  0xd8   :  { %392 = vmatprep.subr.bf16.mxu1 %v435_v1 }
  0xdb   :  { %393 = vmatpush3.bf16.msra.mxu1 %v408_v35 }
 0x18e   :  { %v163_v15 = vpop.f32.mrf.mxu1 }
 0x18f   :  { %v164_v16 = vadd.f32 %v340_v14, %v163_v15 }
 0x190   :  { %v378_v17 = vpop.f32.mrf.mxu1 }
 0x191   :  { %v170_v18 = vsel %vm169_vm2, %v164_v16, -inf  ;;  %315 = vst.msk [vmem:[#allocation2] sm:$0x3] %vm169_vm2, %v164_v16 }
 0x192   :  { %171 = vmax.xlane.f32.xlu0 %v170_v18  ;;  %v166_v19 = vpop.f32.mrf.mxu1 }
 0x194   :  { %v379_v20 = vpop.f32.mrf.mxu1 }
 0x21b   :  { %v172_v21 = vpop.xlane.xlu0 %171 }
 0x21c   :  { %v173_v22 = vsub.f32 %v164_v16, %v172_v21 }
 0x21e   :  { %v174_v23 = vmul.f32 1.442695, %v173_v22 }
 0x220   :  { %409 = vpow2.f32 %v174_v23 }
 0x22d   :  { %v410_v24 = vpop.eup %409 }
 0x22e   :  { %v176_v25 = vsel %vm169_vm2, %v410_v24, 0.0 }
 0x22f   :  { %177 = vadd.xlane.f32.xlu0 %v176_v25 }
 0x2b8   :  { %v178_v31 = vpop.xlane.xlu0 %177 }
 0x2b9   :  { %411 = vrcp.f32 %v178_v31 }
 0x2c6   :  { %v412_v32 = vpop.eup %411 }
 0x2c7   :  { %v180_v33 = vmul.f32 %v412_v32, %v410_v24 }
 0x2c9   :  { %v181_v34 = vpack.c.bf16 %v180_v33, %v180_v33 }
 0x2cb   :  { %383 = vmatmul.mubr.msk.bf16.vlgmr.msra.gmra.mxu0 %vm183_vm4, %v181_v34 }
 0x38b   :  { %v225_v36 = vpop.f32.mrf.mxu0 }
 0x38c   :  { %v231_v37 = vpack.c.bf16 %v225_v36, %v225_v36 }
 0x38d   :  { %v384_v38 = vpop.f32.mrf.mxu0 }
 0x38e   :  { %395 = vmatmul.mubr.msk.bf16.vlgmr.msra.gmra.mxu1 %vm271_vm5, %v231_v37 }
 0x38f   :  { %v228_v39 = vpop.f32.mrf.mxu0 }
 0x391   :  { %v385_v40 = vpop.f32.mrf.mxu0 }
 0x392   :  { %424 = shalt.err (!%p421_p4)
}
 0x393   :  { %327 = dma.vmem_to_hbm [thread:$0]  %s325_s28, 32, %s547_s8, [#allocation3]   ;;  %v345_v41 = vld [vmem:[%s546_s7] ss:$0 sm:$0xff]  ;;  %vm316_vm6 = vcmask 254976  }
 0x44e   :  { %v309_v42 = vpop.f32.mrf.mxu1 }
 0x44f   :  { %v310_v43 = vadd.f32 %v345_v41, %v309_v42 }
 0x450   :  { %v396_v44 = vpop.f32.mrf.mxu1 }
 0x451   :  { %317 = vst.msk [vmem:[%s548_s9] sm:$0x3] %vm316_vm6, %v310_v43 }
 0x452   :  { %v312_v45 = vpop.f32.mrf.mxu1 }
 0x454   :  { %v397_v46 = vpop.f32.mrf.mxu1 }
 0x455   :  { %433 = dma.done.wait [#allocation3], 32  }
 0x456   :  { %434 = vsyncadd [#allocation3], 4294967264 }
 0x457   :  { %335 = vsyncpa [#allocation3], 1 }

// kernel: ladan_forward.8
= control target key start
LH: loop header
LB: loop body
LE: loop exit
PB: predicated region body
PF: predicated region fallthrough
CT: control target
= control target key end

     0   :  { %s6275_s0 = inlined_call_operand.vmem [shape: f32[8,16,32], index: 0, kind: input, shape index: {}]   ;;  %s6276_s1 = inlined_call_operand.vmem [shape: f32[8,16], index: 1, kind: input, shape index: {}]   ;;  %s6277_s2 = inlined_call_operand.vmem [shape: f32[8,16], index: 2, kind: input, shape index: {}]   ;;  %s6278_s3 = inlined_call_operand.vmem [shape: f32[8,32], index: 3, kind: input, shape index: {}]   ;;  %s6279_s4 = inlined_call_operand.vmem [shape: bf16[32,32], index: 4, kind: input, shape index: {}]   ;;  %s6280_s5 = inlined_call_operand.vmem [shape: f32[1,32], index: 5, kind: input, shape index: {}]   ;;  %s6281_s6 = inlined_call_operand.vmem [shape: bf16[32,32], index: 6, kind: input, shape index: {}]   ;;  %s6282_s7 = inlined_call_operand.vmem [shape: f32[1,32], index: 7, kind: input, shape index: {}]   ;;  %s6283_s8 = inlined_call_operand.vmem [shape: bf16[32,32], index: 8, kind: input, shape index: {}]   ;;  %s6284_s9 = inlined_call_operand.vmem [shape: f32[1,32], index: 9, kind: input, shape index: {}]   ;;  %s6285_s10 = inlined_call_operand.vmem [shape: bf16[32,32], index: 10, kind: input, shape index: {}]   ;;  %s6286_s11 = inlined_call_operand.vmem [shape: f32[1,32], index: 11, kind: input, shape index: {}]   ;;  %s6287_s12 = inlined_call_operand.vmem [shape: f32[1,32], index: 12, kind: input, shape index: {}]   ;;  %s6288_s13 = inlined_call_operand.vmem [shape: f32[1,32], index: 13, kind: input, shape index: {}]   ;;  %s6289_s14 = inlined_call_operand.vmem [shape: bf16[32,64], index: 14, kind: input, shape index: {}]   ;;  %s6290_s15 = inlined_call_operand.vmem [shape: f32[1,64], index: 15, kind: input, shape index: {}]   ;;  %s6291_s16 = inlined_call_operand.vmem [shape: bf16[64,32], index: 16, kind: input, shape index: {}]   ;;  %s6292_s17 = inlined_call_operand.vmem [shape: f32[1,32], index: 17, kind: input, shape index: {}]   ;;  %s6293_s18 = inlined_call_operand.vmem [shape: f32[1,32], index: 18, kind: input, shape index: {}]   ;;  %s6294_s19 = inlined_call_operand.vmem [shape: f32[1,32], index: 19, kind: input, shape index: {}]   ;;  %s6295_s20 = inlined_call_operand.vmem [shape: bf16[32,32], index: 20, kind: input, shape index: {}]   ;;  %s6296_s21 = inlined_call_operand.vmem [shape: f32[1,32], index: 21, kind: input, shape index: {}]   ;;  %s6297_s22 = inlined_call_operand.vmem [shape: f32[8,32], index: 22, kind: output, shape index: {0}]   ;;  %s6298_s23 = inlined_call_operand.hbm [shape: f32[8,16], index: 23, kind: output, shape index: {1}]  }
   0x1   :  { %6302 = sst [smem:[#allocation5_spill]] %s6275_s0 }
   0x2   :  { %6303 = sst [smem:[#allocation6_spill]] %s6276_s1 }
   0x3   :  { %6304 = sst [smem:[#allocation7_spill]] %s6277_s2 }
   0x4   :  { %6305 = sst [smem:[#allocation8_spill]] %s6278_s3 }
   0x5   :  { %6306 = sst [smem:[#allocation9_spill]] %s6279_s4 }
   0x6   :  { %6307 = sst [smem:[#allocation10_spill]] %s6280_s5 }
   0x7   :  { %6308 = sst [smem:[#allocation11_spill]] %s6281_s6 }
   0x8   :  { %6309 = sst [smem:[#allocation12_spill]] %s6282_s7 }
   0x9   :  { %s6310_s24 = sld [smem:[#allocation11_spill]]  ;;  %vm161_vm0 = vcmask 261120  }
   0xa   :  { %s6311_s2 = sld [smem:[#allocation5_spill]] }
   0xb   :  { %s6312_s29 = sld [smem:[#allocation9_spill]] }
   0xf   :  { %v4434_v0 = vld [vmem:[%s6310_s24 + $0x8] sm:$0xff]   ;;  %v4435_v1 = vld [vmem:[%s6310_s24] sm:$0xff]  }
  0x10   :  { %4113 = vmatprep.subr.bf16.mxu1 %v4434_v0  ;;  %v118_v2 = vld [vmem:[%s6311_s2] sm:$0xff]  ;;  %v119_v3 = vld [vmem:[%s6311_s2 + $0x8] sm:$0xff]  ;;  %v120_v6 = vld [vmem:[%s6311_s2 + $0x10] sm:$0xff] }
  0x11   :  { %4114 = vmatpush3.bf16.msra.mxu1 %v4434_v0  ;;  %v135_v4 = vpack.c.bf16 %v119_v3, %v118_v2  ;;  %v4436_v5 = vld [vmem:[%s6312_s29 + $0x8] sm:$0xff]   ;;  %v121_v7 = vld [vmem:[%s6311_s2 + $0x18] sm:$0xff]  ;;  %v4437_v8 = vld [vmem:[%s6312_s29] sm:$0xff]  }
  0x12   :  { %4115 = vmatprep.subr.bf16.mxu1 %v4435_v1  ;;  %4093 = vmatprep.subr.bf16.mxu0 %v4436_v5  ;;  %v122_v9 = vld [vmem:[%s6311_s2 + $0x20] sm:$0xff]  ;;  %v123_v10 = vld [vmem:[%s6311_s2 + $0x28] sm:$0xff]  ;;  %v136_v11 = vpack.c.bf16 %v121_v7, %v120_v6  ;;  %v124_v13 = vld [vmem:[%s6311_s2 + $0x30] sm:$0xff] }
  0x13   :  { %4117 = vmatprep.mubr.msk.bf16.mxu1 %vm161_vm0, %v135_v4  ;;  %4094 = vmatpush3.bf16.msra.mxu0 %v4436_v5  ;;  %v137_v12 = vpack.c.bf16 %v123_v10, %v122_v9  ;;  %v125_v14 = vld [vmem:[%s6311_s2 + $0x38] sm:$0xff]  ;;  %v126_v15 = vld [vmem:[%s6311_s2 + $0x40] sm:$0xff]  ;;  %v127_v16 = vld [vmem:[%s6311_s2 + $0x48] sm:$0xff] }
  0x14   :  { %4097 = vmatprep.mubr.msk.bf16.mxu0 %vm161_vm0, %v135_v4  ;;  %4095 = vmatprep.subr.bf16.mxu0 %v4437_v8  ;;  %v138_v17 = vpack.c.bf16 %v125_v14, %v124_v13  ;;  %v139_v18 = vpack.c.bf16 %v127_v16, %v126_v15 }
  0x15   :  { %4116 = vmatpush3.bf16.msra.mxu1 %v4435_v1 }
  0x17   :  { %4096 = vmatpush3.bf16.msra.mxu0 %v4437_v8 }
  0x18   :  { %4118 = vmatmul.mubr.msk.bf16.vlgmr.msra.gmra.mxu1 %vm161_vm0, %v136_v11 }
  0x19   :  { %4121 = vmatprep.mubr.msk.bf16.mxu1 %vm161_vm0, %v137_v12 }
  0x1a   :  { %4098 = vmatmul.mubr.msk.bf16.vlgmr.msra.gmra.mxu0 %vm161_vm0, %v136_v11 }
  0x1b   :  { %4101 = vmatprep.mubr.msk.bf16.mxu0 %vm161_vm0, %v137_v12 }
  0x1c   :  { %29 = vsyncpa [#allocation3], 0  ;;  %v128_v19 = vld [vmem:[%s6311_s2 + $0x50] sm:$0xff]  ;;  %v129_v20 = vld [vmem:[%s6311_s2 + $0x58] sm:$0xff]  ;;  %v4685_v30 = vmov 0.0   ;;  %vm4686_vm1 = vmmov 0  }
  0x1d   :  { %v130_v21 = vld [vmem:[%s6311_s2 + $0x60] sm:$0xff]  ;;  %v131_v22 = vld [vmem:[%s6311_s2 + $0x68] sm:$0xff]  ;;  %v140_v23 = vpack.c.bf16 %v129_v20, %v128_v19  ;;  %v132_v25 = vld [vmem:[%s6311_s2 + $0x70] sm:$0xff]  ;;  %4153 = vmatprep.subr.bf16.mxu1 %v4685_v30  ;;  %s6313_s1 = sld [smem:[#allocation12_spill]]  ;;  %vm1043_vm5 = vcmask 130048   ;;  %s4689_s5 = smov [#allocation2]  }
  0x1e   :  { %v141_v24 = vpack.c.bf16 %v131_v22, %v130_v21  ;;  %v133_v26 = vld [vmem:[%s6311_s2 + $0x78] sm:$0xff]  ;;  %v4438_v28 = vld [vmem:[%s6283_s8 + $0x8] sm:$0xff]   ;;  %v4439_v29 = vld [vmem:[%s6283_s8] sm:$0xff]   ;;  %s6314_s27 = sld [smem:[#allocation10_spill]] }
  0x1f   :  { %v142_v27 = vpack.c.bf16 %v133_v26, %v132_v25  ;;  %4133 = vmatprep.subr.bf16.mxu0 %v4438_v28  ;;  %s6315_s3 = sld [smem:[#allocation6_spill]] }
  0x20   :  { %4122 = vmatmul.mubr.msk.bf16.gmra.mxu1 %vm161_vm0, %v138_v17  ;;  %4134 = vmatpush3.bf16.msra.mxu0 %v4438_v28  ;;  %s6327_s8 = sld [smem:[#allocation7_spill]] }
  0x21   :  { %4125 = vmatprep.mubr.msk.bf16.mxu1 %vm161_vm0, %v139_v18  ;;  %4135 = vmatprep.subr.bf16.mxu0 %v4439_v29 }
  0x22   :  { %4102 = vmatmul.mubr.msk.bf16.gmra.mxu0 %vm161_vm0, %v138_v17 }
  0x23   :  { %4105 = vmatprep.mubr.msk.bf16.mxu0 %vm161_vm0, %v139_v18  ;;  %v4909_v36 = vld [vmem:[%s6313_s1] ss:$0 sm:$0xff] }
  0x24   :  { %4136 = vmatpush3.bf16.msra.mxu0 %v4439_v29  ;;  %v4916_v44 = vld [vmem:[%s6314_s27] ss:$0 sm:$0xff] }
  0x25   :  { %4177 = vmatprep.subr.bf16.mxu0 %v4685_v30 }
  0x28   :  { %4126 = vmatmul.mubr.msk.bf16.gmra.mxu1 %vm161_vm0, %v140_v23 }
  0x29   :  { %4129 = vmatprep.mubr.msk.bf16.mxu1 %vm161_vm0, %v141_v24 }
  0x2a   :  { %4106 = vmatmul.mubr.msk.bf16.gmra.mxu0 %vm161_vm0, %v140_v23 }
  0x2b   :  { %4109 = vmatprep.mubr.msk.bf16.mxu0 %vm161_vm0, %v141_v24 }
  0x30   :  { %4130 = vmatmul.mubr.msk.bf16.gmra.mxu1 %vm161_vm0, %v142_v27 }
  0x31   :  { %4155 = vmatprep.mubr.msk.bf16.mxu1 %vm4686_vm1, %v4685_v30 }
  0x32   :  { %4110 = vmatmul.mubr.msk.bf16.gmra.mxu0 %vm161_vm0, %v142_v27 }
  0x33   :  { %4137 = vmatprep.mubr.msk.bf16.mxu0 %vm161_vm0, %v135_v4 }
  0x3a   :  { %4138 = vmatmul.mubr.msk.bf16.vlgmr.msra.gmra.mxu0 %vm161_vm0, %v136_v11 }
  0x3b   :  { %4141 = vmatprep.mubr.msk.bf16.mxu0 %vm161_vm0, %v137_v12 }
  0x42   :  { %4142 = vmatmul.mubr.msk.bf16.gmra.mxu0 %vm161_vm0, %v138_v17 }
  0x43   :  { %4145 = vmatprep.mubr.msk.bf16.mxu0 %vm161_vm0, %v139_v18 }
  0x4a   :  { %4146 = vmatmul.mubr.msk.bf16.gmra.mxu0 %vm161_vm0, %v140_v23 }
  0x4b   :  { %4149 = vmatprep.mubr.msk.bf16.mxu0 %vm161_vm0, %v141_v24 }
  0x52   :  { %4150 = vmatmul.mubr.msk.bf16.gmra.mxu0 %vm161_vm0, %v142_v27 }
  0x53   :  { %4179 = vmatprep.mubr.msk.bf16.mxu0 %vm4686_vm1, %v4685_v30 }
  0xd8   :  { %v4119_v31 = vpop.f32.mrf.mxu1 }
  0xd9   :  { %v344_v50 = vadd.f32 %v4119_v31, %v4909_v36 }
  0xda   :  { %v335_v32 = vpop.f32.mrf.mxu1  ;;  %v4099_v33 = vpop.f32.mrf.mxu0 }
  0xdb   :  { %v336_v38 = vadd.f32 %v4909_v36, %v335_v32  ;;  %v229_v2 = vadd.f32 %v4099_v33, %v4916_v44 }
  0xdc   :  { %v4120_v34 = vpop.f32.mrf.mxu1  ;;  %v220_v35 = vpop.f32.mrf.mxu0 }
  0xdd   :  { %v347_v46 = vadd.f32 %v4120_v34, %v4909_v36  ;;  %v221_v51 = vadd.f32 %v4916_v44, %v220_v35 }
  0xde   :  { %v338_v37 = vpop.f32.mrf.mxu1  ;;  %v4100_v40 = vpop.f32.mrf.mxu0 }
  0xdf   :  { %v339_v39 = vadd.f32 %v4909_v36, %v338_v37  ;;  %v522_v55 = vpack.c.bf16 %v347_v46, %v344_v50  ;;  %v232_v3 = vadd.f32 %v4100_v40, %v4916_v44 }
  0xe0   :  { %v4123_v41 = vpop.f32.mrf.mxu1  ;;  %v223_v43 = vpop.f32.mrf.mxu0 }
  0xe1   :  { %v521_v42 = vpack.c.bf16 %v339_v39, %v336_v38  ;;  %v224_v52 = vadd.f32 %v4916_v44, %v223_v43  ;;  %v588_v63 = vsel %vm161_vm0, %v522_v55, 0  ;;  %v514_v11 = vpack.c.bf16 %v232_v3, %v229_v2 }
  0xe2   :  { %v351_v45 = vpop.f32.mrf.mxu1  ;;  %v4920_v48 = vpop.f32.mrf.mxu0  ;;  %v360_v15 = vadd.f32 %v4123_v41, %v4909_v36 }
  0xe3   :  { %v541_v47 = vsel %vm161_vm0, %v521_v42, 0  ;;  %v513_v58 = vpack.c.bf16 %v224_v52, %v221_v51  ;;  %v352_v61 = vadd.f32 %v4909_v36, %v351_v45  ;;  %v245_v41 = vadd.f32 %v4920_v48, %v4916_v44 }
  0xe4   :  { %4154 = vmatpush3.bf16.xpose.msra.mxu1 %v541_v47  ;;  %v4124_v49 = vpop.f32.mrf.mxu1  ;;  %v236_v53 = vpop.f32.mrf.mxu0 }
  0xe5   :  { %4159 = vmatprep.subr.bf16.mxu1 %v4685_v30  ;;  %v363_v16 = vadd.f32 %v4124_v49, %v4909_v36  ;;  %v237_v20 = vadd.f32 %v4916_v44, %v236_v53 }
  0xe6   :  { %v354_v54 = vpop.f32.mrf.mxu1  ;;  %v4104_v56 = vpop.f32.mrf.mxu0 }
  0xe7   :  { %v355_v62 = vadd.f32 %v4909_v36, %v354_v54  ;;  %v524_v28 = vpack.c.bf16 %v363_v16, %v360_v15  ;;  %v248_v42 = vadd.f32 %v4104_v56, %v4916_v44 }
  0xe8   :  { %v4127_v57 = vpop.f32.mrf.mxu1  ;;  %v239_v59 = vpop.f32.mrf.mxu0 }
  0xe9   :  { %v523_v7 = vpack.c.bf16 %v355_v62, %v352_v61  ;;  %v240_v21 = vadd.f32 %v4916_v44, %v239_v59  ;;  %v376_v37 = vadd.f32 %v4127_v57, %v4909_v36  ;;  %v682_v39 = vsel %vm161_vm0, %v524_v28, 0 }
  0xea   :  { %v367_v60 = vpop.f32.mrf.mxu1  ;;  %v4930_v0 = vpop.f32.mrf.mxu0  ;;  %v516_v47 = vpack.c.bf16 %v248_v42, %v245_v41 }
  0xeb   :  { %4156 = vmatmul.mubr.msk.bf16.vlgmr.msra.gmra.mxu1 %vm161_vm0, %v513_v58  ;;  %v368_v4 = vadd.f32 %v4909_v36, %v367_v60  ;;  %v635_v17 = vsel %vm161_vm0, %v523_v7, 0  ;;  %v515_v32 = vpack.c.bf16 %v240_v21, %v237_v20  ;;  %v261_v52 = vadd.f32 %v4930_v0, %v4916_v44  ;;  %v3856_v60 = vld [vmem:[%s6284_s9] ss:$0 sm:$0xff] }
  0xec   :  { %4160 = vmatpush3.bf16.xpose.msra.mxu1 %v588_v63  ;;  %v4128_v1 = vpop.f32.mrf.mxu1  ;;  %4161 = vmatprep.mubr.msk.bf16.mxu1 %vm4686_vm1, %v4685_v30  ;;  %v252_v5 = vpop.f32.mrf.mxu0 }
  0xed   :  { %4165 = vmatprep.subr.bf16.mxu1 %v4685_v30  ;;  %v253_v23 = vadd.f32 %v4916_v44, %v252_v5  ;;  %v379_v38 = vadd.f32 %v4128_v1, %v4909_v36 }
  0xee   :  { %v370_v6 = vpop.f32.mrf.mxu1  ;;  %v4108_v9 = vpop.f32.mrf.mxu0 }
  0xef   :  { %v371_v8 = vadd.f32 %v4909_v36, %v370_v6  ;;  %v526_v46 = vpack.c.bf16 %v379_v38, %v376_v37  ;;  %v264_v53 = vadd.f32 %v4108_v9, %v4916_v44  ;;  %v4687_v37 = vmov 1966171168  }
  0xf0   :  { %v4131_v10 = vpop.f32.mrf.mxu1  ;;  %v255_v13 = vpop.f32.mrf.mxu0  ;;  %v916_v38 = vunpack.c.l.s4 %v4687_v37 }
  0xf1   :  { %v525_v12 = vpack.c.bf16 %v371_v8, %v368_v4  ;;  %v256_v25 = vadd.f32 %v4916_v44, %v255_v13  ;;  %v392_v49 = vadd.f32 %v4131_v10, %v4909_v36  ;;  %v776_v51 = vsel %vm161_vm0, %v526_v46, 0 }
  0xf2   :  { %v383_v14 = vpop.f32.mrf.mxu1  ;;  %v4111_v19 = vpop.f32.mrf.mxu0  ;;  %v518_v54 = vpack.c.bf16 %v264_v53, %v261_v52 }
  0xf3   :  { %4162 = vmatmul.mubr.msk.bf16.vlgmr.msra.gmra.mxu1 %vm161_vm0, %v514_v11  ;;  %v729_v18 = vsel %vm161_vm0, %v525_v12, 0  ;;  %v384_v24 = vadd.f32 %v4909_v36, %v383_v14  ;;  %v517_v33 = vpack.c.bf16 %v256_v25, %v253_v23  ;;  %v277_v56 = vadd.f32 %v4111_v19, %v4916_v44 }
  0xf4   :  { %4166 = vmatpush3.bf16.xpose.msra.mxu1 %v635_v17  ;;  %4167 = vmatprep.mubr.msk.bf16.mxu1 %vm4686_vm1, %v4685_v30  ;;  %v4132_v22 = vpop.f32.mrf.mxu1  ;;  %v268_v26 = vpop.f32.mrf.mxu0 }
  0xf5   :  { %4178 = vmatpush3.bf16.xpose.msra.mxu0 %v729_v18  ;;  %4171 = vmatprep.subr.bf16.mxu1 %v4685_v30  ;;  %v269_v43 = vadd.f32 %v4916_v44, %v268_v26  ;;  %v395_v50 = vadd.f32 %v4132_v22, %v4909_v36 }
  0xf6   :  { %v386_v27 = vpop.f32.mrf.mxu1  ;;  %4189 = vmatprep.subr.bf16.mxu0 %v4685_v30  ;;  %v4112_v31 = vpop.f32.mrf.mxu0 }
  0xf7   :  { %v387_v29 = vadd.f32 %v4909_v36, %v386_v27  ;;  %v528_v36 = vpack.c.bf16 %v395_v50, %v392_v49  ;;  %v280_v57 = vadd.f32 %v4112_v31, %v4916_v44  ;;  %v4688_v49 = vmov 0  }
  0xf8   :  { %v271_v35 = vpop.f32.mrf.mxu0 }
  0xf9   :  { %v527_v34 = vpack.c.bf16 %v387_v29, %v384_v24  ;;  %v272_v45 = vadd.f32 %v4916_v44, %v271_v35  ;;  %v870_v55 = vsel %vm161_vm0, %v528_v36, 0  ;;  %v520_v58 = vpack.c.bf16 %v280_v57, %v277_v56 }
  0xfa   :  { %v4139_v59 = vpop.f32.mrf.mxu0 }
  0xfb   :  { %4168 = vmatmul.mubr.msk.bf16.vlgmr.msra.gmra.mxu1 %vm161_vm0, %v515_v32  ;;  %v823_v40 = vsel %vm161_vm0, %v527_v34, 0  ;;  %v519_v48 = vpack.c.bf16 %v272_v45, %v269_v43  ;;  %v459_v62 = vadd.f32 %v4139_v59, %v3856_v60  ;;  %v134_v43 = vld [vmem:[%s6315_s3] sm:$0xff] }
  0xfc   :  { %4172 = vmatpush3.bf16.xpose.msra.mxu1 %v682_v39  ;;  %4173 = vmatprep.mubr.msk.bf16.mxu1 %vm4686_vm1, %v4685_v30  ;;  %v450_v61 = vpop.f32.mrf.mxu0  ;;  %v918_v39 = vlaneseq  ;;  %v914_v59 = vcombine.high %v134_v43, %v134_v43 }
  0xfd   :  { %4183 = vmatprep.subr.bf16.mxu1 %v4685_v30  ;;  %4180 = vmatmul.mubr.msk.bf16.vlgmr.msra.gmra.mxu0 %vm161_vm0, %v517_v33  ;;  %v451_v4 = vadd.f32 %v3856_v60, %v450_v61 }
  0xfe   :  { %4190 = vmatpush3.bf16.xpose.msra.mxu0 %v823_v40  ;;  %4191 = vmatprep.mubr.msk.bf16.mxu0 %vm4686_vm1, %v4685_v30  ;;  %v4140_v63 = vpop.f32.mrf.mxu0  ;;  %v917_v40 = vunpack.c.0.s8 %v916_v38  ;;  %v919_v41 = vshrl.u32 %v918_v39, 7 }
  0xff   :  { %4201 = vmatprep.subr.bf16.mxu0 %v4685_v30  ;;  %v462_v0 = vadd.f32 %v4140_v63, %v3856_v60 }
 0x100   :  { %v453_v2 = vpop.f32.mrf.mxu0  ;;  %v5035_v42 = vsub.s32 %v917_v40, %v919_v41 }
 0x101   :  { %v530_v1 = vpack.c.bf16 %v462_v0, %v459_v62  ;;  %v454_v6 = vadd.f32 %v3856_v60, %v453_v2 }
 0x102   :  { %v4143_v44 = vpop.f32.mrf.mxu0  ;;  %v921_v45 = vrot.slane %v134_v43, %v5035_v42  ;;  %v928_v0 = vrot.slane %v914_v59, %v5035_v42 }
 0x103   :  { %4174 = vmatmul.mubr.msk.bf16.vlgmr.msra.gmra.mxu1 %vm161_vm0, %v516_v47  ;;  %v529_v8 = vpack.c.bf16 %v454_v6, %v451_v4  ;;  %v4998_v10 = vadd.f32 %v4143_v44, %v3856_v60 }
 0x104   :  { %4184 = vmatpush3.bf16.xpose.msra.mxu1 %v776_v51  ;;  %4185 = vmatprep.mubr.msk.bf16.mxu1 %vm4686_vm1, %v4685_v30  ;;  %v466_v3 = vpop.f32.mrf.mxu0  ;;  %v937_v46 = vrot.slane %v921_v45, %v5035_v42  ;;  %v929_v47 = vcombine.high %v921_v45, %v921_v45 }
 0x105   :  { %4195 = vmatprep.subr.bf16.mxu1 %v4685_v30  ;;  %4192 = vmatmul.mubr.msk.bf16.vlgmr.msra.gmra.mxu0 %vm161_vm0, %v519_v48  ;;  %v5001_v12 = vadd.f32 %v3856_v60, %v466_v3  ;;  %v5042_v48 = vsub.s32 0, %v919_v41 }
 0x106   :  { %4203 = vmatprep.mubr.msk.bf16.mxu0 %vm4686_vm1, %v4685_v30  ;;  %v4144_v5 = vpop.f32.mrf.mxu0  ;;  %4202 = vmatpush3.bf16.msra.mxu0 %v529_v8  ;;  %vm971_vm2 = vcmp.gt.f32.partialorder %v937_v46, 0.5  ;;  %v951_v51 = vrot.slane %v929_v47, %v5035_v42 }
 0x107   :  { %4213 = vmatprep.subr.bf16.mxu0 %v4685_v30  ;;  %v5003_v14 = vadd.f32 %v4144_v5, %v3856_v60  ;;  %v979_v50 = vsel %vm971_vm2, 1, %v4688_v49 }
 0x108   :  { %v469_v7 = vpop.f32.mrf.mxu0  ;;  %v990_v52 = vrot.slane %v979_v50, %v5042_v48  ;;  %vm972_vm3 = vcmp.gt.f32.partialorder %v951_v51, 0.5  ;;  %v961_v44 = vcombine.high %v951_v51, %v951_v51 }
 0x109   :  { %v5005_v15 = vadd.f32 %v3856_v60, %v469_v7  ;;  %v532_v17 = vpack.c.bf16 %v5003_v14, %v4998_v10  ;;  %v980_v53 = vsel %vm972_vm3, 1, %v4688_v49  ;;  %v944_v7 = vrot.slane %v928_v0, %v5035_v42 }
 0x10a   :  { %v4147_v9 = vpop.f32.mrf.mxu0  ;;  %vm1019_vm4 = vcmp.eq.s32.totalorder %v990_v52, 1  ;;  %vm974_vm8 = vcmp.gt.f32.partialorder %v961_v44, 0.5 }
 0x10b   :  { %4186 = vmatmul.mubr.msk.bf16.vlgmr.msra.gmra.mxu1 %vm161_vm0, %v518_v54  ;;  %v531_v18 = vpack.c.bf16 %v5005_v15, %v5001_v12  ;;  %v5011_v20 = vadd.f32 %v4147_v9, %v3856_v60  ;;  %v959_v54 = vcombine.high %v937_v46, %v937_v46  ;;  %v930_v9 = vcombine.high %v928_v0, %v928_v0 }
 0x10c   :  { %4196 = vmatpush3.bf16.xpose.msra.mxu1 %v870_v55  ;;  %4197 = vmatprep.mubr.msk.bf16.mxu1 %vm4686_vm1, %v4685_v30  ;;  %v482_v11 = vpop.f32.mrf.mxu0  ;;  %vm975_vm10 = vcmp.gt.f32.partialorder %v944_v7, 0.5  ;;  %v960_v45 = vcombine.high %v944_v7, %v944_v7 }
 0x10d   :  { %4207 = vmatprep.subr.bf16.mxu1 %v4685_v30  ;;  %v5013_v21 = vadd.f32 %v3856_v60, %v482_v11  ;;  %vm973_vm6 = vcmp.gt.f32.partialorder %v959_v54, 0.5  ;;  %v983_v38 = vsel %vm975_vm10, 1, %v4688_v49  ;;  %vm3349_vm10 = vcmask 1044484  }
 0x10e   :  { %v4148_v13 = vpop.f32.mrf.mxu0  ;;  %v1006_v47 = vrot.slane %v983_v38, %v5042_v48  ;;  %vm977_vm13 = vcmp.gt.f32.partialorder %v960_v45, 0.5 }
 0x10f   :  { %v5015_v23 = vadd.f32 %v4148_v13, %v3856_v60 }
 0x110   :  { %v485_v16 = vpop.f32.mrf.mxu0  ;;  %vm5095_vm14 = vcmp.eq.s32.totalorder %v1006_v47, 1 }
 0x111   :  { %v5017_v24 = vadd.f32 %v3856_v60, %v485_v16  ;;  %v534_v25 = vpack.c.bf16 %v5015_v23, %v5011_v20 }
 0x112   :  { %v4151_v19 = vpop.f32.mrf.mxu0 }
 0x113   :  { %4198 = vmatmul.mubr.msk.bf16.vlgmr.msra.gmra.mxu1 %vm161_vm0, %v520_v58  ;;  %v533_v26 = vpack.c.bf16 %v5017_v24, %v5013_v21  ;;  %v5023_v28 = vadd.f32 %v4151_v19, %v3856_v60  ;;  %v994_v58 = vrot.slane %v980_v53, %v5042_v48 }
 0x114   :  { %4209 = vmatprep.mubr.msk.bf16.mxu1 %vm4686_vm1, %v4685_v30  ;;  %4208 = vmatpush3.bf16.msra.mxu1 %v530_v1  ;;  %v498_v22 = vpop.f32.mrf.mxu0  ;;  %v981_v1 = vsel %vm973_vm6, 1, %v4688_v49  ;;  %vm2325_vm6 = vcmask 523264  }
 0x115   :  { %4219 = vmatprep.subr.bf16.mxu1 %v4685_v30  ;;  %v5025_v29 = vadd.f32 %v3856_v60, %v498_v22  ;;  %vm1020_vm7 = vcmp.eq.s32.totalorder %v994_v58, 1  ;;  %v998_v6 = vrot.slane %v981_v1, %v5042_v48  ;;  %v982_v22 = vsel %vm974_vm8, 1, %v4688_v49 }
 0x116   :  { %v4152_v27 = vpop.f32.mrf.mxu0  ;;  %v1002_v41 = vrot.slane %v982_v22, %v5042_v48  ;;  %vm3343_vm8 = vcmask 1042434  }
 0x117   :  { %v5027_v32 = vadd.f32 %v4152_v27, %v3856_v60  ;;  %vm5069_vm9 = vcmp.eq.s32.totalorder %v998_v6, 1 }
 0x118   :  { %v501_v31 = vpop.f32.mrf.mxu0  ;;  %vm5090_vm12 = vcmp.eq.s32.totalorder %v1002_v41, 1 }
 0x119   :  { %v5029_v33 = vadd.f32 %v3856_v60, %v501_v31  ;;  %v536_v34 = vpack.c.bf16 %v5027_v32, %v5023_v28  ;;  %v958_v31 = vrot.slane %v930_v9, %v5035_v42  ;;  %v4442_v28 = vld [vmem:[%s6285_s10] sm:$0xff]  }
 0x11b   :  { %v535_v35 = vpack.c.bf16 %v5029_v33, %v5025_v29  ;;  %vm976_vm11 = vcmp.gt.f32.partialorder %v958_v31, 0.5 }
 0x1ab   :  { %v577_v36 = vpop.f32.mrf.mxu1 }
 0x1ac   :  { %v5048_v55 = vsel %vm1019_vm4, %v577_v36, -1e+09 }
 0x1ad   :  { %v4157_v56 = vpop.f32.mrf.mxu1  ;;  %v1044_v57 = vsel %vm1043_vm5, %v5048_v55, -inf }
 0x1ae   :  { %1045 = vmax.xlane.f32.xlu0 %v1044_v57  ;;  %v984_v56 = vsel %vm976_vm11, 1, %v4688_v49  ;;  %vm3352_vm11 = vcmask 1045509  }
 0x1af   :  { %v580_v60 = vpop.f32.mrf.mxu1 }
 0x1b0   :  { %v5053_v61 = vsel %vm1019_vm4, %v580_v60, -1e+09  ;;  %v962_v60 = vcombine.high %v958_v31, %v958_v31 }
 0x1b1   :  { %v4158_v62 = vpop.f32.mrf.mxu1  ;;  %v1047_v63 = vsel %vm1043_vm5, %v5053_v61, -inf }
 0x1b2   :  { %1048 = vmax.xlane.f32.xlu0 %v1047_v63  ;;  %v985_v63 = vsel %vm977_vm13, 1, %v4688_v49  ;;  %vm978_vm15 = vcmp.gt.f32.partialorder %v962_v60, 0.5  ;;  %vm3358_vm13 = vcmask 1047559  }
 0x1b3   :  { %v624_v2 = vpop.f32.mrf.mxu1  ;;  %v1014_v6 = vrot.slane %v985_v63, %v5042_v48  ;;  %v986_v31 = vsel %vm978_vm15, 1, %v4688_v49 }
 0x1b4   :  { %v5059_v3 = vsel %vm1020_vm7, %v624_v2, -1e+09  ;;  %v1010_v2 = vrot.slane %v984_v56, %v5042_v48  ;;  %v1018_v47 = vrot.slane %v986_v31, %v5042_v48 }
 0x1b5   :  { %v4163_v4 = vpop.f32.mrf.mxu1  ;;  %v1050_v5 = vsel %vm1043_vm5, %v5059_v3, -inf  ;;  %vm5129_vm3 = vcmp.eq.s32.totalorder %v1014_v6, 1 }
 0x1b6   :  { %1051 = vmax.xlane.f32.xlu1 %v1050_v5  ;;  %vm5120_vm2 = vcmp.eq.s32.totalorder %v1010_v2, 1  ;;  %vm1026_vm4 = vcmp.eq.s32.totalorder %v1018_v47, 1 }
 0x1b7   :  { %v627_v8 = vpop.f32.mrf.mxu1 }
 0x1b8   :  { %v5065_v11 = vsel %vm1020_vm7, %v627_v8, -1e+09  ;;  %vm3340_vm7 = vcmask 1041409  }
 0x1b9   :  { %v4164_v13 = vpop.f32.mrf.mxu1  ;;  %v1053_v16 = vsel %vm1043_vm5, %v5065_v11, -inf }
 0x1ba   :  { %1054 = vmax.xlane.f32.xlu1 %v1053_v16 }
 0x1bb   :  { %v671_v27 = vpop.f32.mrf.mxu1 }
 0x1bc   :  { %v5077_v37 = vsel %vm5069_vm9, %v671_v27, -1e+09 }
 0x1bd   :  { %v4169_v39 = vpop.f32.mrf.mxu1  ;;  %v1056_v40 = vsel %vm1043_vm5, %v5077_v37, -inf  ;;  %v765_v43 = vpop.f32.mrf.mxu0 }
 0x1be   :  { %1057 = vmax.xlane.f32.xlu0 %v1056_v40  ;;  %v5109_v4 = vsel %vm5095_vm14, %v765_v43, -1e+09 }
 0x1bf   :  { %v674_v46 = vpop.f32.mrf.mxu1  ;;  %v4181_v50 = vpop.f32.mrf.mxu0  ;;  %v1068_v13 = vsel %vm1043_vm5, %v5109_v4, -inf }
 0x1c0   :  { %v5086_v51 = vsel %vm5069_vm9, %v674_v46, -1e+09  ;;  %vm3346_vm9 = vcmask 1043459  }
 0x1c1   :  { %v4170_v52 = vpop.f32.mrf.mxu1  ;;  %v1059_v53 = vsel %vm1043_vm5, %v5086_v51, -inf  ;;  %v768_v54 = vpop.f32.mrf.mxu0 }
 0x1c2   :  { %1060 = vmax.xlane.f32.xlu1 %v1059_v53  ;;  %v5126_v27 = vsel %vm5095_vm14, %v768_v54, -1e+09 }
 0x1c3   :  { %v718_v57 = vpop.f32.mrf.mxu1  ;;  %v4182_v59 = vpop.f32.mrf.mxu0  ;;  %v1071_v45 = vsel %vm1043_vm5, %v5126_v27, -inf }
 0x1c4   :  { %v5101_v62 = vsel %vm5090_vm12, %v718_v57, -1e+09 }
 0x1c5   :  { %v4175_v0 = vpop.f32.mrf.mxu1  ;;  %v1062_v1 = vsel %vm1043_vm5, %v5101_v62, -inf  ;;  %v859_v44 = vpop.f32.mrf.mxu0 }
 0x1c6   :  { %1063 = vmax.xlane.f32.xlu0 %v1062_v1  ;;  %v5144_v49 = vsel %vm5129_vm3, %v859_v44, -1e+09 }
 0x1c7   :  { %v721_v5 = vpop.f32.mrf.mxu1  ;;  %v4193_v7 = vpop.f32.mrf.mxu0  ;;  %v1080_v36 = vsel %vm1043_vm5, %v5144_v49, -inf }
 0x1c8   :  { %v5114_v8 = vsel %vm5090_vm12, %v721_v5, -1e+09  ;;  %vm3355_vm12 = vcmask 1046534  }
 0x1c9   :  { %v4176_v9 = vpop.f32.mrf.mxu1  ;;  %v1065_v16 = vsel %vm1043_vm5, %v5114_v8, -inf  ;;  %v862_v22 = vpop.f32.mrf.mxu0 }
 0x1ca   :  { %1069 = vmax.xlane.f32.xlu0 %v1068_v13  ;;  %1066 = vmax.xlane.f32.xlu1 %v1065_v16  ;;  %v5156_v56 = vsel %vm5129_vm3, %v862_v22, -1e+09 }
 0x1cb   :  { %v812_v38 = vpop.f32.mrf.mxu1  ;;  %v4194_v40 = vpop.f32.mrf.mxu0  ;;  %v1083_v60 = vsel %vm1043_vm5, %v5156_v56, -inf }
 0x1cc   :  { %v5135_v41 = vsel %vm5120_vm2, %v812_v38, -1e+09 }
 0x1cd   :  { %v4187_v43 = vpop.f32.mrf.mxu1  ;;  %v1074_v46 = vsel %vm1043_vm5, %v5135_v41, -inf }
 0x1ce   :  { %1072 = vmax.xlane.f32.xlu1 %v1071_v45  ;;  %1075 = vmax.xlane.f32.xlu0 %v1074_v46 }
 0x1cf   :  { %v815_v50 = vpop.f32.mrf.mxu1 }
 0x1d0   :  { %v5148_v52 = vsel %vm5120_vm2, %v815_v50, -1e+09 }
 0x1d1   :  { %v4188_v53 = vpop.f32.mrf.mxu1  ;;  %v1077_v54 = vsel %vm1043_vm5, %v5148_v52, -inf }
 0x1d2   :  { %1081 = vmax.xlane.f32.xlu0 %v1080_v36  ;;  %1078 = vmax.xlane.f32.xlu1 %v1077_v54 }
 0x1d3   :  { %v906_v57 = vpop.f32.mrf.mxu1 }
 0x1d4   :  { %v5158_v58 = vsel %vm1026_vm4, %v906_v57, -1e+09 }
 0x1d5   :  { %v4199_v59 = vpop.f32.mrf.mxu1  ;;  %v1086_v63 = vsel %vm1043_vm5, %v5158_v58, -inf }
 0x1d6   :  { %1084 = vmax.xlane.f32.xlu1 %v1083_v60  ;;  %1087 = vmax.xlane.f32.xlu0 %v1086_v63 }
 0x1d7   :  { %v909_v0 = vpop.f32.mrf.mxu1 }
 0x1d8   :  { %v5164_v1 = vsel %vm1026_vm4, %v909_v0, -1e+09 }
 0x1d9   :  { %v1089_v2 = vsel %vm1043_vm5, %v5164_v1, -inf  ;;  %v4200_v44 = vpop.f32.mrf.mxu1 }
 0x1da   :  { %1090 = vmax.xlane.f32.xlu1 %v1089_v2 }
 0x237   :  { %v1046_v5 = vpop.xlane.xlu0 %1045 }
 0x238   :  { %v1092_v6 = vsub.f32 %v5048_v55, %v1046_v5 }
 0x23a   :  { %v1108_v7 = vmul.f32 1.442695, %v1092_v6 }
 0x23b   :  { %v1049_v9 = vpop.xlane.xlu0 %1048 }
 0x23c   :  { %4451 = vpow2.f32 %v1108_v7  ;;  %v1093_v13 = vsub.f32 %v5053_v61, %v1049_v9 }
 0x23e   :  { %v1110_v16 = vmul.f32 1.442695, %v1093_v13 }
 0x23f   :  { %v1052_v19 = vpop.xlane.xlu1 %1051 }
 0x240   :  { %4453 = vpow2.f32 %v1110_v16  ;;  %v1094_v22 = vsub.f32 %v5059_v3, %v1052_v19 }
 0x242   :  { %v1112_v31 = vmul.f32 1.442695, %v1094_v22 }
 0x243   :  { %v1055_v38 = vpop.xlane.xlu1 %1054 }
 0x244   :  { %4455 = vpow2.f32 %v1112_v31  ;;  %v1095_v39 = vsub.f32 %v5065_v11, %v1055_v38 }
 0x246   :  { %v1114_v40 = vmul.f32 1.442695, %v1095_v39 }
 0x247   :  { %v1058_v43 = vpop.xlane.xlu0 %1057 }
 0x248   :  { %4457 = vpow2.f32 %v1114_v40  ;;  %v1096_v55 = vsub.f32 %v5077_v37, %v1058_v43 }
 0x249   :  { %v5173_v45 = vpop.eup %4451 }
 0x24a   :  { %v1116_v46 = vmul.f32 1.442695, %v1096_v55  ;;  %v1140_v61 = vsel %vm1043_vm5, %v5173_v45, 0.0 }
 0x24b   :  { %v1061_v47 = vpop.xlane.xlu1 %1060  ;;  %1141 = vadd.xlane.f32.xlu0 %v1140_v61 }
 0x24c   :  { %4459 = vpow2.f32 %v1116_v46  ;;  %v1097_v3 = vsub.f32 %v5086_v51, %v1061_v47 }
 0x24d   :  { %v5178_v50 = vpop.eup %4453 }
 0x24e   :  { %v1118_v53 = vmul.f32 1.442695, %v1097_v3  ;;  %v1143_v11 = vsel %vm1043_vm5, %v5178_v50, 0.0 }
 0x24f   :  { %v1064_v36 = vpop.xlane.xlu0 %1063  ;;  %1144 = vadd.xlane.f32.xlu1 %v1143_v11 }
 0x250   :  { %4461 = vpow2.f32 %v1118_v53  ;;  %v1098_v37 = vsub.f32 %v5101_v62, %v1064_v36 }
 0x251   :  { %v5183_v54 = vpop.eup %4455 }
 0x252   :  { %v1120_v57 = vmul.f32 1.442695, %v1098_v37  ;;  %v1146_v59 = vsel %vm1043_vm5, %v5183_v54, 0.0 }
 0x253   :  { %v1070_v60 = vpop.xlane.xlu0 %1069  ;;  %v1067_v63 = vpop.xlane.xlu1 %1066  ;;  %1147 = vadd.xlane.f32.xlu0 %v1146_v59 }
 0x254   :  { %4463 = vpow2.f32 %v1120_v57  ;;  %v1100_v51 = vsub.f32 %v5109_v4, %v1070_v60  ;;  %v1099_v0 = vsub.f32 %v5114_v8, %v1067_v63 }
 0x255   :  { %v5189_v2 = vpop.eup %4457 }
 0x256   :  { %v1124_v44 = vmul.f32 1.442695, %v1100_v51  ;;  %v1122_v5 = vmul.f32 1.442695, %v1099_v0  ;;  %v1149_v62 = vsel %vm1043_vm5, %v5189_v2, 0.0 }
 0x257   :  { %v1073_v6 = vpop.xlane.xlu1 %1072  ;;  %v1076_v7 = vpop.xlane.xlu0 %1075  ;;  %1150 = vadd.xlane.f32.xlu1 %v1149_v62 }
 0x258   :  { %4465 = vpow2.f32 %v1124_v44  ;;  %v1101_v9 = vsub.f32 %v5126_v27, %v1073_v6  ;;  %v1102_v13 = vsub.f32 %v5135_v41, %v1076_v7 }
 0x259   :  { %v5195_v16 = vpop.eup %4459  ;;  %4467 = vpow2.f32 %v1122_v5 }
 0x25a   :  { %v1126_v4 = vmul.f32 1.442695, %v1101_v9  ;;  %v1128_v8 = vmul.f32 1.442695, %v1102_v13  ;;  %v1152_v19 = vsel %vm1043_vm5, %v5195_v16, 0.0 }
 0x25b   :  { %v1082_v22 = vpop.xlane.xlu0 %1081  ;;  %v1079_v31 = vpop.xlane.xlu1 %1078  ;;  %1153 = vadd.xlane.f32.xlu0 %v1152_v19 }
 0x25c   :  { %4469 = vpow2.f32 %v1126_v4  ;;  %v1104_v38 = vsub.f32 %v5144_v49, %v1082_v22  ;;  %v1103_v39 = vsub.f32 %v5148_v52, %v1079_v31 }
 0x25d   :  { %v5201_v40 = vpop.eup %4461  ;;  %4471 = vpow2.f32 %v1128_v8 }
 0x25e   :  { %v1132_v27 = vmul.f32 1.442695, %v1104_v38  ;;  %v1130_v41 = vmul.f32 1.442695, %v1103_v39  ;;  %v1155_v43 = vsel %vm1043_vm5, %v5201_v40, 0.0 }
 0x25f   :  { %v1085_v55 = vpop.xlane.xlu1 %1084  ;;  %v1088_v46 = vpop.xlane.xlu0 %1087  ;;  %1156 = vadd.xlane.f32.xlu1 %v1155_v43 }
 0x260   :  { %4473 = vpow2.f32 %v1132_v27  ;;  %v1105_v61 = vsub.f32 %v5156_v56, %v1085_v55  ;;  %v1106_v47 = vsub.f32 %v5158_v58, %v1088_v46 }
 0x261   :  { %v5207_v3 = vpop.eup %4463  ;;  %4475 = vpow2.f32 %v1130_v41 }
 0x262   :  { %v1134_v49 = vmul.f32 1.442695, %v1105_v61  ;;  %v1136_v52 = vmul.f32 1.442695, %v1106_v47  ;;  %v1158_v53 = vsel %vm1043_vm5, %v5207_v3, 0.0 }
 0x263   :  { %1159 = vadd.xlane.f32.xlu0 %v1158_v53  ;;  %v1091_v11 = vpop.xlane.xlu1 %1090 }
 0x264   :  { %4477 = vpow2.f32 %v1134_v49  ;;  %v1107_v36 = vsub.f32 %v5164_v1, %v1091_v11 }
 0x265   :  { %v5212_v37 = vpop.eup %4465  ;;  %4479 = vpow2.f32 %v1136_v52 }
 0x266   :  { %v5214_v57 = vpop.eup %4467  ;;  %v1138_v56 = vmul.f32 1.442695, %v1107_v36  ;;  %v1164_v58 = vsel %vm1043_vm5, %v5212_v37, 0.0 }
 0x267   :  { %1165 = vadd.xlane.f32.xlu0 %v1164_v58  ;;  %v1161_v59 = vsel %vm1043_vm5, %v5214_v57, 0.0 }
 0x268   :  { %4481 = vpow2.f32 %v1138_v56  ;;  %1162 = vadd.xlane.f32.xlu1 %v1161_v59 }
 0x269   :  { %v5220_v60 = vpop.eup %4469 }
 0x26a   :  { %v5222_v63 = vpop.eup %4471  ;;  %v1167_v1 = vsel %vm1043_vm5, %v5220_v60, 0.0 }
 0x26b   :  { %v1170_v51 = vsel %vm1043_vm5, %v5222_v63, 0.0 }
 0x26c   :  { %1171 = vadd.xlane.f32.xlu0 %v1170_v51  ;;  %1168 = vadd.xlane.f32.xlu1 %v1167_v1 }
 0x26d   :  { %v5228_v0 = vpop.eup %4473 }
 0x26e   :  { %v5230_v44 = vpop.eup %4475  ;;  %v1176_v5 = vsel %vm1043_vm5, %v5228_v0, 0.0 }
 0x26f   :  { %v1173_v62 = vsel %vm1043_vm5, %v5230_v44, 0.0 }
 0x270   :  { %1177 = vadd.xlane.f32.xlu0 %v1176_v5  ;;  %1174 = vadd.xlane.f32.xlu1 %v1173_v62 }
 0x271   :  { %v5236_v6 = vpop.eup %4477 }
 0x272   :  { %v5238_v7 = vpop.eup %4479  ;;  %v1179_v9 = vsel %vm1043_vm5, %v5236_v6, 0.0 }
 0x273   :  { %v1182_v13 = vsel %vm1043_vm5, %v5238_v7, 0.0 }
 0x274   :  { %1183 = vadd.xlane.f32.xlu0 %v1182_v13  ;;  %1180 = vadd.xlane.f32.xlu1 %v1179_v9 }
 0x275   :  { %v5244_v4 = vpop.eup %4481 }
 0x276   :  { %v1185_v8 = vsel %vm1043_vm5, %v5244_v4, 0.0 }
 0x278   :  { %1186 = vadd.xlane.f32.xlu1 %v1185_v8 }
 0x2d4   :  { %v1142_v19 = vpop.xlane.xlu0 %1141 }
 0x2d5   :  { %4483 = vrcp.f32 %v1142_v19 }
 0x2d8   :  { %v1145_v22 = vpop.xlane.xlu1 %1144 }
 0x2d9   :  { %4485 = vrcp.f32 %v1145_v22 }
 0x2dc   :  { %v1148_v31 = vpop.xlane.xlu0 %1147 }
 0x2dd   :  { %4487 = vrcp.f32 %v1148_v31 }
 0x2e0   :  { %v1151_v38 = vpop.xlane.xlu1 %1150 }
 0x2e1   :  { %4489 = vrcp.f32 %v1151_v38 }
 0x2e2   :  { %v4484_v39 = vpop.eup %4483 }
 0x2e3   :  { %v1189_v43 = vmul.f32 %v4484_v39, %v5173_v45 }
 0x2e4   :  { %v1154_v27 = vpop.xlane.xlu0 %1153 }
 0x2e5   :  { %4491 = vrcp.f32 %v1154_v27 }
 0x2e6   :  { %v4486_v41 = vpop.eup %4485 }
 0x2e7   :  { %v1191_v55 = vmul.f32 %v4486_v41, %v5178_v50 }
 0x2e8   :  { %v1157_v46 = vpop.xlane.xlu1 %1156 }
 0x2e9   :  { %4493 = vrcp.f32 %v1157_v46  ;;  %v1220_v61 = vpack.c.bf16 %v1191_v55, %v1189_v43 }
 0x2ea   :  { %v4488_v47 = vpop.eup %4487 }
 0x2eb   :  { %4204 = vmatmul.mubr.msk.bf16.vlgmr.msra.gmra.mxu0 %vm1043_vm5, %v1220_v61  ;;  %v1193_v45 = vmul.f32 %v4488_v47, %v5183_v54 }
 0x2ec   :  { %4214 = vmatpush3.bf16.msra.mxu0 %v531_v18  ;;  %v1160_v49 = vpop.xlane.xlu0 %1159  ;;  %4215 = vmatprep.mubr.msk.bf16.mxu0 %vm4686_vm1, %v4685_v30 }
 0x2ed   :  { %4225 = vmatprep.subr.bf16.mxu0 %v4685_v30  ;;  %4495 = vrcp.f32 %v1160_v49 }
 0x2ee   :  { %v4490_v52 = vpop.eup %4489 }
 0x2ef   :  { %v1195_v50 = vmul.f32 %v4490_v52, %v5189_v2 }
 0x2f0   :  { %v1166_v53 = vpop.xlane.xlu0 %1165 }
 0x2f1   :  { %v1163_v11 = vpop.xlane.xlu1 %1162  ;;  %v1221_v36 = vpack.c.bf16 %v1195_v50, %v1193_v45 }
 0x2f2   :  { %4497 = vrcp.f32 %v1163_v11  ;;  %v4492_v12 = vpop.eup %4491 }
 0x2f3   :  { %4210 = vmatmul.mubr.msk.bf16.vlgmr.msra.gmra.mxu1 %vm1043_vm5, %v1221_v36  ;;  %4499 = vrcp.f32 %v1166_v53  ;;  %v1197_v2 = vmul.f32 %v4492_v12, %v5195_v16 }
 0x2f4   :  { %4220 = vmatpush3.bf16.msra.mxu1 %v532_v17  ;;  %4221 = vmatprep.mubr.msk.bf16.mxu1 %vm4686_vm1, %v4685_v30 }
 0x2f5   :  { %v1172_v15 = vpop.xlane.xlu0 %1171  ;;  %v1169_v18 = vpop.xlane.xlu1 %1168  ;;  %4231 = vmatprep.subr.bf16.mxu1 %v4685_v30 }
 0x2f6   :  { %v4494_v54 = vpop.eup %4493  ;;  %4501 = vrcp.f32 %v1169_v18 }
 0x2f7   :  { %v1199_v56 = vmul.f32 %v4494_v54, %v5201_v40  ;;  %4503 = vrcp.f32 %v1172_v15 }
 0x2f9   :  { %v1178_v58 = vpop.xlane.xlu0 %1177  ;;  %v1175_v59 = vpop.xlane.xlu1 %1174  ;;  %v1222_v1 = vpack.c.bf16 %v1199_v56, %v1197_v2 }
 0x2fa   :  { %4505 = vrcp.f32 %v1175_v59  ;;  %v4496_v10 = vpop.eup %4495 }
 0x2fb   :  { %4216 = vmatmul.mubr.msk.bf16.vlgmr.msra.gmra.mxu0 %vm1043_vm5, %v1222_v1  ;;  %4507 = vrcp.f32 %v1178_v58  ;;  %v1201_v40 = vmul.f32 %v4496_v10, %v5207_v3 }
 0x2fc   :  { %4226 = vmatpush3.bf16.msra.mxu0 %v533_v26  ;;  %4227 = vmatprep.mubr.msk.bf16.mxu0 %vm4686_vm1, %v4685_v30 }
 0x2fd   :  { %v1184_v14 = vpop.xlane.xlu0 %1183  ;;  %v1181_v17 = vpop.xlane.xlu1 %1180  ;;  %4237 = vmatprep.subr.bf16.mxu0 %v4685_v30 }
 0x2fe   :  { %4509 = vrcp.f32 %v1181_v17 }
 0x2ff   :  { %v4498_v16 = vpop.eup %4497  ;;  %4511 = vrcp.f32 %v1184_v14 }
 0x300   :  { %v1203_v51 = vmul.f32 %v4498_v16, %v5214_v57  ;;  %v4500_v62 = vpop.eup %4499 }
 0x301   :  { %v1187_v5 = vpop.xlane.xlu1 %1186  ;;  %v1205_v26 = vmul.f32 %v4500_v62, %v5212_v37 }
 0x302   :  { %4513 = vrcp.f32 %v1187_v5  ;;  %v1223_v21 = vpack.c.bf16 %v1203_v51, %v1201_v40 }
 0x303   :  { %v4502_v24 = vpop.eup %4501 }
 0x304   :  { %4222 = vmatmul.mubr.msk.bf16.vlgmr.msra.gmra.mxu1 %vm1043_vm5, %v1223_v21  ;;  %v1207_v9 = vmul.f32 %v4502_v24, %v5220_v60  ;;  %v4504_v3 = vpop.eup %4503 }
 0x305   :  { %4232 = vmatpush3.bf16.msra.mxu1 %v534_v25  ;;  %4233 = vmatprep.mubr.msk.bf16.mxu1 %vm4686_vm1, %v4685_v30  ;;  %v1209_v8 = vmul.f32 %v4504_v3, %v5222_v63 }
 0x306   :  { %4243 = vmatprep.subr.bf16.mxu1 %v4685_v30  ;;  %v1224_v57 = vpack.c.bf16 %v1207_v9, %v1205_v26  ;;  %v5323_v26 = vld [vmem:[%s6286_s11] ss:$0 sm:$0xff] }
 0x307   :  { %v4506_v13 = vpop.eup %4505 }
 0x308   :  { %4228 = vmatmul.mubr.msk.bf16.vlgmr.msra.gmra.mxu0 %vm1043_vm5, %v1224_v57  ;;  %v1211_v19 = vmul.f32 %v4506_v13, %v5230_v44  ;;  %v4508_v20 = vpop.eup %4507 }
 0x309   :  { %4238 = vmatpush3.bf16.msra.mxu0 %v535_v35  ;;  %4239 = vmatprep.mubr.msk.bf16.mxu0 %vm4686_vm1, %v4685_v30  ;;  %v1213_v60 = vmul.f32 %v4508_v20, %v5228_v0  ;;  %v4441_v0 = vld [vmem:[%s6285_s10 + $0x8] sm:$0xff]  }
 0x30a   :  { %v1225_v23 = vpack.c.bf16 %v1211_v19, %v1209_v8  ;;  %4249 = vmatprep.subr.bf16.mxu0 %v4441_v0  ;;  %v4647_v8 = vld [vmem:[%s6311_s2] sm:$0xff] }
 0x30b   :  { %v4510_v25 = vpop.eup %4509 }
 0x30c   :  { %v4512_v37 = vpop.eup %4511  ;;  %4234 = vmatmul.mubr.msk.bf16.vlgmr.msra.gmra.mxu1 %vm1043_vm5, %v1225_v23  ;;  %v1215_v22 = vmul.f32 %v4510_v25, %v5236_v6 }
 0x30d   :  { %4244 = vmatpush3.bf16.msra.mxu1 %v536_v34  ;;  %4245 = vmatprep.mubr.msk.bf16.mxu1 %vm4686_vm1, %v4685_v30  ;;  %v1217_v35 = vmul.f32 %v4512_v37, %v5238_v7 }
 0x30e   :  { %v1226_v33 = vpack.c.bf16 %v1215_v22, %v1213_v60  ;;  %v4648_v60 = vld [vmem:[%s6311_s2 + $0x10] sm:$0xff] }
 0x30f   :  { %v4514_v29 = vpop.eup %4513 }
 0x310   :  { %v1219_v63 = vmul.f32 %v4514_v29, %v5244_v4  ;;  %4240 = vmatmul.mubr.msk.bf16.vlgmr.msra.gmra.mxu0 %vm1043_vm5, %v1226_v33  ;;  %v4649_v29 = vld [vmem:[%s6311_s2 + $0x8] sm:$0xff] }
 0x311   :  { %4250 = vmatpush3.bf16.msra.mxu0 %v4441_v0 }
 0x312   :  { %v1227_v44 = vpack.c.bf16 %v1219_v63, %v1217_v35  ;;  %4251 = vmatprep.subr.bf16.mxu0 %v4442_v28 }
 0x314   :  { %4246 = vmatmul.mubr.msk.bf16.vlgmr.msra.gmra.mxu1 %vm1043_vm5, %v1227_v44  ;;  %v4650_v44 = vld [vmem:[%s6311_s2 + $0x18] sm:$0xff] }
 0x315   :  { %4252 = vmatpush3.bf16.msra.mxu0 %v4442_v28 }
 0x3ab   :  { %v1265_v32 = vpop.f32.mrf.mxu0 }
 0x3ad   :  { %v4205_v34 = vpop.f32.mrf.mxu0 }
 0x3af   :  { %v1268_v6 = vpop.f32.mrf.mxu0 }
 0x3b0   :  { %v1580_v7 = vpack.c.bf16 %v1268_v6, %v1265_v32 }
 0x3b1   :  { %v4206_v4 = vpop.f32.mrf.mxu0 }
 0x3b2   :  { %4253 = vmatprep.mubr.msk.bf16.mxu0 %vm161_vm0, %v1580_v7 }
 0x3b3   :  { %v1309_v31 = vpop.f32.mrf.mxu1 }
 0x3b5   :  { %v4211_v38 = vpop.f32.mrf.mxu1 }
 0x3b7   :  { %v1312_v39 = vpop.f32.mrf.mxu1 }
 0x3b8   :  { %v1581_v27 = vpack.c.bf16 %v1312_v39, %v1309_v31  ;;  %v4651_v31 = vld [vmem:[%s6311_s2 + $0x20] sm:$0xff] }
 0x3b9   :  { %v4212_v41 = vpop.f32.mrf.mxu1 }
 0x3ba   :  { %4254 = vmatmul.mubr.msk.bf16.vlgmr.msra.gmra.mxu0 %vm161_vm0, %v1581_v27 }
 0x3bb   :  { %v1353_v43 = vpop.f32.mrf.mxu0 }
 0x3bd   :  { %v4217_v55 = vpop.f32.mrf.mxu0 }
 0x3be   :  { %v4652_v55 = vld [vmem:[%s6311_s2 + $0x30] sm:$0xff] }
 0x3bf   :  { %v1356_v46 = vpop.f32.mrf.mxu0 }
 0x3c0   :  { %v1582_v61 = vpack.c.bf16 %v1356_v46, %v1353_v43 }
 0x3c1   :  { %v4218_v47 = vpop.f32.mrf.mxu0 }
 0x3c2   :  { %4257 = vmatprep.mubr.msk.bf16.mxu0 %vm161_vm0, %v1582_v61  ;;  %v4653_v47 = vld [vmem:[%s6311_s2 + $0x28] sm:$0xff] }
 0x3c4   :  { %v1397_v49 = vpop.f32.mrf.mxu1 }
 0x3c6   :  { %v4223_v52 = vpop.f32.mrf.mxu1 }
 0x3c8   :  { %v1400_v45 = vpop.f32.mrf.mxu1  ;;  %v1441_v53 = vpop.f32.mrf.mxu0 }
 0x3c9   :  { %v1583_v50 = vpack.c.bf16 %v1400_v45, %v1397_v49 }
 0x3ca   :  { %v4224_v11 = vpop.f32.mrf.mxu1  ;;  %v4229_v36 = vpop.f32.mrf.mxu0 }
 0x3cb   :  { %4258 = vmatmul.mubr.msk.bf16.gmra.mxu0 %vm161_vm0, %v1583_v50 }
 0x3cc   :  { %v1444_v12 = vpop.f32.mrf.mxu0  ;;  %v1485_v15 = vpop.f32.mrf.mxu1 }
 0x3cd   :  { %v1584_v18 = vpack.c.bf16 %v1444_v12, %v1441_v53  ;;  %v4654_v53 = vld [vmem:[%s6311_s2 + $0x38] sm:$0xff] }
 0x3ce   :  { %v4230_v54 = vpop.f32.mrf.mxu0  ;;  %v4235_v2 = vpop.f32.mrf.mxu1 }
 0x3cf   :  { %4261 = vmatprep.mubr.msk.bf16.mxu0 %vm161_vm0, %v1584_v18  ;;  %v4655_v18 = vld [vmem:[%s6311_s2 + $0x40] sm:$0xff] }
 0x3d0   :  { %v1488_v56 = vpop.f32.mrf.mxu1  ;;  %v1529_v58 = vpop.f32.mrf.mxu0 }
 0x3d1   :  { %v1585_v59 = vpack.c.bf16 %v1488_v56, %v1485_v15 }
 0x3d2   :  { %v4236_v1 = vpop.f32.mrf.mxu1  ;;  %v4241_v10 = vpop.f32.mrf.mxu0 }
 0x3d3   :  { %4262 = vmatmul.mubr.msk.bf16.gmra.mxu0 %vm161_vm0, %v1585_v59  ;;  %v4656_v10 = vld [vmem:[%s6311_s2 + $0x50] sm:$0xff] }
 0x3d4   :  { %v1532_v14 = vpop.f32.mrf.mxu0  ;;  %v1573_v17 = vpop.f32.mrf.mxu1 }
 0x3d5   :  { %v1586_v16 = vpack.c.bf16 %v1532_v14, %v1529_v58 }
 0x3d6   :  { %v4242_v40 = vpop.f32.mrf.mxu0  ;;  %v4247_v51 = vpop.f32.mrf.mxu1 }
 0x3d7   :  { %4265 = vmatprep.mubr.msk.bf16.mxu0 %vm161_vm0, %v1586_v16  ;;  %v4657_v16 = vld [vmem:[%s6311_s2 + $0x48] sm:$0xff] }
 0x3d8   :  { %v1576_v5 = vpop.f32.mrf.mxu1 }
 0x3d9   :  { %v1587_v62 = vpack.c.bf16 %v1576_v5, %v1573_v17  ;;  %v4658_v5 = vld [vmem:[%s6311_s2 + $0x58] sm:$0xff] }
 0x3da   :  { %v4248_v21 = vpop.f32.mrf.mxu1 }
 0x3db   :  { %4266 = vmatmul.mubr.msk.bf16.gmra.mxu0 %vm161_vm0, %v1587_v62 }
 0x47a   :  { %v4255_v24 = vpop.f32.mrf.mxu0 }
 0x47b   :  { %v1673_v3 = vadd.f32 %v4255_v24, %v5323_v26 }
 0x47c   :  { %v1664_v9 = vpop.f32.mrf.mxu0 }
 0x47d   :  { %v1665_v57 = vadd.f32 %v5323_v26, %v1664_v9  ;;  %v5339_v22 = vadd.f32 %v4648_v60, %v1673_v3 }
 0x47e   :  { %v4256_v13 = vpop.f32.mrf.mxu0 }
 0x47f   :  { %v5330_v19 = vadd.f32 %v4647_v8, %v1665_v57  ;;  %v1676_v23 = vadd.f32 %v4256_v13, %v5323_v26  ;;  %v1749_v63 = vsel %vm161_vm0, %v5339_v22, 0.0  ;;  %v4659_v13 = vld [vmem:[%s6311_s2 + $0x60] sm:$0xff] }
 0x480   :  { %v1667_v20 = vpop.f32.mrf.mxu0 }
 0x481   :  { %v1668_v25 = vadd.f32 %v5323_v26, %v1667_v20  ;;  %v1743_v37 = vsel %vm161_vm0, %v5330_v19, 0.0  ;;  %v5353_v0 = vadd.f32 %v4650_v44, %v1676_v23 }
 0x482   :  { %1744 = vadd.xlane.f32.xlu0 %v1743_v37 }
 0x483   :  { %v5344_v33 = vadd.f32 %v4649_v29, %v1668_v25  ;;  %v1752_v28 = vsel %vm161_vm0, %v5353_v0, 0.0  ;;  %v4660_v29 = vld [vmem:[%s6311_s2 + $0x70] sm:$0xff] }
 0x485   :  { %v1746_v35 = vsel %vm161_vm0, %v5344_v33, 0.0 }
 0x486   :  { %1747 = vadd.xlane.f32.xlu1 %v1746_v35  ;;  %1750 = vadd.xlane.f32.xlu0 %v1749_v63  ;;  %v4661_v63 = vld [vmem:[%s6311_s2 + $0x68] sm:$0xff] }
 0x48a   :  { %1753 = vadd.xlane.f32.xlu1 %v1752_v28 }
 0x48b   :  { %v4259_v32 = vpop.f32.mrf.mxu0 }
 0x48c   :  { %v1689_v6 = vadd.f32 %v4259_v32, %v5323_v26  ;;  %v4662_v32 = vld [vmem:[%s6311_s2 + $0x78] sm:$0xff] }
 0x48d   :  { %v1680_v34 = vpop.f32.mrf.mxu0 }
 0x48e   :  { %v1681_v7 = vadd.f32 %v5323_v26, %v1680_v34  ;;  %v5371_v46 = vadd.f32 %v4652_v55, %v1689_v6 }
 0x48f   :  { %v4260_v4 = vpop.f32.mrf.mxu0 }
 0x490   :  { %v5362_v38 = vadd.f32 %v4651_v31, %v1681_v7  ;;  %v1692_v27 = vadd.f32 %v4260_v4, %v5323_v26  ;;  %v1761_v50 = vsel %vm161_vm0, %v5371_v46, 0.0 }
 0x491   :  { %v1683_v39 = vpop.f32.mrf.mxu0 }
 0x492   :  { %v1684_v41 = vadd.f32 %v5323_v26, %v1683_v39  ;;  %v1755_v43 = vsel %vm161_vm0, %v5362_v38, 0.0  ;;  %v5385_v11 = vadd.f32 %v4654_v53, %v1692_v27 }
 0x493   :  { %1756 = vadd.xlane.f32.xlu0 %v1755_v43  ;;  %v4263_v61 = vpop.f32.mrf.mxu0 }
 0x494   :  { %v5376_v49 = vadd.f32 %v4653_v47, %v1684_v41  ;;  %v1705_v36 = vadd.f32 %v4263_v61, %v5323_v26  ;;  %v1764_v58 = vsel %vm161_vm0, %v5385_v11, 0.0 }
 0x495   :  { %v1696_v52 = vpop.f32.mrf.mxu0 }
 0x496   :  { %v1758_v45 = vsel %vm161_vm0, %v5376_v49, 0.0  ;;  %v1697_v12 = vadd.f32 %v5323_v26, %v1696_v52  ;;  %v5403_v14 = vadd.f32 %v4656_v10, %v1705_v36 }
 0x497   :  { %1759 = vadd.xlane.f32.xlu1 %v1758_v45  ;;  %1762 = vadd.xlane.f32.xlu0 %v1761_v50  ;;  %v4264_v15 = vpop.f32.mrf.mxu0 }
 0x498   :  { %v5392_v54 = vadd.f32 %v4655_v18, %v1697_v12  ;;  %v1708_v2 = vadd.f32 %v4264_v15, %v5323_v26  ;;  %v1773_v3 = vsel %vm161_vm0, %v5403_v14, 0.0 }
 0x499   :  { %v1699_v56 = vpop.f32.mrf.mxu0 }
 0x49a   :  { %v1700_v59 = vadd.f32 %v5323_v26, %v1699_v56  ;;  %v1767_v1 = vsel %vm161_vm0, %v5392_v54, 0.0  ;;  %v5413_v62 = vadd.f32 %v4658_v5, %v1708_v2 }
 0x49b   :  { %1765 = vadd.xlane.f32.xlu1 %v1764_v58  ;;  %1768 = vadd.xlane.f32.xlu0 %v1767_v1  ;;  %v4267_v17 = vpop.f32.mrf.mxu0 }
 0x49c   :  { %v5408_v40 = vadd.f32 %v4657_v16, %v1700_v59  ;;  %v1721_v21 = vadd.f32 %v4267_v17, %v5323_v26  ;;  %v1776_v23 = vsel %vm161_vm0, %v5413_v62, 0.0 }
 0x49d   :  { %v1712_v51 = vpop.f32.mrf.mxu0 }
 0x49e   :  { %v1713_v24 = vadd.f32 %v5323_v26, %v1712_v51  ;;  %v1770_v9 = vsel %vm161_vm0, %v5408_v40, 0.0  ;;  %v5435_v35 = vadd.f32 %v4660_v29, %v1721_v21 }
 0x49f   :  { %1771 = vadd.xlane.f32.xlu1 %v1770_v9  ;;  %1774 = vadd.xlane.f32.xlu0 %v1773_v3  ;;  %v4268_v57 = vpop.f32.mrf.mxu0 }
 0x4a0   :  { %v5424_v8 = vadd.f32 %v4659_v13, %v1713_v24  ;;  %v1724_v25 = vadd.f32 %v4268_v57, %v5323_v26  ;;  %v1785_v28 = vsel %vm161_vm0, %v5435_v35, 0.0 }
 0x4a1   :  { %v1715_v20 = vpop.f32.mrf.mxu0 }
 0x4a2   :  { %v1716_v37 = vadd.f32 %v5323_v26, %v1715_v20  ;;  %v1779_v60 = vsel %vm161_vm0, %v5424_v8, 0.0  ;;  %v5449_v34 = vadd.f32 %v4662_v32, %v1724_v25 }
 0x4a3   :  { %1777 = vadd.xlane.f32.xlu1 %v1776_v23  ;;  %1780 = vadd.xlane.f32.xlu0 %v1779_v60 }
 0x4a4   :  { %v5440_v44 = vadd.f32 %v4661_v63, %v1716_v37  ;;  %v1788_v6 = vsel %vm161_vm0, %v5449_v34, 0.0 }
 0x4a6   :  { %v1782_v26 = vsel %vm161_vm0, %v5440_v44, 0.0 }
 0x4a7   :  { %1783 = vadd.xlane.f32.xlu1 %v1782_v26  ;;  %1786 = vadd.xlane.f32.xlu0 %v1785_v28 }
 0x4ab   :  { %1789 = vadd.xlane.f32.xlu1 %v1788_v6 }
 0x50b   :  { %v1745_v7 = vpop.xlane.xlu0 %1744 }
 0x50c   :  { %v1792_v4 = vmul.f32 0.03125, %v1745_v7 }
 0x50e   :  { %v5454_v31 = vsub.f32 %v5330_v19, %v1792_v4 }
 0x50f   :  { %v1748_v39 = vpop.xlane.xlu1 %1747  ;;  %v1751_v27 = vpop.xlane.xlu0 %1750 }
 0x510   :  { %v1793_v41 = vmul.f32 0.03125, %v1748_v39  ;;  %v1794_v43 = vmul.f32 0.03125, %v1751_v27  ;;  %v1824_v55 = vmul.f32 %v5454_v31, %v5454_v31 }
 0x512   :  { %v5459_v61 = vsub.f32 %v5344_v33, %v1793_v41  ;;  %v5462_v47 = vsub.f32 %v5339_v22, %v1794_v43  ;;  %v1840_v52 = vsel %vm161_vm0, %v1824_v55, 0.0 }
 0x513   :  { %v1754_v45 = vpop.xlane.xlu1 %1753  ;;  %1841 = vadd.xlane.f32.xlu0 %v1840_v52 }
 0x514   :  { %v1795_v50 = vmul.f32 0.03125, %v1754_v45  ;;  %v1825_v19 = vmul.f32 %v5459_v61, %v5459_v61  ;;  %v1826_v53 = vmul.f32 %v5462_v47, %v5462_v47 }
 0x516   :  { %v5470_v36 = vsub.f32 %v5353_v0, %v1795_v50  ;;  %v1843_v33 = vsel %vm161_vm0, %v1825_v19, 0.0  ;;  %v1846_v12 = vsel %vm161_vm0, %v1826_v53, 0.0 }
 0x517   :  { %1844 = vadd.xlane.f32.xlu1 %v1843_v33  ;;  %1847 = vadd.xlane.f32.xlu0 %v1846_v12 }
 0x518   :  { %v1827_v22 = vmul.f32 %v5470_v36, %v5470_v36 }
 0x51a   :  { %v1849_v15 = vsel %vm161_vm0, %v1827_v22, 0.0 }
 0x51b   :  { %1850 = vadd.xlane.f32.xlu1 %v1849_v15 }
 0x51c   :  { %v1757_v18 = vpop.xlane.xlu0 %1756 }
 0x51d   :  { %v1796_v2 = vmul.f32 0.03125, %v1757_v18 }
 0x51f   :  { %v5478_v56 = vsub.f32 %v5362_v38, %v1796_v2 }
 0x520   :  { %v1760_v58 = vpop.xlane.xlu1 %1759  ;;  %v1763_v0 = vpop.xlane.xlu0 %1762 }
 0x521   :  { %v1797_v59 = vmul.f32 0.03125, %v1760_v58  ;;  %v1798_v1 = vmul.f32 0.03125, %v1763_v0  ;;  %v1828_v10 = vmul.f32 %v5478_v56, %v5478_v56  ;;  %v4443_v58 = vld [vmem:[%s6289_s14 + $0x8] sm:$0xff]  }
 0x522   :  { %4269 = vmatprep.subr.bf16.mxu1 %v4443_v58 }
 0x523   :  { %v5483_v17 = vsub.f32 %v5376_v49, %v1797_v59  ;;  %v5486_v16 = vsub.f32 %v5371_v46, %v1798_v1  ;;  %v1852_v51 = vsel %vm161_vm0, %v1828_v10, 0.0  ;;  %4270 = vmatpush3.bf16.msra.mxu1 %v4443_v58 }
 0x524   :  { %v1766_v5 = vpop.xlane.xlu1 %1765  ;;  %1853 = vadd.xlane.f32.xlu0 %v1852_v51  ;;  %v1769_v38 = vpop.xlane.xlu0 %1768 }
 0x525   :  { %v1799_v21 = vmul.f32 0.03125, %v1766_v5  ;;  %v1829_v24 = vmul.f32 %v5483_v17, %v5483_v17  ;;  %v1830_v9 = vmul.f32 %v5486_v16, %v5486_v16  ;;  %v1800_v3 = vmul.f32 0.03125, %v1769_v38 }
 0x527   :  { %v5494_v57 = vsub.f32 %v5385_v11, %v1799_v21  ;;  %v1855_v49 = vsel %vm161_vm0, %v1829_v24, 0.0  ;;  %v1858_v46 = vsel %vm161_vm0, %v1830_v9, 0.0  ;;  %v5499_v13 = vsub.f32 %v5392_v54, %v1800_v3 }
 0x528   :  { %1856 = vadd.xlane.f32.xlu1 %v1855_v49  ;;  %1859 = vadd.xlane.f32.xlu0 %v1858_v46  ;;  %v1772_v20 = vpop.xlane.xlu1 %1771  ;;  %v1775_v23 = vpop.xlane.xlu0 %1774 }
 0x529   :  { %v1831_v25 = vmul.f32 %v5494_v57, %v5494_v57  ;;  %v1801_v37 = vmul.f32 0.03125, %v1772_v20  ;;  %v1802_v60 = vmul.f32 0.03125, %v1775_v23  ;;  %v1832_v11 = vmul.f32 %v5499_v13, %v5499_v13 }
 0x52b   :  { %v1861_v29 = vsel %vm161_vm0, %v1831_v25, 0.0  ;;  %v5507_v63 = vsub.f32 %v5408_v40, %v1801_v37  ;;  %v5510_v54 = vsub.f32 %v5403_v14, %v1802_v60  ;;  %v1864_v26 = vsel %vm161_vm0, %v1832_v11, 0.0  ;;  %v5558_v60 = vld [vmem:[%s6287_s12] ss:$0 sm:$0xff]  ;;  %s3824_s12 = sshll.u32 %s4689_s5, 4  ;;  %s3825_s12 = int_to_ptr.vmem [resolvable:$true] %s3824_s12 }
 0x52c   :  { %1862 = vadd.xlane.f32.xlu1 %v1861_v29  ;;  %v1778_v28 = vpop.xlane.xlu1 %1777  ;;  %1865 = vadd.xlane.f32.xlu0 %v1864_v26  ;;  %v1781_v32 = vpop.xlane.xlu0 %1780  ;;  %p4668_p1 = scmp.lt.s32.totalorder %s3825_s12, %s3825_s12 }
 0x52d   :  { %v1803_v6 = vmul.f32 0.03125, %v1778_v28  ;;  %v1804_v7 = vmul.f32 0.03125, %v1781_v32  ;;  %v1833_v4 = vmul.f32 %v5507_v63, %v5507_v63  ;;  %v1834_v39 = vmul.f32 %v5510_v54, %v5510_v54 }
 0x52f   :  { %v5518_v40 = vsub.f32 %v5413_v62, %v1803_v6  ;;  %v5521_v14 = vsub.f32 %v5424_v8, %v1804_v7  ;;  %v1867_v27 = vsel %vm161_vm0, %v1833_v4, 0.0  ;;  %v1870_v41 = vsel %vm161_vm0, %v1834_v39, 0.0 }
 0x530   :  { %1868 = vadd.xlane.f32.xlu1 %v1867_v27  ;;  %v1784_v43 = vpop.xlane.xlu1 %1783  ;;  %1871 = vadd.xlane.f32.xlu0 %v1870_v41  ;;  %v1787_v55 = vpop.xlane.xlu0 %1786  ;;  %v5565_v27 = vld [vmem:[%s6288_s13] ss:$0 sm:$0xff]  ;;  %s4663_s13 = scalar_lea.vmem %s3825_s12, 128 }
 0x531   :  { %v1805_v52 = vmul.f32 0.03125, %v1784_v43  ;;  %v1806_v45 = vmul.f32 0.03125, %v1787_v55  ;;  %v1835_v50 = vmul.f32 %v5518_v40, %v5518_v40  ;;  %v1836_v62 = vmul.f32 %v5521_v14, %v5521_v14  ;;  %p4664_p0 = scmp.ne.s32.totalorder %s3825_s12, %s4663_s13  ;;  %p4669_p2 = scmp.lt.s32.totalorder %s4663_s13, %s4663_s13 }
 0x533   :  { %v5530_v19 = vsub.f32 %v5440_v44, %v1805_v52  ;;  %v5533_v8 = vsub.f32 %v5435_v35, %v1806_v45  ;;  %v1873_v53 = vsel %vm161_vm0, %v1835_v50, 0.0  ;;  %v1876_v33 = vsel %vm161_vm0, %v1836_v62, 0.0  ;;  %p4670_p3 = por %p4669_p2, %p4668_p1 }
 0x534   :  { %1874 = vadd.xlane.f32.xlu1 %v1873_v53  ;;  %v1790_v12 = vpop.xlane.xlu1 %1789  ;;  %1877 = vadd.xlane.f32.xlu0 %v1876_v33 }
 0x535   :  { %v1807_v22 = vmul.f32 0.03125, %v1790_v12  ;;  %v1837_v15 = vmul.f32 %v5530_v19, %v5530_v19  ;;  %v1838_v18 = vmul.f32 %v5533_v8, %v5533_v8  ;;  %p4671_p4 = pnand %p4670_p3, %p4664_p0 }
 0x537   :  { %v5542_v44 = vsub.f32 %v5449_v34, %v1807_v22  ;;  %v1879_v35 = vsel %vm161_vm0, %v1837_v15, 0.0  ;;  %v1882_v2 = vsel %vm161_vm0, %v1838_v18, 0.0  ;;  %v4444_v34 = vld [vmem:[%s6289_s14] sm:$0xff]   ;;  %s6326_s14 = sld [smem:[#allocation8_spill]] }
 0x538   :  { %1880 = vadd.xlane.f32.xlu1 %v1879_v35  ;;  %1883 = vadd.xlane.f32.xlu0 %v1882_v2 }
 0x539   :  { %v1839_v0 = vmul.f32 %v5542_v44, %v5542_v44  ;;  %4271 = vmatprep.subr.bf16.mxu1 %v4444_v34 }
 0x53a   :  { %4272 = vmatpush3.bf16.msra.mxu1 %v4444_v34 }
 0x53b   :  { %v1885_v59 = vsel %vm161_vm0, %v1839_v0, 0.0 }
 0x53c   :  { %1886 = vadd.xlane.f32.xlu1 %v1885_v59 }
 0x59c   :  { %v1842_v1 = vpop.xlane.xlu0 %1841 }
 0x59d   :  { %v1888_v10 = vmul.f32 0.03125, %v1842_v1 }
 0x59f   :  { %v1904_v51 = vadd.f32 1e-12, %v1888_v10 }
 0x5a0   :  { %v1845_v5 = vpop.xlane.xlu1 %1844  ;;  %v1848_v21 = vpop.xlane.xlu0 %1847 }
 0x5a1   :  { %4515 = vrsqrt.f32 %v1904_v51  ;;  %v1889_v38 = vmul.f32 0.03125, %v1845_v5  ;;  %v1890_v24 = vmul.f32 0.03125, %v1848_v21 }
 0x5a3   :  { %v1905_v9 = vadd.f32 1e-12, %v1889_v38  ;;  %v1906_v3 = vadd.f32 1e-12, %v1890_v24 }
 0x5a4   :  { %v1851_v49 = vpop.xlane.xlu1 %1850 }
 0x5a5   :  { %4517 = vrsqrt.f32 %v1905_v9  ;;  %v1891_v46 = vmul.f32 0.03125, %v1851_v49 }
 0x5a6   :  { %4519 = vrsqrt.f32 %v1906_v3 }
 0x5a7   :  { %v1907_v20 = vadd.f32 1e-12, %v1891_v46 }
 0x5a9   :  { %4521 = vrsqrt.f32 %v1907_v20 }
 0x5ad   :  { %v1854_v23 = vpop.xlane.xlu0 %1853 }
 0x5ae   :  { %v4516_v25 = vpop.eup %4515  ;;  %v1892_v37 = vmul.f32 0.03125, %v1854_v23 }
 0x5af   :  { %v1936_v11 = vmul.f32 %v4516_v25, %v5454_v31 }
 0x5b0   :  { %v1908_v29 = vadd.f32 1e-12, %v1892_v37 }
 0x5b1   :  { %v1857_v26 = vpop.xlane.xlu1 %1856  ;;  %v1860_v28 = vpop.xlane.xlu0 %1859  ;;  %v1958_v4 = vmul.f32 %v5558_v60, %v1936_v11 }
 0x5b2   :  { %v4518_v32 = vpop.eup %4517  ;;  %4523 = vrsqrt.f32 %v1908_v29  ;;  %v1893_v6 = vmul.f32 0.03125, %v1857_v26  ;;  %v1894_v7 = vmul.f32 0.03125, %v1860_v28 }
 0x5b3   :  { %v4520_v39 = vpop.eup %4519  ;;  %v1937_v41 = vmul.f32 %v4518_v32, %v5459_v61  ;;  %v5571_v33 = vadd.f32 %v5565_v27, %v1958_v4 }
 0x5b4   :  { %v1938_v43 = vmul.f32 %v4520_v39, %v5462_v47  ;;  %v1909_v31 = vadd.f32 1e-12, %v1893_v6  ;;  %v1910_v55 = vadd.f32 1e-12, %v1894_v7 }
 0x5b5   :  { %v1863_v52 = vpop.xlane.xlu1 %1862  ;;  %v1959_v45 = vmul.f32 %v5558_v60, %v1937_v41  ;;  %v1866_v53 = vpop.xlane.xlu0 %1865 }
 0x5b6   :  { %v4522_v50 = vpop.eup %4521  ;;  %4525 = vrsqrt.f32 %v1909_v31  ;;  %v1895_v62 = vmul.f32 0.03125, %v1863_v52  ;;  %v1960_v12 = vmul.f32 %v5558_v60, %v1938_v43  ;;  %v1896_v61 = vmul.f32 0.03125, %v1866_v53 }
 0x5b7   :  { %v1939_v22 = vmul.f32 %v4522_v50, %v5470_v36  ;;  %4527 = vrsqrt.f32 %v1910_v55  ;;  %v5576_v47 = vadd.f32 %v5565_v27, %v1959_v45 }
 0x5b8   :  { %v1911_v15 = vadd.f32 1e-12, %v1895_v62  ;;  %v1912_v18 = vadd.f32 1e-12, %v1896_v61  ;;  %v5582_v59 = vadd.f32 %v5565_v27, %v1960_v12 }
 0x5b9   :  { %v1996_v35 = vpack.c.bf16 %v5576_v47, %v5571_v33  ;;  %v1961_v2 = vmul.f32 %v5558_v60, %v1939_v22  ;;  %v1869_v58 = vpop.xlane.xlu1 %1868  ;;  %v1872_v0 = vpop.xlane.xlu0 %1871 }
 0x5ba   :  { %4529 = vrsqrt.f32 %v1911_v15  ;;  %v1897_v36 = vmul.f32 0.03125, %v1869_v58  ;;  %v1898_v34 = vmul.f32 0.03125, %v1872_v0 }
 0x5bb   :  { %4531 = vrsqrt.f32 %v1912_v18  ;;  %4273 = vmatprep.mubr.msk.bf16.mxu1 %vm161_vm0, %v1996_v35  ;;  %v5586_v1 = vadd.f32 %v5565_v27, %v1961_v2 }
 0x5bc   :  { %v1913_v10 = vadd.f32 1e-12, %v1897_v36  ;;  %v1914_v51 = vadd.f32 1e-12, %v1898_v34 }
 0x5bd   :  { %v1997_v5 = vpack.c.bf16 %v5586_v1, %v5582_v59  ;;  %v1875_v21 = vpop.xlane.xlu1 %1874  ;;  %v1878_v38 = vpop.xlane.xlu0 %1877 }
 0x5be   :  { %4533 = vrsqrt.f32 %v1913_v10  ;;  %v1899_v9 = vmul.f32 0.03125, %v1875_v21  ;;  %v1900_v3 = vmul.f32 0.03125, %v1878_v38 }
 0x5bf   :  { %v4524_v24 = vpop.eup %4523  ;;  %4274 = vmatmul.mubr.msk.bf16.vlgmr.msra.gmra.mxu1 %vm161_vm0, %v1997_v5  ;;  %4535 = vrsqrt.f32 %v1914_v51 }
 0x5c0   :  { %v1940_v49 = vmul.f32 %v4524_v24, %v5478_v56  ;;  %v1915_v46 = vadd.f32 1e-12, %v1899_v9  ;;  %v1916_v20 = vadd.f32 1e-12, %v1900_v3 }
 0x5c1   :  { %v1881_v23 = vpop.xlane.xlu1 %1880  ;;  %v1884_v25 = vpop.xlane.xlu0 %1883 }
 0x5c2   :  { %4537 = vrsqrt.f32 %v1915_v46  ;;  %v1901_v11 = vmul.f32 0.03125, %v1881_v23  ;;  %v1902_v29 = vmul.f32 0.03125, %v1884_v25  ;;  %v1962_v26 = vmul.f32 %v5558_v60, %v1940_v49 }
 0x5c3   :  { %v4526_v37 = vpop.eup %4525  ;;  %4539 = vrsqrt.f32 %v1916_v20 }
 0x5c4   :  { %v4528_v28 = vpop.eup %4527  ;;  %v1941_v32 = vmul.f32 %v4526_v37, %v5483_v17  ;;  %v1917_v6 = vadd.f32 1e-12, %v1901_v11  ;;  %v1918_v7 = vadd.f32 1e-12, %v1902_v29  ;;  %v5597_v31 = vadd.f32 %v5565_v27, %v1962_v26 }
 0x5c5   :  { %v1942_v4 = vmul.f32 %v4528_v28, %v5486_v16  ;;  %v1887_v39 = vpop.xlane.xlu1 %1886 }
 0x5c6   :  { %v1963_v56 = vmul.f32 %v5558_v60, %v1941_v32  ;;  %4541 = vrsqrt.f32 %v1917_v6  ;;  %v1903_v43 = vmul.f32 0.03125, %v1887_v39  ;;  %v4448_v32 = vld [vmem:[%s6291_s16] sm:$0xff]  }
 0x5c7   :  { %v4530_v41 = vpop.eup %4529  ;;  %4543 = vrsqrt.f32 %v1918_v7  ;;  %v1964_v45 = vmul.f32 %v5558_v60, %v1942_v4  ;;  %v5685_v6 = vld [vmem:[%s6290_s15] ss:$0 sm:$0xff] }
 0x5c8   :  { %v4532_v55 = vpop.eup %4531  ;;  %v5600_v52 = vadd.f32 %v5565_v27, %v1963_v56  ;;  %v1943_v17 = vmul.f32 %v4530_v41, %v5494_v57  ;;  %v1919_v50 = vadd.f32 1e-12, %v1903_v43 }
 0x5c9   :  { %v1944_v16 = vmul.f32 %v4532_v55, %v5499_v13  ;;  %v5610_v22 = vadd.f32 %v5565_v27, %v1964_v45 }
 0x5ca   :  { %v1998_v62 = vpack.c.bf16 %v5600_v52, %v5597_v31  ;;  %v1965_v53 = vmul.f32 %v5558_v60, %v1943_v17  ;;  %4545 = vrsqrt.f32 %v1919_v50 }
 0x5cb   :  { %v4534_v12 = vpop.eup %4533  ;;  %v1966_v13 = vmul.f32 %v5558_v60, %v1944_v16 }
 0x5cc   :  { %4277 = vmatprep.mubr.msk.bf16.mxu1 %vm161_vm0, %v1998_v62  ;;  %v5613_v61 = vadd.f32 %v5565_v27, %v1965_v53  ;;  %v4536_v57 = vpop.eup %4535  ;;  %v1945_v15 = vmul.f32 %v4534_v12, %v5507_v63 }
 0x5cd   :  { %v1946_v35 = vmul.f32 %v4536_v57, %v5510_v54  ;;  %v5623_v36 = vadd.f32 %v5565_v27, %v1966_v13 }
 0x5ce   :  { %v1999_v18 = vpack.c.bf16 %v5613_v61, %v5610_v22  ;;  %v1967_v2 = vmul.f32 %v5558_v60, %v1945_v15 }
 0x5cf   :  { %v4538_v58 = vpop.eup %4537  ;;  %v1968_v10 = vmul.f32 %v5558_v60, %v1946_v35 }
 0x5d0   :  { %4278 = vmatmul.mubr.msk.bf16.gmra.mxu1 %vm161_vm0, %v1999_v18  ;;  %v4540_v0 = vpop.eup %4539  ;;  %v5626_v34 = vadd.f32 %v5565_v27, %v1967_v2  ;;  %v1947_v63 = vmul.f32 %v4538_v58, %v5518_v40 }
 0x5d1   :  { %v1948_v51 = vmul.f32 %v4540_v0, %v5521_v14  ;;  %v5636_v24 = vadd.f32 %v5565_v27, %v1968_v10 }
 0x5d2   :  { %v2000_v54 = vpack.c.bf16 %v5626_v34, %v5623_v36  ;;  %v1969_v5 = vmul.f32 %v5558_v60, %v1947_v63 }
 0x5d3   :  { %v4542_v21 = vpop.eup %4541  ;;  %v1970_v3 = vmul.f32 %v5558_v60, %v1948_v51 }
 0x5d4   :  { %v4544_v38 = vpop.eup %4543  ;;  %4281 = vmatprep.mubr.msk.bf16.mxu1 %vm161_vm0, %v2000_v54  ;;  %v5639_v9 = vadd.f32 %v5565_v27, %v1969_v5  ;;  %v1949_v40 = vmul.f32 %v4542_v21, %v5530_v19 }
 0x5d5   :  { %v1950_v14 = vmul.f32 %v4544_v38, %v5533_v8  ;;  %v5649_v23 = vadd.f32 %v5565_v27, %v1970_v3 }
 0x5d6   :  { %v2001_v49 = vpack.c.bf16 %v5639_v9, %v5636_v24  ;;  %v1971_v46 = vmul.f32 %v5558_v60, %v1949_v40 }
 0x5d7   :  { %v4546_v20 = vpop.eup %4545  ;;  %v1972_v37 = vmul.f32 %v5558_v60, %v1950_v14 }
 0x5d8   :  { %4282 = vmatmul.mubr.msk.bf16.gmra.mxu1 %vm161_vm0, %v2001_v49  ;;  %v5652_v25 = vadd.f32 %v5565_v27, %v1971_v46  ;;  %v1951_v19 = vmul.f32 %v4546_v20, %v5542_v44  ;;  %v4445_v44 = vld [vmem:[%s6291_s16 + $0x18] sm:$0xff]  }
 0x5d9   :  { %v5661_v29 = vadd.f32 %v5565_v27, %v1972_v37  ;;  %4289 = vmatprep.subr.bf16.mxu0 %v4445_v44 }
 0x5da   :  { %v2002_v8 = vpack.c.bf16 %v5652_v25, %v5649_v23  ;;  %v1973_v11 = vmul.f32 %v5558_v60, %v1951_v19  ;;  %4290 = vmatpush3.bf16.msra.mxu0 %v4445_v44  ;;  %v4446_v60 = vld [vmem:[%s6291_s16 + $0x10] sm:$0xff]  }
 0x5db   :  { %4291 = vmatprep.subr.bf16.mxu0 %v4446_v60 }
 0x5dc   :  { %4285 = vmatprep.mubr.msk.bf16.mxu1 %vm161_vm0, %v2002_v8  ;;  %v5664_v26 = vadd.f32 %v5565_v27, %v1973_v11  ;;  %v4447_v27 = vld [vmem:[%s6291_s16 + $0x8] sm:$0xff]  }
 0x5de   :  { %v2003_v28 = vpack.c.bf16 %v5664_v26, %v5661_v29  ;;  %4292 = vmatpush3.bf16.msra.mxu0 %v4446_v60 }
 0x5df   :  { %4293 = vmatprep.subr.bf16.mxu0 %v4447_v27 }
 0x5e0   :  { %4286 = vmatmul.mubr.msk.bf16.gmra.mxu1 %vm161_vm0, %v2003_v28 }
 0x5e2   :  { %4294 = vmatpush3.bf16.msra.mxu0 %v4447_v27 }
 0x5e3   :  { %4295 = vmatprep.subr.bf16.mxu0 %v4448_v32 }
 0x5e6   :  { %4296 = vmatpush3.bf16.msra.mxu0 %v4448_v32 }
 0x5e7   :  { %4333 = vmatprep.subr.bf16.mxu0 %v4685_v30 }
 0x67f   :  { %v4275_v7 = vpop.f32.mrf.mxu1 }
 0x680   :  { %v5688_v4 = vadd.f32 %v4275_v7, %v5685_v6 }
 0x681   :  { %v2080_v39 = vpop.f32.mrf.mxu1 }
 0x682   :  { %v2145_v56 = vmul.f32 %v5688_v4, %v5688_v4  ;;  %v5693_v41 = vadd.f32 %v5685_v6, %v2080_v39 }
 0x683   :  { %v4276_v43 = vpop.f32.mrf.mxu1 }
 0x684   :  { %v2161_v55 = vmul.f32 %v2145_v56, %v5688_v4  ;;  %v2143_v17 = vmul.f32 %v5693_v41, %v5693_v41  ;;  %v5699_v45 = vadd.f32 %v4276_v43, %v5685_v6 }
 0x685   :  { %v2083_v50 = vpop.f32.mrf.mxu1 }
 0x686   :  { %v2177_v16 = vmul.f32 0.044715, %v2161_v55  ;;  %v2159_v62 = vmul.f32 %v2143_v17, %v5693_v41  ;;  %v2146_v53 = vmul.f32 %v5699_v45, %v5699_v45  ;;  %v5705_v12 = vadd.f32 %v5685_v6, %v2083_v50 }
 0x688   :  { %v2193_v57 = vadd.f32 %v2177_v16, %v5688_v4  ;;  %v2175_v15 = vmul.f32 0.044715, %v2159_v62  ;;  %v2162_v13 = vmul.f32 %v2146_v53, %v5699_v45  ;;  %v2144_v18 = vmul.f32 %v5705_v12, %v5705_v12 }
 0x68a   :  { %v2209_v35 = vmul.f32 0.7978846, %v2193_v57  ;;  %v2191_v2 = vadd.f32 %v2175_v15, %v5693_v41  ;;  %v2178_v58 = vmul.f32 0.044715, %v2162_v13  ;;  %v2160_v0 = vmul.f32 %v2144_v18, %v5705_v12 }
 0x68c   :  { %4547 = vtanh.f32 %v2209_v35  ;;  %v2207_v63 = vmul.f32 0.7978846, %v2191_v2  ;;  %v2194_v10 = vadd.f32 %v2178_v58, %v5699_v45  ;;  %v2176_v51 = vmul.f32 0.044715, %v2160_v0 }
 0x68e   :  { %4549 = vtanh.f32 %v2207_v63  ;;  %v2210_v54 = vmul.f32 0.7978846, %v2194_v10  ;;  %v2192_v5 = vadd.f32 %v2176_v51, %v5705_v12 }
 0x690   :  { %4551 = vtanh.f32 %v2210_v54  ;;  %v2208_v21 = vmul.f32 0.7978846, %v2192_v5  ;;  %v4279_v38 = vpop.f32.mrf.mxu1 }
 0x691   :  { %v5716_v40 = vadd.f32 %v4279_v38, %v5685_v6 }
 0x692   :  { %4553 = vtanh.f32 %v2208_v21  ;;  %v2096_v3 = vpop.f32.mrf.mxu1 }
 0x693   :  { %v2149_v14 = vmul.f32 %v5716_v40, %v5716_v40  ;;  %v5721_v49 = vadd.f32 %v5685_v6, %v2096_v3 }
 0x694   :  { %v4280_v46 = vpop.f32.mrf.mxu1 }
 0x695   :  { %v2165_v20 = vmul.f32 %v2149_v14, %v5716_v40  ;;  %v2147_v19 = vmul.f32 %v5721_v49, %v5721_v49  ;;  %v5727_v37 = vadd.f32 %v4280_v46, %v5685_v6 }
 0x696   :  { %v2099_v8 = vpop.f32.mrf.mxu1 }
 0x697   :  { %v2181_v11 = vmul.f32 0.044715, %v2165_v20  ;;  %v2163_v28 = vmul.f32 %v2147_v19, %v5721_v49  ;;  %v2150_v44 = vmul.f32 %v5727_v37, %v5727_v37  ;;  %v5733_v60 = vadd.f32 %v5685_v6, %v2099_v8 }
 0x698   :  { %v4283_v43 = vpop.f32.mrf.mxu1 }
 0x699   :  { %v4548_v27 = vpop.eup %4547  ;;  %v2197_v32 = vadd.f32 %v2181_v11, %v5716_v40  ;;  %v2179_v7 = vmul.f32 0.044715, %v2163_v28  ;;  %v2166_v39 = vmul.f32 %v2150_v44, %v5727_v37  ;;  %v2148_v56 = vmul.f32 %v5733_v60, %v5733_v60 }
 0x69a   :  { %v2241_v55 = vadd.f32 1.0, %v4548_v27  ;;  %v5740_v17 = vadd.f32 %v4283_v43, %v5685_v6  ;;  %v2112_v15 = vpop.f32.mrf.mxu1 }
 0x69b   :  { %v4550_v50 = vpop.eup %4549  ;;  %v2213_v16 = vmul.f32 0.7978846, %v2197_v32  ;;  %v2195_v62 = vadd.f32 %v2179_v7, %v5721_v49  ;;  %v2182_v53 = vmul.f32 0.044715, %v2166_v39  ;;  %v2164_v57 = vmul.f32 %v2148_v56, %v5733_v60 }
 0x69c   :  { %v2257_v13 = vmul.f32 0.5, %v2241_v55  ;;  %v2239_v18 = vadd.f32 1.0, %v4550_v50  ;;  %v2153_v35 = vmul.f32 %v5740_v17, %v5740_v17  ;;  %v5747_v2 = vadd.f32 %v5685_v6, %v2112_v15  ;;  %v4284_v51 = vpop.f32.mrf.mxu1 }
 0x69d   :  { %v4552_v58 = vpop.eup %4551  ;;  %4555 = vtanh.f32 %v2213_v16  ;;  %v2211_v0 = vmul.f32 0.7978846, %v2195_v62  ;;  %v2198_v63 = vadd.f32 %v2182_v53, %v5727_v37  ;;  %v2180_v10 = vmul.f32 0.044715, %v2164_v57 }
 0x69e   :  { %v2273_v54 = vmul.f32 %v2257_v13, %v5688_v4  ;;  %v2242_v5 = vadd.f32 1.0, %v4552_v58  ;;  %v2169_v21 = vmul.f32 %v2153_v35, %v5740_v17  ;;  %v2151_v46 = vmul.f32 %v5747_v2, %v5747_v2  ;;  %v2115_v20 = vpop.f32.mrf.mxu1 }
 0x69f   :  { %v4554_v38 = vpop.eup %4553  ;;  %4557 = vtanh.f32 %v2211_v0  ;;  %v2214_v3 = vmul.f32 0.7978846, %v2198_v63  ;;  %v2196_v14 = vadd.f32 %v2180_v10, %v5733_v60  ;;  %v2255_v19 = vmul.f32 0.5, %v2239_v18 }
 0x6a0   :  { %v2258_v8 = vmul.f32 0.5, %v2242_v5  ;;  %v2240_v11 = vadd.f32 1.0, %v4554_v38  ;;  %v2185_v28 = vmul.f32 0.044715, %v2169_v21  ;;  %v2167_v4 = vmul.f32 %v2151_v46, %v5747_v2  ;;  %v4287_v32 = vpop.f32.mrf.mxu1 }
 0x6a1   :  { %4559 = vtanh.f32 %v2214_v3  ;;  %v2212_v44 = vmul.f32 0.7978846, %v2196_v14  ;;  %v5757_v27 = vadd.f32 %v4284_v51, %v5685_v6  ;;  %v5762_v43 = vadd.f32 %v5685_v6, %v2115_v20 }
 0x6a2   :  { %v2274_v7 = vmul.f32 %v2258_v8, %v5699_v45  ;;  %v2256_v39 = vmul.f32 0.5, %v2240_v11  ;;  %v2201_v56 = vadd.f32 %v2185_v28, %v5740_v17  ;;  %v2183_v55 = vmul.f32 0.044715, %v2167_v4  ;;  %v2128_v62 = vpop.f32.mrf.mxu1 }
 0x6a3   :  { %4561 = vtanh.f32 %v2212_v44  ;;  %v2154_v50 = vmul.f32 %v5757_v27, %v5757_v27  ;;  %v5767_v16 = vadd.f32 %v4287_v32, %v5685_v6  ;;  %v2271_v53 = vmul.f32 %v2255_v19, %v5693_v41 }
 0x6a4   :  { %v2272_v57 = vmul.f32 %v2256_v39, %v5705_v12  ;;  %v2217_v45 = vmul.f32 0.7978846, %v2201_v56  ;;  %v2152_v15 = vmul.f32 %v5762_v43, %v5762_v43  ;;  %v2199_v13 = vadd.f32 %v2183_v55, %v5747_v2  ;;  %v4288_v0 = vpop.f32.mrf.mxu1 }
 0x6a5   :  { %v2170_v18 = vmul.f32 %v2154_v50, %v5757_v27  ;;  %v2157_v35 = vmul.f32 %v5767_v16, %v5767_v16  ;;  %v5778_v58 = vadd.f32 %v5685_v6, %v2128_v62  ;;  %v2288_v63 = vpack.c.bf16 %v2274_v7, %v2273_v54 }
 0x6a6   :  { %v2168_v41 = vmul.f32 %v2152_v15, %v5762_v43  ;;  %v5782_v12 = vadd.f32 %v4288_v0, %v5685_v6  ;;  %v2287_v10 = vpack.c.bf16 %v2272_v57, %v2271_v53  ;;  %v2215_v51 = vmul.f32 0.7978846, %v2199_v13  ;;  %v2131_v3 = vpop.f32.mrf.mxu1 }
 0x6a7   :  { %v2186_v5 = vmul.f32 0.044715, %v2170_v18  ;;  %v2173_v21 = vmul.f32 %v2157_v35, %v5767_v16  ;;  %v2155_v38 = vmul.f32 %v5778_v58, %v5778_v58  ;;  %4563 = vtanh.f32 %v2217_v45 }
 0x6a8   :  { %v2184_v14 = vmul.f32 0.044715, %v2168_v41  ;;  %v2158_v46 = vmul.f32 %v5782_v12, %v5782_v12  ;;  %v5790_v54 = vadd.f32 %v5685_v6, %v2131_v3  ;;  %4297 = vmatprep.mubr.msk.bf16.mxu0 %vm2325_vm6, %v2287_v10  ;;  %4565 = vtanh.f32 %v2215_v51 }
 0x6a9   :  { %v2202_v20 = vadd.f32 %v2186_v5, %v5757_v27  ;;  %v2189_v19 = vmul.f32 0.044715, %v2173_v21  ;;  %v2171_v8 = vmul.f32 %v2155_v38, %v5778_v58  ;;  %4298 = vmatmul.mubr.msk.bf16.vlgmr.msra.gmra.mxu0 %vm2325_vm6, %v2288_v63 }
 0x6aa   :  { %v4556_v11 = vpop.eup %4555  ;;  %v2200_v28 = vadd.f32 %v2184_v14, %v5762_v43  ;;  %v2174_v44 = vmul.f32 %v2158_v46, %v5782_v12  ;;  %v2156_v4 = vmul.f32 %v5790_v54, %v5790_v54 }
 0x6ab   :  { %v2218_v6 = vmul.f32 0.7978846, %v2202_v20  ;;  %v2205_v32 = vadd.f32 %v2189_v19, %v5767_v16  ;;  %v2187_v7 = vmul.f32 0.044715, %v2171_v8  ;;  %v2245_v62 = vadd.f32 1.0, %v4556_v11 }
 0x6ac   :  { %v4558_v39 = vpop.eup %4557  ;;  %v2216_v56 = vmul.f32 0.7978846, %v2200_v28  ;;  %v2190_v55 = vmul.f32 0.044715, %v2174_v44  ;;  %v2172_v50 = vmul.f32 %v2156_v4, %v5790_v54 }
 0x6ad   :  { %v2243_v53 = vadd.f32 1.0, %v4558_v39  ;;  %4567 = vtanh.f32 %v2218_v6  ;;  %v2221_v57 = vmul.f32 0.7978846, %v2205_v32  ;;  %v2203_v15 = vadd.f32 %v2187_v7, %v5778_v58 }
 0x6ae   :  { %v4560_v45 = vpop.eup %4559  ;;  %4569 = vtanh.f32 %v2216_v56  ;;  %v2206_v13 = vadd.f32 %v2190_v55, %v5782_v12  ;;  %v2188_v18 = vmul.f32 0.044715, %v2172_v50  ;;  %v2261_v38 = vmul.f32 0.5, %v2245_v62 }
 0x6af   :  { %v2246_v35 = vadd.f32 1.0, %v4560_v45  ;;  %v2219_v63 = vmul.f32 0.7978846, %v2203_v15  ;;  %v2259_v51 = vmul.f32 0.5, %v2243_v53  ;;  %4571 = vtanh.f32 %v2221_v57 }
 0x6b0   :  { %v4562_v0 = vpop.eup %4561  ;;  %v2222_v41 = vmul.f32 0.7978846, %v2206_v13  ;;  %v2204_v10 = vadd.f32 %v2188_v18, %v5790_v54  ;;  %v2277_v28 = vmul.f32 %v2261_v38, %v5716_v40 }
 0x6b1   :  { %v2262_v5 = vmul.f32 0.5, %v2246_v35  ;;  %v2244_v21 = vadd.f32 1.0, %v4562_v0  ;;  %4573 = vtanh.f32 %v2219_v63  ;;  %v2275_v19 = vmul.f32 %v2259_v51, %v5721_v49 }
 0x6b2   :  { %v2220_v3 = vmul.f32 0.7978846, %v2204_v10  ;;  %4575 = vtanh.f32 %v2222_v41 }
 0x6b3   :  { %v2260_v14 = vmul.f32 0.5, %v2244_v21  ;;  %v2278_v46 = vmul.f32 %v2262_v5, %v5727_v37 }
 0x6b4   :  { %4577 = vtanh.f32 %v2220_v3  ;;  %v4564_v20 = vpop.eup %4563 }
 0x6b5   :  { %v2276_v8 = vmul.f32 %v2260_v14, %v5733_v60  ;;  %v4566_v11 = vpop.eup %4565  ;;  %v2290_v6 = vpack.c.bf16 %v2278_v46, %v2277_v28  ;;  %v2249_v32 = vadd.f32 1.0, %v4564_v20 }
 0x6b6   :  { %v2247_v4 = vadd.f32 1.0, %v4566_v11 }
 0x6b7   :  { %v2289_v44 = vpack.c.bf16 %v2276_v8, %v2275_v19  ;;  %v2265_v50 = vmul.f32 0.5, %v2249_v32 }
 0x6b8   :  { %v2263_v56 = vmul.f32 0.5, %v2247_v4 }
 0x6b9   :  { %4301 = vmatprep.mubr.msk.bf16.mxu0 %vm2325_vm6, %v2289_v44  ;;  %v2281_v35 = vmul.f32 %v2265_v50, %v5740_v17 }
 0x6ba   :  { %v4568_v7 = vpop.eup %4567  ;;  %4302 = vmatmul.mubr.msk.bf16.gmra.mxu0 %vm2325_vm6, %v2290_v6  ;;  %v2279_v45 = vmul.f32 %v2263_v56, %v5747_v2 }
 0x6bb   :  { %v4570_v39 = vpop.eup %4569  ;;  %v2250_v37 = vadd.f32 1.0, %v4568_v7 }
 0x6bc   :  { %v2248_v55 = vadd.f32 1.0, %v4570_v39  ;;  %v4572_v62 = vpop.eup %4571 }
 0x6bd   :  { %v2266_v49 = vmul.f32 0.5, %v2250_v37  ;;  %v2253_v0 = vadd.f32 1.0, %v4572_v62 }
 0x6be   :  { %v2264_v60 = vmul.f32 0.5, %v2248_v55  ;;  %v4574_v53 = vpop.eup %4573 }
 0x6bf   :  { %v2282_v40 = vmul.f32 %v2266_v49, %v5757_v27  ;;  %v4576_v57 = vpop.eup %4575  ;;  %v2251_v13 = vadd.f32 1.0, %v4574_v53  ;;  %v2269_v27 = vmul.f32 0.5, %v2253_v0 }
 0x6c0   :  { %v2280_v15 = vmul.f32 %v2264_v60, %v5762_v43  ;;  %v2254_v63 = vadd.f32 1.0, %v4576_v57 }
 0x6c1   :  { %v4578_v18 = vpop.eup %4577  ;;  %v2267_v41 = vmul.f32 0.5, %v2251_v13  ;;  %v2292_v21 = vpack.c.bf16 %v2282_v40, %v2281_v35  ;;  %v2285_v14 = vmul.f32 %v2269_v27, %v5767_v16 }
 0x6c2   :  { %v2252_v10 = vadd.f32 1.0, %v4578_v18  ;;  %v2291_v51 = vpack.c.bf16 %v2280_v15, %v2279_v45  ;;  %v2270_v5 = vmul.f32 0.5, %v2254_v63 }
 0x6c3   :  { %v2283_v2 = vmul.f32 %v2267_v41, %v5778_v58  ;;  %v5828_v58 = vld [vmem:[%s6292_s17] ss:$0 sm:$0xff] }
 0x6c4   :  { %v2268_v38 = vmul.f32 0.5, %v2252_v10  ;;  %4305 = vmatprep.mubr.msk.bf16.mxu0 %vm2325_vm6, %v2291_v51  ;;  %v2286_v3 = vmul.f32 %v2270_v5, %v5782_v12 }
 0x6c5   :  { %4306 = vmatmul.mubr.msk.bf16.gmra.mxu0 %vm2325_vm6, %v2292_v21 }
 0x6c6   :  { %v2284_v43 = vmul.f32 %v2268_v38, %v5790_v54  ;;  %v2294_v46 = vpack.c.bf16 %v2286_v3, %v2285_v14 }
 0x6c8   :  { %v2293_v17 = vpack.c.bf16 %v2284_v43, %v2283_v2 }
 0x6ca   :  { %4309 = vmatprep.mubr.msk.bf16.mxu0 %vm2325_vm6, %v2293_v17 }
 0x6cd   :  { %4310 = vmatmul.mubr.msk.bf16.gmra.mxu0 %vm2325_vm6, %v2294_v46 }
 0x6ce   :  { %4335 = vmatprep.mubr.msk.bf16.mxu0 %vm4686_vm1, %v4685_v30 }
 0x769   :  { %v4299_v20 = vpop.f32.mrf.mxu0 }
 0x76a   :  { %v2393_v12 = vadd.f32 %v4299_v20, %v5828_v58 }
 0x76b   :  { %v2384_v54 = vpop.f32.mrf.mxu0 }
 0x76c   :  { %v2385_v19 = vadd.f32 %v5828_v58, %v2384_v54  ;;  %v5840_v6 = vadd.f32 %v2393_v12, %v5582_v59 }
 0x76d   :  { %v4300_v16 = vpop.f32.mrf.mxu0 }
 0x76e   :  { %v5833_v8 = vadd.f32 %v2385_v19, %v5571_v33  ;;  %v2396_v28 = vadd.f32 %v4300_v16, %v5828_v58  ;;  %v2469_v33 = vsel %vm161_vm0, %v5840_v6, 0.0 }
 0x76f   :  { %v2387_v11 = vpop.f32.mrf.mxu0 }
 0x770   :  { %v2388_v44 = vadd.f32 %v5828_v58, %v2387_v11  ;;  %v2463_v4 = vsel %vm161_vm0, %v5833_v8, 0.0  ;;  %v5850_v39 = vadd.f32 %v2396_v28, %v5586_v1 }
 0x771   :  { %2464 = vadd.xlane.f32.xlu0 %v2463_v4 }
 0x772   :  { %v5843_v32 = vadd.f32 %v2388_v44, %v5576_v47  ;;  %v2472_v37 = vsel %vm161_vm0, %v5850_v39, 0.0 }
 0x774   :  { %v2466_v7 = vsel %vm161_vm0, %v5843_v32, 0.0 }
 0x775   :  { %2467 = vadd.xlane.f32.xlu1 %v2466_v7  ;;  %2470 = vadd.xlane.f32.xlu0 %v2469_v33 }
 0x779   :  { %2473 = vadd.xlane.f32.xlu1 %v2472_v37 }
 0x77a   :  { %v4303_v59 = vpop.f32.mrf.mxu0 }
 0x77b   :  { %v2409_v47 = vadd.f32 %v4303_v59, %v5828_v58 }
 0x77c   :  { %v2400_v56 = vpop.f32.mrf.mxu0 }
 0x77d   :  { %v2401_v55 = vadd.f32 %v5828_v58, %v2400_v56  ;;  %v5864_v40 = vadd.f32 %v2409_v47, %v5610_v22 }
 0x77e   :  { %v4304_v50 = vpop.f32.mrf.mxu0 }
 0x77f   :  { %v5857_v49 = vadd.f32 %v2401_v55, %v5597_v31  ;;  %v2412_v1 = vadd.f32 %v4304_v50, %v5828_v58  ;;  %v2481_v15 = vsel %vm161_vm0, %v5864_v40, 0.0 }
 0x780   :  { %v2403_v62 = vpop.f32.mrf.mxu0 }
 0x781   :  { %v2404_v60 = vadd.f32 %v5828_v58, %v2403_v62  ;;  %v2475_v53 = vsel %vm161_vm0, %v5857_v49, 0.0  ;;  %v5874_v13 = vadd.f32 %v2412_v1, %v5613_v61 }
 0x782   :  { %2476 = vadd.xlane.f32.xlu0 %v2475_v53 }
 0x783   :  { %v5867_v57 = vadd.f32 %v2404_v60, %v5600_v52  ;;  %v2484_v52 = vsel %vm161_vm0, %v5874_v13, 0.0 }
 0x785   :  { %v4307_v45 = vpop.f32.mrf.mxu0  ;;  %v2478_v31 = vsel %vm161_vm0, %v5867_v57, 0.0 }
 0x786   :  { %2479 = vadd.xlane.f32.xlu1 %v2478_v31  ;;  %2482 = vadd.xlane.f32.xlu0 %v2481_v15  ;;  %v2425_v22 = vadd.f32 %v4307_v45, %v5828_v58 }
 0x787   :  { %v2416_v18 = vpop.f32.mrf.mxu0 }
 0x788   :  { %v2417_v35 = vadd.f32 %v5828_v58, %v2416_v18  ;;  %v5888_v5 = vadd.f32 %v2425_v22, %v5636_v24 }
 0x789   :  { %v4308_v0 = vpop.f32.mrf.mxu0 }
 0x78a   :  { %2485 = vadd.xlane.f32.xlu1 %v2484_v52  ;;  %v5881_v63 = vadd.f32 %v2417_v35, %v5623_v36  ;;  %v2428_v41 = vadd.f32 %v4308_v0, %v5828_v58  ;;  %v2493_v24 = vsel %vm161_vm0, %v5888_v5, 0.0 }
 0x78b   :  { %v2419_v10 = vpop.f32.mrf.mxu0 }
 0x78c   :  { %v2420_v61 = vadd.f32 %v5828_v58, %v2419_v10  ;;  %v2487_v51 = vsel %vm161_vm0, %v5881_v63, 0.0  ;;  %v5894_v36 = vadd.f32 %v2428_v41, %v5639_v9 }
 0x78d   :  { %v4311_v21 = vpop.f32.mrf.mxu0  ;;  %2488 = vadd.xlane.f32.xlu0 %v2487_v51 }
 0x78e   :  { %v5891_v38 = vadd.f32 %v2420_v61, %v5626_v34  ;;  %v2441_v2 = vadd.f32 %v4311_v21, %v5828_v58  ;;  %v2496_v9 = vsel %vm161_vm0, %v5894_v36, 0.0 }
 0x78f   :  { %v2432_v27 = vpop.f32.mrf.mxu0 }
 0x790   :  { %v2433_v43 = vadd.f32 %v5828_v58, %v2432_v27  ;;  %v2490_v3 = vsel %vm161_vm0, %v5891_v38, 0.0  ;;  %v5912_v12 = vadd.f32 %v2441_v2, %v5661_v29 }
 0x791   :  { %v4312_v17 = vpop.f32.mrf.mxu0  ;;  %2491 = vadd.xlane.f32.xlu1 %v2490_v3  ;;  %2494 = vadd.xlane.f32.xlu0 %v2493_v24 }
 0x792   :  { %v5903_v34 = vadd.f32 %v2433_v43, %v5649_v23  ;;  %v2444_v46 = vadd.f32 %v4312_v17, %v5828_v58  ;;  %v2505_v16 = vsel %vm161_vm0, %v5912_v12, 0.0 }
 0x793   :  { %v2435_v14 = vpop.f32.mrf.mxu0 }
 0x794   :  { %v2436_v20 = vadd.f32 %v5828_v58, %v2435_v14  ;;  %v2499_v54 = vsel %vm161_vm0, %v5903_v34, 0.0  ;;  %v5922_v11 = vadd.f32 %v2444_v46, %v5664_v26 }
 0x795   :  { %2497 = vadd.xlane.f32.xlu1 %v2496_v9  ;;  %2500 = vadd.xlane.f32.xlu0 %v2499_v54 }
 0x796   :  { %v5915_v19 = vadd.f32 %v2436_v20, %v5652_v25  ;;  %v2508_v29 = vsel %vm161_vm0, %v5922_v11, 0.0 }
 0x798   :  { %v2502_v23 = vsel %vm161_vm0, %v5915_v19, 0.0 }
 0x799   :  { %2503 = vadd.xlane.f32.xlu1 %v2502_v23  ;;  %2506 = vadd.xlane.f32.xlu0 %v2505_v16 }
 0x79d   :  { %2509 = vadd.xlane.f32.xlu1 %v2508_v29 }
 0x7fa   :  { %v2465_v58 = vpop.xlane.xlu0 %2464 }
 0x7fb   :  { %v2511_v28 = vmul.f32 0.03125, %v2465_v58 }
 0x7fd   :  { %v5927_v25 = vsub.f32 %v5833_v8, %v2511_v28 }
 0x7fe   :  { %v2468_v44 = vpop.xlane.xlu1 %2467  ;;  %v2471_v4 = vpop.xlane.xlu0 %2470 }
 0x7ff   :  { %v2512_v7 = vmul.f32 0.03125, %v2468_v44  ;;  %v2513_v33 = vmul.f32 0.03125, %v2471_v4  ;;  %v2543_v37 = vmul.f32 %v5927_v25, %v5927_v25 }
 0x801   :  { %v5932_v26 = vsub.f32 %v5843_v32, %v2512_v7  ;;  %v5935_v59 = vsub.f32 %v5840_v6, %v2513_v33  ;;  %v2559_v56 = vsel %vm161_vm0, %v2543_v37, 0.0 }
 0x802   :  { %v2474_v47 = vpop.xlane.xlu1 %2473  ;;  %2560 = vadd.xlane.f32.xlu0 %v2559_v56 }
 0x803   :  { %v2514_v55 = vmul.f32 0.03125, %v2474_v47  ;;  %v2544_v8 = vmul.f32 %v5932_v26, %v5932_v26  ;;  %v2545_v50 = vmul.f32 %v5935_v59, %v5935_v59 }
 0x805   :  { %v5943_v62 = vsub.f32 %v5850_v39, %v2514_v55  ;;  %v2562_v32 = vsel %vm161_vm0, %v2544_v8, 0.0  ;;  %v2565_v1 = vsel %vm161_vm0, %v2545_v50, 0.0 }
 0x806   :  { %2563 = vadd.xlane.f32.xlu1 %v2562_v32  ;;  %2566 = vadd.xlane.f32.xlu0 %v2565_v1 }
 0x807   :  { %v2546_v6 = vmul.f32 %v5943_v62, %v5943_v62 }
 0x809   :  { %v2568_v60 = vsel %vm161_vm0, %v2546_v6, 0.0 }
 0x80a   :  { %2569 = vadd.xlane.f32.xlu1 %v2568_v60 }
 0x80b   :  { %v2477_v53 = vpop.xlane.xlu0 %2476 }
 0x80c   :  { %v2515_v45 = vmul.f32 0.03125, %v2477_v53 }
 0x80e   :  { %v5951_v31 = vsub.f32 %v5857_v49, %v2515_v45 }
 0x80f   :  { %v2480_v15 = vpop.xlane.xlu1 %2479  ;;  %v2483_v39 = vpop.xlane.xlu0 %2482 }
 0x810   :  { %v2516_v18 = vmul.f32 0.03125, %v2480_v15  ;;  %v2517_v22 = vmul.f32 0.03125, %v2483_v39  ;;  %v2547_v35 = vmul.f32 %v5951_v31, %v5951_v31  ;;  %v4449_v15 = vld [vmem:[%s6295_s20 + $0x8] sm:$0xff]  }
 0x811   :  { %4313 = vmatprep.subr.bf16.mxu1 %v4449_v15 }
 0x812   :  { %v5956_v0 = vsub.f32 %v5867_v57, %v2516_v18  ;;  %v5959_v52 = vsub.f32 %v5864_v40, %v2517_v22  ;;  %v2571_v41 = vsel %vm161_vm0, %v2547_v35, 0.0  ;;  %4314 = vmatpush3.bf16.msra.mxu1 %v4449_v15 }
 0x813   :  { %v2486_v10 = vpop.xlane.xlu1 %2485  ;;  %2572 = vadd.xlane.f32.xlu0 %v2571_v41 }
 0x814   :  { %v2518_v61 = vmul.f32 0.03125, %v2486_v10  ;;  %v2548_v49 = vmul.f32 %v5956_v0, %v5956_v0  ;;  %v2549_v51 = vmul.f32 %v5959_v52, %v5959_v52 }
 0x816   :  { %v5967_v21 = vsub.f32 %v5874_v13, %v2518_v61  ;;  %v2489_v27 = vpop.xlane.xlu0 %2488  ;;  %v2574_v57 = vsel %vm161_vm0, %v2548_v49, 0.0  ;;  %v2577_v40 = vsel %vm161_vm0, %v2549_v51, 0.0 }
 0x817   :  { %v2519_v2 = vmul.f32 0.03125, %v2489_v27  ;;  %2575 = vadd.xlane.f32.xlu1 %v2574_v57  ;;  %2578 = vadd.xlane.f32.xlu0 %v2577_v40 }
 0x818   :  { %v2550_v43 = vmul.f32 %v5967_v21, %v5967_v21 }
 0x819   :  { %v5974_v3 = vsub.f32 %v5881_v63, %v2519_v2 }
 0x81a   :  { %v2492_v24 = vpop.xlane.xlu1 %2491  ;;  %v2495_v17 = vpop.xlane.xlu0 %2494  ;;  %v2580_v14 = vsel %vm161_vm0, %v2550_v43, 0.0 }
 0x81b   :  { %v2520_v13 = vmul.f32 0.03125, %v2492_v24  ;;  %v2521_v9 = vmul.f32 0.03125, %v2495_v17  ;;  %2581 = vadd.xlane.f32.xlu1 %v2580_v14  ;;  %v2551_v46 = vmul.f32 %v5974_v3, %v5974_v3 }
 0x81d   :  { %v5980_v20 = vsub.f32 %v5891_v38, %v2520_v13  ;;  %v5983_v54 = vsub.f32 %v5888_v5, %v2521_v9  ;;  %v2583_v23 = vsel %vm161_vm0, %v2551_v46, 0.0  ;;  %v6032_v13 = vld [vmem:[%s6293_s18] ss:$0 sm:$0xff] }
 0x81e   :  { %v2498_v63 = vpop.xlane.xlu1 %2497  ;;  %2584 = vadd.xlane.f32.xlu0 %v2583_v23  ;;  %v2501_v16 = vpop.xlane.xlu0 %2500 }
 0x81f   :  { %v2522_v29 = vmul.f32 0.03125, %v2498_v63  ;;  %v2523_v58 = vmul.f32 0.03125, %v2501_v16  ;;  %v2552_v28 = vmul.f32 %v5980_v20, %v5980_v20  ;;  %v2553_v44 = vmul.f32 %v5983_v54, %v5983_v54 }
 0x821   :  { %v5991_v4 = vsub.f32 %v5894_v36, %v2522_v29  ;;  %v5994_v38 = vsub.f32 %v5903_v34, %v2523_v58  ;;  %v2586_v5 = vsel %vm161_vm0, %v2552_v28, 0.0  ;;  %v2589_v7 = vsel %vm161_vm0, %v2553_v44, 0.0 }
 0x822   :  { %2587 = vadd.xlane.f32.xlu1 %v2586_v5  ;;  %v2504_v33 = vpop.xlane.xlu1 %2503  ;;  %2590 = vadd.xlane.f32.xlu0 %v2589_v7  ;;  %v2507_v37 = vpop.xlane.xlu0 %2506  ;;  %v6039_v5 = vld [vmem:[%s6294_s19] ss:$0 sm:$0xff] }
 0x823   :  { %v2524_v56 = vmul.f32 0.03125, %v2504_v33  ;;  %v2525_v47 = vmul.f32 0.03125, %v2507_v37  ;;  %v2554_v55 = vmul.f32 %v5991_v4, %v5991_v4  ;;  %v2555_v36 = vmul.f32 %v5994_v38, %v5994_v38 }
 0x825   :  { %v6003_v8 = vsub.f32 %v5915_v19, %v2524_v56  ;;  %v6006_v34 = vsub.f32 %v5912_v12, %v2525_v47  ;;  %v2592_v50 = vsel %vm161_vm0, %v2554_v55, 0.0  ;;  %v2595_v32 = vsel %vm161_vm0, %v2555_v36, 0.0 }
 0x826   :  { %2593 = vadd.xlane.f32.xlu1 %v2592_v50  ;;  %v2510_v1 = vpop.xlane.xlu1 %2509  ;;  %2596 = vadd.xlane.f32.xlu0 %v2595_v32 }
 0x827   :  { %v2526_v6 = vmul.f32 0.03125, %v2510_v1  ;;  %v2556_v60 = vmul.f32 %v6003_v8, %v6003_v8  ;;  %v2557_v53 = vmul.f32 %v6006_v34, %v6006_v34 }
 0x829   :  { %v6015_v19 = vsub.f32 %v5922_v11, %v2526_v6  ;;  %v2598_v12 = vsel %vm161_vm0, %v2556_v60, 0.0  ;;  %v2601_v45 = vsel %vm161_vm0, %v2557_v53, 0.0  ;;  %v4450_v11 = vld [vmem:[%s6295_s20] sm:$0xff]  }
 0x82a   :  { %2599 = vadd.xlane.f32.xlu1 %v2598_v12  ;;  %2602 = vadd.xlane.f32.xlu0 %v2601_v45 }
 0x82b   :  { %v2558_v39 = vmul.f32 %v6015_v19, %v6015_v19  ;;  %4315 = vmatprep.subr.bf16.mxu1 %v4450_v11 }
 0x82c   :  { %4316 = vmatpush3.bf16.msra.mxu1 %v4450_v11 }
 0x82d   :  { %v2604_v18 = vsel %vm161_vm0, %v2558_v39, 0.0  ;;  %4339 = vmatprep.subr.bf16.mxu1 %v4685_v30 }
 0x82e   :  { %2605 = vadd.xlane.f32.xlu1 %v2604_v18 }
 0x88b   :  { %v2561_v22 = vpop.xlane.xlu0 %2560 }
 0x88c   :  { %v2607_v35 = vmul.f32 0.03125, %v2561_v22 }
 0x88e   :  { %v2623_v41 = vadd.f32 1e-12, %v2607_v35 }
 0x88f   :  { %v2564_v10 = vpop.xlane.xlu1 %2563  ;;  %v2567_v61 = vpop.xlane.xlu0 %2566 }
 0x890   :  { %4579 = vrsqrt.f32 %v2623_v41  ;;  %v2608_v49 = vmul.f32 0.03125, %v2564_v10  ;;  %v2609_v51 = vmul.f32 0.03125, %v2567_v61 }
 0x892   :  { %v2624_v27 = vadd.f32 1e-12, %v2608_v49  ;;  %v2625_v57 = vadd.f32 1e-12, %v2609_v51 }
 0x893   :  { %v2570_v40 = vpop.xlane.xlu1 %2569 }
 0x894   :  { %4581 = vrsqrt.f32 %v2624_v27  ;;  %v2610_v2 = vmul.f32 0.03125, %v2570_v40 }
 0x895   :  { %4583 = vrsqrt.f32 %v2625_v57 }
 0x896   :  { %v2626_v43 = vadd.f32 1e-12, %v2610_v2 }
 0x898   :  { %4585 = vrsqrt.f32 %v2626_v43 }
 0x89c   :  { %v2573_v24 = vpop.xlane.xlu0 %2572 }
 0x89d   :  { %v4580_v17 = vpop.eup %4579  ;;  %v2611_v14 = vmul.f32 0.03125, %v2573_v24 }
 0x89e   :  { %v2655_v9 = vmul.f32 %v4580_v17, %v5927_v25 }
 0x89f   :  { %v2627_v46 = vadd.f32 1e-12, %v2611_v14 }
 0x8a0   :  { %v2576_v23 = vpop.xlane.xlu1 %2575  ;;  %v2579_v63 = vpop.xlane.xlu0 %2578  ;;  %v2677_v28 = vmul.f32 %v6032_v13, %v2655_v9 }
 0x8a1   :  { %v4582_v16 = vpop.eup %4581  ;;  %4587 = vrsqrt.f32 %v2627_v46  ;;  %v2612_v29 = vmul.f32 0.03125, %v2576_v23  ;;  %v2613_v58 = vmul.f32 0.03125, %v2579_v63 }
 0x8a2   :  { %v4584_v44 = vpop.eup %4583  ;;  %v2656_v7 = vmul.f32 %v4582_v16, %v5932_v26  ;;  %v2699_v50 = vadd.f32 %v6039_v5, %v2677_v28 }
 0x8a3   :  { %v2657_v33 = vmul.f32 %v4584_v44, %v5935_v59  ;;  %v2628_v25 = vadd.f32 1e-12, %v2612_v29  ;;  %v2629_v37 = vadd.f32 1e-12, %v2613_v58 }
 0x8a4   :  { %v2582_v56 = vpop.xlane.xlu1 %2581  ;;  %v2678_v47 = vmul.f32 %v6032_v13, %v2656_v7 }
 0x8a5   :  { %v4586_v55 = vpop.eup %4585  ;;  %4589 = vrsqrt.f32 %v2628_v25  ;;  %v2614_v36 = vmul.f32 0.03125, %v2582_v56  ;;  %v2679_v32 = vmul.f32 %v6032_v13, %v2657_v33 }
 0x8a6   :  { %v2658_v1 = vmul.f32 %v4586_v55, %v5943_v62  ;;  %4591 = vrsqrt.f32 %v2629_v37  ;;  %v2700_v6 = vadd.f32 %v6039_v5, %v2678_v47 }
 0x8a7   :  { %v2630_v26 = vadd.f32 1e-12, %v2614_v36  ;;  %v2585_v60 = vpop.xlane.xlu0 %2584  ;;  %v2701_v15 = vadd.f32 %v6039_v5, %v2679_v32 }
 0x8a8   :  { %v2680_v59 = vmul.f32 %v6032_v13, %v2658_v1  ;;  %v2615_v53 = vmul.f32 0.03125, %v2585_v60  ;;  %v6049_v12 = vpack.c.bf16 %v2700_v6, %v2699_v50 }
 0x8a9   :  { %4593 = vrsqrt.f32 %v2630_v26 }
 0x8aa   :  { %v2631_v45 = vadd.f32 1e-12, %v2615_v53  ;;  %4317 = vmatprep.mubr.msk.bf16.mxu1 %vm161_vm0, %v6049_v12  ;;  %v2702_v39 = vadd.f32 %v6039_v5, %v2680_v59 }
 0x8ab   :  { %v2588_v62 = vpop.xlane.xlu1 %2587  ;;  %v2591_v18 = vpop.xlane.xlu0 %2590 }
 0x8ac   :  { %4595 = vrsqrt.f32 %v2631_v45  ;;  %v2616_v11 = vmul.f32 0.03125, %v2588_v62  ;;  %v2617_v22 = vmul.f32 0.03125, %v2591_v18  ;;  %v6055_v35 = vpack.c.bf16 %v2702_v39, %v2701_v15 }
 0x8ae   :  { %v4588_v41 = vpop.eup %4587  ;;  %v2632_v10 = vadd.f32 1e-12, %v2616_v11  ;;  %v2633_v61 = vadd.f32 1e-12, %v2617_v22  ;;  %4318 = vmatmul.mubr.msk.bf16.vlgmr.msra.gmra.mxu1 %vm161_vm0, %v6055_v35 }
 0x8af   :  { %v2594_v49 = vpop.xlane.xlu1 %2593  ;;  %v2597_v51 = vpop.xlane.xlu0 %2596  ;;  %v2659_v27 = vmul.f32 %v4588_v41, %v5951_v31 }
 0x8b0   :  { %4597 = vrsqrt.f32 %v2632_v10  ;;  %v2618_v57 = vmul.f32 0.03125, %v2594_v49  ;;  %v2619_v40 = vmul.f32 0.03125, %v2597_v51 }
 0x8b1   :  { %4599 = vrsqrt.f32 %v2633_v61  ;;  %v2681_v23 = vmul.f32 %v6032_v13, %v2659_v27 }
 0x8b2   :  { %v4590_v2 = vpop.eup %4589  ;;  %v2634_v43 = vadd.f32 1e-12, %v2618_v57  ;;  %v2635_v24 = vadd.f32 1e-12, %v2619_v40 }
 0x8b3   :  { %v4592_v17 = vpop.eup %4591  ;;  %v2600_v14 = vpop.xlane.xlu1 %2599  ;;  %v2660_v46 = vmul.f32 %v4590_v2, %v5956_v0  ;;  %v2703_v33 = vadd.f32 %v6039_v5, %v2681_v23 }
 0x8b4   :  { %v2603_v9 = vpop.xlane.xlu0 %2602  ;;  %4601 = vrsqrt.f32 %v2634_v43  ;;  %v2620_v63 = vmul.f32 0.03125, %v2600_v14  ;;  %v2661_v29 = vmul.f32 %v4592_v17, %v5959_v52 }
 0x8b5   :  { %v2621_v16 = vmul.f32 0.03125, %v2603_v9  ;;  %4603 = vrsqrt.f32 %v2635_v24  ;;  %v2682_v31 = vmul.f32 %v6032_v13, %v2660_v46 }
 0x8b6   :  { %v4594_v58 = vpop.eup %4593  ;;  %v2636_v28 = vadd.f32 1e-12, %v2620_v63  ;;  %v2683_v37 = vmul.f32 %v6032_v13, %v2661_v29  ;;  %v2886_v29 = vld [vmem:[%s6326_s14] sm:$0xff] }
 0x8b7   :  { %v2637_v44 = vadd.f32 1e-12, %v2621_v16  ;;  %v2606_v7 = vpop.xlane.xlu1 %2605  ;;  %v2704_v25 = vadd.f32 %v6039_v5, %v2682_v31  ;;  %v2662_v0 = vmul.f32 %v4594_v58, %v5967_v21 }
 0x8b8   :  { %4605 = vrsqrt.f32 %v2636_v28  ;;  %v2622_v56 = vmul.f32 0.03125, %v2606_v7  ;;  %v2705_v32 = vadd.f32 %v6039_v5, %v2683_v37 }
 0x8b9   :  { %v4596_v47 = vpop.eup %4595  ;;  %4607 = vrsqrt.f32 %v2637_v44  ;;  %v6068_v52 = vpack.c.bf16 %v2704_v25, %v2703_v33  ;;  %v2684_v55 = vmul.f32 %v6032_v13, %v2662_v0  ;;  %v2887_v44 = vpack.c.bf16 %v2886_v29, %v2886_v29 }
 0x8ba   :  { %v2638_v36 = vadd.f32 1e-12, %v2622_v56  ;;  %v2663_v50 = vmul.f32 %v4596_v47, %v5974_v3 }
 0x8bb   :  { %4321 = vmatprep.mubr.msk.bf16.mxu1 %vm161_vm0, %v6068_v52  ;;  %v2706_v21 = vadd.f32 %v6039_v5, %v2684_v55  ;;  %v2895_v7 = vrot.slane %v2887_v44, %v5035_v42 }
 0x8bc   :  { %4609 = vrsqrt.f32 %v2638_v36  ;;  %v2685_v59 = vmul.f32 %v6032_v13, %v2663_v50 }
 0x8bd   :  { %v4598_v1 = vpop.eup %4597  ;;  %v6076_v6 = vpack.c.bf16 %v2706_v21, %v2705_v32  ;;  %v6135_v33 = vrot.slane %v2895_v7, %v5035_v42 }
 0x8be   :  { %v4600_v26 = vpop.eup %4599  ;;  %v2664_v60 = vmul.f32 %v4598_v1, %v5980_v20  ;;  %v2707_v39 = vadd.f32 %v6039_v5, %v2685_v59 }
 0x8bf   :  { %4322 = vmatmul.mubr.msk.bf16.gmra.mxu1 %vm161_vm0, %v6076_v6  ;;  %v2665_v3 = vmul.f32 %v4600_v26, %v5983_v54  ;;  %v2914_v47 = vunpack.i.h.s16 %v6135_v33 }
 0x8c0   :  { %v2686_v53 = vmul.f32 %v6032_v13, %v2664_v60 }
 0x8c1   :  { %v4602_v45 = vpop.eup %4601  ;;  %v2687_v11 = vmul.f32 %v6032_v13, %v2665_v3 }
 0x8c2   :  { %v4604_v15 = vpop.eup %4603  ;;  %v2708_v62 = vadd.f32 %v6039_v5, %v2686_v53  ;;  %v2666_v18 = vmul.f32 %v4602_v45, %v5991_v4  ;;  %v2972_v53 = vpack.i.b16 %v2914_v47, %v2914_v47 }
 0x8c3   :  { %v2667_v20 = vmul.f32 %v4604_v15, %v5994_v38  ;;  %v2709_v61 = vadd.f32 %v6039_v5, %v2687_v11  ;;  %v2896_v11 = vcombine.high %v2895_v7, %v2895_v7  ;;  %v2911_v7 = vcombine.high %v6135_v33, %v6135_v33 }
 0x8c4   :  { %v6089_v22 = vpack.c.bf16 %v2708_v62, %v2707_v39  ;;  %v2688_v41 = vmul.f32 %v6032_v13, %v2666_v18  ;;  %v3933_v39 = vpack.i.b16 %v6135_v33, %v6135_v33  ;;  %v2976_v62 = vrot.slane %v2972_v53, %v5042_v48 }
 0x8c5   :  { %v4606_v10 = vpop.eup %4605  ;;  %v2689_v4 = vmul.f32 %v6032_v13, %v2667_v20 }
 0x8c6   :  { %v4608_v54 = vpop.eup %4607  ;;  %4325 = vmatprep.mubr.msk.bf16.mxu1 %vm161_vm0, %v6089_v22  ;;  %v2710_v49 = vadd.f32 %v6039_v5, %v2688_v41  ;;  %v2668_v51 = vmul.f32 %v4606_v10, %v6003_v8  ;;  %v2925_v20 = vrot.slane %v3933_v39, %v5042_v48 }
 0x8c7   :  { %v2669_v27 = vmul.f32 %v4608_v54, %v6006_v34  ;;  %v2711_v2 = vadd.f32 %v6039_v5, %v2689_v4 }
 0x8c8   :  { %v6099_v38 = vpack.c.bf16 %v2710_v49, %v2709_v61  ;;  %v2690_v57 = vmul.f32 %v6032_v13, %v2668_v51  ;;  %v2910_v49 = vrot.slane %v2896_v11, %v5035_v42 }
 0x8c9   :  { %v4610_v40 = vpop.eup %4609  ;;  %v2691_v8 = vmul.f32 %v6032_v13, %v2669_v27 }
 0x8ca   :  { %4326 = vmatmul.mubr.msk.bf16.gmra.mxu1 %vm161_vm0, %v6099_v38  ;;  %v2712_v43 = vadd.f32 %v6039_v5, %v2690_v57  ;;  %v2670_v24 = vmul.f32 %v4610_v40, %v6015_v19  ;;  %v6124_v19 = vld [vmem:[%s6296_s21] ss:$0 sm:$0xff] }
 0x8cb   :  { %v2713_v14 = vadd.f32 %v6039_v5, %v2691_v8 }
 0x8cc   :  { %v6108_v17 = vpack.c.bf16 %v2712_v43, %v2711_v2  ;;  %v2692_v34 = vmul.f32 %v6032_v13, %v2670_v24  ;;  %v2916_v2 = vunpack.i.h.s16 %v2910_v49 }
 0x8ce   :  { %4329 = vmatprep.mubr.msk.bf16.mxu1 %vm161_vm0, %v6108_v17  ;;  %v2714_v9 = vadd.f32 %v6039_v5, %v2692_v34 }
 0x8d0   :  { %v6115_v46 = vpack.c.bf16 %v2714_v9, %v2713_v14 }
 0x8d2   :  { %4330 = vmatmul.mubr.msk.bf16.gmra.mxu1 %vm161_vm0, %v6115_v46 }
 0x8d3   :  { %4341 = vmatprep.mubr.msk.bf16.mxu1 %vm4686_vm1, %v4685_v30 }
 0x96e   :  { %v4319_v13 = vpop.f32.mrf.mxu1 }
 0x96f   :  { %v2808_v23 = vadd.f32 %v4319_v13, %v6124_v19 }
 0x970   :  { %v2799_v63 = vpop.f32.mrf.mxu1 }
 0x971   :  { %v2800_v16 = vadd.f32 %v6124_v19, %v2799_v63  ;;  %4611 = vtanh.f32 %v2808_v23 }
 0x972   :  { %v4320_v5 = vpop.f32.mrf.mxu1 }
 0x973   :  { %v2811_v31 = vadd.f32 %v4320_v5, %v6124_v19  ;;  %v3074_v5 = vpack.i.b16 %v2916_v2, %v2916_v2 }
 0x974   :  { %v2802_v58 = vpop.f32.mrf.mxu1 }
 0x975   :  { %4613 = vtanh.f32 %v2811_v31  ;;  %v2803_v28 = vadd.f32 %v6124_v19, %v2802_v58 }
 0x976   :  { %4615 = vtanh.f32 %v2800_v16 }
 0x977   :  { %4617 = vtanh.f32 %v2803_v28  ;;  %v3936_v28 = vpack.i.b16 %v2910_v49, %v2910_v49 }
 0x97e   :  { %v4612_v0 = vpop.eup %4611 }
 0x97f   :  { %v4323_v25 = vpop.f32.mrf.mxu1 }
 0x980   :  { %v2824_v37 = vadd.f32 %v4323_v25, %v6124_v19  ;;  %v3078_v25 = vrot.slane %v3074_v5, %v5042_v48 }
 0x981   :  { %v2815_v56 = vpop.f32.mrf.mxu1 }
 0x982   :  { %v4614_v55 = vpop.eup %4613  ;;  %v2816_v50 = vadd.f32 %v6124_v19, %v2815_v56  ;;  %4619 = vtanh.f32 %v2824_v37  ;;  %v2918_v56 = vunpack.i.h.s16 %v2911_v7 }
 0x983   :  { %v4616_v36 = vpop.eup %4615  ;;  %v4324_v32 = vpop.f32.mrf.mxu1  ;;  %v2879_v21 = vpack.c.bf16 %v4614_v55, %v4612_v0  ;;  %v3027_v0 = vrot.slane %v3936_v28, %v5042_v48 }
 0x984   :  { %v4618_v1 = vpop.eup %4617  ;;  %v2827_v26 = vadd.f32 %v4324_v32, %v6124_v19  ;;  %v3176_v32 = vpack.i.b16 %v2918_v56, %v2918_v56 }
 0x985   :  { %v2818_v60 = vpop.f32.mrf.mxu1  ;;  %v2981_v59 = vsel %vm161_vm0, %v2879_v21, 0  ;;  %v2878_v3 = vpack.c.bf16 %v4618_v1, %v4616_v36  ;;  %v2912_v21 = vcombine.high %v2910_v49, %v2910_v49 }
 0x986   :  { %4621 = vtanh.f32 %v2827_v26  ;;  %v2819_v45 = vadd.f32 %v6124_v19, %v2818_v60  ;;  %4340 = vmatpush3.bf16.xpose.msra.mxu1 %v2981_v59  ;;  %v3939_v26 = vpack.i.b16 %v2911_v7, %v2911_v7  ;;  %v3180_v59 = vrot.slane %v3176_v32, %v5042_v48 }
 0x987   :  { %4623 = vtanh.f32 %v2816_v50  ;;  %v2930_v15 = vsel %vm161_vm0, %v2878_v3, 0  ;;  %4351 = vmatprep.subr.bf16.mxu1 %v4685_v30  ;;  %v2920_v3 = vunpack.i.h.s16 %v2912_v21 }
 0x988   :  { %4625 = vtanh.f32 %v2819_v45  ;;  %4334 = vmatpush3.bf16.xpose.msra.mxu0 %v2930_v15  ;;  %v3129_v39 = vrot.slane %v3939_v26, %v5042_v48 }
 0x989   :  { %4345 = vmatprep.subr.bf16.mxu0 %v4685_v30 }
 0x98a   :  { %v4327_v18 = vpop.f32.mrf.mxu1 }
 0x98b   :  { %v2840_v41 = vadd.f32 %v4327_v18, %v6124_v19 }
 0x98c   :  { %v2831_v10 = vpop.f32.mrf.mxu1 }
 0x98d   :  { %4342 = vmatmul.mubr.msk.bf16.vlgmr.msra.gmra.mxu1 %vm161_vm0, %v2976_v62  ;;  %v2832_v54 = vadd.f32 %v6124_v19, %v2831_v10  ;;  %4627 = vtanh.f32 %v2840_v41  ;;  %v3942_v10 = vpack.i.b16 %v2912_v21, %v2912_v21 }
 0x98e   :  { %v4328_v61 = vpop.f32.mrf.mxu1  ;;  %4353 = vmatprep.mubr.msk.bf16.mxu1 %vm4686_vm1, %v4685_v30 }
 0x98f   :  { %v2843_v51 = vadd.f32 %v4328_v61, %v6124_v19  ;;  %4336 = vmatmul.mubr.msk.bf16.vlgmr.msra.gmra.mxu0 %vm161_vm0, %v2925_v20  ;;  %v4620_v57 = vpop.eup %4619  ;;  %v3278_v20 = vpack.i.b16 %v2920_v3, %v2920_v3  ;;  %v3231_v61 = vrot.slane %v3942_v10, %v5042_v48 }
 0x990   :  { %v2834_v4 = vpop.f32.mrf.mxu1  ;;  %4347 = vmatprep.mubr.msk.bf16.mxu0 %vm4686_vm1, %v4685_v30 }
 0x991   :  { %4629 = vtanh.f32 %v2843_v51  ;;  %v2835_v27 = vadd.f32 %v6124_v19, %v2834_v4 }
 0x992   :  { %4631 = vtanh.f32 %v2832_v54  ;;  %v4331_v40 = vpop.f32.mrf.mxu1  ;;  %v3282_v54 = vrot.slane %v3278_v20, %v5042_v48 }
 0x993   :  { %v4622_v43 = vpop.eup %4621  ;;  %4633 = vtanh.f32 %v2835_v27  ;;  %v2856_v8 = vadd.f32 %v4331_v40, %v6124_v19 }
 0x994   :  { %v4624_v24 = vpop.eup %4623  ;;  %v2847_v34 = vpop.f32.mrf.mxu1  ;;  %v2881_v14 = vpack.c.bf16 %v4622_v43, %v4620_v57 }
 0x995   :  { %v4626_v9 = vpop.eup %4625  ;;  %v2848_v13 = vadd.f32 %v6124_v19, %v2847_v34  ;;  %4635 = vtanh.f32 %v2856_v8 }
 0x996   :  { %v4332_v23 = vpop.f32.mrf.mxu1  ;;  %v3083_v63 = vsel %vm161_vm0, %v2881_v14, 0  ;;  %v2880_v16 = vpack.c.bf16 %v4626_v9, %v4624_v24 }
 0x997   :  { %v2859_v29 = vadd.f32 %v4332_v23, %v6124_v19  ;;  %4352 = vmatpush3.bf16.xpose.msra.mxu1 %v3083_v63 }
 0x998   :  { %v2850_v31 = vpop.f32.mrf.mxu1  ;;  %v3032_v58 = vsel %vm161_vm0, %v2880_v16, 0  ;;  %4363 = vmatprep.subr.bf16.mxu1 %v4685_v30 }
 0x999   :  { %4637 = vtanh.f32 %v2859_v29  ;;  %v2851_v44 = vadd.f32 %v6124_v19, %v2850_v31  ;;  %4346 = vmatpush3.bf16.xpose.msra.mxu0 %v3032_v58 }
 0x99a   :  { %4639 = vtanh.f32 %v2848_v13  ;;  %4357 = vmatprep.subr.bf16.mxu0 %v4685_v30  ;;  %v4628_v37 = vpop.eup %4627 }
 0x99b   :  { %4641 = vtanh.f32 %v2851_v44 }
 0x99e   :  { %v4630_v47 = vpop.eup %4629  ;;  %4354 = vmatmul.mubr.msk.bf16.vlgmr.msra.gmra.mxu1 %vm161_vm0, %v3078_v25 }
 0x99f   :  { %v4632_v55 = vpop.eup %4631  ;;  %v2883_v36 = vpack.c.bf16 %v4630_v47, %v4628_v37  ;;  %4365 = vmatprep.mubr.msk.bf16.mxu1 %vm4686_vm1, %v4685_v30 }
 0x9a0   :  { %v4634_v19 = vpop.eup %4633  ;;  %4348 = vmatmul.mubr.msk.bf16.vlgmr.msra.gmra.mxu0 %vm161_vm0, %v3027_v0 }
 0x9a1   :  { %v3185_v33 = vsel %vm161_vm0, %v2883_v36, 0  ;;  %v2882_v50 = vpack.c.bf16 %v4634_v19, %v4632_v55  ;;  %4359 = vmatprep.mubr.msk.bf16.mxu0 %vm4686_vm1, %v4685_v30 }
 0x9a2   :  { %4364 = vmatpush3.bf16.xpose.msra.mxu1 %v3185_v33  ;;  %v4636_v60 = vpop.eup %4635  ;;  %v3329_v33 = vld [vmem:[%s6327_s8] sm:$0xff] }
 0x9a3   :  { %v3134_v1 = vsel %vm161_vm0, %v2882_v50, 0  ;;  %4375 = vmatprep.subr.bf16.mxu1 %v4685_v30  ;;  %vm3330_vm14 = vcmp.gt.f32.partialorder %v3329_v33, 0.5 }
 0x9a4   :  { %4358 = vmatpush3.bf16.xpose.msra.mxu0 %v3134_v1 }
 0x9a5   :  { %4369 = vmatprep.subr.bf16.mxu0 %v4685_v30 }
 0x9a6   :  { %v4638_v53 = vpop.eup %4637 }
 0x9a7   :  { %v4640_v45 = vpop.eup %4639  ;;  %v2885_v15 = vpack.c.bf16 %v4638_v53, %v4636_v60 }
 0x9a8   :  { %v4642_v62 = vpop.eup %4641 }
 0x9a9   :  { %4366 = vmatmul.mubr.msk.bf16.vlgmr.msra.gmra.mxu1 %vm161_vm0, %v3180_v59  ;;  %v3287_v18 = vsel %vm161_vm0, %v2885_v15, 0  ;;  %v2884_v11 = vpack.c.bf16 %v4642_v62, %v4640_v45 }
 0x9aa   :  { %4376 = vmatpush3.bf16.xpose.msra.mxu1 %v3287_v18  ;;  %4377 = vmatprep.mubr.msk.bf16.mxu1 %vm4686_vm1, %v4685_v30 }
 0x9ab   :  { %4360 = vmatmul.mubr.msk.bf16.vlgmr.msra.gmra.mxu0 %vm161_vm0, %v3129_v39  ;;  %v3236_v41 = vsel %vm161_vm0, %v2884_v11, 0  ;;  %4387 = vmatprep.subr.bf16.mxu1 %v4685_v30 }
 0x9ac   :  { %4370 = vmatpush3.bf16.xpose.msra.mxu0 %v3236_v41  ;;  %4371 = vmatprep.mubr.msk.bf16.mxu0 %vm4686_vm1, %v4685_v30 }
 0x9ad   :  { %4381 = vmatprep.subr.bf16.mxu0 %v4685_v30 }
 0x9b1   :  { %4378 = vmatmul.mubr.msk.bf16.vlgmr.msra.gmra.mxu1 %vm161_vm0, %v3282_v54 }
 0x9b2   :  { %4388 = vmatpush3.bf16.msra.mxu1 %v6055_v35  ;;  %4389 = vmatprep.mubr.msk.bf16.mxu1 %vm4686_vm1, %v4685_v30 }
 0x9b3   :  { %4372 = vmatmul.mubr.msk.bf16.vlgmr.msra.gmra.mxu0 %vm161_vm0, %v3231_v61  ;;  %4399 = vmatprep.subr.bf16.mxu1 %v4685_v30 }
 0x9b4   :  { %4382 = vmatpush3.bf16.msra.mxu0 %v6049_v12  ;;  %4383 = vmatprep.mubr.msk.bf16.mxu0 %vm4686_vm1, %v4685_v30 }
 0x9b5   :  { %4393 = vmatprep.subr.bf16.mxu0 %v4685_v30 }
 0xa4d   :  { %v3017_v49 = vpop.f32.mrf.mxu1 }
 0xa4e   :  { %v3339_v23 = vrot.slane %v3017_v49, 7 }
 0xa4f   :  { %v2966_v51 = vpop.f32.mrf.mxu0  ;;  %v4343_v4 = vpop.f32.mrf.mxu1 }
 0xa50   :  { %v3341_v31 = vsel %vm3340_vm7, %v3339_v23, %v2966_v51 }
 0xa51   :  { %v4337_v27 = vpop.f32.mrf.mxu0  ;;  %v3020_v57 = vpop.f32.mrf.mxu1 }
 0xa53   :  { %v2969_v35 = vpop.f32.mrf.mxu0  ;;  %v4344_v40 = vpop.f32.mrf.mxu1 }
 0xa55   :  { %v4338_v2 = vpop.f32.mrf.mxu0 }
 0xa5e   :  { %v3119_v43 = vpop.f32.mrf.mxu1 }
 0xa5f   :  { %v3345_v58 = vrot.slane %v3119_v43, 5 }
 0xa60   :  { %v3068_v24 = vpop.f32.mrf.mxu0  ;;  %v4355_v8 = vpop.f32.mrf.mxu1 }
 0xa61   :  { %v3342_v16 = vrot.slane %v3068_v24, 6 }
 0xa62   :  { %v4349_v34 = vpop.f32.mrf.mxu0  ;;  %v3122_v14 = vpop.f32.mrf.mxu1 }
 0xa63   :  { %v3344_v7 = vsel %vm3343_vm8, %v3342_v16, %v3341_v31 }
 0xa64   :  { %v3071_v9 = vpop.f32.mrf.mxu0  ;;  %v4356_v12 = vpop.f32.mrf.mxu1  ;;  %v3347_v56 = vsel %vm3346_vm9, %v3345_v58, %v3344_v7 }
 0xa66   :  { %v4350_v13 = vpop.f32.mrf.mxu0 }
 0xa69   :  { %v3221_v63 = vpop.f32.mrf.mxu1 }
 0xa6a   :  { %v3351_v47 = vrot.slane %v3221_v63, 3 }
 0xa6b   :  { %v3170_v5 = vpop.f32.mrf.mxu0  ;;  %v4367_v29 = vpop.f32.mrf.mxu1 }
 0xa6c   :  { %v3348_v25 = vrot.slane %v3170_v5, 4 }
 0xa6d   :  { %v4361_v28 = vpop.f32.mrf.mxu0  ;;  %v3224_v44 = vpop.f32.mrf.mxu1 }
 0xa6e   :  { %v3350_v19 = vsel %vm3349_vm10, %v3348_v25, %v3347_v56 }
 0xa6f   :  { %v3173_v0 = vpop.f32.mrf.mxu0  ;;  %v4368_v37 = vpop.f32.mrf.mxu1  ;;  %v3353_v26 = vsel %vm3352_vm11, %v3351_v47, %v3350_v19 }
 0xa71   :  { %v4362_v55 = vpop.f32.mrf.mxu0  ;;  %v3323_v36 = vpop.f32.mrf.mxu1 }
 0xa72   :  { %v3357_v32 = vrot.slane %v3323_v36, 1 }
 0xa73   :  { %v3272_v50 = vpop.f32.mrf.mxu0  ;;  %v4379_v21 = vpop.f32.mrf.mxu1 }
 0xa74   :  { %v3354_v1 = vrot.slane %v3272_v50, 2 }
 0xa75   :  { %v4373_v60 = vpop.f32.mrf.mxu0  ;;  %v3326_v59 = vpop.f32.mrf.mxu1 }
 0xa76   :  { %v3356_v3 = vsel %vm3355_vm12, %v3354_v1, %v3353_v26 }
 0xa77   :  { %v3359_v53 = vsel %vm3358_vm13, %v3357_v32, %v3356_v3  ;;  %v3275_v45 = vpop.f32.mrf.mxu0  ;;  %v4380_v15 = vpop.f32.mrf.mxu1 }
 0xa78   :  { %v3361_v39 = vsel %vm3330_vm14, %v3359_v53, -1e+09 }
 0xa79   :  { %v3362_v62 = vsel %vm1043_vm5, %v3361_v39, -inf  ;;  %v4374_v18 = vpop.f32.mrf.mxu0 }
 0xa7a   :  { %3363 = vmax.xlane.f32.xlu0 %v3362_v62 }
 0xb03   :  { %v3364_v11 = vpop.xlane.xlu0 %3363 }
 0xb04   :  { %v3365_v20 = vsub.f32 %v3361_v39, %v3364_v11 }
 0xb06   :  { %v3366_v41 = vmul.f32 1.442695, %v3365_v20 }
 0xb08   :  { %4643 = vpow2.f32 %v3366_v41 }
 0xb15   :  { %v4644_v10 = vpop.eup %4643 }
 0xb16   :  { %v3368_v54 = vsel %vm1043_vm5, %v4644_v10, 0.0 }
 0xb17   :  { %3369 = vadd.xlane.f32.xlu1 %v3368_v54 }
 0xba0   :  { %v3370_v61 = vpop.xlane.xlu1 %3369 }
 0xba1   :  { %4645 = vrcp.f32 %v3370_v61 }
 0xbae   :  { %v4646_v49 = vpop.eup %4645 }
 0xbaf   :  { %v3372_v51 = vmul.f32 %v4646_v49, %v4644_v10 }
 0xbb1   :  { %v3373_v4 = vpack.c.bf16 %v3372_v51, %v3372_v51  ;;  %3815 = vst.msk [vmem:[#allocation2] sm:$0xff] %vm1043_vm5, %v3372_v51 }
 0xbb3   :  { %v3381_v27 = vrot.slane %v3373_v4, %v5035_v42 }
 0xbb5   :  { %v3382_v57 = vcombine.high %v3381_v27, %v3381_v27  ;;  %v3389_v35 = vrot.slane %v3381_v27, %v5035_v42 }
 0xbb7   :  { %v3945_v40 = vpack.i.b16 %v3389_v35, %v3389_v35  ;;  %v3400_v2 = vunpack.i.h.s16 %v3389_v35  ;;  %v3396_v43 = vrot.slane %v3382_v57, %v5035_v42  ;;  %v3397_v12 = vcombine.high %v3389_v35, %v3389_v35 }
 0xbb9   :  { %v3411_v24 = vrot.slane %v3945_v40, %v5042_v48  ;;  %v3455_v8 = vpack.i.b16 %v3400_v2, %v3400_v2  ;;  %v3402_v14 = vunpack.i.h.s16 %v3396_v43  ;;  %v3948_v9 = vpack.i.b16 %v3396_v43, %v3396_v43 }
 0xbba   :  { %v3404_v23 = vunpack.i.h.s16 %v3397_v12  ;;  %v3398_v16 = vcombine.high %v3396_v43, %v3396_v43 }
 0xbbb   :  { %4384 = vmatmul.mubr.msk.bf16.vlgmr.msra.gmra.mxu0 %vm1043_vm5, %v3411_v24  ;;  %v3459_v34 = vrot.slane %v3455_v8, %v5042_v48  ;;  %v3551_v42 = vpack.i.b16 %v3402_v14, %v3402_v14  ;;  %v3507_v13 = vrot.slane %v3948_v9, %v5042_v48 }
 0xbbc   :  { %4394 = vmatpush3.bf16.msra.mxu0 %v6068_v52  ;;  %4395 = vmatprep.mubr.msk.bf16.mxu0 %vm4686_vm1, %v4685_v30  ;;  %v3647_v63 = vpack.i.b16 %v3404_v23, %v3404_v23  ;;  %v3406_v29 = vunpack.i.h.s16 %v3398_v16 }
 0xbbd   :  { %4390 = vmatmul.mubr.msk.bf16.vlgmr.msra.gmra.mxu1 %vm1043_vm5, %v3459_v34  ;;  %4405 = vmatprep.subr.bf16.mxu0 %v4685_v30  ;;  %v3555_v52 = vrot.slane %v3551_v42, %v5042_v48 }
 0xbbe   :  { %4400 = vmatpush3.bf16.msra.mxu1 %v6076_v6  ;;  %4401 = vmatprep.mubr.msk.bf16.mxu1 %vm4686_vm1, %v4685_v30  ;;  %v3951_v6 = vpack.i.b16 %v3397_v12, %v3397_v12  ;;  %v3743_v31 = vpack.i.b16 %v3406_v29, %v3406_v29 }
 0xbbf   :  { %4411 = vmatprep.subr.bf16.mxu1 %v4685_v30 }
 0xbc0   :  { %v3603_v5 = vrot.slane %v3951_v6, %v5042_v48  ;;  %v3747_v28 = vrot.slane %v3743_v31, %v5042_v48 }
 0xbc3   :  { %4396 = vmatmul.mubr.msk.bf16.vlgmr.msra.gmra.mxu0 %vm1043_vm5, %v3507_v13 }
 0xbc4   :  { %4406 = vmatpush3.bf16.msra.mxu0 %v6089_v22  ;;  %4407 = vmatprep.mubr.msk.bf16.mxu0 %vm4686_vm1, %v4685_v30  ;;  %v3651_v22 = vrot.slane %v3647_v63, %v5042_v48 }
 0xbc5   :  { %4402 = vmatmul.mubr.msk.bf16.vlgmr.msra.gmra.mxu1 %vm1043_vm5, %v3555_v52  ;;  %4417 = vmatprep.subr.bf16.mxu0 %v4685_v30 }
 0xbc6   :  { %4412 = vmatpush3.bf16.msra.mxu1 %v6099_v38  ;;  %4413 = vmatprep.mubr.msk.bf16.mxu1 %vm4686_vm1, %v4685_v30  ;;  %v3954_v38 = vpack.i.b16 %v3398_v16, %v3398_v16 }
 0xbc7   :  { %4423 = vmatprep.subr.bf16.mxu1 %v4685_v30 }
 0xbc8   :  { %v3699_v58 = vrot.slane %v3954_v38, %v5042_v48 }
 0xbcb   :  { %4408 = vmatmul.mubr.msk.bf16.vlgmr.msra.gmra.mxu0 %vm1043_vm5, %v3603_v5 }
 0xbcc   :  { %4418 = vmatpush3.bf16.msra.mxu0 %v6108_v17  ;;  %4419 = vmatprep.mubr.msk.bf16.mxu0 %vm4686_vm1, %v4685_v30 }
 0xbcd   :  { %4414 = vmatmul.mubr.msk.bf16.vlgmr.msra.gmra.mxu1 %vm1043_vm5, %v3651_v22 }
 0xbce   :  { %4424 = vmatpush3.bf16.msra.mxu1 %v6115_v46  ;;  %4425 = vmatprep.mubr.msk.bf16.mxu1 %vm4686_vm1, %v4685_v30 }
 0xbd3   :  { %4420 = vmatmul.mubr.msk.bf16.vlgmr.msra.gmra.mxu0 %vm1043_vm5, %v3699_v58 }
 0xbd5   :  { %4426 = vmatmul.mubr.msk.bf16.vlgmr.msra.gmra.mxu1 %vm1043_vm5, %v3747_v28 }
 0xbd6   :  { %4674 = shalt.err (!%p4671_p4)
}
 0xbd7   :  { %3827 = dma.vmem_to_hbm [thread:$0]  %s3825_s12, 128, %s6298_s23, [#allocation3]  }
 0xc7b   :  { %v3449_v30 = vpop.f32.mrf.mxu0 }
 0xc7d   :  { %v4385_v17 = vpop.f32.mrf.mxu0  ;;  %v3497_v46 = vpop.f32.mrf.mxu1 }
 0xc7e   :  { %v3799_v19 = vrot.slane %v3497_v46, 7 }
 0xc7f   :  { %v3452_v48 = vpop.f32.mrf.mxu0  ;;  %v4391_v44 = vpop.f32.mrf.mxu1 }
 0xc80   :  { %v3800_v26 = vsel %vm3340_vm7, %v3799_v19, %v3449_v30 }
 0xc81   :  { %v4386_v7 = vpop.f32.mrf.mxu0  ;;  %v3500_v25 = vpop.f32.mrf.mxu1 }
 0xc83   :  { %v4392_v0 = vpop.f32.mrf.mxu1  ;;  %v3545_v37 = vpop.f32.mrf.mxu0 }
 0xc84   :  { %v3801_v32 = vrot.slane %v3545_v37, 6 }
 0xc85   :  { %v4397_v56 = vpop.f32.mrf.mxu0  ;;  %v3593_v47 = vpop.f32.mrf.mxu1 }
 0xc86   :  { %v3803_v60 = vrot.slane %v3593_v47, 5  ;;  %v3802_v53 = vsel %vm3343_vm8, %v3801_v32, %v3800_v26 }
 0xc87   :  { %v3548_v55 = vpop.f32.mrf.mxu0  ;;  %v4403_v36 = vpop.f32.mrf.mxu1 }
 0xc88   :  { %v3804_v62 = vsel %vm3346_vm9, %v3803_v60, %v3802_v53 }
 0xc89   :  { %v4398_v33 = vpop.f32.mrf.mxu0  ;;  %v3596_v50 = vpop.f32.mrf.mxu1 }
 0xc8b   :  { %v4404_v21 = vpop.f32.mrf.mxu1  ;;  %v3641_v1 = vpop.f32.mrf.mxu0 }
 0xc8c   :  { %v3805_v45 = vrot.slane %v3641_v1, 4 }
 0xc8d   :  { %v4409_v59 = vpop.f32.mrf.mxu0  ;;  %v3689_v3 = vpop.f32.mrf.mxu1 }
 0xc8e   :  { %v3807_v18 = vrot.slane %v3689_v3, 3  ;;  %v3806_v41 = vsel %vm3349_vm10, %v3805_v45, %v3804_v62 }
 0xc8f   :  { %v3644_v15 = vpop.f32.mrf.mxu0  ;;  %v4415_v39 = vpop.f32.mrf.mxu1 }
 0xc90   :  { %v3808_v49 = vsel %vm3352_vm11, %v3807_v18, %v3806_v41 }
 0xc91   :  { %v4410_v11 = vpop.f32.mrf.mxu0  ;;  %v3692_v20 = vpop.f32.mrf.mxu1 }
 0xc93   :  { %v4416_v10 = vpop.f32.mrf.mxu1  ;;  %v3737_v54 = vpop.f32.mrf.mxu0 }
 0xc94   :  { %v3809_v61 = vrot.slane %v3737_v54, 2 }
 0xc95   :  { %v4421_v51 = vpop.f32.mrf.mxu0  ;;  %v3785_v4 = vpop.f32.mrf.mxu1 }
 0xc96   :  { %v3810_v27 = vsel %vm3355_vm12, %v3809_v61, %v3808_v49  ;;  %v3811_v57 = vrot.slane %v3785_v4, 1 }
 0xc97   :  { %v3740_v35 = vpop.f32.mrf.mxu0  ;;  %v4427_v40 = vpop.f32.mrf.mxu1 }
 0xc98   :  { %v3812_v2 = vsel %vm3358_vm13, %v3811_v57, %v3810_v27 }
 0xc99   :  { %3814 = vst.msk [vmem:[%s6297_s22] sm:$0xff] %vm161_vm0, %v3812_v2  ;;  %v4422_v43 = vpop.f32.mrf.mxu0  ;;  %v3788_v24 = vpop.f32.mrf.mxu1 }
 0xc9b   :  { %v4428_v8 = vpop.f32.mrf.mxu1 }
 0xc9c   :  { %4683 = dma.done.wait [#allocation3], 128  }
 0xc9d   :  { %4684 = vsyncadd [#allocation3], 4294967168 }
 0xc9e   :  { %3833 = vsyncpa [#allocation3], 1 }

</bundles_post_ra>
